<compile_context>
chip_gen: v5e
topology: v5e:2x2
jax: 0.10.0
libtpu: 0.0.40
codegen_flags: <defaults>
</compile_context>

<pallas_src>
import jax
import jax.numpy as jnp
from jax import lax
from jax.experimental import pallas as pl
from jax.experimental.pallas import tpu as pltpu

BN_EPS = 1e-5
LANE = 128


def _silu(v):
    return v * jax.nn.sigmoid(v)


def _round_up(n, m):
    return (n + m - 1) // m * m


# ------------------------------------------------------------------ kernel helpers
def _conv3x3_im2col(v, w_stack_ref, b_ref):
    """3x3 SAME conv of one (H, W, Cp) image as a single im2col matmul.

    v:           (H, W, Cp) f32, Cp % 128 == 0 (lane-dense)
    w_stack_ref: (9*Cp, Cp) ref, HWIO weights stacked along K
    b_ref:       (1, Cp) ref, bias
    """
    H, W, Cp = v.shape
    # zero-pad the spatial dims once (replaces per-tap shift + mask + select)
    zr = jnp.zeros((1, W, Cp), v.dtype)
    vp = jnp.concatenate([zr, v, zr], axis=0)            # (H+2, W, Cp)
    zc = jnp.zeros((H + 2, 1, Cp), v.dtype)
    vp = jnp.concatenate([zc, vp, zc], axis=1)           # (H+2, W+2, Cp)
    # 9 static slices -> one lane-aligned concat -> ONE MXU matmul with K = 9*Cp
    taps = [vp[dy:dy + H, dx:dx + W, :] for dy in range(3) for dx in range(3)]
    lhs = jnp.concatenate(taps, axis=-1)                 # (H, W, 9*Cp)
    out = jnp.dot(lhs.reshape(H * W, 9 * Cp), w_stack_ref[...],
                  preferred_element_type=jnp.float32)    # (H*W, Cp)
    return out.reshape(H, W, Cp) + b_ref[...]


def _partial_stats(a, Cp):
    """One-pass per-grid-step (sum, sum-of-squares) rows for batch-global BatchNorm."""
    flat = a.reshape(-1, Cp)
    ssum = jnp.sum(flat, axis=0, keepdims=True)
    ssq = jnp.sum(flat * flat, axis=0, keepdims=True)
    return jnp.concatenate([ssum, ssq, jnp.zeros((6, Cp), jnp.float32)], axis=0)


# ------------------------------------------------------------------ kernels
def _prep_kernel(x_ref, t_ref, r_ref, y_ref,
                 tw1_ref, tb1_ref, tw2_ref, tb2_ref,
                 rw1_ref, rb1_ref, rw2_ref, rb2_ref,
                 yw1_ref, yb1_ref, yw2_ref, yb2_ref,
                 stats_ref, emb_ref):
    """Pass 1 (grid over batch): partial BN1 stats of silu(x) + fused (t+r+y) adapter bias."""
    b = pl.program_id(0)
    Cp = x_ref.shape[-1]

    stats_ref[0] = _partial_stats(_silu(x_ref[0]), Cp)

    def adapter(e, w1, b1, w2, b2):
        h = _silu(jnp.dot(e, w1[...], preferred_element_type=jnp.float32) + b1[...])
        return jnp.dot(h, w2[...], preferred_element_type=jnp.float32) + b2[...]

    emb = (adapter(t_ref[pl.ds(b, 1), :], tw1_ref, tb1_ref, tw2_ref, tb2_ref)
           + adapter(r_ref[pl.ds(b, 1), :], rw1_ref, rb1_ref, rw2_ref, rb2_ref)
           + adapter(y_ref[pl.ds(b, 1), :], yw1_ref, yb1_ref, yw2_ref, yb2_ref))
    emb_ref[0] = jnp.concatenate([emb, jnp.zeros((7, Cp), jnp.float32)], axis=0)


def _block1_kernel(x_ref, sc_ref, sh_ref, w_ref, b_ref, emb_ref, a_ref, stats_ref):
    """Pass 2: a1 = silu(conv1(bn1(silu(x))) + emb) and partial BN2 stats of a1."""
    Cp = x_ref.shape[-1]
    v = _silu(x_ref[0]) * sc_ref[...] + sh_ref[...]        # SiLU -> BN1 (global affine)
    h = _conv3x3_im2col(v, w_ref, b_ref)                   # Conv3x3 (one matmul)
    h = h + emb_ref[0][0:1, :]                             # + pre-summed adapter bias
    a = _silu(h)                                           # block2's SiLU, hoisted here
    a_ref[0] = a.astype(a_ref.dtype)
    stats_ref[0] = _partial_stats(a, Cp)


def _block2_kernel(a_ref, sc_ref, sh_ref, w_ref, b_ref, x_ref, out_ref):
    """Pass 3: out = conv2(bn2(a1)) + x."""
    v = a_ref[0] * sc_ref[...] + sh_ref[...]               # BN2 affine (input already SiLU'd)
    h = _conv3x3_im2col(v, w_ref, b_ref)
    out_ref[0] = (h + x_ref[0]).astype(out_ref.dtype)      # + residual


# ------------------------------------------------------------------ specs / wrapper
def _full_spec(shape):
    nd = len(shape)
    return pl.BlockSpec(tuple(shape), lambda b, _nd=nd: (0,) * _nd)


def _batch_spec(shape):
    nd = len(shape)
    return pl.BlockSpec((1,) + tuple(shape[1:]),
                        lambda b, _nd=nd: (b,) + (0,) * (_nd - 1))


@jax.jit
def residual_layer(x_nchw, t_embed, r_embed, y_embed, params):
    B, C, H, W = x_nchw.shape
    Cp = _round_up(max(C, LANE), LANE)          # lane-dense channel padding
    out_dtype = x_nchw.dtype

    # layout glue: NCHW -> NHWC with channels zero-padded to the 128-lane width
    # (grid is over batch; one image per grid step.  For very large H*W*Cp a row-tiled
    #  halo'd grid would be added, not needed at these sizes.)
    x_p = jnp.pad(jnp.transpose(x_nchw, (0, 2, 3, 1)).astype(jnp.float32),
                  ((0, 0), (0, 0), (0, 0), (0, Cp - C)))
    t_e = t_embed.astype(jnp.float32)
    r_e = r_embed.astype(jnp.float32)
    y_e = y_embed.astype(jnp.float32)

    def cpad(a, axes):                           # zero-pad channel axes C -> Cp
        pad = [(0, 0)] * a.ndim
        for ax in axes:
            pad[ax] = (0, Cp - C)
        return jnp.pad(a.astype(jnp.float32), pad)

    g1, bt1 = cpad(params["bn1_gamma"], (1,)), cpad(params["bn1_beta"], (1,))
    g2, bt2 = cpad(params["bn2_gamma"], (1,)), cpad(params["bn2_beta"], (1,))
    w1 = cpad(params["conv1_w"], (2, 3)).reshape(9 * Cp, Cp)   # HWIO -> stacked (9*Cp, Cp)
    w2 = cpad(params["conv2_w"], (2, 3)).reshape(9 * Cp, Cp)
    cb1, cb2 = cpad(params["conv1_b"], (1,)), cpad(params["conv2_b"], (1,))
    tw2, tb2 = cpad(params["t_w2"], (1,)), cpad(params["t_b2"], (1,))
    rw2, rb2 = cpad(params["r_w2"], (1,)), cpad(params["r_b2"], (1,))
    yw2, yb2 = cpad(params["y_w2"], (1,)), cpad(params["y_b2"], (1,))

    parallel = pltpu.CompilerParams(dimension_semantics=("parallel",))
    stats_sds = jax.ShapeDtypeStruct((B, 8, Cp), jnp.float32)

    # ---- pass 1: BN1 partial stats + fused adapter bias --------------------------------
    prep_args = (x_p, t_e, r_e, y_e,
                 params["t_w1"].astype(jnp.float32), params["t_b1"].astype(jnp.float32), tw2, tb2,
                 params["r_w1"].astype(jnp.float32), params["r_b1"].astype(jnp.float32), rw2, rb2,
                 params["y_w1"].astype(jnp.float32), params["y_b1"].astype(jnp.float32), yw2, yb2)
    stats1, emb = pl.pallas_call(
        _prep_kernel,
        grid=(B,),
        in_specs=[_batch_spec(x_p.shape)] + [_full_spec(a.shape) for a in prep_args[1:]],
        out_specs=(_batch_spec((B, 8, Cp)), _batch_spec((B, 8, Cp))),
        out_shape=(stats_sds, stats_sds),
        compiler_params=parallel,
    )(*prep_args)

    # tiny cross-batch combine: (sum, sumsq) -> per-channel affine (keeps BN batch-global).
    # TODO(synk): running_mean/running_var buffer updates (stateful training side effect,
    #             no effect on this forward output) are not replicated.
    def bn_affine(stats, gamma, beta):
        n = float(B * H * W)
        mean = jnp.sum(stats[:, 0, :], axis=0) / n
        var = jnp.maximum(jnp.sum(stats[:, 1, :], axis=0) / n - mean * mean, 0.0)
        scale = gamma[0] * lax.rsqrt(var + BN_EPS)
        return scale[None, :], (beta[0] - mean * scale)[None, :]

    conv_cost = pl.CostEstimate(
        flops=2 * B * H * W * 9 * Cp * Cp,
        transcendentals=2 * B * H * W * Cp,
        bytes_accessed=4 * (3 * B * H * W * Cp + 9 * Cp * Cp))

    # ---- pass 2: block1 conv + adapter bias + SiLU, plus BN2 partial stats --------------
    sc1, sh1 = bn_affine(stats1, g1, bt1)
    a1, stats2 = pl.pallas_call(
        _block1_kernel,
        grid=(B,),
        in_specs=[_batch_spec(x_p.shape), _full_spec(sc1.shape), _full_spec(sh1.shape),
                  _full_spec(w1.shape), _full_spec(cb1.shape), _batch_spec((B, 8, Cp))],
        out_specs=(_batch_spec((B, H, W, Cp)), _batch_spec((B, 8, Cp))),
        out_shape=(jax.ShapeDtypeStruct((B, H, W, Cp), jnp.float32), stats_sds),
        compiler_params=parallel,
        cost_estimate=conv_cost,
    )(x_p, sc1, sh1, w1, cb1, emb)

    # ---- pass 3: block2 conv + residual --------------------------------------------------
    sc2, sh2 = bn_affine(stats2, g2, bt2)
    out_p = pl.pallas_call(
        _block2_kernel,
        grid=(B,),
        in_specs=[_batch_spec((B, H, W, Cp)), _full_spec(sc2.shape), _full_spec(sh2.shape),
                  _full_spec(w2.shape), _full_spec(cb2.shape), _batch_spec(x_p.shape)],
        out_specs=_batch_spec((B, H, W, Cp)),
        out_shape=jax.ShapeDtypeStruct((B, H, W, Cp), jnp.float32),
        compiler_params=parallel,
        cost_estimate=conv_cost,
    )(a1, sc2, sh2, w2, cb2, x_p)

    return jnp.transpose(out_p[..., :C].astype(out_dtype), (0, 3, 1, 2))   # NHWC -> NCHW


# ------------------------------------------------------------------ params / reference
def init_params(key, channels, time_embed_dim, y_embed_dim):
    C, T, Y = channels, time_embed_dim, y_embed_dim
    ks = jax.random.split(key, 20)

    def n(k, shape, scale=0.1):
        return scale * jax.random.normal(k, shape, jnp.float32)

    return {
        "bn1_gamma": 1.0 + n(ks[0], (1, C)), "bn1_beta": n(ks[1], (1, C)),
        "conv1_w": n(ks[2], (3, 3, C, C)), "conv1_b": n(ks[3], (1, C)),   # HWIO
        "bn2_gamma": 1.0 + n(ks[4], (1, C)), "bn2_beta": n(ks[5], (1, C)),
        "conv2_w": n(ks[6], (3, 3, C, C)), "conv2_b": n(ks[7], (1, C)),
        "t_w1": n(ks[8], (T, T)), "t_b1": n(ks[9], (1, T)),
        "t_w2": n(ks[10], (T, C)), "t_b2": n(ks[11], (1, C)),
        "r_w1": n(ks[12], (T, T)), "r_b1": n(ks[13], (1, T)),
        "r_w2": n(ks[14], (T, C)), "r_b2": n(ks[15], (1, C)),
        "y_w1": n(ks[16], (Y, Y)), "y_b1": n(ks[17], (1, Y)),
        "y_w2": n(ks[18], (Y, C)), "y_b2": n(ks[19], (1, C)),
    }


def reference(x_nchw, t_embed, r_embed, y_embed, params):
    # pure-JAX reference for verification
    x = jnp.transpose(x_nchw, (0, 2, 3, 1))

    def silu(v):
        return v * jax.nn.sigmoid(v)

    def bn(v, g, b):
        mean = jnp.mean(v, axis=(0, 1, 2), keepdims=True)
        var = jnp.mean((v - mean) ** 2, axis=(0, 1, 2), keepdims=True)
        return (v - mean) * lax.rsqrt(var + BN_EPS) * g[None, None] + b[None, None]

    def conv(v, w, b):
        out = lax.conv_general_dilated(v, w, (1, 1), "SAME",
                                       dimension_numbers=("NHWC", "HWIO", "NHWC"))
        return out + b[None, None]

    def adapter(e, w1, b1, w2, b2):
        return silu(e @ w1 + b1) @ w2 + b2

    res = x
    h = conv(bn(silu(x), params["bn1_gamma"], params["bn1_beta"]),
             params["conv1_w"], params["conv1_b"])
    h = h + adapter(t_embed, params["t_w1"], params["t_b1"],
                    params["t_w2"], params["t_b2"])[:, None, None, :]
    h = h + adapter(r_embed, params["r_w1"], params["r_b1"],
                    params["r_w2"], params["r_b2"])[:, None, None, :]
    h = h + adapter(y_embed, params["y_w1"], params["y_b1"],
                    params["y_w2"], params["y_b2"])[:, None, None, :]
    h = conv(bn(silu(h), params["bn2_gamma"], params["bn2_beta"]),
             params["conv2_w"], params["conv2_b"])
    return jnp.transpose(h + res, (0, 3, 1, 2))


if __name__ == "__main__":
    B, C, H, W = 2, 8, 16, 16
    T, Y = 32, 16   # time_embed_dim, y_embed_dim (r_embed_dim == time_embed_dim)

    key = jax.random.PRNGKey(0)
    kx, kt, kr, ky, kp = jax.random.split(key, 5)
    x = jax.random.normal(kx, (B, C, H, W), jnp.float32)
    t_embed = jax.random.normal(kt, (B, T), jnp.float32)
    r_embed = jax.random.normal(kr, (B, T), jnp.float32)
    y_embed = jax.random.normal(ky, (B, Y), jnp.float32)
    params = init_params(kp, C, T, Y)

    out = residual_layer(x, t_embed, r_embed, y_embed, params)
    out = jax.block_until_ready(out)

    ref = reference(x, t_embed, r_embed, y_embed, params)
    assert out.shape == (B, C, H, W)
    err = float(jnp.max(jnp.abs(out - ref)))
    assert jnp.allclose(out, ref, atol=2e-4, rtol=2e-4), f"max abs err {err}"
    print("KERNEL_OK")
</pallas_src>

<mosaic_0001>
module attributes {stable_mosaic.version = 11 : i64} {
  func.func @_block1_kernel(%arg0: i32, %arg1: memref<1x16x16x128xf32, #tpu.memory_space<vmem>>, %arg2: memref<1x128xf32, #tpu.memory_space<vmem>>, %arg3: memref<1x128xf32, #tpu.memory_space<vmem>>, %arg4: memref<1152x128xf32, #tpu.memory_space<vmem>>, %arg5: memref<1x128xf32, #tpu.memory_space<vmem>>, %arg6: memref<1x8x128xf32, #tpu.memory_space<vmem>>, %arg7: memref<1x16x16x128xf32, #tpu.memory_space<vmem>>, %arg8: memref<1x8x128xf32, #tpu.memory_space<vmem>>) attributes {dimension_semantics = [#tpu.dimension_semantics<parallel>], iteration_bounds = array<i64: 2>, scalar_prefetch = 0 : i64, scratch_operands = 0 : i64, tpu.core_type = #tpu.core_type<tc>, window_params = [{transform_indices = @transform_0, window_bounds = array<i64: 1, 16, 16, 128>}, {pipeline_mode = #tpu.pipeline_mode<synchronous>, transform_indices = @transform_1, window_bounds = array<i64: 1, 128>}, {pipeline_mode = #tpu.pipeline_mode<synchronous>, transform_indices = @transform_2, window_bounds = array<i64: 1, 128>}, {pipeline_mode = #tpu.pipeline_mode<synchronous>, transform_indices = @transform_3, window_bounds = array<i64: 1152, 128>}, {pipeline_mode = #tpu.pipeline_mode<synchronous>, transform_indices = @transform_4, window_bounds = array<i64: 1, 128>}, {transform_indices = @transform_5, window_bounds = array<i64: 1, 8, 128>}, {transform_indices = @transform_6, window_bounds = array<i64: 1, 16, 16, 128>}, {transform_indices = @transform_7, window_bounds = array<i64: 1, 8, 128>}]} {
    %c0 = arith.constant 0 : index
    %c0_0 = arith.constant 0 : index
    %c0_1 = arith.constant 0 : index
    %c0_2 = arith.constant 0 : index
    %0 = vector.load %arg1[%c0, %c0_0, %c0_1, %c0_2] : memref<1x16x16x128xf32, #tpu.memory_space<vmem>>, vector<1x16x16x128xf32>
    %1 = vector.shape_cast %0 : vector<1x16x16x128xf32> to vector<16x16x128xf32>
    %2 = arith.negf %1 : vector<16x16x128xf32>
    %3 = math.exp %2 : vector<16x16x128xf32>
    %cst = arith.constant 1.000000e+00 : f32
    %4 = vector.broadcast %cst : f32 to vector<16x16x128xf32>
    %5 = arith.addf %4, %3 : vector<16x16x128xf32>
    %6 = arith.divf %4, %5 : vector<16x16x128xf32>
    %7 = arith.mulf %1, %6 : vector<16x16x128xf32>
    %c0_3 = arith.constant 0 : index
    %c0_4 = arith.constant 0 : index
    %8 = vector.load %arg2[%c0_3, %c0_4] : memref<1x128xf32, #tpu.memory_space<vmem>>, vector<1x128xf32>
    %9 = vector.shape_cast %8 : vector<1x128xf32> to vector<1x1x128xf32>
    %10 = vector.broadcast %9 : vector<1x1x128xf32> to vector<16x16x128xf32>
    %11 = arith.mulf %7, %10 : vector<16x16x128xf32>
    %c0_5 = arith.constant 0 : index
    %c0_6 = arith.constant 0 : index
    %12 = vector.load %arg3[%c0_5, %c0_6] : memref<1x128xf32, #tpu.memory_space<vmem>>, vector<1x128xf32>
    %13 = vector.shape_cast %12 : vector<1x128xf32> to vector<1x1x128xf32>
    %14 = vector.broadcast %13 : vector<1x1x128xf32> to vector<16x16x128xf32>
    %15 = arith.addf %11, %14 : vector<16x16x128xf32>
    %cst_7 = arith.constant 0.000000e+00 : f32
    %16 = vector.broadcast %cst_7 : f32 to vector<1x16x128xf32>
    %17 = tpu.concatenate %16, %15, %16 in 0 : vector<1x16x128xf32>, vector<16x16x128xf32>, vector<1x16x128xf32> -> vector<18x16x128xf32>
    %cst_8 = arith.constant 0.000000e+00 : f32
    %18 = vector.broadcast %cst_8 : f32 to vector<18x1x128xf32>
    %19 = tpu.concatenate %18, %17, %18 in 1 : vector<18x1x128xf32>, vector<18x16x128xf32>, vector<18x1x128xf32> -> vector<18x18x128xf32>
    %20 = vector.extract_strided_slice %19 {offsets = [0, 0, 0], sizes = [16, 16, 128], strides = [1, 1, 1]} : vector<18x18x128xf32> to vector<16x16x128xf32>
    %21 = vector.extract_strided_slice %19 {offsets = [0, 1, 0], sizes = [16, 16, 128], strides = [1, 1, 1]} : vector<18x18x128xf32> to vector<16x16x128xf32>
    %22 = vector.extract_strided_slice %19 {offsets = [0, 2, 0], sizes = [16, 16, 128], strides = [1, 1, 1]} : vector<18x18x128xf32> to vector<16x16x128xf32>
    %23 = vector.extract_strided_slice %19 {offsets = [1, 0, 0], sizes = [16, 16, 128], strides = [1, 1, 1]} : vector<18x18x128xf32> to vector<16x16x128xf32>
    %24 = vector.extract_strided_slice %19 {offsets = [1, 1, 0], sizes = [16, 16, 128], strides = [1, 1, 1]} : vector<18x18x128xf32> to vector<16x16x128xf32>
    %25 = vector.extract_strided_slice %19 {offsets = [1, 2, 0], sizes = [16, 16, 128], strides = [1, 1, 1]} : vector<18x18x128xf32> to vector<16x16x128xf32>
    %26 = vector.extract_strided_slice %19 {offsets = [2, 0, 0], sizes = [16, 16, 128], strides = [1, 1, 1]} : vector<18x18x128xf32> to vector<16x16x128xf32>
    %27 = vector.extract_strided_slice %19 {offsets = [2, 1, 0], sizes = [16, 16, 128], strides = [1, 1, 1]} : vector<18x18x128xf32> to vector<16x16x128xf32>
    %28 = vector.extract_strided_slice %19 {offsets = [2, 2, 0], sizes = [16, 16, 128], strides = [1, 1, 1]} : vector<18x18x128xf32> to vector<16x16x128xf32>
    %29 = tpu.concatenate %20, %21, %22, %23, %24, %25, %26, %27, %28 in 2 : vector<16x16x128xf32>, vector<16x16x128xf32>, vector<16x16x128xf32>, vector<16x16x128xf32>, vector<16x16x128xf32>, vector<16x16x128xf32>, vector<16x16x128xf32>, vector<16x16x128xf32>, vector<16x16x128xf32> -> vector<16x16x1152xf32>
    %30 = vector.shape_cast %29 : vector<16x16x1152xf32> to vector<256x1152xf32>
    %c0_9 = arith.constant 0 : index
    %c0_10 = arith.constant 0 : index
    %31 = vector.load %arg4[%c0_9, %c0_10] : memref<1152x128xf32, #tpu.memory_space<vmem>>, vector<1152x128xf32>
    %cst_11 = arith.constant dense<0.000000e+00> : vector<256x128xf32>
    %32 = tpu.matmul %30, %31, %cst_11 {dimension_numbers = #tpu.dot_dimension_numbers<[1], [0], [0], [1], [0, 0, 1, 1], [], []>} : vector<256x1152xf32>, vector<1152x128xf32>, vector<256x128xf32> -> vector<256x128xf32>
    %33 = vector.shape_cast %32 : vector<256x128xf32> to vector<16x16x128xf32>
    %c0_12 = arith.constant 0 : index
    %c0_13 = arith.constant 0 : index
    %34 = vector.load %arg5[%c0_12, %c0_13] : memref<1x128xf32, #tpu.memory_space<vmem>>, vector<1x128xf32>
    %35 = vector.shape_cast %34 : vector<1x128xf32> to vector<1x1x128xf32>
    %36 = vector.broadcast %35 : vector<1x1x128xf32> to vector<16x16x128xf32>
    %37 = arith.addf %33, %36 : vector<16x16x128xf32>
    %c0_14 = arith.constant 0 : index
    %c0_15 = arith.constant 0 : index
    %c0_16 = arith.constant 0 : index
    %38 = vector.load %arg6[%c0_14, %c0_15, %c0_16] : memref<1x8x128xf32, #tpu.memory_space<vmem>>, vector<1x8x128xf32>
    %39 = vector.shape_cast %38 : vector<1x8x128xf32> to vector<8x128xf32>
    %40 = vector.extract_strided_slice %39 {offsets = [0, 0], sizes = [1, 128], strides = [1, 1]} : vector<8x128xf32> to vector<1x128xf32>
    %41 = vector.shape_cast %40 : vector<1x128xf32> to vector<1x1x128xf32>
    %42 = vector.broadcast %41 : vector<1x1x128xf32> to vector<16x16x128xf32>
    %43 = arith.addf %37, %42 : vector<16x16x128xf32>
    %44 = arith.negf %43 : vector<16x16x128xf32>
    %45 = math.exp %44 : vector<16x16x128xf32>
    %cst_17 = arith.constant 1.000000e+00 : f32
    %46 = vector.broadcast %cst_17 : f32 to vector<16x16x128xf32>
    %47 = arith.addf %46, %45 : vector<16x16x128xf32>
    %48 = arith.divf %46, %47 : vector<16x16x128xf32>
    %49 = arith.mulf %43, %48 : vector<16x16x128xf32>
    %c0_18 = arith.constant 0 : index
    %c0_19 = arith.constant 0 : index
    %c0_20 = arith.constant 0 : index
    %c0_21 = arith.constant 0 : index
    %50 = vector.load %arg7[%c0_18, %c0_19, %c0_20, %c0_21] : memref<1x16x16x128xf32, #tpu.memory_space<vmem>>, vector<1x16x16x128xf32>
    %51 = vector.shape_cast %50 : vector<1x16x16x128xf32> to vector<16x16x128xf32>
    %52 = vector.shape_cast %49 : vector<16x16x128xf32> to vector<1x16x16x128xf32>
    tpu.vector_store %arg7[%c0_18, %c0_19, %c0_20, %c0_21], %52 {strides = array<i32>} : memref<1x16x16x128xf32, #tpu.memory_space<vmem>>, vector<1x16x16x128xf32>,
    %53 = vector.shape_cast %49 : vector<16x16x128xf32> to vector<256x128xf32>
    %cst_22 = arith.constant dense<0.000000e+00> : vector<128xf32>
    %54 = vector.multi_reduction <add>, %53, %cst_22 [0] : vector<256x128xf32> to vector<128xf32>
    %55 = vector.shape_cast %54 : vector<128xf32> to vector<1x128xf32>
    %56 = arith.mulf %53, %53 : vector<256x128xf32>
    %cst_23 = arith.constant dense<0.000000e+00> : vector<128xf32>
    %57 = vector.multi_reduction <add>, %56, %cst_23 [0] : vector<256x128xf32> to vector<128xf32>
    %58 = vector.shape_cast %57 : vector<128xf32> to vector<1x128xf32>
    %cst_24 = arith.constant 0.000000e+00 : f32
    %59 = vector.broadcast %cst_24 : f32 to vector<6x128xf32>
    %60 = tpu.concatenate %55, %58, %59 in 0 : vector<1x128xf32>, vector<1x128xf32>, vector<6x128xf32> -> vector<8x128xf32>
    %c0_25 = arith.constant 0 : index
    %c0_26 = arith.constant 0 : index
    %c0_27 = arith.constant 0 : index
    %61 = vector.load %arg8[%c0_25, %c0_26, %c0_27] : memref<1x8x128xf32, #tpu.memory_space<vmem>>, vector<1x8x128xf32>
    %62 = vector.shape_cast %61 : vector<1x8x128xf32> to vector<8x128xf32>
    %63 = vector.shape_cast %60 : vector<8x128xf32> to vector<1x8x128xf32>
    tpu.vector_store %arg8[%c0_25, %c0_26, %c0_27], %63 {strides = array<i32>} : memref<1x8x128xf32, #tpu.memory_space<vmem>>, vector<1x8x128xf32>,
    return
  }
  func.func @transform_0(%arg0: i32) -> (i32, i32, i32, i32) {
    %c0_i32 = arith.constant 0 : i32
    %c0_i32_0 = arith.constant 0 : i32
    %c0_i32_1 = arith.constant 0 : i32
    %c0_i32_2 = arith.constant 0 : i32
    return %arg0, %c0_i32, %c0_i32_0, %c0_i32_1 : i32, i32, i32, i32
  }
  func.func @transform_1(%arg0: i32) -> (i32, i32) {
    %c0_i32 = arith.constant 0 : i32
    %c0_i32_0 = arith.constant 0 : i32
    %c0_i32_1 = arith.constant 0 : i32
    return %c0_i32, %c0_i32_0 : i32, i32
  }
  func.func @transform_2(%arg0: i32) -> (i32, i32) {
    %c0_i32 = arith.constant 0 : i32
    %c0_i32_0 = arith.constant 0 : i32
    %c0_i32_1 = arith.constant 0 : i32
    return %c0_i32, %c0_i32_0 : i32, i32
  }
  func.func @transform_3(%arg0: i32) -> (i32, i32) {
    %c0_i32 = arith.constant 0 : i32
    %c0_i32_0 = arith.constant 0 : i32
    %c0_i32_1 = arith.constant 0 : i32
    return %c0_i32, %c0_i32_0 : i32, i32
  }
  func.func @transform_4(%arg0: i32) -> (i32, i32) {
    %c0_i32 = arith.constant 0 : i32
    %c0_i32_0 = arith.constant 0 : i32
    %c0_i32_1 = arith.constant 0 : i32
    return %c0_i32, %c0_i32_0 : i32, i32
  }
  func.func @transform_5(%arg0: i32) -> (i32, i32, i32) {
    %c0_i32 = arith.constant 0 : i32
    %c0_i32_0 = arith.constant 0 : i32
    %c0_i32_1 = arith.constant 0 : i32
    return %arg0, %c0_i32, %c0_i32_0 : i32, i32, i32
  }
  func.func @transform_6(%arg0: i32) -> (i32, i32, i32, i32) {
    %c0_i32 = arith.constant 0 : i32
    %c0_i32_0 = arith.constant 0 : i32
    %c0_i32_1 = arith.constant 0 : i32
    %c0_i32_2 = arith.constant 0 : i32
    return %arg0, %c0_i32, %c0_i32_0, %c0_i32_1 : i32, i32, i32, i32
  }
  func.func @transform_7(%arg0: i32) -> (i32, i32, i32) {
    %c0_i32 = arith.constant 0 : i32
    %c0_i32_0 = arith.constant 0 : i32
    %c0_i32_1 = arith.constant 0 : i32
    return %arg0, %c0_i32, %c0_i32_0 : i32, i32, i32
  }
}

module attributes {stable_mosaic.version = 11 : i64} {
  func.func @_prep_kernel(%arg0: i32, %arg1: memref<1x16x16x128xf32, #tpu.memory_space<vmem>>, %arg2: memref<2x32xf32, #tpu.memory_space<vmem>>, %arg3: memref<2x32xf32, #tpu.memory_space<vmem>>, %arg4: memref<2x16xf32, #tpu.memory_space<vmem>>, %arg5: memref<32x32xf32, #tpu.memory_space<vmem>>, %arg6: memref<1x32xf32, #tpu.memory_space<vmem>>, %arg7: memref<32x128xf32, #tpu.memory_space<vmem>>, %arg8: memref<1x128xf32, #tpu.memory_space<vmem>>, %arg9: memref<32x32xf32, #tpu.memory_space<vmem>>, %arg10: memref<1x32xf32, #tpu.memory_space<vmem>>, %arg11: memref<32x128xf32, #tpu.memory_space<vmem>>, %arg12: memref<1x128xf32, #tpu.memory_space<vmem>>, %arg13: memref<16x16xf32, #tpu.memory_space<vmem>>, %arg14: memref<1x16xf32, #tpu.memory_space<vmem>>, %arg15: memref<16x128xf32, #tpu.memory_space<vmem>>, %arg16: memref<1x128xf32, #tpu.memory_space<vmem>>, %arg17: memref<1x8x128xf32, #tpu.memory_space<vmem>>, %arg18: memref<1x8x128xf32, #tpu.memory_space<vmem>>) attributes {dimension_semantics = [#tpu.dimension_semantics<parallel>], iteration_bounds = array<i64: 2>, scalar_prefetch = 0 : i64, scratch_operands = 0 : i64, tpu.core_type = #tpu.core_type<tc>, window_params = [{transform_indices = @transform_0, window_bounds = array<i64: 1, 16, 16, 128>}, {pipeline_mode = #tpu.pipeline_mode<synchronous>, transform_indices = @transform_1, window_bounds = array<i64: 2, 32>}, {pipeline_mode = #tpu.pipeline_mode<synchronous>, transform_indices = @transform_2, window_bounds = array<i64: 2, 32>}, {pipeline_mode = #tpu.pipeline_mode<synchronous>, transform_indices = @transform_3, window_bounds = array<i64: 2, 16>}, {pipeline_mode = #tpu.pipeline_mode<synchronous>, transform_indices = @transform_4, window_bounds = array<i64: 32, 32>}, {pipeline_mode = #tpu.pipeline_mode<synchronous>, transform_indices = @transform_5, window_bounds = array<i64: 1, 32>}, {pipeline_mode = #tpu.pipeline_mode<synchronous>, transform_indices = @transform_6, window_bounds = array<i64: 32, 128>}, {pipeline_mode = #tpu.pipeline_mode<synchronous>, transform_indices = @transform_7, window_bounds = array<i64: 1, 128>}, {pipeline_mode = #tpu.pipeline_mode<synchronous>, transform_indices = @transform_8, window_bounds = array<i64: 32, 32>}, {pipeline_mode = #tpu.pipeline_mode<synchronous>, transform_indices = @transform_9, window_bounds = array<i64: 1, 32>}, {pipeline_mode = #tpu.pipeline_mode<synchronous>, transform_indices = @transform_10, window_bounds = array<i64: 32, 128>}, {pipeline_mode = #tpu.pipeline_mode<synchronous>, transform_indices = @transform_11, window_bounds = array<i64: 1, 128>}, {pipeline_mode = #tpu.pipeline_mode<synchronous>, transform_indices = @transform_12, window_bounds = array<i64: 16, 16>}, {pipeline_mode = #tpu.pipeline_mode<synchronous>, transform_indices = @transform_13, window_bounds = array<i64: 1, 16>}, {pipeline_mode = #tpu.pipeline_mode<synchronous>, transform_indices = @transform_14, window_bounds = array<i64: 16, 128>}, {pipeline_mode = #tpu.pipeline_mode<synchronous>, transform_indices = @transform_15, window_bounds = array<i64: 1, 128>}, {transform_indices = @transform_16, window_bounds = array<i64: 1, 8, 128>}, {transform_indices = @transform_17, window_bounds = array<i64: 1, 8, 128>}]} {
    %c0 = arith.constant 0 : index
    %c0_0 = arith.constant 0 : index
    %c0_1 = arith.constant 0 : index
    %c0_2 = arith.constant 0 : index
    %0 = vector.load %arg1[%c0, %c0_0, %c0_1, %c0_2] : memref<1x16x16x128xf32, #tpu.memory_space<vmem>>, vector<1x16x16x128xf32>
    %1 = vector.shape_cast %0 : vector<1x16x16x128xf32> to vector<16x16x128xf32>
    %2 = arith.negf %1 : vector<16x16x128xf32>
    %3 = math.exp %2 : vector<16x16x128xf32>
    %cst = arith.constant 1.000000e+00 : f32
    %4 = vector.broadcast %cst : f32 to vector<16x16x128xf32>
    %5 = arith.addf %4, %3 : vector<16x16x128xf32>
    %6 = arith.divf %4, %5 : vector<16x16x128xf32>
    %7 = arith.mulf %1, %6 : vector<16x16x128xf32>
    %8 = vector.shape_cast %7 : vector<16x16x128xf32> to vector<256x128xf32>
    %cst_3 = arith.constant dense<0.000000e+00> : vector<128xf32>
    %9 = vector.multi_reduction <add>, %8, %cst_3 [0] : vector<256x128xf32> to vector<128xf32>
    %10 = vector.shape_cast %9 : vector<128xf32> to vector<1x128xf32>
    %11 = arith.mulf %8, %8 : vector<256x128xf32>
    %cst_4 = arith.constant dense<0.000000e+00> : vector<128xf32>
    %12 = vector.multi_reduction <add>, %11, %cst_4 [0] : vector<256x128xf32> to vector<128xf32>
    %13 = vector.shape_cast %12 : vector<128xf32> to vector<1x128xf32>
    %cst_5 = arith.constant 0.000000e+00 : f32
    %14 = vector.broadcast %cst_5 : f32 to vector<6x128xf32>
    %15 = tpu.concatenate %10, %13, %14 in 0 : vector<1x128xf32>, vector<1x128xf32>, vector<6x128xf32> -> vector<8x128xf32>
    %c0_6 = arith.constant 0 : index
    %c0_7 = arith.constant 0 : index
    %c0_8 = arith.constant 0 : index
    %16 = vector.load %arg17[%c0_6, %c0_7, %c0_8] : memref<1x8x128xf32, #tpu.memory_space<vmem>>, vector<1x8x128xf32>
    %17 = vector.shape_cast %16 : vector<1x8x128xf32> to vector<8x128xf32>
    %18 = vector.shape_cast %15 : vector<8x128xf32> to vector<1x8x128xf32>
    tpu.vector_store %arg17[%c0_6, %c0_7, %c0_8], %18 {strides = array<i32>} : memref<1x8x128xf32, #tpu.memory_space<vmem>>, vector<1x8x128xf32>,
    %19 = arith.index_cast %arg0 : i32 to index
    %c0_9 = arith.constant 0 : index
    %20 = vector.load %arg2[%19, %c0_9] : memref<2x32xf32, #tpu.memory_space<vmem>>, vector<1x32xf32>
    %c0_10 = arith.constant 0 : index
    %c0_11 = arith.constant 0 : index
    %21 = vector.load %arg5[%c0_10, %c0_11] : memref<32x32xf32, #tpu.memory_space<vmem>>, vector<32x32xf32>
    %cst_12 = arith.constant dense<0.000000e+00> : vector<1x32xf32>
    %22 = tpu.matmul %20, %21, %cst_12 {dimension_numbers = #tpu.dot_dimension_numbers<[1], [0], [0], [1], [0, 0, 1, 1], [], []>} : vector<1x32xf32>, vector<32x32xf32>, vector<1x32xf32> -> vector<1x32xf32>
    %c0_13 = arith.constant 0 : index
    %c0_14 = arith.constant 0 : index
    %23 = vector.load %arg6[%c0_13, %c0_14] : memref<1x32xf32, #tpu.memory_space<vmem>>, vector<1x32xf32>
    %24 = arith.addf %22, %23 : vector<1x32xf32>
    %25 = arith.negf %24 : vector<1x32xf32>
    %26 = math.exp %25 : vector<1x32xf32>
    %cst_15 = arith.constant 1.000000e+00 : f32
    %27 = vector.broadcast %cst_15 : f32 to vector<1x32xf32>
    %28 = arith.addf %27, %26 : vector<1x32xf32>
    %29 = arith.divf %27, %28 : vector<1x32xf32>
    %30 = arith.mulf %24, %29 : vector<1x32xf32>
    %c0_16 = arith.constant 0 : index
    %c0_17 = arith.constant 0 : index
    %31 = vector.load %arg7[%c0_16, %c0_17] : memref<32x128xf32, #tpu.memory_space<vmem>>, vector<32x128xf32>
    %cst_18 = arith.constant dense<0.000000e+00> : vector<1x128xf32>
    %32 = tpu.matmul %30, %31, %cst_18 {dimension_numbers = #tpu.dot_dimension_numbers<[1], [0], [0], [1], [0, 0, 1, 1], [], []>} : vector<1x32xf32>, vector<32x128xf32>, vector<1x128xf32> -> vector<1x128xf32>
    %c0_19 = arith.constant 0 : index
    %c0_20 = arith.constant 0 : index
    %33 = vector.load %arg8[%c0_19, %c0_20] : memref<1x128xf32, #tpu.memory_space<vmem>>, vector<1x128xf32>
    %34 = arith.addf %32, %33 : vector<1x128xf32>
    %35 = arith.index_cast %arg0 : i32 to index
    %c0_21 = arith.constant 0 : index
    %36 = vector.load %arg3[%35, %c0_21] : memref<2x32xf32, #tpu.memory_space<vmem>>, vector<1x32xf32>
    %c0_22 = arith.constant 0 : index
    %c0_23 = arith.constant 0 : index
    %37 = vector.load %arg9[%c0_22, %c0_23] : memref<32x32xf32, #tpu.memory_space<vmem>>, vector<32x32xf32>
    %cst_24 = arith.constant dense<0.000000e+00> : vector<1x32xf32>
    %38 = tpu.matmul %36, %37, %cst_24 {dimension_numbers = #tpu.dot_dimension_numbers<[1], [0], [0], [1], [0, 0, 1, 1], [], []>} : vector<1x32xf32>, vector<32x32xf32>, vector<1x32xf32> -> vector<1x32xf32>
    %c0_25 = arith.constant 0 : index
    %c0_26 = arith.constant 0 : index
    %39 = vector.load %arg10[%c0_25, %c0_26] : memref<1x32xf32, #tpu.memory_space<vmem>>, vector<1x32xf32>
    %40 = arith.addf %38, %39 : vector<1x32xf32>
    %41 = arith.negf %40 : vector<1x32xf32>
    %42 = math.exp %41 : vector<1x32xf32>
    %cst_27 = arith.constant 1.000000e+00 : f32
    %43 = vector.broadcast %cst_27 : f32 to vector<1x32xf32>
    %44 = arith.addf %43, %42 : vector<1x32xf32>
    %45 = arith.divf %43, %44 : vector<1x32xf32>
    %46 = arith.mulf %40, %45 : vector<1x32xf32>
    %c0_28 = arith.constant 0 : index
    %c0_29 = arith.constant 0 : index
    %47 = vector.load %arg11[%c0_28, %c0_29] : memref<32x128xf32, #tpu.memory_space<vmem>>, vector<32x128xf32>
    %cst_30 = arith.constant dense<0.000000e+00> : vector<1x128xf32>
    %48 = tpu.matmul %46, %47, %cst_30 {dimension_numbers = #tpu.dot_dimension_numbers<[1], [0], [0], [1], [0, 0, 1, 1], [], []>} : vector<1x32xf32>, vector<32x128xf32>, vector<1x128xf32> -> vector<1x128xf32>
    %c0_31 = arith.constant 0 : index
    %c0_32 = arith.constant 0 : index
    %49 = vector.load %arg12[%c0_31, %c0_32] : memref<1x128xf32, #tpu.memory_space<vmem>>, vector<1x128xf32>
    %50 = arith.addf %48, %49 : vector<1x128xf32>
    %51 = arith.addf %34, %50 : vector<1x128xf32>
    %52 = arith.index_cast %arg0 : i32 to index
    %c0_33 = arith.constant 0 : index
    %53 = vector.load %arg4[%52, %c0_33] : memref<2x16xf32, #tpu.memory_space<vmem>>, vector<1x16xf32>
    %c0_34 = arith.constant 0 : index
    %c0_35 = arith.constant 0 : index
    %54 = vector.load %arg13[%c0_34, %c0_35] : memref<16x16xf32, #tpu.memory_space<vmem>>, vector<16x16xf32>
    %cst_36 = arith.constant dense<0.000000e+00> : vector<1x16xf32>
    %55 = tpu.matmul %53, %54, %cst_36 {dimension_numbers = #tpu.dot_dimension_numbers<[1], [0], [0], [1], [0, 0, 1, 1], [], []>} : vector<1x16xf32>, vector<16x16xf32>, vector<1x16xf32> -> vector<1x16xf32>
    %c0_37 = arith.constant 0 : index
    %c0_38 = arith.constant 0 : index
    %56 = vector.load %arg14[%c0_37, %c0_38] : memref<1x16xf32, #tpu.memory_space<vmem>>, vector<1x16xf32>
    %57 = arith.addf %55, %56 : vector<1x16xf32>
    %58 = arith.negf %57 : vector<1x16xf32>
    %59 = math.exp %58 : vector<1x16xf32>
    %cst_39 = arith.constant 1.000000e+00 : f32
    %60 = vector.broadcast %cst_39 : f32 to vector<1x16xf32>
    %61 = arith.addf %60, %59 : vector<1x16xf32>
    %62 = arith.divf %60, %61 : vector<1x16xf32>
    %63 = arith.mulf %57, %62 : vector<1x16xf32>
    %c0_40 = arith.constant 0 : index
    %c0_41 = arith.constant 0 : index
    %64 = vector.load %arg15[%c0_40, %c0_41] : memref<16x128xf32, #tpu.memory_space<vmem>>, vector<16x128xf32>
    %cst_42 = arith.constant dense<0.000000e+00> : vector<1x128xf32>
    %65 = tpu.matmul %63, %64, %cst_42 {dimension_numbers = #tpu.dot_dimension_numbers<[1], [0], [0], [1], [0, 0, 1, 1], [], []>} : vector<1x16xf32>, vector<16x128xf32>, vector<1x128xf32> -> vector<1x128xf32>
    %c0_43 = arith.constant 0 : index
    %c0_44 = arith.constant 0 : index
    %66 = vector.load %arg16[%c0_43, %c0_44] : memref<1x128xf32, #tpu.memory_space<vmem>>, vector<1x128xf32>
    %67 = arith.addf %65, %66 : vector<1x128xf32>
    %68 = arith.addf %51, %67 : vector<1x128xf32>
    %cst_45 = arith.constant 0.000000e+00 : f32
    %69 = vector.broadcast %cst_45 : f32 to vector<7x128xf32>
    %70 = tpu.concatenate %68, %69 in 0 : vector<1x128xf32>, vector<7x128xf32> -> vector<8x128xf32>
    %c0_46 = arith.constant 0 : index
    %c0_47 = arith.constant 0 : index
    %c0_48 = arith.constant 0 : index
    %71 = vector.load %arg18[%c0_46, %c0_47, %c0_48] : memref<1x8x128xf32, #tpu.memory_space<vmem>>, vector<1x8x128xf32>
    %72 = vector.shape_cast %71 : vector<1x8x128xf32> to vector<8x128xf32>
    %73 = vector.shape_cast %70 : vector<8x128xf32> to vector<1x8x128xf32>
    tpu.vector_store %arg18[%c0_46, %c0_47, %c0_48], %73 {strides = array<i32>} : memref<1x8x128xf32, #tpu.memory_space<vmem>>, vector<1x8x128xf32>,
    return
  }
  func.func @transform_0(%arg0: i32) -> (i32, i32, i32, i32) {
    %c0_i32 = arith.constant 0 : i32
    %c0_i32_0 = arith.constant 0 : i32
    %c0_i32_1 = arith.constant 0 : i32
    %c0_i32_2 = arith.constant 0 : i32
    return %arg0, %c0_i32, %c0_i32_0, %c0_i32_1 : i32, i32, i32, i32
  }
  func.func @transform_1(%arg0: i32) -> (i32, i32) {
    %c0_i32 = arith.constant 0 : i32
    %c0_i32_0 = arith.constant 0 : i32
    %c0_i32_1 = arith.constant 0 : i32
    return %c0_i32, %c0_i32_0 : i32, i32
  }
  func.func @transform_2(%arg0: i32) -> (i32, i32) {
    %c0_i32 = arith.constant 0 : i32
    %c0_i32_0 = arith.constant 0 : i32
    %c0_i32_1 = arith.constant 0 : i32
    return %c0_i32, %c0_i32_0 : i32, i32
  }
  func.func @transform_3(%arg0: i32) -> (i32, i32) {
    %c0_i32 = arith.constant 0 : i32
    %c0_i32_0 = arith.constant 0 : i32
    %c0_i32_1 = arith.constant 0 : i32
    return %c0_i32, %c0_i32_0 : i32, i32
  }
  func.func @transform_4(%arg0: i32) -> (i32, i32) {
    %c0_i32 = arith.constant 0 : i32
    %c0_i32_0 = arith.constant 0 : i32
    %c0_i32_1 = arith.constant 0 : i32
    return %c0_i32, %c0_i32_0 : i32, i32
  }
  func.func @transform_5(%arg0: i32) -> (i32, i32) {
    %c0_i32 = arith.constant 0 : i32
    %c0_i32_0 = arith.constant 0 : i32
    %c0_i32_1 = arith.constant 0 : i32
    return %c0_i32, %c0_i32_0 : i32, i32
  }
  func.func @transform_6(%arg0: i32) -> (i32, i32) {
    %c0_i32 = arith.constant 0 : i32
    %c0_i32_0 = arith.constant 0 : i32
    %c0_i32_1 = arith.constant 0 : i32
    return %c0_i32, %c0_i32_0 : i32, i32
  }
  func.func @transform_7(%arg0: i32) -> (i32, i32) {
    %c0_i32 = arith.constant 0 : i32
    %c0_i32_0 = arith.constant 0 : i32
    %c0_i32_1 = arith.constant 0 : i32
    return %c0_i32, %c0_i32_0 : i32, i32
  }
  func.func @transform_8(%arg0: i32) -> (i32, i32) {
    %c0_i32 = arith.constant 0 : i32
    %c0_i32_0 = arith.constant 0 : i32
    %c0_i32_1 = arith.constant 0 : i32
    return %c0_i32, %c0_i32_0 : i32, i32
  }
  func.func @transform_9(%arg0: i32) -> (i32, i32) {
    %c0_i32 = arith.constant 0 : i32
    %c0_i32_0 = arith.constant 0 : i32
    %c0_i32_1 = arith.constant 0 : i32
    return %c0_i32, %c0_i32_0 : i32, i32
  }
  func.func @transform_10(%arg0: i32) -> (i32, i32) {
    %c0_i32 = arith.constant 0 : i32
    %c0_i32_0 = arith.constant 0 : i32
    %c0_i32_1 = arith.constant 0 : i32
    return %c0_i32, %c0_i32_0 : i32, i32
  }
  func.func @transform_11(%arg0: i32) -> (i32, i32) {
    %c0_i32 = arith.constant 0 : i32
    %c0_i32_0 = arith.constant 0 : i32
    %c0_i32_1 = arith.constant 0 : i32
    return %c0_i32, %c0_i32_0 : i32, i32
  }
  func.func @transform_12(%arg0: i32) -> (i32, i32) {
    %c0_i32 = arith.constant 0 : i32
    %c0_i32_0 = arith.constant 0 : i32
    %c0_i32_1 = arith.constant 0 : i32
    return %c0_i32, %c0_i32_0 : i32, i32
  }
  func.func @transform_13(%arg0: i32) -> (i32, i32) {
    %c0_i32 = arith.constant 0 : i32
    %c0_i32_0 = arith.constant 0 : i32
    %c0_i32_1 = arith.constant 0 : i32
    return %c0_i32, %c0_i32_0 : i32, i32
  }
  func.func @transform_14(%arg0: i32) -> (i32, i32) {
    %c0_i32 = arith.constant 0 : i32
    %c0_i32_0 = arith.constant 0 : i32
    %c0_i32_1 = arith.constant 0 : i32
    return %c0_i32, %c0_i32_0 : i32, i32
  }
  func.func @transform_15(%arg0: i32) -> (i32, i32) {
    %c0_i32 = arith.constant 0 : i32
    %c0_i32_0 = arith.constant 0 : i32
    %c0_i32_1 = arith.constant 0 : i32
    return %c0_i32, %c0_i32_0 : i32, i32
  }
  func.func @transform_16(%arg0: i32) -> (i32, i32, i32) {
    %c0_i32 = arith.constant 0 : i32
    %c0_i32_0 = arith.constant 0 : i32
    %c0_i32_1 = arith.constant 0 : i32
    return %arg0, %c0_i32, %c0_i32_0 : i32, i32, i32
  }
  func.func @transform_17(%arg0: i32) -> (i32, i32, i32) {
    %c0_i32 = arith.constant 0 : i32
    %c0_i32_0 = arith.constant 0 : i32
    %c0_i32_1 = arith.constant 0 : i32
    return %arg0, %c0_i32, %c0_i32_0 : i32, i32, i32
  }
}

module attributes {stable_mosaic.version = 11 : i64} {
  func.func @_block2_kernel(%arg0: i32, %arg1: memref<1x16x16x128xf32, #tpu.memory_space<vmem>>, %arg2: memref<1x128xf32, #tpu.memory_space<vmem>>, %arg3: memref<1x128xf32, #tpu.memory_space<vmem>>, %arg4: memref<1152x128xf32, #tpu.memory_space<vmem>>, %arg5: memref<1x128xf32, #tpu.memory_space<vmem>>, %arg6: memref<1x16x16x128xf32, #tpu.memory_space<vmem>>, %arg7: memref<1x16x16x128xf32, #tpu.memory_space<vmem>>) attributes {dimension_semantics = [#tpu.dimension_semantics<parallel>], iteration_bounds = array<i64: 2>, scalar_prefetch = 0 : i64, scratch_operands = 0 : i64, tpu.core_type = #tpu.core_type<tc>, window_params = [{transform_indices = @transform_0, window_bounds = array<i64: 1, 16, 16, 128>}, {pipeline_mode = #tpu.pipeline_mode<synchronous>, transform_indices = @transform_1, window_bounds = array<i64: 1, 128>}, {pipeline_mode = #tpu.pipeline_mode<synchronous>, transform_indices = @transform_2, window_bounds = array<i64: 1, 128>}, {pipeline_mode = #tpu.pipeline_mode<synchronous>, transform_indices = @transform_3, window_bounds = array<i64: 1152, 128>}, {pipeline_mode = #tpu.pipeline_mode<synchronous>, transform_indices = @transform_4, window_bounds = array<i64: 1, 128>}, {transform_indices = @transform_5, window_bounds = array<i64: 1, 16, 16, 128>}, {transform_indices = @transform_6, window_bounds = array<i64: 1, 16, 16, 128>}]} {
    %c0 = arith.constant 0 : index
    %c0_0 = arith.constant 0 : index
    %c0_1 = arith.constant 0 : index
    %c0_2 = arith.constant 0 : index
    %0 = vector.load %arg1[%c0, %c0_0, %c0_1, %c0_2] : memref<1x16x16x128xf32, #tpu.memory_space<vmem>>, vector<1x16x16x128xf32>
    %1 = vector.shape_cast %0 : vector<1x16x16x128xf32> to vector<16x16x128xf32>
    %c0_3 = arith.constant 0 : index
    %c0_4 = arith.constant 0 : index
    %2 = vector.load %arg2[%c0_3, %c0_4] : memref<1x128xf32, #tpu.memory_space<vmem>>, vector<1x128xf32>
    %3 = vector.shape_cast %2 : vector<1x128xf32> to vector<1x1x128xf32>
    %4 = vector.broadcast %3 : vector<1x1x128xf32> to vector<16x16x128xf32>
    %5 = arith.mulf %1, %4 : vector<16x16x128xf32>
    %c0_5 = arith.constant 0 : index
    %c0_6 = arith.constant 0 : index
    %6 = vector.load %arg3[%c0_5, %c0_6] : memref<1x128xf32, #tpu.memory_space<vmem>>, vector<1x128xf32>
    %7 = vector.shape_cast %6 : vector<1x128xf32> to vector<1x1x128xf32>
    %8 = vector.broadcast %7 : vector<1x1x128xf32> to vector<16x16x128xf32>
    %9 = arith.addf %5, %8 : vector<16x16x128xf32>
    %cst = arith.constant 0.000000e+00 : f32
    %10 = vector.broadcast %cst : f32 to vector<1x16x128xf32>
    %11 = tpu.concatenate %10, %9, %10 in 0 : vector<1x16x128xf32>, vector<16x16x128xf32>, vector<1x16x128xf32> -> vector<18x16x128xf32>
    %cst_7 = arith.constant 0.000000e+00 : f32
    %12 = vector.broadcast %cst_7 : f32 to vector<18x1x128xf32>
    %13 = tpu.concatenate %12, %11, %12 in 1 : vector<18x1x128xf32>, vector<18x16x128xf32>, vector<18x1x128xf32> -> vector<18x18x128xf32>
    %14 = vector.extract_strided_slice %13 {offsets = [0, 0, 0], sizes = [16, 16, 128], strides = [1, 1, 1]} : vector<18x18x128xf32> to vector<16x16x128xf32>
    %15 = vector.extract_strided_slice %13 {offsets = [0, 1, 0], sizes = [16, 16, 128], strides = [1, 1, 1]} : vector<18x18x128xf32> to vector<16x16x128xf32>
    %16 = vector.extract_strided_slice %13 {offsets = [0, 2, 0], sizes = [16, 16, 128], strides = [1, 1, 1]} : vector<18x18x128xf32> to vector<16x16x128xf32>
    %17 = vector.extract_strided_slice %13 {offsets = [1, 0, 0], sizes = [16, 16, 128], strides = [1, 1, 1]} : vector<18x18x128xf32> to vector<16x16x128xf32>
    %18 = vector.extract_strided_slice %13 {offsets = [1, 1, 0], sizes = [16, 16, 128], strides = [1, 1, 1]} : vector<18x18x128xf32> to vector<16x16x128xf32>
    %19 = vector.extract_strided_slice %13 {offsets = [1, 2, 0], sizes = [16, 16, 128], strides = [1, 1, 1]} : vector<18x18x128xf32> to vector<16x16x128xf32>
    %20 = vector.extract_strided_slice %13 {offsets = [2, 0, 0], sizes = [16, 16, 128], strides = [1, 1, 1]} : vector<18x18x128xf32> to vector<16x16x128xf32>
    %21 = vector.extract_strided_slice %13 {offsets = [2, 1, 0], sizes = [16, 16, 128], strides = [1, 1, 1]} : vector<18x18x128xf32> to vector<16x16x128xf32>
    %22 = vector.extract_strided_slice %13 {offsets = [2, 2, 0], sizes = [16, 16, 128], strides = [1, 1, 1]} : vector<18x18x128xf32> to vector<16x16x128xf32>
    %23 = tpu.concatenate %14, %15, %16, %17, %18, %19, %20, %21, %22 in 2 : vector<16x16x128xf32>, vector<16x16x128xf32>, vector<16x16x128xf32>, vector<16x16x128xf32>, vector<16x16x128xf32>, vector<16x16x128xf32>, vector<16x16x128xf32>, vector<16x16x128xf32>, vector<16x16x128xf32> -> vector<16x16x1152xf32>
    %24 = vector.shape_cast %23 : vector<16x16x1152xf32> to vector<256x1152xf32>
    %c0_8 = arith.constant 0 : index
    %c0_9 = arith.constant 0 : index
    %25 = vector.load %arg4[%c0_8, %c0_9] : memref<1152x128xf32, #tpu.memory_space<vmem>>, vector<1152x128xf32>
    %cst_10 = arith.constant dense<0.000000e+00> : vector<256x128xf32>
    %26 = tpu.matmul %24, %25, %cst_10 {dimension_numbers = #tpu.dot_dimension_numbers<[1], [0], [0], [1], [0, 0, 1, 1], [], []>} : vector<256x1152xf32>, vector<1152x128xf32>, vector<256x128xf32> -> vector<256x128xf32>
    %27 = vector.shape_cast %26 : vector<256x128xf32> to vector<16x16x128xf32>
    %c0_11 = arith.constant 0 : index
    %c0_12 = arith.constant 0 : index
    %28 = vector.load %arg5[%c0_11, %c0_12] : memref<1x128xf32, #tpu.memory_space<vmem>>, vector<1x128xf32>
    %29 = vector.shape_cast %28 : vector<1x128xf32> to vector<1x1x128xf32>
    %30 = vector.broadcast %29 : vector<1x1x128xf32> to vector<16x16x128xf32>
    %31 = arith.addf %27, %30 : vector<16x16x128xf32>
    %c0_13 = arith.constant 0 : index
    %c0_14 = arith.constant 0 : index
    %c0_15 = arith.constant 0 : index
    %c0_16 = arith.constant 0 : index
    %32 = vector.load %arg6[%c0_13, %c0_14, %c0_15, %c0_16] : memref<1x16x16x128xf32, #tpu.memory_space<vmem>>, vector<1x16x16x128xf32>
    %33 = vector.shape_cast %32 : vector<1x16x16x128xf32> to vector<16x16x128xf32>
    %34 = arith.addf %31, %33 : vector<16x16x128xf32>
    %c0_17 = arith.constant 0 : index
    %c0_18 = arith.constant 0 : index
    %c0_19 = arith.constant 0 : index
    %c0_20 = arith.constant 0 : index
    %35 = vector.load %arg7[%c0_17, %c0_18, %c0_19, %c0_20] : memref<1x16x16x128xf32, #tpu.memory_space<vmem>>, vector<1x16x16x128xf32>
    %36 = vector.shape_cast %35 : vector<1x16x16x128xf32> to vector<16x16x128xf32>
    %37 = vector.shape_cast %34 : vector<16x16x128xf32> to vector<1x16x16x128xf32>
    tpu.vector_store %arg7[%c0_17, %c0_18, %c0_19, %c0_20], %37 {strides = array<i32>} : memref<1x16x16x128xf32, #tpu.memory_space<vmem>>, vector<1x16x16x128xf32>,
    return
  }
  func.func @transform_0(%arg0: i32) -> (i32, i32, i32, i32) {
    %c0_i32 = arith.constant 0 : i32
    %c0_i32_0 = arith.constant 0 : i32
    %c0_i32_1 = arith.constant 0 : i32
    %c0_i32_2 = arith.constant 0 : i32
    return %arg0, %c0_i32, %c0_i32_0, %c0_i32_1 : i32, i32, i32, i32
  }
  func.func @transform_1(%arg0: i32) -> (i32, i32) {
    %c0_i32 = arith.constant 0 : i32
    %c0_i32_0 = arith.constant 0 : i32
    %c0_i32_1 = arith.constant 0 : i32
    return %c0_i32, %c0_i32_0 : i32, i32
  }
  func.func @transform_2(%arg0: i32) -> (i32, i32) {
    %c0_i32 = arith.constant 0 : i32
    %c0_i32_0 = arith.constant 0 : i32
    %c0_i32_1 = arith.constant 0 : i32
    return %c0_i32, %c0_i32_0 : i32, i32
  }
  func.func @transform_3(%arg0: i32) -> (i32, i32) {
    %c0_i32 = arith.constant 0 : i32
    %c0_i32_0 = arith.constant 0 : i32
    %c0_i32_1 = arith.constant 0 : i32
    return %c0_i32, %c0_i32_0 : i32, i32
  }
  func.func @transform_4(%arg0: i32) -> (i32, i32) {
    %c0_i32 = arith.constant 0 : i32
    %c0_i32_0 = arith.constant 0 : i32
    %c0_i32_1 = arith.constant 0 : i32
    return %c0_i32, %c0_i32_0 : i32, i32
  }
  func.func @transform_5(%arg0: i32) -> (i32, i32, i32, i32) {
    %c0_i32 = arith.constant 0 : i32
    %c0_i32_0 = arith.constant 0 : i32
    %c0_i32_1 = arith.constant 0 : i32
    %c0_i32_2 = arith.constant 0 : i32
    return %arg0, %c0_i32, %c0_i32_0, %c0_i32_1 : i32, i32, i32, i32
  }
  func.func @transform_6(%arg0: i32) -> (i32, i32, i32, i32) {
    %c0_i32 = arith.constant 0 : i32
    %c0_i32_0 = arith.constant 0 : i32
    %c0_i32_1 = arith.constant 0 : i32
    %c0_i32_2 = arith.constant 0 : i32
    return %arg0, %c0_i32, %c0_i32_0, %c0_i32_1 : i32, i32, i32, i32
  }
}

</mosaic_0001>

<bundles_post_ra>
// kernel: residual_layer.3
= control target key start
LH: loop header
LB: loop body
LE: loop exit
PB: predicated region body
PF: predicated region fallthrough
CT: control target
= control target key end

     0   :  { %s1991_s24 = smov 0   ;;  %s3249_s0 = inlined_call_operand.vmem [shape: f32[2,16,16,128], index: 0, kind: input, shape index: {}]   ;;  %s3250_s1 = inlined_call_operand.vmem [shape: f32[2,32], index: 1, kind: input, shape index: {}]   ;;  %s3251_s2 = inlined_call_operand.vmem [shape: f32[2,32], index: 2, kind: input, shape index: {}]   ;;  %s3252_s3 = inlined_call_operand.vmem [shape: f32[2,16], index: 3, kind: input, shape index: {}]   ;;  %s3253_s4 = inlined_call_operand.vmem [shape: f32[32,32], index: 4, kind: input, shape index: {}]   ;;  %s3254_s5 = inlined_call_operand.vmem [shape: f32[1,32], index: 5, kind: input, shape index: {}]   ;;  %s3255_s6 = inlined_call_operand.vmem [shape: f32[32,128], index: 6, kind: input, shape index: {}]   ;;  %s3256_s7 = inlined_call_operand.vmem [shape: f32[1,128], index: 7, kind: input, shape index: {}]   ;;  %s3257_s8 = inlined_call_operand.vmem [shape: f32[32,32], index: 8, kind: input, shape index: {}]   ;;  %s3258_s9 = inlined_call_operand.vmem [shape: f32[1,32], index: 9, kind: input, shape index: {}]   ;;  %s3259_s10 = inlined_call_operand.vmem [shape: f32[32,128], index: 10, kind: input, shape index: {}]   ;;  %s3260_s11 = inlined_call_operand.vmem [shape: f32[1,128], index: 11, kind: input, shape index: {}]   ;;  %s3261_s12 = inlined_call_operand.vmem [shape: f32[16,16], index: 12, kind: input, shape index: {}]   ;;  %s3262_s13 = inlined_call_operand.vmem [shape: f32[1,16], index: 13, kind: input, shape index: {}]   ;;  %s3263_s14 = inlined_call_operand.vmem [shape: f32[16,128], index: 14, kind: input, shape index: {}]   ;;  %s3264_s15 = inlined_call_operand.vmem [shape: f32[1,128], index: 15, kind: input, shape index: {}]   ;;  %s3265_s16 = inlined_call_operand.vmem [shape: f32[2,8,128], index: 16, kind: output, shape index: {0}]   ;;  %s3266_s17 = inlined_call_operand.vmem [shape: f32[2,8,128], index: 17, kind: output, shape index: {1}]  }
   0x1   :  { %3270 = sst [smem:[#allocation6_spill]] %s3249_s0 }
   0x2   :  { %3271 = sst [smem:[#allocation7_spill]] %s3250_s1 }
   0x3 LB: > { %s1997_s25 = sadd.s32 4294967295, %s1899_s24   ;;  %p1668_p0 = scmp.ge.s32.totalorder %s1899_s24, 1  ;;  %s1899_s24 = sphi %s1991_s24, %s28_s24  }
   0x4   : > { %p490_p1 = scmp.lt.s32.totalorder %s1899_s24, 3 }
   0x6   : > { %p491_p2 = pnand %p1668_p0, %p490_p1 }
   0x8   : > { %494 = sbr.rel (%p491_p2) target bundleno = 364 (0x16c), region = 84 }
   0xd   : > { %v1346_v0 = vld [vmem:[%s3253_s4 + $0x18] sm:$0xff]  ;;  %v1345_v2 = vld [vmem:[%s3253_s4 + $0x10] sm:$0xff]  ;;  %v1344_v4 = vld [vmem:[%s3253_s4 + $0x8] sm:$0xff]  ;;  %s3272_s27 = sld [smem:[#allocation7_spill]]  ;;  %s1420_s30 = scalar_lea.vmem %s3251_s2, %s1997_s25  ;;  %vm1348_vm0 = vcmask 261120   ;;  %vm1504_vm1 = vcmask 130048  }
   0xe   : > { %v1425_v1 = vld [vmem:[%s3257_s8 + $0x18] sm:$0xff]  ;;  %1364 = vmatpush.msra.mxu0 %v1346_v0  ;;  %v1424_v3 = vld [vmem:[%s3257_s8 + $0x10] sm:$0xff]  ;;  %v1423_v5 = vld [vmem:[%s3257_s8 + $0x8] sm:$0xff]  ;;  %p545_p3 = scmp.lt.s32.totalorder %s1997_s25, 1  ;;  %s3273_s19 = sld [smem:[#allocation6_spill]] }
   0xf   : > { %1442 = vmatpush.msra.mxu2 %v1425_v1  ;;  %v1343_v6 = vld [vmem:[%s3253_s4] sm:$0xff]  ;;  %v1502_v10 = vld [vmem:[%s3261_s12 + $0x8] sm:$0xff]  ;;  %v1395_v13 = vld [vmem:[%s3255_s6 + $0x18] sm:$0xff] }
  0x10   : > { %1365 = vmatpush.msra.mxu0 %v1345_v2  ;;  %v1422_v7 = vld [vmem:[%s3257_s8] sm:$0xff]  ;;  %1412 = vmatpush.msra.mxu1 %v1395_v13  ;;  %v1394_v14 = vld [vmem:[%s3255_s6 + $0x10] sm:$0xff]  ;;  %v1393_v16 = vld [vmem:[%s3255_s6 + $0x8] sm:$0xff] }
  0x11   : > { %1443 = vmatpush.msra.mxu2 %v1424_v3  ;;  %v1421_v9 = vld [vmem:[%s1420_s30] sm:$0x1]  ;;  %v1473_v19 = vld [vmem:[%s3259_s10 + $0x18] sm:$0xff]  ;;  %v1472_v21 = vld [vmem:[%s3259_s10 + $0x10] sm:$0xff] }
  0x12   : > { %1366 = vmatpush.msra.mxu0 %v1344_v4  ;;  %v1501_v11 = vld [vmem:[%s3261_s12] sm:$0xff]  ;;  %1413 = vmatpush.msra.mxu1 %v1394_v14  ;;  %v1471_v24 = vld [vmem:[%s3259_s10 + $0x8] sm:$0xff] }
  0x13   : > { %s1341_s28 = scalar_lea.vmem %s3272_s27, %s1997_s25  ;;  %1444 = vmatpush.msra.mxu2 %v1423_v5  ;;  %v1347_v15 = vld [vmem:[%s3254_s5] sm:$0x1]  ;;  %1490 = vmatpush.msra.mxu3 %v1473_v19  ;;  %v1549_v28 = vld [vmem:[%s3263_s14 + $0x8] sm:$0xff] }
  0x14   : > { %v1342_v8 = vld [vmem:[%s1341_s28] sm:$0x1]  ;;  %1367 = vmatpush.msra.mxu0 %v1343_v6  ;;  %s1499_s28 = scalar_lea.vmem %s3252_s3, %s1997_s25  ;;  %1414 = vmatpush.msra.mxu1 %v1393_v16  ;;  %s3407_s25 = smov (!%p545_p3, %s1997_s25), 1 }
  0x15   : > { %1445 = vmatpush.msra.mxu2 %v1422_v7  ;;  %1705 = vmatmul.msk.f32.vlgmr.msra.gmra.mxu0 %vm1348_vm0, %v1342_v8  ;;  %v1500_v12 = vld [vmem:[%s1499_s28] sm:$0x1]  ;;  %s1716_s0 = sshll.u32 %s3407_s25, 8  ;;  %s1671_s29 = sshll.u32 %s3407_s25, 3 }
  0x16   : > { %1708 = vmatmul.msk.f32.vlgmr.msra.gmra.mxu2 %vm1348_vm0, %v1421_v9  ;;  %1522 = vmatpush.msrb.mxu0 %v1502_v10  ;;  %v1392_v18 = vld [vmem:[%s3255_s6] sm:$0xff]  ;;  %s2096_s1 = scalar_lea.vmem %s3273_s19, %s1716_s0  ;;  %s557_s30 = scalar_lea.vmem %s3266_s17, %s1671_s29 }
  0x17   : > { %1415 = vmatpush.msra.mxu1 %v1392_v18  ;;  %1491 = vmatpush.msra.mxu3 %v1472_v21  ;;  %v1426_v23 = vld [vmem:[%s3258_s9] sm:$0x1]  ;;  %v2107_v14 = vld [vmem:[%s2096_s1 + $0x10] sm:$0xff] }
  0x18   : > { %1523 = vmatpush.msrb.mxu0 %v1501_v11  ;;  %v1503_v26 = vld [vmem:[%s3262_s13] sm:$0x1]  ;;  %v2102_v11 = vld [vmem:[%s2096_s1 + $0x8] sm:$0xff] }
  0x19   : > { %1492 = vmatpush.msra.mxu3 %v1471_v24  ;;  %v1470_v27 = vld [vmem:[%s3259_s10] sm:$0xff]  ;;  %1568 = vmatpush.msrb.mxu1 %v1549_v28  ;;  %v1674_v13 = vmul.f32 -1.442695, %v2102_v11  ;;  %v565_v28 = vld [vmem:[%s2096_s1 + $0x38] sm:$0xff] }
  0x1a   : > { %v1548_v31 = vld [vmem:[%s3263_s14] sm:$0xff] }
  0x1b   : > { %1493 = vmatpush.msra.mxu3 %v1470_v27  ;;  %1569 = vmatpush.msrb.mxu1 %v1548_v31  ;;  %v2099_v10 = vld [vmem:[%s2096_s1] sm:$0xff] }
  0x1c   : > { %v562_v21 = vld [vmem:[%s2096_s1 + $0x20] sm:$0xff] }
  0x1d   : > { %1711 = vmatmul.msk.f32.vlgmr.msrb.gmra.mxu0 %vm1504_vm1, %v1500_v12  ;;  %v1673_v12 = vmul.f32 -1.442695, %v2099_v10  ;;  %v566_v31 = vld [vmem:[%s2096_s1 + $0x40] sm:$0xff] }
  0x92   : > { %v1369_v17 = vpop.f32.mrf.mxu0 }
  0x93   : > { %v1370_v20 = vadd.f32 %v1369_v17, %v1347_v15  ;;  %v1675_v15 = vmul.f32 -1.442695, %v2107_v14  ;;  %v2111_v17 = vld [vmem:[%s2096_s1 + $0x18] sm:$0xff] }
  0x95   : > { %v1706_v22 = vmul.f32 -1.442695, %v1370_v20 }
  0x97   : > { %1725 = vpow2.f32 %v1706_v22 }
  0x99   : > { %v1447_v25 = vpop.f32.mrf.mxu2 }
  0x9a   : > { %v1448_v29 = vadd.f32 %v1447_v25, %v1426_v23  ;;  %v1525_v30 = vpop.f32.mrf.mxu0  ;;  %v563_v23 = vld [vmem:[%s2096_s1 + $0x28] sm:$0xff]  ;;  %v1677_v25 = vmul.f32 -1.442695, %v562_v21 }
  0x9b   : > { %v1526_v33 = vadd.f32 %v1525_v30, %v1503_v26  ;;  %v564_v26 = vld [vmem:[%s2096_s1 + $0x30] sm:$0xff]  ;;  %v1678_v27 = vmul.f32 -1.442695, %v563_v23  ;;  %v575_v21 = vld [vmem:[%s2096_s1 + $0x88] sm:$0xff] }
  0x9c   : > { %v1709_v32 = vmul.f32 -1.442695, %v1448_v29 }
  0x9d   : > { %v1726_v34 = vpop.eup %1725  ;;  %v1712_v35 = vmul.f32 -1.442695, %v1526_v33 }
  0x9e   : > { %1727 = vpow2.f32 %v1709_v32  ;;  %v1375_v36 = vadd.f32 1.0, %v1726_v34  ;;  %v1679_v32 = vmul.f32 -1.442695, %v564_v26  ;;  %v1680_v34 = vmul.f32 -1.442695, %v565_v28 }
  0x9f   : > { %1729 = vpow2.f32 %v1712_v35  ;;  %v567_v35 = vld [vmem:[%s2096_s1 + $0x48] sm:$0xff] }
  0xa0   : > { %1731 = vrcp.f32 %v1375_v36  ;;  %v1387_v44 = vand.u32 2147483648, %v1375_v36  ;;  %vm1381_vm2 = vweird.f32 %v1375_v36  ;;  %v1385_v46 = vand.u32 2147483647, %v1375_v36 }
  0xa2   : > { %v1388_v50 = vor.u32 1.1754944e-38, %v1387_v44  ;;  %vm1386_vm5 = vcmp.eq.f32.partialorder %v1385_v46, 8.507059e+37 }
  0xa4   : > { %v1728_v37 = vpop.eup %1727 }
  0xa5   : > { %v1453_v38 = vadd.f32 1.0, %v1728_v37  ;;  %v1730_v39 = vpop.eup %1729  ;;  %v1681_v37 = vmul.f32 -1.442695, %v566_v31 }
  0xa6   : > { %v1732_v40 = vpop.eup %1731  ;;  %v1531_v42 = vadd.f32 1.0, %v1730_v39  ;;  %v568_v39 = vld [vmem:[%s2096_s1 + $0x50] sm:$0xff] }
  0xa7   : > { %1733 = vrcp.f32 %v1453_v38  ;;  %v1377_v41 = vmul.f32 %v1732_v40, %v1375_v36  ;;  %vm1382_vm3 = vweird.f32 %v1732_v40  ;;  %v1465_v54 = vand.u32 2147483648, %v1453_v38 }
  0xa8   : > { %1735 = vrcp.f32 %v1531_v42  ;;  %vm1383_vm4 = vmor %vm1381_vm2, %vm1382_vm3  ;;  %v1463_v59 = vand.u32 2147483647, %v1453_v38  ;;  %vm1459_vm7 = vweird.f32 %v1453_v38  ;;  %v1543_v63 = vand.u32 2147483648, %v1531_v42 }
  0xa9   : > { %v1378_v43 = vsub.f32 1.0, %v1377_v41  ;;  %v1466_v62 = vor.u32 1.1754944e-38, %v1465_v54  ;;  %vm1537_vm9 = vweird.f32 %v1531_v42  ;;  %v1541_v1 = vand.u32 2147483647, %v1531_v42 }
  0xaa   : > { %vm1464_vm11 = vcmp.eq.f32.partialorder %v1463_v59, 8.507059e+37  ;;  %v1544_v6 = vor.u32 1.1754944e-38, %v1543_v63  ;;  %1737 = vpow2.f32 %v1673_v12  ;;  %v580_v12 = vld [vmem:[%s2096_s1 + $0xb0] sm:$0xff] }
  0xab   : > { %v1379_v45 = vmul.f32 %v1732_v40, %v1378_v43  ;;  %vm1542_vm13 = vcmp.eq.f32.partialorder %v1541_v1, 8.507059e+37  ;;  %1739 = vpow2.f32 %v1674_v13  ;;  %v1695_v28 = vmul.f32 -1.442695, %v580_v12 }
  0xac   : > { %1741 = vpow2.f32 %v1675_v15  ;;  %v574_v15 = vld [vmem:[%s2096_s1 + $0x80] sm:$0xff] }
  0xad   : > { %v1734_v47 = vpop.eup %1733  ;;  %v1380_v48 = vadd.f32 %v1732_v40, %v1379_v45  ;;  %v1683_v45 = vmul.f32 -1.442695, %v568_v39  ;;  %v577_v39 = vld [vmem:[%s2096_s1 + $0x98] sm:$0xff] }
  0xae   : > { %v1455_v49 = vmul.f32 %v1734_v47, %v1453_v38  ;;  %v1736_v51 = vpop.eup %1735  ;;  %vm1460_vm6 = vweird.f32 %v1734_v47 }
  0xaf   : > { %v1384_v52 = vsel %vm1383_vm4, %v1732_v40, %v1380_v48  ;;  %v1533_v56 = vmul.f32 %v1736_v51, %v1531_v42  ;;  %vm1461_vm8 = vmor %vm1459_vm7, %vm1460_vm6  ;;  %vm1538_vm10 = vweird.f32 %v1736_v51  ;;  %v1682_v42 = vmul.f32 -1.442695, %v567_v35  ;;  %v569_v48 = vld [vmem:[%s2096_s1 + $0x58] sm:$0xff] }
  0xb0   : > { %v1456_v53 = vsub.f32 1.0, %v1455_v49  ;;  %v1389_v55 = vsel %vm1386_vm5, %v1388_v50, %v1384_v52  ;;  %vm1539_vm12 = vmor %vm1537_vm9, %vm1538_vm10  ;;  %v1738_v16 = vpop.eup %1737  ;;  %v570_v50 = vld [vmem:[%s2096_s1 + $0x60] sm:$0xff]  ;;  %v571_v52 = vld [vmem:[%s2096_s1 + $0x68] sm:$0xff]  ;;  %v1689_v35 = vmul.f32 -1.442695, %v574_v15 }
  0xb1   : > { %v1391_v57 = vmul.f32 %v1389_v55, %v1370_v20  ;;  %v1534_v60 = vsub.f32 1.0, %v1533_v56  ;;  %v1740_v18 = vpop.eup %1739  ;;  %v2113_v19 = vadd.f32 1.0, %v1738_v16  ;;  %v1676_v20 = vmul.f32 -1.442695, %v2111_v17 }
  0xb2   : > { %v1457_v58 = vmul.f32 %v1734_v47, %v1456_v53  ;;  %v2117_v22 = vadd.f32 1.0, %v1740_v18  ;;  %v1742_v24 = vpop.eup %1741  ;;  %v1684_v56 = vmul.f32 -1.442695, %v569_v48  ;;  %v1685_v59 = vmul.f32 -1.442695, %v570_v50 }
  0xb3   : > { %1707 = vmatmul.msk.f32.vlgmr.msra.gmra.mxu1 %vm1348_vm0, %v1391_v57  ;;  %v1535_v0 = vmul.f32 %v1736_v51, %v1534_v60  ;;  %1743 = vrcp.f32 %v2113_v19  ;;  %vm723_vm14 = vweird.f32 %v2113_v19 }
  0xb4   : > { %v1458_v61 = vadd.f32 %v1734_v47, %v1457_v58  ;;  %1745 = vpow2.f32 %v1676_v20  ;;  %v744_v18 = vand.u32 2147483648, %v2117_v22 }
  0xb5   : > { %v1536_v4 = vadd.f32 %v1736_v51, %v1535_v0  ;;  %1747 = vrcp.f32 %v2117_v22 }
  0xb6   : > { %v1462_v2 = vsel %vm1461_vm8, %v1734_v47, %v1458_v61  ;;  %1749 = vpow2.f32 %v1677_v25  ;;  %v572_v61 = vld [vmem:[%s2096_s1 + $0x70] sm:$0xff]  ;;  %v745_v48 = vor.u32 1.1754944e-38, %v744_v18 }
  0xb7   : > { %v1467_v3 = vsel %vm1464_vm11, %v1466_v62, %v1462_v2  ;;  %v1540_v7 = vsel %vm1539_vm12, %v1736_v51, %v1536_v4  ;;  %1751 = vpow2.f32 %v1678_v27  ;;  %v1686_v62 = vmul.f32 -1.442695, %v571_v52 }
  0xb8   : > { %v1469_v5 = vmul.f32 %v1467_v3, %v1448_v29  ;;  %v1545_v8 = vsel %vm1542_vm13, %v1544_v6, %v1540_v7  ;;  %v2124_v29 = vadd.f32 1.0, %v1742_v24  ;;  %v729_v2 = vand.u32 2147483648, %v2113_v19 }
  0xb9   : > { %v1547_v9 = vmul.f32 %v1545_v8, %v1526_v33  ;;  %v2126_v30 = vpop.eup %1743  ;;  %v727_v7 = vand.u32 2147483647, %v2113_v19 }
  0xba   : > { %1710 = vmatmul.msk.f32.vlgmr.msra.gmra.mxu3 %vm1348_vm0, %v1469_v5  ;;  %v1746_v33 = vpop.eup %1745  ;;  %1753 = vrcp.f32 %v2124_v29  ;;  %v719_v38 = vmul.f32 %v2126_v30, %v2113_v19  ;;  %vm724_vm15 = vweird.f32 %v2126_v30  ;;  %v573_v5 = vld [vmem:[%s2096_s1 + $0x78] sm:$0xff]  ;;  %v730_v25 = vor.u32 1.1754944e-38, %v729_v2 }
  0xbb   : > { %1713 = vmatmul.msk.f32.vlgmr.msrb.gmra.mxu1 %vm1504_vm1, %v1547_v9  ;;  %v2131_v36 = vpop.eup %1747  ;;  %1755 = vpow2.f32 %v1679_v32  ;;  %v2136_v40 = vadd.f32 1.0, %v1746_v33  ;;  %v1687_v9 = vmul.f32 -1.442695, %v572_v61  ;;  %vm2171_vm0 = vmor %vm723_vm14, %vm724_vm15  ;;  %vm738_vm1 = vweird.f32 %v2117_v22 }
  0xbc   : > { %v1750_v41 = vpop.eup %1749  ;;  %1757 = vpow2.f32 %v1680_v34  ;;  %v734_v43 = vmul.f32 %v2131_v36, %v2117_v22  ;;  %v720_v46 = vsub.f32 1.0, %v719_v38  ;;  %vm739_vm2 = vweird.f32 %v2131_v36 }
  0xbd   : > { %v1752_v44 = vpop.eup %1751  ;;  %1759 = vpow2.f32 %v1681_v37  ;;  %v2143_v49 = vadd.f32 1.0, %v1750_v41  ;;  %v1688_v23 = vmul.f32 -1.442695, %v573_v5  ;;  %vm2192_vm3 = vcmp.eq.f32.partialorder %v727_v7, 8.507059e+37  ;;  %vm2200_vm4 = vmor %vm738_vm1, %vm739_vm2  ;;  %v579_v5 = vld [vmem:[%s2096_s1 + $0xa8] sm:$0xff] }
  0xbe   : > { %1761 = vrcp.f32 %v2136_v40  ;;  %v2148_v53 = vadd.f32 1.0, %v1752_v44  ;;  %v735_v54 = vsub.f32 1.0, %v734_v43  ;;  %v721_v57 = vmul.f32 %v2126_v30, %v720_v46  ;;  %v578_v44 = vld [vmem:[%s2096_s1 + $0xa0] sm:$0xff] }
  0xbf   : > { %1763 = vpow2.f32 %v1682_v42  ;;  %v742_v32 = vand.u32 2147483647, %v2117_v22  ;;  %vm753_vm5 = vweird.f32 %v2124_v29  ;;  %v1690_v41 = vmul.f32 -1.442695, %v575_v21 }
  0xc0   : > { %v2140_v47 = vpop.eup %1753  ;;  %1765 = vpow2.f32 %v1683_v45  ;;  %v736_v3 = vmul.f32 %v2131_v36, %v735_v54  ;;  %v722_v6 = vadd.f32 %v2126_v30, %v721_v57  ;;  %v757_v54 = vand.u32 2147483647, %v2124_v29  ;;  %v584_v57 = vld [vmem:[%s2096_s1 + $0xd0] sm:$0xff] }
  0xc1   : > { %v1756_v51 = vpop.eup %1755  ;;  %v749_v58 = vmul.f32 %v2140_v47, %v2124_v29  ;;  %1767 = vrcp.f32 %v2143_v49  ;;  %vm754_vm6 = vweird.f32 %v2140_v47  ;;  %vm743_vm7 = vcmp.eq.f32.partialorder %v742_v32, 8.507059e+37 }
  0xc2   : > { %v1758_v55 = vpop.eup %1757  ;;  %v2155_v63 = vadd.f32 1.0, %v1756_v51  ;;  %1769 = vrcp.f32 %v2148_v53  ;;  %v737_v26 = vadd.f32 %v2131_v36, %v736_v3  ;;  %v726_v27 = vsel %vm2171_vm0, %v2126_v30, %v722_v6  ;;  %v576_v30 = vld [vmem:[%s2096_s1 + $0x90] sm:$0xff]  ;;  %vm2232_vm8 = vmor %vm753_vm5, %vm754_vm6 }
  0xc3   : > { %v1760_v60 = vpop.eup %1759  ;;  %v2161_v1 = vadd.f32 1.0, %v1758_v55  ;;  %1771 = vpow2.f32 %v1684_v56  ;;  %v750_v8 = vsub.f32 1.0, %v749_v58  ;;  %v2219_v45 = vsel %vm2192_vm3, %v730_v25, %v726_v27 }
  0xc4   : > { %v2159_v0 = vpop.eup %1761  ;;  %1773 = vpow2.f32 %v1685_v59  ;;  %v2178_v16 = vadd.f32 1.0, %v1760_v60  ;;  %v741_v46 = vsel %vm2200_vm4, %v2131_v36, %v737_v26  ;;  %v1691_v51 = vmul.f32 -1.442695, %v576_v30 }
  0xc5   : > { %v1764_v4 = vpop.eup %1763  ;;  %1775 = vpow2.f32 %v1686_v62  ;;  %v764_v20 = vmul.f32 %v2159_v0, %v2136_v40  ;;  %v751_v33 = vmul.f32 %v2140_v47, %v750_v8  ;;  %v1692_v55 = vmul.f32 -1.442695, %v577_v39 }
  0xc6   : > { %v1766_v13 = vpop.eup %1765  ;;  %v2186_v24 = vadd.f32 1.0, %v1764_v4  ;;  %1777 = vpow2.f32 %v1687_v9  ;;  %v759_v36 = vand.u32 2147483648, %v2124_v29  ;;  %v1693_v58 = vmul.f32 -1.442695, %v578_v44 }
  0xc7   : > { %v2183_v19 = vpop.eup %1767  ;;  %v2209_v37 = vadd.f32 1.0, %v1766_v13  ;;  %v765_v42 = vsub.f32 1.0, %v764_v20  ;;  %1779 = vpow2.f32 %v1688_v23  ;;  %v752_v52 = vadd.f32 %v2140_v47, %v751_v33  ;;  %v581_v20 = vld [vmem:[%s2096_s1 + $0xb8] sm:$0xff] }
  0xc8   : > { %v2206_v34 = vpop.eup %1769  ;;  %v779_v22 = vmul.f32 %v2183_v19, %v2143_v49  ;;  %1781 = vpow2.f32 %v1689_v35  ;;  %v2242_v3 = vsel %vm743_vm7, %v745_v48, %v741_v46  ;;  %vm2250_vm9 = vcmp.eq.f32.partialorder %v757_v54, 8.507059e+37 }
  0xc9   : > { %v1772_v38 = vpop.eup %1771  ;;  %1783 = vpow2.f32 %v1690_v41  ;;  %v766_v59 = vmul.f32 %v2159_v0, %v765_v42  ;;  %v794_v4 = vmul.f32 %v2206_v34, %v2148_v53  ;;  %v756_v29 = vsel %vm2232_vm8, %v2140_v47, %v752_v52 }
  0xca   : > { %v1774_v43 = vpop.eup %1773  ;;  %v2226_v56 = vadd.f32 1.0, %v1772_v38  ;;  %v780_v60 = vsub.f32 1.0, %v779_v22  ;;  %1785 = vpow2.f32 %v1691_v51  ;;  %vm768_vm10 = vweird.f32 %v2136_v40  ;;  %v583_v51 = vld [vmem:[%s2096_s1 + $0xc8] sm:$0xff] }
  0xcb   : > { %v1776_v50 = vpop.eup %1775  ;;  %v2238_v62 = vadd.f32 1.0, %v1774_v43  ;;  %1787 = vpow2.f32 %v1692_v55  ;;  %v760_v8 = vor.u32 1.1754944e-38, %v759_v36  ;;  %vm769_vm11 = vweird.f32 %v2159_v0  ;;  %v582_v43 = vld [vmem:[%s2096_s1 + $0xc0] sm:$0xff] }
  0xcc   : > { %v1778_v61 = vpop.eup %1777  ;;  %v2240_v2 = vadd.f32 1.0, %v1776_v50  ;;  %v772_v9 = vand.u32 2147483647, %v2136_v40  ;;  %1789 = vpow2.f32 %v1693_v58  ;;  %v767_v13 = vadd.f32 %v2159_v0, %v766_v59  ;;  %vm2280_vm14 = vmor %vm768_vm10, %vm769_vm11 }
  0xcd   : > { %v1780_v7 = vpop.eup %1779  ;;  %v774_v15 = vand.u32 2147483648, %v2136_v40  ;;  %v781_v47 = vmul.f32 %v2183_v19, %v780_v60  ;;  %v1694_v21 = vmul.f32 -1.442695, %v579_v5  ;;  %vm783_vm12 = vweird.f32 %v2143_v49 }
  0xce   : > { %v1782_v18 = vpop.eup %1781  ;;  %v795_v23 = vsub.f32 1.0, %v794_v4  ;;  %1791 = vrcp.f32 %v2155_v63  ;;  %vm784_vm13 = vweird.f32 %v2183_v19  ;;  %v787_v26 = vand.u32 2147483647, %v2143_v49 }
  0xcf   : > { %v1784_v25 = vpop.eup %1783  ;;  %v789_v27 = vand.u32 2147483648, %v2143_v49  ;;  %1793 = vrcp.f32 %v2161_v1  ;;  %v2268_v31 = vadd.f32 1.0, %v1778_v61  ;;  %v2270_v32 = vadd.f32 1.0, %v1780_v7  ;;  %vm2298_vm0 = vmor %vm783_vm12, %vm784_vm13  ;;  %v585_v61 = vld [vmem:[%s2096_s1 + $0xd8] sm:$0xff]  ;;  %v586_v7 = vld [vmem:[%s2096_s1 + $0xe0] sm:$0xff] }
  0xd0   : > { %v2274_v33 = vsel %vm2250_vm9, %v760_v8, %v756_v29  ;;  %v1786_v35 = vpop.eup %1785  ;;  %v1696_v38 = vmul.f32 -1.442695, %v581_v20  ;;  %v2284_v39 = vadd.f32 1.0, %v1782_v18  ;;  %vm2286_vm15 = vcmp.eq.f32.partialorder %v772_v9, 8.507059e+37 }
  0xd1   : > { %v782_v42 = vadd.f32 %v2183_v19, %v781_v47  ;;  %v1788_v22 = vpop.eup %1787  ;;  %1795 = vpow2.f32 %v1694_v21  ;;  %v2292_v44 = vadd.f32 1.0, %v1784_v25  ;;  %v775_v40 = vor.u32 1.1754944e-38, %v774_v15  ;;  %v587_v15 = vld [vmem:[%s2096_s1 + $0xe8] sm:$0xff] }
  0xd2   : > { %v796_v48 = vmul.f32 %v2206_v34, %v795_v23  ;;  %v1790_v50 = vpop.eup %1789  ;;  %v771_v52 = vsel %vm2280_vm14, %v2159_v0, %v767_v13  ;;  %vm2307_vm1 = vcmp.eq.f32.partialorder %v787_v26, 8.507059e+37  ;;  %v790_v55 = vor.u32 1.1754944e-38, %v789_v27 }
  0xd3   : > { %1797 = vrcp.f32 %v2178_v16  ;;  %vm798_vm2 = vweird.f32 %v2148_v53  ;;  %vm799_vm3 = vweird.f32 %v2206_v34  ;;  %v802_v36 = vand.u32 2147483647, %v2148_v53 }
  0xd4   : > { %v2312_v49 = vpop.eup %1791  ;;  %1799 = vpow2.f32 %v1695_v28  ;;  %v1697_v0 = vmul.f32 -1.442695, %v582_v43  ;;  %v786_v59 = vsel %vm2298_vm0, %v2183_v19, %v782_v42  ;;  %v804_v60 = vand.u32 2147483648, %v2148_v53  ;;  %vm2341_vm4 = vmor %vm798_vm2, %vm799_vm3  ;;  %v589_v43 = vld [vmem:[%s2096_s1 + $0xf8] sm:$0xff] }
  0xd5   : > { %v2318_v58 = vpop.eup %1793  ;;  %1801 = vpow2.f32 %v1696_v38  ;;  %v1698_v4 = vmul.f32 -1.442695, %v583_v51  ;;  %v2325_v5 = vadd.f32 1.0, %v1786_v35  ;;  %v2329_v29 = vsel %vm2286_vm15, %v775_v40, %v771_v52  ;;  %v588_v38 = vld [vmem:[%s2096_s1 + $0xf0] sm:$0xff] }
  0xd6   : > { %v797_v6 = vadd.f32 %v2206_v34, %v796_v48  ;;  %v1699_v8 = vmul.f32 -1.442695, %v584_v57  ;;  %v2333_v9 = vadd.f32 1.0, %v1788_v22  ;;  %v2335_v12 = vadd.f32 1.0, %v1790_v50 }
  0xd7   : > { %1803 = vrcp.f32 %v2186_v24  ;;  %v1796_v13 = vpop.eup %1795  ;;  %v2349_v47 = vsel %vm2307_vm1, %v790_v55, %v786_v59  ;;  %vm2351_vm5 = vcmp.eq.f32.partialorder %v802_v36, 8.507059e+37  ;;  %v809_v53 = vmul.f32 %v2312_v49, %v2155_v63 }
  0xd8   : > { %v824_v20 = vmul.f32 %v2318_v58, %v2161_v1  ;;  %1805 = vpow2.f32 %v1697_v0  ;;  %v1700_v23 = vmul.f32 -1.442695, %v585_v61  ;;  %v805_v25 = vor.u32 1.1754944e-38, %v804_v60 }
  0xd9   : > { %v2359_v21 = vpop.eup %1797  ;;  %vm813_vm6 = vweird.f32 %v2155_v63  ;;  %1807 = vpow2.f32 %v1698_v4  ;;  %v1701_v27 = vmul.f32 -1.442695, %v586_v7  ;;  %v801_v28 = vsel %vm2341_vm4, %v2206_v34, %v797_v6 }
  0xda   : > { %v1800_v26 = vpop.eup %1799  ;;  %v819_v30 = vand.u32 2147483648, %v2155_v63  ;;  %1809 = vpow2.f32 %v1699_v8  ;;  %v1702_v41 = vmul.f32 -1.442695, %v587_v15  ;;  %v2367_v42 = vadd.f32 1.0, %v1796_v13 }
  0xdb   : > { %v1802_v35 = vpop.eup %1801  ;;  %v817_v22 = vand.u32 2147483647, %v2155_v63  ;;  %v810_v40 = vsub.f32 1.0, %v809_v53  ;;  %v825_v46 = vsub.f32 1.0, %v824_v20  ;;  %v839_v48 = vmul.f32 %v2359_v21, %v2178_v16 }
  0xdc   : > { %1811 = vrcp.f32 %v2209_v37  ;;  %v2376_v34 = vadd.f32 1.0, %v1800_v26  ;;  %v2380_v51 = vsel %vm2351_vm5, %v805_v25, %v801_v28  ;;  %vm828_vm7 = vweird.f32 %v2161_v1 }
  0xdd   : > { %v2374_v50 = vpop.eup %1803  ;;  %1813 = vpow2.f32 %v1700_v23  ;;  %v1703_v52 = vmul.f32 -1.442695, %v588_v38  ;;  %v2383_v54 = vadd.f32 1.0, %v1802_v35  ;;  %v2385_v55 = vor.u32 1.1754944e-38, %v819_v30 }
  0xde   : > { %1815 = vpow2.f32 %v1701_v27  ;;  %v1806_v57 = vpop.eup %1805  ;;  %v1704_v36 = vmul.f32 -1.442695, %v589_v43  ;;  %v832_v0 = vand.u32 2147483647, %v2161_v1  ;;  %v834_v59 = vand.u32 2147483648, %v2161_v1 }
  0xdf   : > { %1817 = vpow2.f32 %v1702_v41  ;;  %v1808_v60 = vpop.eup %1807  ;;  %v811_v61 = vmul.f32 %v2312_v49, %v810_v40  ;;  %vm2390_vm8 = vcmp.eq.f32.partialorder %v817_v22, 8.507059e+37  ;;  %v826_v6 = vmul.f32 %v2318_v58, %v825_v46 }
  0xe0   : > { %v840_v7 = vsub.f32 1.0, %v839_v48  ;;  %v854_v8 = vmul.f32 %v2374_v50, %v2186_v24  ;;  %v1810_v19 = vpop.eup %1809  ;;  %vm814_vm9 = vweird.f32 %v2312_v49  ;;  %vm843_vm10 = vweird.f32 %v2178_v16 }
  0xe1   : > { %v847_v13 = vand.u32 2147483647, %v2178_v16  ;;  %1819 = vrcp.f32 %v2226_v56  ;;  %v2403_v18 = vadd.f32 1.0, %v1806_v57  ;;  %vm829_vm11 = vweird.f32 %v2318_v58  ;;  %vm2417_vm13 = vmor %vm813_vm6, %vm814_vm9 }
  0xe2   : > { %v2401_v15 = vpop.eup %1811  ;;  %1821 = vpow2.f32 %v1703_v52  ;;  %v849_v53 = vand.u32 2147483648, %v2178_v16  ;;  %vm2407_vm12 = vcmp.eq.f32.partialorder %v832_v0, 8.507059e+37  ;;  %v835_v25 = vor.u32 1.1754944e-38, %v834_v59  ;;  %vm2429_vm14 = vmor %vm828_vm7, %vm829_vm11 }
  0xe3   : > { %v1814_v20 = vpop.eup %1813  ;;  %1823 = vpow2.f32 %v1704_v36  ;;  %v862_v26 = vand.u32 2147483647, %v2186_v24  ;;  %v812_v28 = vadd.f32 %v2312_v49, %v811_v61  ;;  %v827_v35 = vadd.f32 %v2318_v58, %v826_v6 }
  0xe4   : > { %v1816_v27 = vpop.eup %1815  ;;  %v841_v38 = vmul.f32 %v2359_v21, %v840_v7  ;;  %v855_v41 = vsub.f32 1.0, %v854_v8  ;;  %v2423_v43 = vadd.f32 1.0, %v1808_v60  ;;  %vm2433_vm15 = vcmp.eq.f32.partialorder %v847_v13, 8.507059e+37 }
  0xe5   : > { %v1818_v22 = vpop.eup %1817  ;;  %v869_v46 = vmul.f32 %v2401_v15, %v2209_v37  ;;  %1825 = vrcp.f32 %v2238_v62  ;;  %v2440_v48 = vadd.f32 1.0, %v1810_v19  ;;  %vm844_vm0 = vweird.f32 %v2359_v21 }
  0xe6   : > { %v850_v52 = vor.u32 1.1754944e-38, %v849_v53  ;;  %1827 = vrcp.f32 %v2240_v2  ;;  %v2446_v57 = vadd.f32 1.0, %v1814_v20  ;;  %vm858_vm1 = vweird.f32 %v2186_v24  ;;  %vm2467_vm3 = vmor %vm843_vm10, %vm844_vm0 }
  0xe7   : > { %v2444_v1 = vpop.eup %1819  ;;  %v864_v36 = vand.u32 2147483648, %v2186_v24  ;;  %1829 = vrcp.f32 %v2268_v31  ;;  %v816_v59 = vsel %vm2417_vm13, %v2312_v49, %v812_v28  ;;  %v831_v60 = vsel %vm2429_vm14, %v2318_v58, %v827_v35 }
  0xe8   : > { %v1822_v0 = vpop.eup %1821  ;;  %v842_v61 = vadd.f32 %v2359_v21, %v841_v38  ;;  %v856_v6 = vmul.f32 %v2374_v50, %v855_v41  ;;  %vm2459_vm2 = vcmp.eq.f32.partialorder %v862_v26, 8.507059e+37  ;;  %v870_v49 = vsub.f32 1.0, %v869_v46 }
  0xe9   : > { %v1824_v8 = vpop.eup %1823  ;;  %v877_v58 = vand.u32 2147483647, %v2209_v37  ;;  %v879_v13 = vand.u32 2147483648, %v2209_v37  ;;  %1831 = vrcp.f32 %v2270_v32  ;;  %v2474_v53 = vadd.f32 1.0, %v1816_v27 }
  0xea   : > { %vm859_vm4 = vweird.f32 %v2374_v50  ;;  %vm873_vm5 = vweird.f32 %v2209_v37  ;;  %v884_v16 = vmul.f32 %v2444_v1, %v2226_v56  ;;  %v2482_v26 = vadd.f32 1.0, %v1818_v22 }
  0xeb   : > { %v2480_v20 = vpop.eup %1825  ;;  %v2484_v28 = vadd.f32 1.0, %v1822_v0  ;;  %v2489_v30 = vsel %vm2390_vm8, %v2385_v55, %v816_v59  ;;  %v865_v27 = vor.u32 1.1754944e-38, %v864_v36  ;;  %v2495_v38 = vsel %vm2407_vm12, %v835_v25, %v831_v60  ;;  %vm2506_vm6 = vmor %vm858_vm1, %vm859_vm4 }
  0xec   : > { %3310 = vst [vmem:[#allocation2_spill] sm:$0xff] %v2482_v26  ;;  %v2491_v35 = vpop.eup %1827  ;;  %v846_v41 = vsel %vm2467_vm3, %v2359_v21, %v842_v61  ;;  %v857_v22 = vadd.f32 %v2374_v50, %v856_v6  ;;  %v894_v40 = vand.u32 2147483648, %v2226_v56  ;;  %v871_v4 = vmul.f32 %v2401_v15, %v870_v49 }
  0xed   : > { %3311 = vst [vmem:[#allocation3_spill] sm:$0xff] %v2484_v28  ;;  %v2502_v46 = vpop.eup %1829  ;;  %vm2511_vm7 = vcmp.eq.f32.partialorder %v877_v58, 8.507059e+37  ;;  %v880_v25 = vor.u32 1.1754944e-38, %v879_v13  ;;  %vm888_vm8 = vweird.f32 %v2226_v56  ;;  %v885_v21 = vsub.f32 1.0, %v884_v16 }
  0xee   : > { %v892_v36 = vand.u32 2147483647, %v2226_v56  ;;  %v899_v0 = vmul.f32 %v2480_v20, %v2238_v62  ;;  %1833 = vrcp.f32 %v2284_v39  ;;  %v2522_v59 = vadd.f32 1.0, %v1824_v8 }
  0xef   : > { %v2520_v24 = vpop.eup %1831  ;;  %v2526_v60 = vsel %vm2433_vm15, %v850_v52, %v846_v41  ;;  %vm874_vm9 = vweird.f32 %v2401_v15  ;;  %v914_v61 = vmul.f32 %v2491_v35, %v2240_v2  ;;  %v861_v6 = vsel %vm2506_vm6, %v2374_v50, %v857_v22 }
  0xf0   : > { %3316 = vst [vmem:[#allocation4_spill] sm:$0xff] %v2522_v59  ;;  %v2534_v19 = vor.u32 1.1754944e-38, %v894_v40  ;;  %v909_v49 = vand.u32 2147483648, %v2238_v62  ;;  %v929_v8 = vmul.f32 %v2502_v46, %v2268_v31  ;;  %v872_v63 = vadd.f32 %v2401_v15, %v871_v4  ;;  %vm2545_vm11 = vmor %vm873_vm5, %vm874_vm9 }
  0xf1   : > { %vm903_vm10 = vweird.f32 %v2238_v62  ;;  %v907_v52 = vand.u32 2147483647, %v2238_v62  ;;  %v924_v58 = vand.u32 2147483648, %v2240_v2  ;;  %v886_v50 = vmul.f32 %v2444_v1, %v885_v21 }
  0xf2   : > { %vm2550_vm12 = vcmp.eq.f32.partialorder %v892_v36, 8.507059e+37  ;;  %v900_v41 = vsub.f32 1.0, %v899_v0  ;;  %v944_v22 = vmul.f32 %v2520_v24, %v2270_v32  ;;  %1835 = vrcp.f32 %v2292_v44 }
  0xf3   : > { %v2559_v40 = vsel %vm2459_vm2, %v865_v27, %v861_v6  ;;  %v915_v37 = vsub.f32 1.0, %v914_v61  ;;  %vm918_vm13 = vweird.f32 %v2240_v2  ;;  %v922_v55 = vand.u32 2147483647, %v2240_v2 }
  0xf4   : > { %v2563_v4 = vpop.eup %1833  ;;  %vm889_vm14 = vweird.f32 %v2444_v1  ;;  %v2566_v21 = vor.u32 1.1754944e-38, %v909_v49  ;;  %v930_v36 = vsub.f32 1.0, %v929_v8  ;;  %v937_v0 = vand.u32 2147483647, %v2268_v31 }
  0xf5   : > { %v876_v7 = vsel %vm2545_vm11, %v2401_v15, %v872_v63  ;;  %vm933_vm15 = vweird.f32 %v2268_v31  ;;  %v939_v27 = vand.u32 2147483648, %v2268_v31  ;;  %1837 = vrcp.f32 %v2325_v5  ;;  %vm2583_vm1 = vmor %vm888_vm8, %vm889_vm14 }
  0xf6   : > { %v887_v61 = vadd.f32 %v2444_v1, %v886_v50  ;;  %v901_v6 = vmul.f32 %v2480_v20, %v900_v41  ;;  %vm2577_vm0 = vcmp.eq.f32.partialorder %v907_v52, 8.507059e+37  ;;  %v925_v8 = vor.u32 1.1754944e-38, %v924_v58 }
  0xf7   : > { %v945_v59 = vsub.f32 1.0, %v944_v22  ;;  %v916_v63 = vmul.f32 %v2491_v35, %v915_v37  ;;  %vm2588_vm2 = vcmp.eq.f32.partialorder %v922_v55, 8.507059e+37  ;;  %vm948_vm3 = vweird.f32 %v2270_v32 }
  0xf8   : > { %v959_v52 = vmul.f32 %v2563_v4, %v2284_v39  ;;  %1839 = vrcp.f32 %v2333_v9  ;;  %v2596_v58 = vpop.eup %1835  ;;  %v2600_v56 = vsel %vm2511_vm7, %v880_v25, %v876_v7  ;;  %vm904_vm4 = vweird.f32 %v2480_v20 }
  0xf9   : > { %v931_v50 = vmul.f32 %v2502_v46, %v930_v36  ;;  %vm2604_vm5 = vcmp.eq.f32.partialorder %v937_v0, 8.507059e+37  ;;  %vm919_vm6 = vweird.f32 %v2491_v35  ;;  %v940_v22 = vor.u32 1.1754944e-38, %v939_v27  ;;  %vm2621_vm8 = vmor %vm903_vm10, %vm904_vm4 }
  0xfa   : > { %v952_v37 = vand.u32 2147483647, %v2270_v32  ;;  %v954_v55 = vand.u32 2147483648, %v2270_v32  ;;  %v891_v23 = vsel %vm2583_vm1, %v2444_v1, %v887_v61  ;;  %v902_v25 = vadd.f32 %v2480_v20, %v901_v6  ;;  %vm2631_vm9 = vmor %vm918_vm13, %vm919_vm6 }
  0xfb   : > { %vm934_vm7 = vweird.f32 %v2502_v46  ;;  %v946_v36 = vmul.f32 %v2520_v24, %v945_v59  ;;  %v2617_v0 = vpop.eup %1837  ;;  %v917_v27 = vadd.f32 %v2491_v35, %v916_v63  ;;  %v960_v28 = vsub.f32 1.0, %v959_v52 }
  0xfc   : > { %v974_v1 = vmul.f32 %v2596_v58, %v2292_v44  ;;  %1841 = vrcp.f32 %v2335_v12  ;;  %v932_v62 = vadd.f32 %v2502_v46, %v931_v50  ;;  %vm949_vm10 = vweird.f32 %v2520_v24  ;;  %vm2650_vm11 = vmor %vm933_vm15, %vm934_vm7 }
  0xfd   : > { %v967_v61 = vand.u32 2147483647, %v2284_v39  ;;  %1843 = vrcp.f32 %v2367_v42  ;;  %v2644_v15 = vsel %vm2550_vm12, %v2534_v19, %v891_v23  ;;  %vm2654_vm13 = vcmp.eq.f32.partialorder %v952_v37, 8.507059e+37  ;;  %vm2672_vm12 = vmor %vm948_vm3, %vm949_vm10 }
  0xfe   : > { %v2639_v6 = vpop.eup %1839  ;;  %3333 = vst [vmem:[#allocation5_spill] sm:$0xff] %v2644_v15  ;;  %vm963_vm14 = vweird.f32 %v2284_v39  ;;  %v969_v52 = vand.u32 2147483648, %v2284_v39  ;;  %v906_v19 = vsel %vm2621_vm8, %v2480_v20, %v902_v25  ;;  %v947_v16 = vadd.f32 %v2520_v24, %v946_v36 }
  0xff   : > { %v982_v31 = vand.u32 2147483647, %v2292_v44  ;;  %v989_v50 = vmul.f32 %v2617_v0, %v2325_v5  ;;  %v921_v37 = vsel %vm2631_vm9, %v2491_v35, %v917_v27  ;;  %v961_v7 = vmul.f32 %v2563_v4, %v960_v28 }
 0x100   : > { %v975_v20 = vsub.f32 1.0, %v974_v1  ;;  %v984_v25 = vand.u32 2147483648, %v2292_v44  ;;  %v936_v36 = vsel %vm2650_vm11, %v2502_v46, %v932_v62  ;;  %v955_v26 = vor.u32 1.1754944e-38, %v954_v55 }
 0x101   : > { %vm2681_vm15 = vcmp.eq.f32.partialorder %v967_v61, 8.507059e+37  ;;  %v1004_v32 = vmul.f32 %v2639_v6, %v2333_v9  ;;  %v2692_v28 = vsel %vm2577_vm0, %v2566_v21, %v906_v19  ;;  %vm964_vm1 = vweird.f32 %v2563_v4 }
 0x102   : > { %v2687_v35 = vpop.eup %1841  ;;  %v970_v27 = vor.u32 1.1754944e-38, %v969_v52  ;;  %vm978_vm3 = vweird.f32 %v2292_v44  ;;  %v2700_v55 = vsel %vm2588_vm2, %v925_v8, %v921_v37  ;;  %v951_v1 = vsel %vm2672_vm12, %v2520_v24, %v947_v16  ;;  %vm2718_vm2 = vmor %vm963_vm14, %vm964_vm1 }
 0x103   : > { %v2696_v46 = vpop.eup %1843  ;;  %v990_v59 = vsub.f32 1.0, %v989_v50  ;;  %v997_v49 = vand.u32 2147483647, %v2325_v5  ;;  %v2708_v21 = vsel %vm2604_vm5, %v940_v22, %v936_v36  ;;  %v962_v62 = vadd.f32 %v2563_v4, %v961_v7 }
 0x104   : > { %v976_v61 = vmul.f32 %v2596_v58, %v975_v20  ;;  %vm2712_vm0 = vcmp.eq.f32.partialorder %v982_v31, 8.507059e+37  ;;  %v985_v8 = vor.u32 1.1754944e-38, %v984_v25  ;;  %vm993_vm4 = vweird.f32 %v2325_v5 }
 0x105   : > { %v1005_v13 = vsub.f32 1.0, %v1004_v32  ;;  %v1019_v41 = vmul.f32 %v2687_v35, %v2335_v12  ;;  %1845 = vrcp.f32 %v2376_v34  ;;  %v2728_v22 = vsel %vm2654_vm13, %v955_v26, %v951_v1 }
 0x106   : > { %vm979_vm5 = vweird.f32 %v2596_v58  ;;  %v999_v39 = vand.u32 2147483648, %v2325_v5  ;;  %v1034_v52 = vmul.f32 %v2696_v46, %v2367_v42  ;;  %v991_v19 = vmul.f32 %v2617_v0, %v990_v59 }
 0x107   : > { %vm2735_vm6 = vcmp.eq.f32.partialorder %v997_v49, 8.507059e+37  ;;  %v1012_v31 = vand.u32 2147483647, %v2333_v9  ;;  %1847 = vrcp.f32 %v2383_v54  ;;  %v966_v26 = vsel %vm2718_vm2, %v2563_v4, %v962_v62  ;;  %vm2749_vm8 = vmor %vm978_vm3, %vm979_vm5 }
 0x108   : > { %v977_v63 = vadd.f32 %v2596_v58, %v976_v61  ;;  %vm1008_vm7 = vweird.f32 %v2333_v9  ;;  %v1014_v50 = vand.u32 2147483648, %v2333_v9  ;;  %vm994_vm9 = vweird.f32 %v2617_v0 }
 0x109   : > { %v1006_v23 = vmul.f32 %v2639_v6, %v1005_v13  ;;  %v1020_v7 = vsub.f32 1.0, %v1019_v41  ;;  %v1027_v20 = vand.u32 2147483647, %v2335_v12  ;;  %v1000_v4 = vor.u32 1.1754944e-38, %v999_v39  ;;  %vm2778_vm14 = vmor %vm993_vm4, %vm994_vm9 }
 0x10a   : > { %vm1023_vm10 = vweird.f32 %v2335_v12  ;;  %v1029_v25 = vand.u32 2147483648, %v2335_v12  ;;  %v1035_v36 = vsub.f32 1.0, %v1034_v52  ;;  %v992_v44 = vadd.f32 %v2617_v0, %v991_v19 }
 0x10b   : > { %v2758_v32 = vpop.eup %1845  ;;  %vm1009_vm11 = vweird.f32 %v2639_v6  ;;  %vm2762_vm13 = vcmp.eq.f32.partialorder %v1012_v31, 8.507059e+37  ;;  %1849 = vrcp.f32 %v2403_v18  ;;  %v2769_v59 = vsel %vm2681_vm15, %v970_v27, %v966_v26 }
 0x10c   : > { %v981_v49 = vsel %vm2749_vm8, %v2596_v58, %v977_v63  ;;  %v1042_v61 = vand.u32 2147483647, %v2367_v42  ;;  %v1044_v24 = vand.u32 2147483648, %v2367_v42  ;;  %v1007_v15 = vadd.f32 %v2639_v6, %v1006_v23  ;;  %vm2794_vm15 = vmor %vm1008_vm7, %vm1009_vm11  ;;  %v1866_v63 = vld [vmem:[%s2096_s1 + $0x28] sm:$0xff] }
 0x10d   : > { %v2784_v13 = vpop.eup %1847  ;;  %v1015_v27 = vor.u32 1.1754944e-38, %v1014_v50  ;;  %v1021_v41 = vmul.f32 %v2687_v35, %v1020_v7  ;;  %vm2788_vm12 = vcmp.eq.f32.partialorder %v1027_v20, 8.507059e+37  ;;  %v1030_v39 = vor.u32 1.1754944e-38, %v1029_v25 }
 0x10e   : > { %v1036_v52 = vmul.f32 %v2696_v46, %v1035_v36  ;;  %vm1038_vm1 = vweird.f32 %v2367_v42  ;;  %v1049_v19 = vmul.f32 %v2758_v32, %v2376_v34  ;;  %v2804_v31 = vsel %vm2712_vm0, %v985_v8, %v981_v49 }
 0x10f   : > { %v996_v9 = vsel %vm2778_vm14, %v2617_v0, %v992_v44  ;;  %vm1024_vm3 = vweird.f32 %v2687_v35  ;;  %v1059_v26 = vand.u32 2147483648, %v2376_v34  ;;  %vm1039_vm2 = vweird.f32 %v2696_v46 }
 0x110   : > { %vm2812_vm4 = vcmp.eq.f32.partialorder %v1042_v61, 8.507059e+37  ;;  %v1045_v50 = vor.u32 1.1754944e-38, %v1044_v24  ;;  %v1064_v2 = vmul.f32 %v2784_v13, %v2383_v54  ;;  %v1011_v0 = vsel %vm2794_vm15, %v2639_v6, %v1007_v15  ;;  %vm2832_vm5 = vmor %vm1023_vm10, %vm1024_vm3 }
 0x111   : > { %v2818_v8 = vpop.eup %1849  ;;  %v1022_v37 = vadd.f32 %v2687_v35, %v1021_v41  ;;  %vm1053_vm0 = vweird.f32 %v2376_v34  ;;  %v1057_v23 = vand.u32 2147483647, %v2376_v34  ;;  %v2828_v7 = vsel %vm2735_vm6, %v1000_v4, %v996_v9  ;;  %vm2843_vm8 = vmor %vm1038_vm1, %vm1039_vm2 }
 0x112   : > { %v1037_v25 = vadd.f32 %v2696_v46, %v1036_v52  ;;  %v1050_v36 = vsub.f32 1.0, %v1049_v19  ;;  %vm1068_vm7 = vweird.f32 %v2383_v54  ;;  %v1074_v6 = vand.u32 2147483648, %v2383_v54 }
 0x113   : > { %v2847_v12 = vor.u32 1.1754944e-38, %v1059_v26  ;;  %v1072_v4 = vand.u32 2147483647, %v2383_v54  ;;  %v1198_v44 = vmul.f32 %v2219_v45, %v2099_v10  ;;  %v1199_v49 = vmul.f32 %v2242_v3, %v2102_v11 }
 0x114   : > { %v2856_v62 = vsel %vm2762_vm13, %v1015_v27, %v1011_v0  ;;  %v1065_v61 = vsub.f32 1.0, %v1064_v2  ;;  %v1079_v42 = vmul.f32 %v2818_v8, %v2403_v18  ;;  %v1087_v24 = vand.u32 2147483647, %v2403_v18 }
 0x115   : > { %v1026_v15 = vsel %vm2832_vm5, %v2687_v35, %v1022_v37  ;;  %1851 = vrcp.f32 %v2423_v43  ;;  %v1200_v10 = vmul.f32 %v2274_v33, %v2107_v14  ;;  %v1230_v11 = vadd.f32 %v1199_v49, %v1198_v44 }
 0x116   : > { %v1041_v45 = vsel %vm2843_vm8, %v2696_v46, %v1037_v25  ;;  %v1051_v3 = vmul.f32 %v2758_v32, %v1050_v36  ;;  %vm1054_vm6 = vweird.f32 %v2758_v32  ;;  %v2872_v1 = vor.u32 1.1754944e-38, %v1074_v6 }
 0x117   : > { %vm1083_vm9 = vweird.f32 %v2403_v18  ;;  %vm2875_vm10 = vcmp.eq.f32.partialorder %v1057_v23, 8.507059e+37  ;;  %v1201_v14 = vmul.f32 %v2329_v29, %v2111_v17  ;;  %v1231_v33 = vadd.f32 %v1230_v11, %v1200_v10  ;;  %v1865_v17 = vld [vmem:[%s2096_s1 + $0x20] sm:$0xff]  ;;  %v1868_v11 = vld [vmem:[%s2096_s1 + $0x38] sm:$0xff] }
 0x118   : > { %v1267_v27 = vmul.f32 %v1198_v44, %v1198_v44  ;;  %v1268_v41 = vmul.f32 %v1199_v49, %v1199_v49  ;;  %v2883_v46 = vsel %vm2788_vm12, %v1030_v39, %v1026_v15  ;;  %v1066_v5 = vmul.f32 %v2784_v13, %v1065_v61  ;;  %vm2907_vm12 = vmor %vm1053_vm0, %vm1054_vm6 }
 0x119   : > { %v1080_v52 = vsub.f32 1.0, %v1079_v42  ;;  %v1089_v19 = vand.u32 2147483648, %v2403_v18  ;;  %vm1069_vm11 = vweird.f32 %v2784_v13  ;;  %vm2888_vm13 = vcmp.eq.f32.partialorder %v1072_v4, 8.507059e+37  ;;  %v1867_v4 = vld [vmem:[%s2096_s1 + $0x30] sm:$0xff] }
 0x11a   : > { %v1202_v29 = vmul.f32 %v1865_v17, %v2349_v47  ;;  %v1232_v26 = vadd.f32 %v1231_v33, %v1201_v14  ;;  %v1269_v2 = vmul.f32 %v1200_v10, %v1200_v10  ;;  %v2896_v58 = vsel %vm2812_vm4, %v1045_v50, %v1041_v45  ;;  %vm2920_vm15 = vmor %vm1068_vm7, %vm1069_vm11  ;;  %v1870_v47 = vld [vmem:[%s2096_s1 + $0x48] sm:$0xff] }
 0x11b   : > { %v1052_v39 = vadd.f32 %v2758_v32, %v1051_v3  ;;  %vm1084_vm14 = vweird.f32 %v2818_v8  ;;  %v1102_v0 = vand.u32 2147483647, %v2423_v43  ;;  %v2901_v37 = vpop.eup %1851  ;;  %v1203_v50 = vmul.f32 %v1866_v63, %v2380_v51 }
 0x11c   : > { %v1233_v23 = vadd.f32 %v1232_v26, %v1202_v29  ;;  %v1270_v20 = vmul.f32 %v1201_v14, %v1201_v14  ;;  %v1299_v25 = vadd.f32 %v1268_v41, %v1267_v27  ;;  %v1067_v36 = vadd.f32 %v2784_v13, %v1066_v5  ;;  %vm2953_vm2 = vmor %vm1083_vm9, %vm1084_vm14  ;;  %v1869_v5 = vld [vmem:[%s2096_s1 + $0x40] sm:$0xff] }
 0x11d   : > { %v1081_v6 = vmul.f32 %v2818_v8, %v1080_v52  ;;  %v1090_v16 = vor.u32 1.1754944e-38, %v1089_v19  ;;  %1853 = vrcp.f32 %v2440_v48  ;;  %vm2924_vm1 = vcmp.eq.f32.partialorder %v1087_v24, 8.507059e+37 }
 0x11e   : > { %v1204_v44 = vmul.f32 %v1867_v4, %v2489_v30  ;;  %v1234_v49 = vadd.f32 %v1233_v23, %v1203_v50  ;;  %v1271_v61 = vmul.f32 %v1202_v29, %v1202_v29  ;;  %v1300_v42 = vadd.f32 %v1299_v25, %v1269_v2 }
 0x11f   : > { %v1056_v15 = vsel %vm2907_vm12, %v2758_v32, %v1052_v39  ;;  %v1094_v54 = vmul.f32 %v2901_v37, %v2423_v43  ;;  %v1104_v10 = vand.u32 2147483648, %v2423_v43  ;;  %v1117_v24 = vand.u32 2147483647, %v2440_v48 }
 0x120   : > { %v1205_v45 = vmul.f32 %v1868_v11, %v2495_v38  ;;  %v1235_v3 = vadd.f32 %v1234_v49, %v1204_v44  ;;  %v1272_v30 = vmul.f32 %v1203_v50, %v1203_v50  ;;  %v1301_v14 = vadd.f32 %v1300_v42, %v1270_v20  ;;  %v1396_v38 = vld [vmem:[%s3256_s7] sm:$0x1] }
 0x121   : > { %v1071_v33 = vsel %vm2920_vm15, %v2784_v13, %v1067_v36  ;;  %v1082_v32 = vadd.f32 %v2818_v8, %v1081_v6  ;;  %vm1098_vm3 = vweird.f32 %v2423_v43  ;;  %v1119_v27 = vand.u32 2147483648, %v2440_v48  ;;  %v1871_v36 = vld [vmem:[%s2096_s1 + $0x50] sm:$0xff] }
 0x122   : > { %1855 = vrcp.f32 %v2446_v57  ;;  %v1206_v52 = vmul.f32 %v1869_v5, %v2526_v60  ;;  %v1236_v19 = vadd.f32 %v1235_v3, %v1205_v45  ;;  %v1273_v17 = vmul.f32 %v1204_v44, %v1204_v44 }
 0x123   : > { %v1302_v29 = vadd.f32 %v1301_v14, %v1271_v61  ;;  %v2959_v26 = vpop.eup %1853  ;;  %v2964_v2 = vsel %vm2875_vm10, %v2847_v12, %v1056_v15  ;;  %v1095_v39 = vsub.f32 1.0, %v1094_v54  ;;  %vm1099_vm4 = vweird.f32 %v2901_v37  ;;  %v3378_v61 = vld [vmem:[#allocation5_spill] sm:$0xff] }
 0x124   : > { %v2967_v18 = vor.u32 1.1754944e-38, %v1104_v10  ;;  %v1207_v63 = vmul.f32 %v1870_v47, %v2559_v40  ;;  %v1237_v60 = vadd.f32 %v1236_v19, %v1206_v52  ;;  %v1274_v50 = vmul.f32 %v1205_v45, %v1205_v45  ;;  %vm3018_vm7 = vmor %vm1098_vm3, %vm1099_vm4  ;;  %v3382_v47 = vld [vmem:[#allocation3_spill] sm:$0xff] }
 0x125   : > { %v1303_v23 = vadd.f32 %v1302_v29, %v1272_v30  ;;  %v2976_v35 = vsel %vm2888_vm13, %v2872_v1, %v1071_v33  ;;  %v1086_v12 = vsel %vm2953_vm2, %v2818_v8, %v1082_v32  ;;  %v2981_v25 = vor.u32 1.1754944e-38, %v1119_v27  ;;  %v1873_v30 = vld [vmem:[%s2096_s1 + $0x60] sm:$0xff]  ;;  %v1878_v8 = vld [vmem:[%s2096_s1 + $0x88] sm:$0xff] }
 0x126   : > { %v1208_v40 = vmul.f32 %v1871_v36, %v2600_v56  ;;  %v1238_v6 = vadd.f32 %v1237_v60, %v1207_v63  ;;  %v1275_v34 = vmul.f32 %v1206_v52, %v1206_v52  ;;  %v1096_v49 = vmul.f32 %v2901_v37, %v1095_v39  ;;  %v1872_v56 = vld [vmem:[%s2096_s1 + $0x58] sm:$0xff] }
 0x127   : > { %v1304_v4 = vadd.f32 %v1303_v23, %v1273_v17  ;;  %v1109_v1 = vmul.f32 %v2959_v26, %v2440_v48  ;;  %v1132_v9 = vand.u32 2147483647, %v2446_v57  ;;  %1857 = vrcp.f32 %v2474_v53 }
 0x128   : > { %v2985_v44 = vpop.eup %1855  ;;  %vm2994_vm0 = vcmp.eq.f32.partialorder %v1102_v0, 8.507059e+37  ;;  %v1209_v42 = vmul.f32 %v1872_v56, %v3378_v61  ;;  %v1239_v15 = vadd.f32 %v1238_v6, %v1208_v40  ;;  %v1276_v54 = vmul.f32 %v1207_v63, %v1207_v63  ;;  %v1875_v63 = vld [vmem:[%s2096_s1 + $0x70] sm:$0xff] }
 0x129   : > { %v1305_v10 = vadd.f32 %v1304_v4, %v1274_v50  ;;  %v3002_v11 = vsel %vm2924_vm1, %v1090_v16, %v1086_v12  ;;  %vm1113_vm5 = vweird.f32 %v2440_v48  ;;  %v1134_v45 = vand.u32 2147483648, %v2446_v57  ;;  %v3383_v6 = vld [vmem:[#allocation4_spill] sm:$0xff] }
 0x12a   : > { %v1147_v0 = vand.u32 2147483647, %v2474_v53  ;;  %v1149_v3 = vand.u32 2147483648, %v2474_v53  ;;  %v1210_v14 = vmul.f32 %v1873_v30, %v2692_v28  ;;  %v1240_v33 = vadd.f32 %v1239_v15, %v1209_v42  ;;  %v1874_v28 = vld [vmem:[%s2096_s1 + $0x68] sm:$0xff]  ;;  %v1550_v15 = vld [vmem:[%s3264_s15] sm:$0x1] }
 0x12b   : > { %v1277_v32 = vmul.f32 %v1208_v40, %v1208_v40  ;;  %v1306_v27 = vadd.f32 %v1305_v10, %v1275_v34  ;;  %v1110_v51 = vsub.f32 1.0, %v1109_v1  ;;  %v1124_v16 = vmul.f32 %v2985_v44, %v2446_v57 }
 0x12c   : > { %v1211_v5 = vmul.f32 %v1874_v28, %v2700_v55  ;;  %v1241_v52 = vadd.f32 %v1240_v33, %v1210_v14  ;;  %v1278_v19 = vmul.f32 %v1209_v42, %v1209_v42  ;;  %vm1114_vm8 = vweird.f32 %v2959_v26 }
 0x12d   : > { %v1307_v17 = vadd.f32 %v1306_v27, %v1276_v54  ;;  %v3024_v29 = vpop.eup %1857  ;;  %vm1128_vm6 = vweird.f32 %v2446_v57  ;;  %v3028_v39 = vor.u32 1.1754944e-38, %v1134_v45  ;;  %v3030_v43 = vor.u32 1.1754944e-38, %v1149_v3  ;;  %v1877_v54 = vld [vmem:[%s2096_s1 + $0x80] sm:$0xff]  ;;  %vm3075_vm14 = vmor %vm1113_vm5, %vm1114_vm8 }
 0x12e   : > { %v1212_v60 = vmul.f32 %v1875_v63, %v2708_v21  ;;  %v1242_v55 = vadd.f32 %v1241_v52, %v1211_v5  ;;  %v1279_v50 = vmul.f32 %v1210_v14, %v1210_v14  ;;  %v1111_v36 = vmul.f32 %v2959_v26, %v1110_v51  ;;  %v1876_v21 = vld [vmem:[%s2096_s1 + $0x78] sm:$0xff] }
 0x12f   : > { %v1308_v23 = vadd.f32 %v1307_v17, %v1277_v32  ;;  %v1125_v40 = vsub.f32 1.0, %v1124_v16  ;;  %vm3042_vm9 = vcmp.eq.f32.partialorder %v1117_v24, 8.507059e+37  ;;  %v1213_v4 = vmul.f32 %v1876_v21, %v2728_v22 }
 0x130   : > { %v1417_v41 = vpop.f32.mrf.mxu1  ;;  %v1280_v1 = vmul.f32 %v1211_v5, %v1211_v5  ;;  %vm1129_vm10 = vweird.f32 %v2985_v44  ;;  %v1214_v10 = vmul.f32 %v1877_v54, %v2769_v59  ;;  %v1281_v3 = vmul.f32 %v1212_v60, %v1212_v60 }
 0x131   : > { %v2971_v20 = vadd.f32 %v1417_v41, %v1396_v38  ;;  %v1097_v38 = vadd.f32 %v2901_v37, %v1096_v49  ;;  %v3379_v41 = vld [vmem:[#allocation2_spill] sm:$0xff]  ;;  %v1243_v49 = vadd.f32 %v1242_v55, %v1212_v60  ;;  %v1309_v56 = vadd.f32 %v1308_v23, %v1278_v19  ;;  %vm3109_vm1 = vmor %vm1128_vm6, %vm1129_vm10 }
 0x132   : > { %1859 = vrcp.f32 %v3379_v41  ;;  %v1162_v42 = vand.u32 2147483647, %v3379_v41  ;;  %v1164_v24 = vand.u32 2147483648, %v3379_v41  ;;  %v1112_v32 = vadd.f32 %v2959_v26, %v1111_v36  ;;  %v1880_v36 = vld [vmem:[%s2096_s1 + $0x98] sm:$0xff] }
 0x133   : > { %1861 = vrcp.f32 %v3382_v47  ;;  %v1101_v12 = vsel %vm3018_vm7, %v2901_v37, %v1097_v38  ;;  %v1139_v37 = vmul.f32 %v3024_v29, %v2474_v53  ;;  %v1244_v45 = vadd.f32 %v1243_v49, %v1213_v4 }
 0x134   : > { %1863 = vrcp.f32 %v3383_v6  ;;  %v1310_v30 = vadd.f32 %v1309_v56, %v1279_v50  ;;  %v3065_v33 = vsel %vm2994_vm0, %v2967_v18, %v1101_v12  ;;  %v1126_v27 = vmul.f32 %v2985_v44, %v1125_v40 }
 0x135   : > { %vm1143_vm11 = vweird.f32 %v2474_v53  ;;  %vm1144_vm13 = vweird.f32 %v3024_v29  ;;  %vm3081_vm12 = vcmp.eq.f32.partialorder %v1132_v9, 8.507059e+37  ;;  %v1215_v38 = vmul.f32 %v1878_v8, %v2804_v31  ;;  %v1879_v9 = vld [vmem:[%s2096_s1 + $0x90] sm:$0xff] }
 0x136   : > { %v1245_v51 = vadd.f32 %v1244_v45, %v1214_v10  ;;  %v1282_v16 = vmul.f32 %v1213_v4, %v1213_v4  ;;  %v1311_v13 = vadd.f32 %v1310_v30, %v1280_v1  ;;  %v1140_v5 = vsub.f32 1.0, %v1139_v37  ;;  %v1881_v37 = vld [vmem:[%s2096_s1 + $0xa0] sm:$0xff]  ;;  %vm3144_vm5 = vmor %vm1143_vm11, %vm1144_vm13  ;;  %v1883_v8 = vld [vmem:[%s2096_s1 + $0xb0] sm:$0xff] }
 0x137   : > { %v3093_v19 = vor.u32 1.1754944e-38, %v1164_v24  ;;  %v1216_v17 = vmul.f32 %v1879_v9, %v2828_v7  ;;  %v1283_v60 = vmul.f32 %v1214_v10, %v1214_v10  ;;  %v1116_v55 = vsel %vm3075_vm14, %v2959_v26, %v1112_v32 }
 0x138   : > { %v3048_v61 = vpop.eup %1859  ;;  %v1571_v22 = vpop.f32.mrf.mxu1  ;;  %v1246_v63 = vadd.f32 %v1245_v51, %v1215_v38  ;;  %v1312_v31 = vadd.f32 %v1311_v13, %v1281_v3  ;;  %v1127_v50 = vadd.f32 %v2985_v44, %v1126_v27  ;;  %vm1158_vm15 = vweird.f32 %v3379_v41 }
 0x139   : > { %v3060_v14 = vpop.eup %1861  ;;  %v3089_v48 = vadd.f32 %v1571_v22, %v1550_v15  ;;  %v1154_v52 = vmul.f32 %v3048_v61, %v3379_v41  ;;  %v1177_v12 = vand.u32 2147483647, %v3382_v47  ;;  %v1217_v26 = vmul.f32 %v1880_v36, %v2856_v62 }
 0x13a   : > { %v3087_v28 = vpop.eup %1863  ;;  %v1169_v23 = vmul.f32 %v3060_v14, %v3382_v47  ;;  %v1247_v40 = vadd.f32 %v1246_v63, %v1216_v17  ;;  %v1284_v21 = vmul.f32 %v1215_v38, %v1215_v38  ;;  %v1313_v4 = vadd.f32 %v1312_v31, %v1282_v16 }
 0x13b   : > { %v1141_v49 = vmul.f32 %v3024_v29, %v1140_v5  ;;  %v1155_v1 = vsub.f32 1.0, %v1154_v52  ;;  %vm1173_vm3 = vweird.f32 %v3382_v47  ;;  %v1179_v56 = vand.u32 2147483648, %v3382_v47 }
 0x13c   : > { %v1184_v57 = vmul.f32 %v3087_v28, %v3383_v6  ;;  %v1218_v24 = vmul.f32 %v1881_v37, %v2883_v46  ;;  %v1248_v15 = vadd.f32 %v1247_v40, %v1217_v26  ;;  %v1285_v22 = vmul.f32 %v1216_v17, %v1216_v17  ;;  %v1882_v46 = vld [vmem:[%s2096_s1 + $0xa8] sm:$0xff] }
 0x13d   : > { %v1314_v62 = vadd.f32 %v1313_v4, %v1283_v60  ;;  %v1121_v54 = vsel %vm3042_vm9, %v2981_v25, %v1116_v55  ;;  %v1131_v10 = vsel %vm3109_vm1, %v2985_v44, %v1127_v50  ;;  %v1170_v45 = vsub.f32 1.0, %v1169_v23  ;;  %v1495_v18 = vpop.f32.mrf.mxu3 }
 0x13e   : > { %vm1188_vm2 = vweird.f32 %v3383_v6  ;;  %vm3131_vm4 = vcmp.eq.f32.partialorder %v1147_v0, 8.507059e+37  ;;  %v1219_v30 = vmul.f32 %v1882_v46, %v2896_v58  ;;  %v1249_v32 = vadd.f32 %v1248_v15, %v1218_v24 }
 0x13f   : > { %v1286_v34 = vmul.f32 %v1217_v26, %v1217_v26  ;;  %v1315_v25 = vadd.f32 %v1314_v62, %v1284_v21  ;;  %v1142_v27 = vadd.f32 %v3024_v29, %v1141_v49  ;;  %v1156_v44 = vmul.f32 %v3048_v61, %v1155_v1  ;;  %v1886_v21 = vld [vmem:[%s2096_s1 + $0xc8] sm:$0xff] }
 0x140   : > { %vm1159_vm0 = vweird.f32 %v3048_v61  ;;  %v1185_v59 = vsub.f32 1.0, %v1184_v57  ;;  %vm3150_vm7 = vcmp.eq.f32.partialorder %v1162_v42, 8.507059e+37  ;;  %v1220_v38 = vmul.f32 %v1883_v8, %v2964_v2  ;;  %v1884_v2 = vld [vmem:[%s2096_s1 + $0xb8] sm:$0xff] }
 0x141   : > { %v1250_v51 = vadd.f32 %v1249_v32, %v1219_v30  ;;  %v1287_v16 = vmul.f32 %v1218_v24, %v1218_v24  ;;  %v1316_v13 = vadd.f32 %v1315_v25, %v1285_v22  ;;  %v1136_v53 = vsel %vm3081_vm12, %v3028_v39, %v1131_v10  ;;  %v1474_v39 = vld [vmem:[%s3260_s11] sm:$0x1]  ;;  %vm3181_vm9 = vmor %vm1158_vm15, %vm1159_vm0  ;;  %v1887_v22 = vld [vmem:[%s2096_s1 + $0xd0] sm:$0xff] }
 0x142   : > { %v1171_v5 = vmul.f32 %v3060_v14, %v1170_v45  ;;  %vm1174_vm8 = vweird.f32 %v3060_v14  ;;  %v1192_v42 = vand.u32 2147483647, %v3383_v6  ;;  %vm3162_vm6 = vcmp.eq.f32.partialorder %v1177_v12, 8.507059e+37  ;;  %v1885_v12 = vld [vmem:[%s2096_s1 + $0xc0] sm:$0xff]  ;;  %v1888_v32 = vld [vmem:[%s2096_s1 + $0xd8] sm:$0xff] }
 0x143   : > { %v1221_v9 = vmul.f32 %v1884_v2, %v2976_v35  ;;  %v1251_v17 = vadd.f32 %v1250_v51, %v1220_v38  ;;  %v1288_v63 = vmul.f32 %v1219_v30, %v1219_v30  ;;  %v1317_v60 = vadd.f32 %v1316_v13, %v1286_v34  ;;  %vm3196_vm11 = vmor %vm1173_vm3, %vm1174_vm8 }
 0x144   : > { %v1146_v31 = vsel %vm3144_vm5, %v3024_v29, %v1142_v27  ;;  %v1157_v55 = vadd.f32 %v3048_v61, %v1156_v44  ;;  %v1186_v50 = vmul.f32 %v3087_v28, %v1185_v59  ;;  %v1496_v23 = vadd.f32 %v1495_v18, %v1474_v39 }
 0x145   : > { %v1222_v7 = vmul.f32 %v1885_v12, %v3002_v11  ;;  %v1252_v36 = vadd.f32 %v1251_v17, %v1221_v9  ;;  %v1289_v29 = vmul.f32 %v1220_v38, %v1220_v38  ;;  %v1318_v26 = vadd.f32 %v1317_v60, %v1287_v16  ;;  %v1890_v38 = vld [vmem:[%s2096_s1 + $0xe8] sm:$0xff] }
 0x146   : > { %v1172_v40 = vadd.f32 %v3060_v14, %v1171_v5  ;;  %vm1189_vm10 = vweird.f32 %v3087_v28  ;;  %v1223_v4 = vmul.f32 %v1886_v21, %v3065_v33  ;;  %v1498_v41 = vadd.f32 %v1496_v23, %v2971_v20 }
 0x147   : > { %v1253_v11 = vadd.f32 %v1252_v36, %v1222_v7  ;;  %v1290_v1 = vmul.f32 %v1221_v9, %v1221_v9  ;;  %v1319_v57 = vadd.f32 %v1318_v26, %v1288_v63  ;;  %vm1336_vm13 = vcmask 1040384   ;;  %vm3213_vm14 = vmor %vm1188_vm2, %vm1189_vm10  ;;  %v1892_v9 = vld [vmem:[%s2096_s1 + $0xf8] sm:$0xff] }
 0x148   : > { %v1161_v20 = vsel %vm3181_vm9, %v3048_v61, %v1157_v55  ;;  %v1187_v33 = vadd.f32 %v3087_v28, %v1186_v50  ;;  %v1194_v37 = vand.u32 2147483648, %v3383_v6  ;;  %v1574_v24 = vadd.f32 %v3089_v48, %v1498_v41 }
 0x149   : > { %v1224_v62 = vmul.f32 %v1887_v22, %v1121_v54  ;;  %v1254_v10 = vadd.f32 %v1253_v11, %v1223_v4  ;;  %v1291_v45 = vmul.f32 %v1222_v7, %v1222_v7  ;;  %v1320_v46 = vadd.f32 %v1319_v57, %v1289_v29 }
 0x14a   : > { %v1151_v61 = vsel %vm3131_vm4, %v3030_v43, %v1146_v31  ;;  %v1176_v48 = vsel %vm3196_vm11, %v3060_v14, %v1172_v40  ;;  %v1180_v6 = vor.u32 1.1754944e-38, %v1179_v56  ;;  %v1575_v30 = vsel %vm1336_vm13, %v1574_v24, 0.0  ;;  %v1889_v56 = vld [vmem:[%s2096_s1 + $0xe0] sm:$0xff] }
 0x14b   : > { %v1225_v54 = vmul.f32 %v1888_v32, %v1136_v53  ;;  %v1255_v34 = vadd.f32 %v1254_v10, %v1224_v62  ;;  %v1292_v25 = vmul.f32 %v1223_v4, %v1223_v4  ;;  %v1321_v27 = vadd.f32 %v1320_v46, %v1290_v1  ;;  %1576 = vst [vmem:[%s557_s30] sm:$0xff] %v1575_v30  ;;  %v1891_v53 = vld [vmem:[%s2096_s1 + $0xf0] sm:$0xff]  ;;  %s553_s1 = scalar_lea.vmem %s3265_s16, %s1671_s29 }
 0x14c   : > { %v1166_v43 = vsel %vm3150_vm7, %v3093_v19, %v1161_v20  ;;  %v1191_v14 = vsel %vm3213_vm14, %v3087_v28, %v1187_v33  ;;  %vm1193_vm12 = vcmp.eq.f32.partialorder %v1192_v42, 8.507059e+37  ;;  %v1195_v47 = vor.u32 1.1754944e-38, %v1194_v37 }
 0x14d   : > { %v1226_v3 = vmul.f32 %v1889_v56, %v1151_v61  ;;  %v1256_v44 = vadd.f32 %v1255_v34, %v1225_v54  ;;  %v1293_v59 = vmul.f32 %v1224_v62, %v1224_v62  ;;  %v1322_v0 = vadd.f32 %v1321_v27, %v1291_v45 }
 0x14e   : > { %v1181_v8 = vsel %vm3162_vm6, %v1180_v6, %v1176_v48  ;;  %v1227_v51 = vmul.f32 %v1890_v38, %v1166_v43  ;;  %v1294_v19 = vmul.f32 %v1225_v54, %v1225_v54  ;;  %v1196_v13 = vsel %vm1193_vm12, %v1195_v47, %v1191_v14 }
 0x14f   : > { %v1257_v58 = vadd.f32 %v1256_v44, %v1226_v3  ;;  %v1323_v16 = vadd.f32 %v1322_v0, %v1292_v25  ;;  %v1228_v5 = vmul.f32 %v1891_v53, %v1181_v8  ;;  %v1295_v42 = vmul.f32 %v1226_v3, %v1226_v3 }
 0x150   : > { %v1229_v17 = vmul.f32 %v1892_v9, %v1196_v13  ;;  %v1296_v60 = vmul.f32 %v1227_v51, %v1227_v51  ;;  %vm1338_vm15 = vcmask 1041408  }
 0x151   : > { %v1258_v28 = vadd.f32 %v1257_v58, %v1227_v51  ;;  %v1324_v2 = vadd.f32 %v1323_v16, %v1293_v59  ;;  %v1297_v31 = vmul.f32 %v1228_v5, %v1228_v5 }
 0x152   : > { %v1298_v50 = vmul.f32 %v1229_v17, %v1229_v17 }
 0x153   : > { %v1259_v63 = vadd.f32 %v1258_v28, %v1228_v5  ;;  %v1325_v39 = vadd.f32 %v1324_v2, %v1294_v19 }
 0x155   : > { %v1260_v18 = vadd.f32 %v1259_v63, %v1229_v17  ;;  %v1326_v52 = vadd.f32 %v1325_v39, %v1295_v42 }
 0x157   : > { %v1261_v55 = vrot.slane %v1260_v18, 4  ;;  %v1327_v23 = vadd.f32 %v1326_v52, %v1296_v60 }
 0x159   : > { %v1262_v35 = vadd.f32 %v1261_v55, %v1260_v18  ;;  %v1328_v12 = vadd.f32 %v1327_v23, %v1297_v31 }
 0x15b   : > { %v1263_v7 = vrot.slane %v1262_v35, 2  ;;  %v1329_v36 = vadd.f32 %v1328_v12, %v1298_v50 }
 0x15d   : > { %v1264_v29 = vadd.f32 %v1263_v7, %v1262_v35  ;;  %v1330_v26 = vrot.slane %v1329_v36, 4 }
 0x15f   : > { %v1331_v40 = vadd.f32 %v1330_v26, %v1329_v36  ;;  %v1265_v21 = vrot.slane %v1264_v29, 1 }
 0x161   : > { %v1332_v4 = vrot.slane %v1331_v40, 2  ;;  %v1266_v49 = vadd.f32 %v1265_v21, %v1264_v29 }
 0x163   : > { %v1333_v41 = vadd.f32 %v1332_v4, %v1331_v40 }
 0x165   : > { %v1334_v11 = vrot.slane %v1333_v41, 1 }
 0x167   : > { %v1335_v1 = vadd.f32 %v1334_v11, %v1333_v41 }
 0x169   : > { %v1337_v57 = vsel %vm1336_vm13, %v1266_v49, %v1335_v1 }
 0x16a   : > { %v1339_v20 = vsel %vm1338_vm15, %v1337_v57, 0.0 }
 0x16b   : > { %1340 = vst [vmem:[%s553_s1] sm:$0xff] %v1339_v20 }
 0x16c PF: > { %s28_s24 = sadd.s32 1, %s1899_s24  }
 0x16d   : > { %p25_p4 = scmp.ge.s32.totalorder %s28_s24, 4  }
 0x16f   :  { %27 = sbr.rel (!%p25_p4) target bundleno = 3 (0x3), region = 129 }

// kernel: residual_layer.4
= control target key start
LH: loop header
LB: loop body
LE: loop exit
PB: predicated region body
PF: predicated region fallthrough
CT: control target
= control target key end

     0   :  { %s4150_s24 = smov 0   ;;  %s7409_s0 = inlined_call_operand.vmem [shape: f32[2,16,16,128], index: 0, kind: input, shape index: {}]   ;;  %s7410_s1 = inlined_call_operand.vmem [shape: f32[1,128], index: 1, kind: input, shape index: {}]   ;;  %s7411_s2 = inlined_call_operand.vmem [shape: f32[1,128], index: 2, kind: input, shape index: {}]   ;;  %s7412_s3 = inlined_call_operand.vmem [shape: f32[1152,128], index: 3, kind: input, shape index: {}]   ;;  %s7413_s4 = inlined_call_operand.vmem [shape: f32[1,128], index: 4, kind: input, shape index: {}]   ;;  %s7414_s5 = inlined_call_operand.vmem [shape: f32[2,8,128], index: 5, kind: input, shape index: {}]   ;;  %s7415_s6 = inlined_call_operand.vmem [shape: f32[2,16,16,128], index: 6, kind: output, shape index: {0}]   ;;  %s7416_s7 = inlined_call_operand.vmem [shape: f32[2,8,128], index: 7, kind: output, shape index: {1}]  }
   0x1 LB: > { %s3604_s25 = sadd.s32 4294967295, %s4107_s24   ;;  %p3608_p0 = scmp.ge.s32.totalorder %s4107_s24, 1  ;;  %s4107_s24 = sphi %s4150_s24, %s18_s24  }
   0x2   : > { %p249_p1 = scmp.lt.s32.totalorder %s4107_s24, 3 }
   0x4   : > { %p250_p2 = pnand %p3608_p0, %p249_p1 }
   0x6   : > { %253 = sbr.rel (%p250_p2) target bundleno = 897 (0x381), region = 44 }
   0xb   : > { %v1508_v0 = vld [vmem:[%s7412_s3 + $0x78] sm:$0xff]  ;;  %v1507_v1 = vld [vmem:[%s7412_s3 + $0x70] sm:$0xff]  ;;  %p289_p3 = scmp.lt.s32.totalorder %s3604_s25, 1  ;;  %v1506_v2 = vld [vmem:[%s7412_s3 + $0x68] sm:$0xff]  ;;  %vm1084_vm2 = vcmask 1040384  }
   0xc   : > { %3779 = vmatpush.msra.mxu1 %v1508_v0  ;;  %3780 = vmatpush.msra.mxu2 %v1508_v0  ;;  %v1505_v3 = vld [vmem:[%s7412_s3 + $0x60] sm:$0xff]  ;;  %v1504_v4 = vld [vmem:[%s7412_s3 + $0x58] sm:$0xff]  ;;  %v1503_v5 = vld [vmem:[%s7412_s3 + $0x50] sm:$0xff] }
   0xd   : > { %3781 = vmatpush.msra.mxu3 %v1508_v0  ;;  %1637 = vmatpush.msra.mxu0 %v1508_v0  ;;  %s7906_s25 = smov (!%p289_p3, %s3604_s25), 1  ;;  %v1502_v16 = vld [vmem:[%s7412_s3 + $0x48] sm:$0xff]  ;;  %v1501_v21 = vld [vmem:[%s7412_s3 + $0x40] sm:$0xff]  ;;  %v1500_v24 = vld [vmem:[%s7412_s3 + $0x38] sm:$0xff] }
   0xe   : > { %3782 = vmatpush.msra.mxu1 %v1507_v1  ;;  %3783 = vmatpush.msra.mxu2 %v1507_v1  ;;  %s3777_s11 = sshll.u32 %s7906_s25, 8  ;;  %v1499_v28 = vld [vmem:[%s7412_s3 + $0x30] sm:$0xff]  ;;  %v1498_v35 = vld [vmem:[%s7412_s3 + $0x28] sm:$0xff]  ;;  %v1497_v38 = vld [vmem:[%s7412_s3 + $0x20] sm:$0xff]  ;;  %s3611_s20 = sshll.u32 %s7906_s25, 3 }
   0xf   : > { %3784 = vmatpush.msra.mxu3 %v1507_v1  ;;  %1638 = vmatpush.msra.mxu0 %v1507_v1  ;;  %s4181_s16 = scalar_lea.vmem %s7409_s0, %s3777_s11  ;;  %v1496_v48 = vld [vmem:[%s7412_s3 + $0x18] sm:$0xff]  ;;  %v1495_v57 = vld [vmem:[%s7412_s3 + $0x10] sm:$0xff]  ;;  %v1494_v63 = vld [vmem:[%s7412_s3 + $0x8] sm:$0xff]  ;;  %s297_s23 = scalar_lea.vmem %s7414_s5, %s3611_s20 }
  0x10   : > { %3785 = vmatpush.msra.mxu1 %v1506_v2  ;;  %3786 = vmatpush.msra.mxu2 %v1506_v2  ;;  %v4187_v6 = vld [vmem:[%s4181_s16 + $0x30] sm:$0xff]  ;;  %v4197_v10 = vld [vmem:[%s4181_s16 + $0x38] sm:$0xff]  ;;  %v4213_v18 = vld [vmem:[%s4181_s16 + $0x40] sm:$0xff]  ;;  %s6768_s30 = scalar_lea.vmem %s7415_s6, %s3777_s11  ;;  %s306_s14 = scalar_lea.vmem %s7416_s7, %s3611_s20 }
  0x11   : > { %3787 = vmatpush.msra.mxu3 %v1506_v2  ;;  %1639 = vmatpush.msra.mxu0 %v1506_v2  ;;  %v3621_v7 = vmul.f32 -1.442695, %v4187_v6  ;;  %v4191_v8 = vld [vmem:[%s4181_s16 + $0x70] sm:$0xff]  ;;  %v3622_v13 = vmul.f32 -1.442695, %v4197_v10  ;;  %v4203_v14 = vld [vmem:[%s4181_s16 + $0x78] sm:$0xff] }
  0x12   : > { %3788 = vmatpush.msra.mxu1 %v1505_v3  ;;  %3789 = vmatpush.msra.mxu2 %v1505_v3  ;;  %v4194_v9 = vld [vmem:[%s4181_s16 + $0xb0] sm:$0xff]  ;;  %v3629_v11 = vmul.f32 -1.442695, %v4191_v8  ;;  %v4206_v15 = vld [vmem:[%s4181_s16 + $0xb8] sm:$0xff]  ;;  %v3630_v17 = vmul.f32 -1.442695, %v4203_v14 }
  0x13   : > { %3790 = vmatpush.msra.mxu3 %v1505_v3  ;;  %1640 = vmatpush.msra.mxu0 %v1505_v3  ;;  %v3637_v12 = vmul.f32 -1.442695, %v4194_v9  ;;  %3839 = vpow2.f32 %v3621_v7  ;;  %v4216_v19 = vld [vmem:[%s4181_s16 + $0x80] sm:$0xff]  ;;  %v3638_v20 = vmul.f32 -1.442695, %v4206_v15  ;;  %v4239_v33 = vld [vmem:[%s4181_s16 + $0x48] sm:$0xff] }
  0x14   : > { %3791 = vmatpush.msra.mxu1 %v1504_v4  ;;  %3792 = vmatpush.msra.mxu2 %v1504_v4  ;;  %3841 = vpow2.f32 %v3629_v11  ;;  %v3623_v22 = vmul.f32 -1.442695, %v4213_v18  ;;  %v3631_v23 = vmul.f32 -1.442695, %v4216_v19  ;;  %v4228_v25 = vld [vmem:[%s4181_s16 + $0xc0] sm:$0xff]  ;;  %v4109_v11 = vmov 0.0  }
  0x15   : > { %3793 = vmatpush.msra.mxu3 %v1504_v4  ;;  %1641 = vmatpush.msra.mxu0 %v1504_v4  ;;  %3843 = vpow2.f32 %v3637_v12  ;;  %v3639_v32 = vmul.f32 -1.442695, %v4228_v25  ;;  %v4258_v44 = vmul.f32 -1.442695, %v4239_v33  ;;  %v4317_v12 = vrot.slane %v4109_v11, 7 }
  0x16   : > { %3794 = vmatpush.msra.mxu1 %v1503_v5  ;;  %3795 = vmatpush.msra.mxu2 %v1503_v5  ;;  %3845 = vpow2.f32 %v3622_v13 }
  0x17   : > { %3796 = vmatpush.msra.mxu3 %v1503_v5  ;;  %1642 = vmatpush.msra.mxu0 %v1503_v5  ;;  %3847 = vpow2.f32 %v3630_v17  ;;  %7522 = vst [vmem:[#allocation2_spill] sm:$0xff] %v4317_v12  ;;  %v1493_v17 = vld [vmem:[%s7412_s3] sm:$0xff] }
  0x18   : > { %3797 = vmatpush.msra.mxu1 %v1502_v16  ;;  %3798 = vmatpush.msra.mxu2 %v1502_v16  ;;  %3849 = vpow2.f32 %v3638_v20 }
  0x19   : > { %3799 = vmatpush.msra.mxu3 %v1502_v16  ;;  %1643 = vmatpush.msra.mxu0 %v1502_v16  ;;  %v3840_v26 = vpop.eup %3839  ;;  %3851 = vpow2.f32 %v3623_v22 }
  0x1a   : > { %3800 = vmatpush.msra.mxu1 %v1501_v21  ;;  %3801 = vmatpush.msra.mxu2 %v1501_v21  ;;  %v3842_v27 = vpop.eup %3841  ;;  %v4233_v29 = vadd.f32 1.0, %v3840_v26  ;;  %3853 = vpow2.f32 %v3631_v23 }
  0x1b   : > { %3802 = vmatpush.msra.mxu3 %v1501_v21  ;;  %1644 = vmatpush.msra.mxu0 %v1501_v21  ;;  %v3844_v30 = vpop.eup %3843  ;;  %v4235_v31 = vadd.f32 1.0, %v3842_v27 }
  0x1c   : > { %3803 = vmatpush.msra.mxu1 %v1500_v24  ;;  %3804 = vmatpush.msra.mxu2 %v1500_v24  ;;  %v3846_v34 = vpop.eup %3845  ;;  %3855 = vrcp.f32 %v4233_v29  ;;  %v568_v36 = vand.u32 2147483648, %v4233_v29  ;;  %v566_v39 = vand.u32 2147483647, %v4233_v29  ;;  %v4253_v42 = vadd.f32 1.0, %v3844_v30 }
  0x1d   : > { %3805 = vmatpush.msra.mxu3 %v1500_v24  ;;  %1645 = vmatpush.msra.mxu0 %v1500_v24  ;;  %v3848_v37 = vpop.eup %3847  ;;  %3857 = vrcp.f32 %v4235_v31  ;;  %v688_v40 = vand.u32 2147483648, %v4235_v31  ;;  %v686_v41 = vand.u32 2147483647, %v4235_v31  ;;  %v4255_v43 = vadd.f32 1.0, %v3846_v34 }
  0x1e   : > { %3806 = vmatpush.msra.mxu1 %v1499_v28  ;;  %3807 = vmatpush.msra.mxu2 %v1499_v28  ;;  %v3850_v45 = vpop.eup %3849  ;;  %vm562_vm0 = vweird.f32 %v4233_v29  ;;  %vm682_vm1 = vweird.f32 %v4235_v31  ;;  %v4262_v46 = vadd.f32 1.0, %v3848_v37  ;;  %3859 = vpow2.f32 %v3639_v32  ;;  %v1556_v37 = vld [vmem:[%s7412_s3 + $0x1f8] sm:$0xff] }
  0x1f   : > { %3808 = vmatpush.msra.mxu3 %v1499_v28  ;;  %1646 = vmatpush.msra.mxu0 %v1499_v28  ;;  %v3852_v47 = vpop.eup %3851  ;;  %v4267_v49 = vor.u32 1.1754944e-38, %v568_v36  ;;  %v4269_v50 = vor.u32 1.1754944e-38, %v688_v40  ;;  %3861 = vrcp.f32 %v4253_v42  ;;  %v808_v51 = vand.u32 2147483648, %v4253_v42  ;;  %v1540_v28 = vld [vmem:[%s7412_s3 + $0x178] sm:$0xff]  ;;  %v4375_v40 = vld [vmem:[%s7410_s1] ss:$0 sm:$0xff] }
  0x20   : > { %3809 = vmatpush.msra.mxu1 %v1498_v35  ;;  %3810 = vmatpush.msra.mxu2 %v1498_v35  ;;  %v3854_v52 = vpop.eup %3853  ;;  %vm4273_vm3 = vcmp.eq.f32.partialorder %v566_v39, 8.507059e+37  ;;  %v806_v54 = vand.u32 2147483647, %v4253_v42  ;;  %3863 = vrcp.f32 %v4255_v43  ;;  %v583_v55 = vand.u32 2147483648, %v4255_v43 }
  0x21   : > { %3811 = vmatpush.msra.mxu3 %v1498_v35  ;;  %1647 = vmatpush.msra.mxu0 %v1498_v35  ;;  %vm4285_vm4 = vcmp.eq.f32.partialorder %v686_v41, 8.507059e+37  ;;  %vm802_vm5 = vweird.f32 %v4253_v42  ;;  %vm577_vm6 = vweird.f32 %v4255_v43  ;;  %v581_v59 = vand.u32 2147483647, %v4255_v43 }
  0x22   : > { %3812 = vmatpush.msra.mxu1 %v1497_v38  ;;  %3813 = vmatpush.msra.mxu2 %v1497_v38  ;;  %v4280_v56 = vpop.eup %3855  ;;  %3865 = vrcp.f32 %v4262_v46  ;;  %v4298_v62 = vor.u32 1.1754944e-38, %v808_v51  ;;  %vm697_vm8 = vweird.f32 %v4262_v46  ;;  %v4306_v1 = vor.u32 1.1754944e-38, %v583_v55 }
  0x23   : > { %3814 = vmatpush.msra.mxu3 %v1497_v38  ;;  %1648 = vmatpush.msra.mxu0 %v1497_v38  ;;  %v4293_v60 = vpop.eup %3857  ;;  %v558_v61 = vmul.f32 %v4280_v56, %v4233_v29  ;;  %vm563_vm7 = vweird.f32 %v4280_v56  ;;  %v701_v2 = vand.u32 2147483647, %v4262_v46  ;;  %v703_v3 = vand.u32 2147483648, %v4262_v46  ;;  %v1524_v38 = vld [vmem:[%s7412_s3 + $0xf8] sm:$0xff] }
  0x24   : > { %3815 = vmatpush.msra.mxu1 %v1496_v48  ;;  %3816 = vmatpush.msra.mxu2 %v1496_v48  ;;  %v678_v0 = vmul.f32 %v4293_v60, %v4235_v31  ;;  %v4310_v4 = vpop.eup %3859  ;;  %vm683_vm9 = vweird.f32 %v4293_v60  ;;  %vm4313_vm10 = vcmp.eq.f32.partialorder %v806_v54, 8.507059e+37  ;;  %v4319_v13 = vadd.f32 1.0, %v3850_v45  ;;  %vm4356_vm14 = vmor %vm562_vm0, %vm563_vm7  ;;  %v1555_v31 = vld [vmem:[%s7412_s3 + $0x1f0] sm:$0xff] }
  0x25   : > { %3817 = vmatpush.msra.mxu3 %v1496_v48  ;;  %1649 = vmatpush.msra.mxu0 %v1496_v48  ;;  %v559_v5 = vsub.f32 1.0, %v558_v61  ;;  %v4321_v16 = vpop.eup %3861  ;;  %vm4326_vm11 = vcmp.eq.f32.partialorder %v581_v59, 8.507059e+37  ;;  %v4330_v22 = vor.u32 1.1754944e-38, %v703_v3  ;;  %v4332_v23 = vadd.f32 1.0, %v3852_v47  ;;  %vm4381_vm7 = vmor %vm682_vm1, %vm683_vm9  ;;  %v1539_v47 = vld [vmem:[%s7412_s3 + $0x170] sm:$0xff] }
  0x26   : > { %3818 = vmatpush.msra.mxu1 %v1495_v57  ;;  %3819 = vmatpush.msra.mxu2 %v1495_v57  ;;  %v679_v20 = vsub.f32 1.0, %v678_v0  ;;  %v4334_v24 = vadd.f32 1.0, %v3854_v52  ;;  %v4336_v26 = vpop.eup %3863  ;;  %v798_v30 = vmul.f32 %v4321_v16, %v4253_v42  ;;  %vm803_vm12 = vweird.f32 %v4321_v16  ;;  %vm4401_vm1 = vmneg %vm1084_vm2  ;;  %v1523_v0 = vld [vmem:[%s7412_s3 + $0xf0] sm:$0xff]  ;;  %v4419_v3 = vld [vmem:[%s7411_s2] ss:$0 sm:$0xff] }
  0x27   : > { %3820 = vmatpush.msra.mxu3 %v1495_v57  ;;  %1650 = vmatpush.msra.mxu0 %v1495_v57  ;;  %v560_v27 = vmul.f32 %v4280_v56, %v559_v5  ;;  %vm4345_vm13 = vcmp.eq.f32.partialorder %v701_v2, 8.507059e+37  ;;  %3867 = vrcp.f32 %v4319_v13  ;;  %v573_v39 = vmul.f32 %v4336_v26, %v4255_v43  ;;  %v1538_v2 = vld [vmem:[%s7412_s3 + $0x168] sm:$0xff]  ;;  %vm4428_vm9 = vmor %vm802_vm5, %vm803_vm12 }
  0x28   : > { %3821 = vmatpush.msra.mxu1 %v1494_v63  ;;  %3822 = vmatpush.msra.mxu2 %v1494_v63  ;;  %v4350_v34 = vpop.eup %3865  ;;  %v680_v36 = vmul.f32 %v4293_v60, %v679_v20  ;;  %vm578_vm15 = vweird.f32 %v4336_v26  ;;  %v799_v45 = vsub.f32 1.0, %v798_v30  ;;  %v821_v54 = vand.u32 2147483647, %v4319_v13 }
  0x29   : > { %3823 = vmatpush.msra.mxu3 %v1494_v63  ;;  %1651 = vmatpush.msra.mxu0 %v1494_v63  ;;  %v561_v29 = vadd.f32 %v4280_v56, %v560_v27  ;;  %v693_v48 = vmul.f32 %v4350_v34, %v4262_v46  ;;  %vm698_vm0 = vweird.f32 %v4350_v34  ;;  %v574_v52 = vsub.f32 1.0, %v573_v39  ;;  %vm4451_vm5 = vmor %vm577_vm6, %vm578_vm15 }
  0x2a   : > { %3824 = vmatpush.msra.mxu1 %v1493_v17  ;;  %3825 = vmatpush.msra.mxu2 %v1493_v17  ;;  %v681_v51 = vadd.f32 %v4293_v60, %v680_v36  ;;  %v823_v55 = vand.u32 2147483648, %v4319_v13  ;;  %v800_v61 = vmul.f32 %v4321_v16, %v799_v45  ;;  %3869 = vrcp.f32 %v4332_v23 }
  0x2b   : > { %3826 = vmatpush.msra.mxu3 %v1493_v17  ;;  %v565_v57 = vsel %vm4356_vm14, %v4280_v56, %v561_v29  ;;  %v694_v63 = vsub.f32 1.0, %v693_v48  ;;  %1652 = vmatpush.msra.mxu0 %v1493_v17  ;;  %v1553_v29 = vld [vmem:[%s7412_s3 + $0x1e0] sm:$0xff]  ;;  %v1571_v48 = vld [vmem:[%s7412_s3 + $0x270] sm:$0xff]  ;;  %v596_v11 = vand.u32 2147483647, %v4332_v23  ;;  %3871 = vrcp.f32 %v4334_v24 }
  0x2c   : > { %1863 = vmatpush.msrb.mxu2 %v1540_v28  ;;  %1750 = vmatpush.msrb.mxu1 %v1524_v38  ;;  %v570_v56 = vsel %vm4273_vm3, %v4267_v49, %v565_v57  ;;  %v685_v5 = vsel %vm4381_vm7, %v4293_v60, %v681_v51  ;;  %v575_v49 = vmul.f32 %v4336_v26, %v574_v52  ;;  %vm4433_vm3 = vcmp.eq.f32.partialorder %v821_v54, 8.507059e+37  ;;  %v1554_v60 = vld [vmem:[%s7412_s3 + $0x1e8] sm:$0xff] }
  0x2d   : > { %1976 = vmatpush.msrb.mxu3 %v1556_v37  ;;  %v4440_v20 = vpop.eup %3867  ;;  %v953_v42 = vmul.f32 %v570_v56, %v4187_v6  ;;  %v690_v27 = vsel %vm4285_vm4, %v4269_v50, %v685_v5  ;;  %v801_v28 = vadd.f32 %v4321_v16, %v800_v61  ;;  %v695_v30 = vmul.f32 %v4350_v34, %v694_v63  ;;  %v1572_v6 = vld [vmem:[%s7412_s3 + $0x278] sm:$0xff]  ;;  %v1522_v50 = vld [vmem:[%s7412_s3 + $0xe8] sm:$0xff]  ;;  %vm4468_vm4 = vmor %vm697_vm8, %vm698_vm0 }
  0x2e   : > { %1864 = vmatpush.msrb.mxu2 %v1539_v47  ;;  %v961_v58 = vmul.f32 %v690_v27, %v4191_v8  ;;  %v576_v35 = vadd.f32 %v4336_v26, %v575_v49  ;;  %1751 = vmatpush.msrb.mxu1 %v1523_v0  ;;  %v813_v36 = vmul.f32 %v4440_v20, %v4319_v13  ;;  %vm818_vm6 = vweird.f32 %v4440_v20  ;;  %v1537_v8 = vld [vmem:[%s7412_s3 + $0x160] sm:$0xff]  ;;  %v4564_v27 = vld [vmem:[%s4181_s16 + $0x88] sm:$0xff] }
  0x2f   : > { %1977 = vmatpush.msrb.mxu3 %v1555_v31  ;;  %v989_v37 = vmul.f32 %v4375_v40, %v953_v42  ;;  %v805_v46 = vsel %vm4428_vm9, %v4321_v16, %v801_v28  ;;  %v696_v38 = vadd.f32 %v4350_v34, %v695_v30  ;;  %3648 = vmatmul.msk.f32.vlgmr.msra.gmra.mxu0 %vm4401_vm1, %v4317_v12  ;;  %v824_v39 = vor.u32 1.1754944e-38, %v823_v55  ;;  %v1570_v42 = vld [vmem:[%s7412_s3 + $0x268] sm:$0xff] }
  0x30   : > { %1865 = vmatpush.msrb.mxu2 %v1538_v2  ;;  %v997_v41 = vmul.f32 %v4375_v40, %v961_v58  ;;  %v810_v45 = vsel %vm4313_vm10, %v4298_v62, %v805_v46  ;;  %v580_v16 = vsel %vm4451_vm5, %v4336_v26, %v576_v35  ;;  %v814_v47 = vsub.f32 1.0, %v813_v36  ;;  %2089 = vmatpush.msrb.mxu0 %v1572_v6  ;;  %v4499_v51 = vpop.eup %3869  ;;  %v1520_v6 = vld [vmem:[%s7412_s3 + $0xd8] sm:$0xff]  ;;  %v1551_v58 = vld [vmem:[%s7412_s3 + $0x1d0] sm:$0xff] }
  0x31   : > { %1978 = vmatpush.msrb.mxu3 %v1554_v60  ;;  %1752 = vmatpush.msrb.mxu1 %v1522_v50  ;;  %v1025_v31 = vadd.f32 %v4419_v3, %v989_v37  ;;  %v969_v52 = vmul.f32 %v810_v45, %v4194_v9  ;;  %v585_v62 = vsel %vm4326_vm11, %v4306_v1, %v580_v16  ;;  %v1521_v9 = vld [vmem:[%s7412_s3 + $0xe0] sm:$0xff]  ;;  %v1536_v1 = vld [vmem:[%s7412_s3 + $0x158] sm:$0xff]  ;;  %vm7542_vm8 = vweird.f32 %v4319_v13  ;;  %v1535_v50 = vld [vmem:[%s7412_s3 + $0x150] sm:$0xff] }
  0x32   : > { %v700_v7 = vsel %vm4468_vm4, %v4350_v34, %v696_v38  ;;  %1866 = vmatpush.msrb.mxu2 %v1537_v8  ;;  %v1033_v26 = vadd.f32 %v4419_v3, %v997_v41  ;;  %v954_v54 = vmul.f32 %v585_v62, %v4197_v10  ;;  %v815_v57 = vmul.f32 %v4440_v20, %v814_v47  ;;  %vm4529_vm10 = vmor %vm7542_vm8, %vm818_vm6  ;;  %v1552_v60 = vld [vmem:[%s7412_s3 + $0x1d8] sm:$0xff]  ;;  %v1569_v8 = vld [vmem:[%s7412_s3 + $0x260] sm:$0xff] }
  0x33   : > { %v705_v55 = vsel %vm4345_vm13, %v4330_v22, %v700_v7  ;;  %1979 = vmatpush.msrb.mxu3 %v1553_v29  ;;  %v4521_v21 = vrot.slane %v1025_v31, 7  ;;  %v1005_v34 = vmul.f32 %v4375_v40, %v969_v52  ;;  %2090 = vmatpush.msrb.mxu0 %v1571_v48  ;;  %v588_v32 = vmul.f32 %v4499_v51, %v4332_v23  ;;  %v4626_v16 = vld [vmem:[%s4181_s16] sm:$0xff]  ;;  %v4633_v52 = vld [vmem:[%s4181_s16 + $0xc8] sm:$0xff]  ;;  %v4644_v7 = vld [vmem:[%s4181_s16 + $0x50] sm:$0xff] }
  0x34   : > { %v962_v10 = vmul.f32 %v705_v55, %v4203_v14  ;;  %1753 = vmatpush.msrb.mxu1 %v1521_v9  ;;  %v4535_v61 = vrot.slane %v1033_v26, 7  ;;  %v990_v63 = vmul.f32 %v4375_v40, %v954_v54  ;;  %v816_v14 = vadd.f32 %v4440_v20, %v815_v57  ;;  %1867 = vmatpush.msrb.mxu2 %v1536_v1  ;;  %v4646_v26 = vpop.eup %3871  ;;  %v4656_v9 = vld [vmem:[%s4181_s16 + $0x90] sm:$0xff]  ;;  %v4668_v22 = vld [vmem:[%s4181_s16 + $0x8] sm:$0xff] }
  0x35   : > { %7541 = vst [vmem:[#allocation3_spill] sm:$0xff] %v4521_v21  ;;  %vm592_vm11 = vweird.f32 %v4332_v23  ;;  %3656 = vmatmul.msk.f32.vlgmr.msra.gmra.mxu1 %vm4401_vm1, %v4521_v21  ;;  %v1041_v13 = vadd.f32 %v4419_v3, %v1005_v34  ;;  %v589_v2 = vsub.f32 1.0, %v588_v32  ;;  %vm593_vm12 = vweird.f32 %v4499_v51  ;;  %1980 = vmatpush.msrb.mxu3 %v1552_v60  ;;  %v4671_v32 = vld [vmem:[%s4181_s16 + $0xd0] sm:$0xff] }
  0x36   : > { %7545 = vst [vmem:[#allocation4_spill] sm:$0xff] %v4535_v61  ;;  %v998_v0 = vmul.f32 %v4375_v40, %v962_v10  ;;  %3664 = vmatmul.msk.f32.vlgmr.msra.gmra.mxu2 %vm4401_vm1, %v4535_v61  ;;  %v4550_v56 = vadd.f32 %v4419_v3, %v990_v63  ;;  %v820_v5 = vsel %vm4529_vm10, %v4440_v20, %v816_v14  ;;  %v598_v49 = vand.u32 2147483648, %v4332_v23  ;;  %vm4590_vm13 = vmor %vm592_vm11, %vm593_vm12  ;;  %v1567_v54 = vld [vmem:[%s7412_s3 + $0x250] sm:$0xff] }
  0x37   : > { %v4566_v28 = vrot.slane %v1041_v13, 7  ;;  %v825_v20 = vsel %vm4433_vm3, %v824_v39, %v820_v5  ;;  %v590_v30 = vmul.f32 %v4499_v51, %v589_v2  ;;  %1656 = vmatmul.f32.gmra.mxu0 %v4317_v12  ;;  %1754 = vmatpush.msrb.mxu1 %v1520_v6  ;;  %vm597_vm14 = vcmp.eq.f32.partialorder %v596_v11, 8.507059e+37  ;;  %v1519_v13 = vld [vmem:[%s7412_s3 + $0xd0] sm:$0xff] }
  0x38   : > { %v4569_v17 = vadd.f32 %v4419_v3, %v998_v0  ;;  %v7422_v53 = vrot.slane %v4550_v56, 7  ;;  %v970_v35 = vmul.f32 %v825_v20, %v4206_v15  ;;  %v599_v36 = vor.u32 1.1754944e-38, %v598_v49  ;;  %2091 = vmatpush.msrb.mxu0 %v1570_v42  ;;  %1868 = vmatpush.msrb.mxu2 %v1535_v50  ;;  %v1534_v0 = vld [vmem:[%s7412_s3 + $0x148] sm:$0xff]  ;;  %v4691_v42 = vld [vmem:[%s4181_s16 + $0x58] sm:$0xff] }
  0x39   : > { %7546 = vst [vmem:[#allocation5_spill] sm:$0xff] %v4566_v28  ;;  %3672 = vmatmul.msk.f32.vlgmr.msra.gmra.mxu3 %vm4401_vm1, %v4566_v28  ;;  %v591_v23 = vadd.f32 %v4499_v51, %v590_v30  ;;  %v716_v38 = vand.u32 2147483647, %v4334_v24  ;;  %v3632_v39 = vmul.f32 -1.442695, %v4564_v27  ;;  %v4622_v45 = vadd.f32 1.0, %v4310_v4  ;;  %1755 = vmatpush.msrb.mxu1 %v1519_v13 }
  0x3a   : > { %v7420_v15 = vrot.slane %v4569_v17, 7  ;;  %v4607_v37 = vsel %vm1084_vm2, %v4521_v21, %v7422_v53  ;;  %v1006_v46 = vmul.f32 %v4375_v40, %v970_v35  ;;  %1981 = vmatpush.msrb.mxu3 %v1551_v58  ;;  %2092 = vmatpush.msrb.mxu0 %v1569_v8  ;;  %3873 = vpow2.f32 %v4258_v44  ;;  %v4709_v8 = vld [vmem:[%s4181_s16 + $0x98] sm:$0xff] }
  0x3b   : > { %7549 = vst [vmem:[#allocation6_spill] sm:$0xff] %v4607_v37  ;;  %v595_v41 = vsel %vm4590_vm13, %v4499_v51, %v591_v23  ;;  %v718_v31 = vand.u32 2147483648, %v4334_v24  ;;  %vm712_vm15 = vweird.f32 %v4334_v24  ;;  %3875 = vrcp.f32 %v4622_v45  ;;  %1869 = vmatpush.msrb.mxu2 %v1534_v0  ;;  %v1568_v13 = vld [vmem:[%s7412_s3 + $0x258] sm:$0xff]  ;;  %v1518_v0 = vld [vmem:[%s7412_s3 + $0xc8] sm:$0xff] }
  0x3c   : > { %v4616_v29 = vsel %vm1084_vm2, %v4535_v61, %v7420_v15  ;;  %v4629_v47 = vadd.f32 %v4419_v3, %v1006_v46  ;;  %v600_v48 = vsel %vm597_vm14, %v599_v36, %v595_v41  ;;  %v836_v4 = vand.u32 2147483647, %v4622_v45  ;;  %v4729_v41 = vld [vmem:[%s4181_s16 + $0x10] sm:$0xff]  ;;  %2093 = vmatpush.msrb.mxu0 %v1568_v13  ;;  %1756 = vmatpush.msrb.mxu1 %v1518_v0 }
  0x3d   : > { %7550 = vst [vmem:[#allocation7_spill] sm:$0xff] %v4616_v29  ;;  %1680 = vmatmul.f32.gmra.mxu1 %v4607_v37  ;;  %v955_v51 = vmul.f32 %v600_v48, %v4213_v18  ;;  %3877 = vpow2.f32 %v3632_v39  ;;  %v3615_v62 = vmul.f32 -1.442695, %v4626_v16  ;;  %vm4649_vm0 = vcmp.eq.f32.partialorder %v716_v38, 8.507059e+37 }
  0x3e   : > { %1704 = vmatmul.f32.gmra.mxu2 %v4616_v29  ;;  %v7418_v44 = vrot.slane %v4629_v47, 7  ;;  %v838_v55 = vand.u32 2147483648, %v4622_v45  ;;  %v3640_v57 = vmul.f32 -1.442695, %v4633_v52  ;;  %v708_v34 = vmul.f32 %v4646_v26, %v4334_v24  ;;  %2094 = vmatpush.msrb.mxu0 %v1567_v54 }
  0x3f   : > { %v991_v18 = vmul.f32 %v4375_v40, %v955_v51  ;;  %v719_v10 = vor.u32 1.1754944e-38, %v718_v31  ;;  %vm832_vm7 = vweird.f32 %v4622_v45  ;;  %vm713_vm9 = vweird.f32 %v4646_v26 }
  0x40   : > { %v4662_v1 = vsel %vm1084_vm2, %v4566_v28, %v7418_v44  ;;  %v3874_v63 = vpop.eup %3873  ;;  %3879 = vpow2.f32 %v3615_v62  ;;  %v3625_v2 = vmul.f32 -1.442695, %v4644_v7  ;;  %v709_v5 = vsub.f32 1.0, %v708_v34  ;;  %vm4718_vm4 = vmor %vm712_vm15, %vm713_vm9  ;;  %v1546_v44 = vld [vmem:[%s7412_s3 + $0x1a8] sm:$0xff] }
  0x41   : > { %7553 = vst [vmem:[#allocation8_spill] sm:$0xff] %v4662_v1  ;;  %1728 = vmatmul.f32.gmra.mxu3 %v4662_v1  ;;  %v1027_v14 = vadd.f32 %v4419_v3, %v991_v18  ;;  %vm4683_vm3 = vcmp.eq.f32.partialorder %v836_v4, 8.507059e+37  ;;  %v4687_v49 = vadd.f32 1.0, %v3874_v63  ;;  %3881 = vpow2.f32 %v3640_v57  ;;  %v4693_v20 = vpop.eup %3875 }
  0x42   : > { %v3633_v60 = vmul.f32 -1.442695, %v4656_v9  ;;  %v4697_v6 = vor.u32 1.1754944e-38, %v838_v55  ;;  %v3616_v50 = vmul.f32 -1.442695, %v4668_v22  ;;  %v710_v43 = vmul.f32 %v4646_v26, %v709_v5 }
  0x43   : > { %v4695_v30 = vrot.slane %v1027_v14, 7  ;;  %v4701_v58 = vmul.f32 -1.442695, %v4671_v32  ;;  %v3878_v35 = vpop.eup %3877  ;;  %v828_v36 = vmul.f32 %v4693_v20, %v4622_v45  ;;  %vm833_vm5 = vweird.f32 %v4693_v20  ;;  %v1550_v14 = vld [vmem:[%s7412_s3 + $0x1c8] sm:$0xff] }
  0x44   : > { %3883 = vrcp.f32 %v4687_v49  ;;  %v611_v46 = vand.u32 2147483647, %v4687_v49  ;;  %v4723_v38 = vadd.f32 1.0, %v3878_v35  ;;  %v4726_v39 = vmul.f32 -1.442695, %v4691_v42  ;;  %vm4737_vm6 = vmor %vm832_vm7, %vm833_vm5  ;;  %1982 = vmatpush.msrb.mxu3 %v1550_v14  ;;  %v1533_v35 = vld [vmem:[%s7412_s3 + $0x140] sm:$0xff] }
  0x45   : > { %7556 = vst [vmem:[#allocation9_spill] sm:$0xff] %v4695_v30  ;;  %3658 = vmatmul.msk.f32.gmra.mxu1 %vm4401_vm1, %v4695_v30  ;;  %3885 = vpow2.f32 %v3625_v2  ;;  %v711_v48 = vadd.f32 %v4646_v26, %v710_v43  ;;  %v829_v31 = vsub.f32 1.0, %v828_v36  ;;  %v613_v51 = vand.u32 2147483648, %v4687_v49  ;;  %v1549_v43 = vld [vmem:[%s7412_s3 + $0x1c0] sm:$0xff]  ;;  %1870 = vmatpush.msrb.mxu2 %v1533_v35 }
  0x46   : > { %3887 = vpow2.f32 %v3633_v60  ;;  %v3880_v24 = vpop.eup %3879  ;;  %vm607_vm8 = vweird.f32 %v4687_v49  ;;  %v4744_v62 = vmul.f32 -1.442695, %v4709_v8  ;;  %v4747_v18 = vmul.f32 -1.442695, %v4729_v41  ;;  %1983 = vmatpush.msrb.mxu3 %v1549_v43 }
  0x47   : > { %3889 = vrcp.f32 %v4723_v38  ;;  %v3882_v55 = vpop.eup %3881  ;;  %v715_v57 = vsel %vm4718_vm4, %v4646_v26, %v711_v48  ;;  %v830_v45 = vmul.f32 %v4693_v20, %v829_v31  ;;  %v731_v34 = vand.u32 2147483647, %v4723_v38 }
  0x48   : > { %v733_v63 = vand.u32 2147483648, %v4723_v38  ;;  %v720_v26 = vsel %vm4649_vm0, %v719_v10, %v715_v57  ;;  %vm4766_vm10 = vcmp.eq.f32.partialorder %v611_v46, 8.507059e+37  ;;  %v4770_v5 = vadd.f32 1.0, %v3880_v24 }
  0x49   : > { %v4772_v60 = vadd.f32 1.0, %v3882_v55  ;;  %v963_v36 = vmul.f32 %v720_v26, %v4216_v19  ;;  %v831_v23 = vadd.f32 %v4693_v20, %v830_v45  ;;  %v614_v46 = vor.u32 1.1754944e-38, %v613_v51  ;;  %v1532_v26 = vld [vmem:[%s7412_s3 + $0x138] sm:$0xff] }
  0x4a   : > { %v3884_v10 = vpop.eup %3883  ;;  %3891 = vpow2.f32 %v3616_v50  ;;  %vm727_vm11 = vweird.f32 %v4723_v38  ;;  %v4787_v24 = vor.u32 1.1754944e-38, %v733_v63  ;;  %vm4794_vm13 = vcmp.eq.f32.partialorder %v731_v34, 8.507059e+37  ;;  %1871 = vmatpush.msrb.mxu2 %v1532_v26 }
  0x4b   : > { %v3886_v48 = vpop.eup %3885  ;;  %v603_v31 = vmul.f32 %v3884_v10, %v4687_v49  ;;  %3893 = vrcp.f32 %v4770_v5  ;;  %v999_v19 = vmul.f32 %v4375_v40, %v963_v36  ;;  %v835_v51 = vsel %vm4737_vm6, %v4693_v20, %v831_v23 }
  0x4c   : > { %v3888_v55 = vpop.eup %3887  ;;  %vm608_vm12 = vweird.f32 %v3884_v10  ;;  %v476_v57 = vand.u32 2147483647, %v4770_v5  ;;  %v840_v63 = vsel %vm4683_vm3, %v4697_v6, %v835_v51  ;;  %v478_v13 = vand.u32 2147483648, %v4770_v5  ;;  %v1517_v6 = vld [vmem:[%s7412_s3 + $0xc0] sm:$0xff] }
  0x4d   : > { %v3890_v45 = vpop.eup %3889  ;;  %v604_v14 = vsub.f32 1.0, %v603_v31  ;;  %3895 = vrcp.f32 %v4772_v60  ;;  %v1035_v4 = vadd.f32 %v4419_v3, %v999_v19  ;;  %v971_v20 = vmul.f32 %v840_v63, %v4228_v25  ;;  %vm4824_vm7 = vmor %vm607_vm8, %vm608_vm12  ;;  %1757 = vmatpush.msrb.mxu1 %v1517_v6 }
  0x4e   : > { %v723_v34 = vmul.f32 %v3890_v45, %v4723_v38  ;;  %vm472_vm14 = vweird.f32 %v4770_v5  ;;  %vm728_vm15 = vweird.f32 %v3890_v45  ;;  %vm847_vm0 = vweird.f32 %v4772_v60 }
  0x4f   : > { %v605_v0 = vmul.f32 %v3884_v10, %v604_v14  ;;  %v851_v11 = vand.u32 2147483647, %v4772_v60  ;;  %v4818_v25 = vrot.slane %v1035_v4, 7  ;;  %v1007_v43 = vmul.f32 %v4375_v40, %v971_v20  ;;  %vm4847_vm3 = vmor %vm727_vm11, %vm728_vm15 }
  0x50   : > { %v4816_v35 = vpop.eup %3891  ;;  %v724_v36 = vsub.f32 1.0, %v723_v34  ;;  %vm4828_vm9 = vcmp.eq.f32.partialorder %v476_v57, 8.507059e+37  ;;  %v479_v51 = vor.u32 1.1754944e-38, %v478_v13  ;;  %v853_v63 = vand.u32 2147483648, %v4772_v60 }
  0x51   : > { %7565 = vst [vmem:[#allocation10_spill] sm:$0xff] %v4818_v25  ;;  %v3894_v31 = vpop.eup %3893  ;;  %v606_v19 = vadd.f32 %v3884_v10, %v605_v0  ;;  %v4833_v14 = vadd.f32 1.0, %v3886_v48  ;;  %3666 = vmatmul.msk.f32.gmra.mxu2 %vm4401_vm1, %v4818_v25  ;;  %v1043_v49 = vadd.f32 %v4419_v3, %v1007_v43  ;;  %v4840_v20 = vadd.f32 1.0, %v3888_v55 }
  0x52   : > { %v725_v4 = vmul.f32 %v3890_v45, %v724_v36  ;;  %v468_v57 = vmul.f32 %v3894_v31, %v4770_v5  ;;  %vm473_vm5 = vweird.f32 %v3894_v31  ;;  %vm4851_vm4 = vcmp.eq.f32.partialorder %v851_v11, 8.507059e+37 }
  0x53   : > { %v3896_v34 = vpop.eup %3895  ;;  %v610_v0 = vsel %vm4824_vm7, %v3884_v10, %v606_v19  ;;  %3897 = vrcp.f32 %v4833_v14  ;;  %v4856_v55 = vrot.slane %v1043_v49, 7  ;;  %v854_v54 = vor.u32 1.1754944e-38, %v853_v63  ;;  %vm4877_vm6 = vmor %vm472_vm14, %vm473_vm5 }
  0x54   : > { %v615_v6 = vsel %vm4766_vm10, %v614_v46, %v610_v0  ;;  %v726_v10 = vadd.f32 %v3890_v45, %v725_v4  ;;  %v469_v26 = vsub.f32 1.0, %v468_v57  ;;  %v843_v43 = vmul.f32 %v3896_v34, %v4772_v60 }
  0x55   : > { %7574 = vst [vmem:[#allocation11_spill] sm:$0xff] %v4856_v55  ;;  %v956_v38 = vmul.f32 %v615_v6, %v4239_v33  ;;  %v626_v36 = vand.u32 2147483647, %v4833_v14  ;;  %3674 = vmatmul.msk.f32.gmra.mxu3 %vm4401_vm1, %v4856_v55  ;;  %v628_v2 = vand.u32 2147483648, %v4833_v14  ;;  %3899 = vrcp.f32 %v4840_v20 }
  0x56   : > { %v730_v11 = vsel %vm4847_vm3, %v3890_v45, %v726_v10  ;;  %v470_v19 = vmul.f32 %v3894_v31, %v469_v26  ;;  %v844_v49 = vsub.f32 1.0, %v843_v43  ;;  %vm848_vm8 = vweird.f32 %v3896_v34 }
  0x57   : > { %v992_v46 = vmul.f32 %v4375_v40, %v956_v38  ;;  %v735_v33 = vsel %vm4794_vm13, %v4787_v24, %v730_v11  ;;  %vm622_vm10 = vweird.f32 %v4833_v14  ;;  %vm4883_vm11 = vcmp.eq.f32.partialorder %v626_v36, 8.507059e+37  ;;  %vm4896_vm13 = vmor %vm847_vm0, %vm848_vm8 }
  0x58   : > { %v964_v45 = vmul.f32 %v735_v33, %v4564_v27  ;;  %v471_v4 = vadd.f32 %v3894_v31, %v470_v19  ;;  %v845_v5 = vmul.f32 %v3896_v34, %v844_v49  ;;  %v629_v0 = vor.u32 1.1754944e-38, %v628_v2 }
  0x59   : > { %v3898_v50 = vpop.eup %3897  ;;  %v4888_v24 = vadd.f32 %v4419_v3, %v992_v46  ;;  %vm742_vm12 = vweird.f32 %v4840_v20  ;;  %v746_v26 = vand.u32 2147483647, %v4840_v20  ;;  %v748_v11 = vand.u32 2147483648, %v4840_v20 }
  0x5a   : > { %v1000_v48 = vmul.f32 %v4375_v40, %v964_v45  ;;  %v475_v27 = vsel %vm4877_vm6, %v3894_v31, %v471_v4  ;;  %v618_v10 = vmul.f32 %v3898_v50, %v4833_v14  ;;  %v846_v36 = vadd.f32 %v3896_v34, %v845_v5  ;;  %v4944_v14 = vld [vmem:[%s4181_s16 + $0xd8] sm:$0xff] }
  0x5b   : > { %v7421_v38 = vrot.slane %v4888_v24, 7  ;;  %v480_v43 = vsel %vm4828_vm9, %v479_v51, %v475_v27  ;;  %v3900_v19 = vpop.eup %3899  ;;  %vm623_vm14 = vweird.f32 %v3898_v50  ;;  %v4932_v5 = vadd.f32 1.0, %v4816_v35  ;;  %v1566_v27 = vld [vmem:[%s7412_s3 + $0x248] sm:$0xff] }
  0x5c   : > { %v4907_v31 = vadd.f32 %v4419_v3, %v1000_v48  ;;  %v947_v60 = vmul.f32 %v480_v43, %v4626_v16  ;;  %v619_v2 = vsub.f32 1.0, %v618_v10  ;;  %v850_v23 = vsel %vm4896_vm13, %v3896_v34, %v846_v36  ;;  %vm4927_vm0 = vmor %vm622_vm10, %vm623_vm14  ;;  %2095 = vmatpush.msrb.mxu0 %v1566_v27  ;;  %v1530_v27 = vld [vmem:[%s7412_s3 + $0x128] sm:$0xff] }
  0x5d   : > { %v4914_v46 = vsel %vm1084_vm2, %v4695_v30, %v7421_v38  ;;  %v738_v51 = vmul.f32 %v3900_v19, %v4840_v20  ;;  %vm743_vm15 = vweird.f32 %v3900_v19  ;;  %v855_v63 = vsel %vm4851_vm4, %v854_v54, %v850_v23 }
  0x5e   : > { %7581 = vst [vmem:[#allocation12_spill] sm:$0xff] %v4914_v46  ;;  %1686 = vmatmul.f32.gmra.mxu1 %v4914_v46  ;;  %v7419_v33 = vrot.slane %v4907_v31, 7  ;;  %v983_v16 = vmul.f32 %v4375_v40, %v947_v60  ;;  %v620_v49 = vmul.f32 %v3898_v50, %v619_v2  ;;  %v972_v45 = vmul.f32 %v855_v63, %v4633_v52  ;;  %vm4965_vm7 = vmor %vm742_vm12, %vm743_vm15  ;;  %v1531_v2 = vld [vmem:[%s7412_s3 + $0x130] sm:$0xff] }
  0x5f   : > { %v739_v4 = vsub.f32 1.0, %v738_v51  ;;  %3901 = vpow2.f32 %v4701_v58  ;;  %v1548_v58 = vld [vmem:[%s7412_s3 + $0x1b8] sm:$0xff]  ;;  %vm4969_vm9 = vcmp.eq.f32.partialorder %v746_v26, 8.507059e+37  ;;  %v749_v60 = vor.u32 1.1754944e-38, %v748_v11  ;;  %1872 = vmatpush.msrb.mxu2 %v1531_v2  ;;  %v1565_v11 = vld [vmem:[%s7412_s3 + $0x240] sm:$0xff] }
  0x60   : > { %v4939_v13 = vsel %vm1084_vm2, %v4818_v25, %v7419_v33  ;;  %v1019_v52 = vadd.f32 %v4419_v3, %v983_v16  ;;  %v621_v54 = vadd.f32 %v3898_v50, %v620_v49  ;;  %3903 = vpow2.f32 %v4726_v39  ;;  %v1516_v39 = vld [vmem:[%s7412_s3 + $0xb8] sm:$0xff]  ;;  %1984 = vmatpush.msrb.mxu3 %v1548_v58  ;;  %2096 = vmatpush.msrb.mxu0 %v1565_v11 }
  0x61   : > { %1710 = vmatmul.f32.gmra.mxu2 %v4939_v13  ;;  %v1008_v35 = vmul.f32 %v4375_v40, %v972_v45  ;;  %v740_v48 = vmul.f32 %v3900_v19, %v739_v4  ;;  %3905 = vrcp.f32 %v4932_v5  ;;  %1758 = vmatpush.msrb.mxu1 %v1516_v39  ;;  %v491_v16 = vand.u32 2147483647, %v4932_v5  ;;  %v5029_v39 = vld [vmem:[%s4181_s16 + $0x60] sm:$0xff] }
  0x62   : > { %v4958_v6 = vrot.slane %v1019_v52, 7  ;;  %v625_v10 = vsel %vm4927_vm0, %v3898_v50, %v621_v54  ;;  %v1547_v50 = vld [vmem:[%s7412_s3 + $0x1b0] sm:$0xff]  ;;  %3907 = vpow2.f32 %v4744_v62  ;;  %v3642_v62 = vmul.f32 -1.442695, %v4944_v14  ;;  %1873 = vmatpush.msrb.mxu2 %v1530_v27 }
  0x63   : > { %v4980_v20 = vadd.f32 %v4419_v3, %v1008_v35  ;;  %v630_v26 = vsel %vm4883_vm11, %v629_v0, %v625_v10  ;;  %v741_v23 = vadd.f32 %v3900_v19, %v740_v48  ;;  %1985 = vmatpush.msrb.mxu3 %v1547_v50  ;;  %3909 = vpow2.f32 %v4747_v18 }
  0x64   : > { %3650 = vmatmul.msk.f32.gmra.mxu0 %vm4401_vm1, %v4958_v6  ;;  %v957_v51 = vmul.f32 %v630_v26, %v4644_v7  ;;  %vm487_vm3 = vweird.f32 %v4932_v5  ;;  %v493_v52 = vand.u32 2147483648, %v4932_v5  ;;  %vm5017_vm5 = vcmp.eq.f32.partialorder %v491_v16, 8.507059e+37 }
  0x65   : > { %7588 = vst [vmem:[#allocation13_spill] sm:$0xff] %v4980_v20  ;;  %v3902_v57 = vpop.eup %3901  ;;  %v7417_v0 = vrot.slane %v4980_v20, 7  ;;  %v745_v63 = vsel %vm4965_vm7, %v3900_v19, %v741_v23  ;;  %1986 = vmatpush.msrb.mxu3 %v1546_v44  ;;  %v1563_v44 = vld [vmem:[%s7412_s3 + $0x230] sm:$0xff] }
  0x66   : > { %v3904_v49 = vpop.eup %3903  ;;  %v993_v45 = vmul.f32 %v4375_v40, %v957_v51  ;;  %v750_v7 = vsel %vm4969_vm9, %v749_v60, %v745_v63  ;;  %v5002_v34 = vadd.f32 1.0, %v3902_v57  ;;  %v5034_v60 = vld [vmem:[%s4181_s16 + $0xa0] sm:$0xff]  ;;  %v494_v51 = vor.u32 1.1754944e-38, %v493_v52  ;;  %v1514_v52 = vld [vmem:[%s7412_s3 + $0xa8] sm:$0xff] }
  0x67   : > { %v3906_v18 = vpop.eup %3905  ;;  %v5008_v19 = vsel %vm1084_vm2, %v4856_v55, %v7417_v0  ;;  %v965_v4 = vmul.f32 %v750_v7, %v4656_v9  ;;  %v5012_v54 = vadd.f32 1.0, %v3904_v49  ;;  %v1515_v9 = vld [vmem:[%s7412_s3 + $0xb0] sm:$0xff]  ;;  %v3627_v57 = vmul.f32 -1.442695, %v5029_v39  ;;  %v5052_v7 = vld [vmem:[%s4181_s16 + $0x18] sm:$0xff] }
  0x68   : > { %7589 = vst [vmem:[#allocation14_spill] sm:$0xff] %v5008_v19  ;;  %1734 = vmatmul.f32.gmra.mxu3 %v5008_v19  ;;  %v1029_v35 = vadd.f32 %v4419_v3, %v993_v45  ;;  %v483_v48 = vmul.f32 %v3906_v18, %v4932_v5  ;;  %3911 = vrcp.f32 %v5002_v34  ;;  %v3908_v10 = vpop.eup %3907  ;;  %vm488_vm4 = vweird.f32 %v3906_v18  ;;  %1759 = vmatpush.msrb.mxu1 %v1515_v9 }
  0x69   : > { %v1001_v43 = vmul.f32 %v4375_v40, %v965_v4  ;;  %v866_v36 = vand.u32 2147483647, %v5002_v34  ;;  %3913 = vpow2.f32 %v3642_v62  ;;  %v3910_v2 = vpop.eup %3909  ;;  %v868_v23 = vand.u32 2147483648, %v5002_v34  ;;  %vm5059_vm6 = vmor %vm487_vm3, %vm488_vm4 }
  0x6a   : > { %v5036_v50 = vrot.slane %v1029_v35, 7  ;;  %v484_v26 = vsub.f32 1.0, %v483_v48  ;;  %3915 = vrcp.f32 %v5012_v54  ;;  %v641_v16 = vand.u32 2147483647, %v5012_v54  ;;  %1760 = vmatpush.msrb.mxu1 %v1514_v52 }
  0x6b   : > { %v1037_v11 = vadd.f32 %v4419_v3, %v1001_v43  ;;  %v5046_v62 = vadd.f32 1.0, %v3908_v10  ;;  %v5048_v49 = vadd.f32 1.0, %v3910_v2  ;;  %v3635_v45 = vmul.f32 -1.442695, %v5034_v60 }
  0x6c   : > { %7592 = vst [vmem:[#allocation15_spill] sm:$0xff] %v5036_v50  ;;  %3660 = vmatmul.msk.f32.gmra.mxu1 %vm4401_vm1, %v5036_v50  ;;  %v485_v63 = vmul.f32 %v3906_v18, %v484_v26  ;;  %vm862_vm8 = vweird.f32 %v5002_v34  ;;  %vm5064_vm10 = vcmp.eq.f32.partialorder %v866_v36, 8.507059e+37  ;;  %vm637_vm11 = vweird.f32 %v5012_v54 }
  0x6d   : > { %v5054_v4 = vrot.slane %v1037_v11, 7  ;;  %v869_v27 = vor.u32 1.1754944e-38, %v868_v23  ;;  %v643_v10 = vand.u32 2147483648, %v5012_v54  ;;  %3917 = vrcp.f32 %v5046_v62 }
  0x6e   : > { %v5069_v48 = vpop.eup %3911  ;;  %v486_v9 = vadd.f32 %v3906_v18, %v485_v63  ;;  %vm5078_vm12 = vcmp.eq.f32.partialorder %v641_v16, 8.507059e+37  ;;  %3919 = vpow2.f32 %v3627_v57  ;;  %v5083_v2 = vmul.f32 -1.442695, %v5052_v7 }
  0x6f   : > { %v3914_v5 = vpop.eup %3913  ;;  %3668 = vmatmul.msk.f32.gmra.mxu2 %vm4401_vm1, %v5054_v4  ;;  %v858_v43 = vmul.f32 %v5069_v48, %v5002_v34  ;;  %v761_v11 = vand.u32 2147483647, %v5046_v62  ;;  %v763_v63 = vand.u32 2147483648, %v5046_v62  ;;  %3921 = vrcp.f32 %v5048_v49 }
  0x70   : > { %v3916_v26 = vpop.eup %3915  ;;  %v490_v23 = vsel %vm5059_vm6, %v3906_v18, %v486_v9  ;;  %vm863_vm13 = vweird.f32 %v5069_v48  ;;  %v1564_v18 = vld [vmem:[%s7412_s3 + $0x238] sm:$0xff]  ;;  %vm757_vm14 = vweird.f32 %v5046_v62  ;;  %vm502_vm15 = vweird.f32 %v5048_v49  ;;  %v1529_v9 = vld [vmem:[%s7412_s3 + $0x120] sm:$0xff] }
  0x71   : > { %v495_v16 = vsel %vm5017_vm5, %v494_v51, %v490_v23  ;;  %v859_v0 = vsub.f32 1.0, %v858_v43  ;;  %v633_v57 = vmul.f32 %v3916_v26, %v5012_v54  ;;  %v644_v51 = vor.u32 1.1754944e-38, %v643_v10  ;;  %2097 = vmatpush.msrb.mxu0 %v1564_v18  ;;  %v1545_v43 = vld [vmem:[%s7412_s3 + $0x1a0] sm:$0xff]  ;;  %1874 = vmatpush.msrb.mxu2 %v1529_v9  ;;  %vm5123_vm7 = vmor %vm862_vm8, %vm863_vm13 }
  0x72   : > { %v948_v58 = vmul.f32 %v495_v16, %v4668_v22  ;;  %vm638_vm0 = vweird.f32 %v3916_v26  ;;  %v5113_v22 = vadd.f32 1.0, %v3914_v5  ;;  %vm5127_vm9 = vcmp.eq.f32.partialorder %v761_v11, 8.507059e+37  ;;  %1987 = vmatpush.msrb.mxu3 %v1545_v43  ;;  %v5262_v11 = vld [vmem:[%s4181_s16 + $0x68] sm:$0xff] }
  0x73   : > { %v860_v23 = vmul.f32 %v5069_v48, %v859_v0  ;;  %v634_v33 = vsub.f32 1.0, %v633_v57  ;;  %v3918_v10 = vpop.eup %3917  ;;  %v764_v5 = vor.u32 1.1754944e-38, %v763_v63  ;;  %v506_v57 = vand.u32 2147483647, %v5048_v49  ;;  %2098 = vmatpush.msrb.mxu0 %v1563_v44  ;;  %vm5140_vm3 = vmor %vm637_vm11, %vm638_vm0 }
  0x74   : > { %v984_v16 = vmul.f32 %v4375_v40, %v948_v58  ;;  %v3920_v52 = vpop.eup %3919  ;;  %v753_v15 = vmul.f32 %v3918_v10, %v5046_v62  ;;  %3923 = vpow2.f32 %v3635_v45  ;;  %vm758_vm5 = vweird.f32 %v3918_v10  ;;  %v1513_v62 = vld [vmem:[%s7412_s3 + $0xa0] sm:$0xff] }
  0x75   : > { %v861_v58 = vadd.f32 %v5069_v48, %v860_v23  ;;  %v635_v9 = vmul.f32 %v3916_v26, %v634_v33  ;;  %v3922_v34 = vpop.eup %3921  ;;  %v508_v63 = vand.u32 2147483648, %v5048_v49  ;;  %3925 = vrcp.f32 %v5113_v22  ;;  %vm5172_vm6 = vmor %vm757_vm14, %vm758_vm5  ;;  %1761 = vmatpush.msrb.mxu1 %v1513_v62 }
  0x76   : > { %v5135_v38 = vadd.f32 %v4419_v3, %v984_v16  ;;  %v754_v43 = vsub.f32 1.0, %v753_v15  ;;  %v498_v23 = vmul.f32 %v3922_v34, %v5048_v49  ;;  %vm503_vm4 = vweird.f32 %v3922_v34 }
  0x77   : > { %v865_v33 = vsel %vm5123_vm7, %v5069_v48, %v861_v58  ;;  %v636_v45 = vadd.f32 %v3916_v26, %v635_v9  ;;  %v5153_v16 = vadd.f32 1.0, %v3920_v52  ;;  %v5159_v48 = vld [vmem:[%s4181_s16 + $0xe0] sm:$0xff]  ;;  %vm5176_vm8 = vcmp.eq.f32.partialorder %v506_v57, 8.507059e+37  ;;  %v1528_v57 = vld [vmem:[%s7412_s3 + $0x118] sm:$0xff] }
  0x78   : > { %v7429_v54 = vrot.slane %v5135_v38, 7  ;;  %v870_v44 = vsel %vm5064_vm10, %v869_v27, %v865_v33  ;;  %v755_v19 = vmul.f32 %v3918_v10, %v754_v43  ;;  %v499_v18 = vsub.f32 1.0, %v498_v23  ;;  %vm5193_vm10 = vmor %vm502_vm15, %vm503_vm4  ;;  %1875 = vmatpush.msrb.mxu2 %v1528_v57 }
  0x79   : > { %v973_v53 = vmul.f32 %v870_v44, %v4671_v32  ;;  %v640_v20 = vsel %vm5140_vm3, %v3916_v26, %v636_v45  ;;  %v883_v26 = vand.u32 2147483648, %v5113_v22  ;;  %vm877_vm11 = vweird.f32 %v5113_v22 }
  0x7a   : > { %v5165_v15 = vsel %vm1084_vm2, %v4958_v6, %v7429_v54  ;;  %v645_v35 = vsel %vm5078_vm12, %v644_v51, %v640_v20  ;;  %v3924_v52 = vpop.eup %3923  ;;  %v756_v36 = vadd.f32 %v3918_v10, %v755_v19  ;;  %v500_v51 = vmul.f32 %v3922_v34, %v499_v18 }
  0x7b   : > { %1662 = vmatmul.f32.gmra.mxu0 %v5165_v15  ;;  %v1009_v58 = vmul.f32 %v4375_v40, %v973_v53  ;;  %v958_v20 = vmul.f32 %v645_v35, %v4691_v42  ;;  %v3926_v9 = vpop.eup %3925  ;;  %v509_v53 = vor.u32 1.1754944e-38, %v508_v63  ;;  %3927 = vrcp.f32 %v5153_v16 }
  0x7c   : > { %v3643_v42 = vmul.f32 -1.442695, %v5159_v48  ;;  %v760_v49 = vsel %vm5172_vm6, %v3918_v10, %v756_v36  ;;  %v501_v45 = vadd.f32 %v3922_v34, %v500_v51  ;;  %v873_v63 = vmul.f32 %v3926_v9, %v5113_v22 }
  0x7d   : > { %v1045_v19 = vadd.f32 %v4419_v3, %v1009_v58  ;;  %v994_v33 = vmul.f32 %v4375_v40, %v958_v20  ;;  %v765_v43 = vsel %vm5127_vm9, %v764_v5, %v760_v49  ;;  %v881_v23 = vand.u32 2147483647, %v5113_v22 }
  0x7e   : > { %v884_v44 = vor.u32 1.1754944e-38, %v883_v26  ;;  %v966_v58 = vmul.f32 %v765_v43, %v4709_v8  ;;  %v505_v40 = vsel %vm5193_vm10, %v3922_v34, %v501_v45  ;;  %v874_v0 = vsub.f32 1.0, %v873_v63  ;;  %v5274_v45 = vld [vmem:[%s4181_s16 + $0xa8] sm:$0xff] }
  0x7f   : > { %v5208_v18 = vrot.slane %v1045_v19, 7  ;;  %v5211_v35 = vadd.f32 %v4419_v3, %v994_v33  ;;  %v510_v10 = vsel %vm5176_vm8, %v509_v53, %v505_v40  ;;  %vm878_vm12 = vweird.f32 %v3926_v9  ;;  %v5227_v3 = vld [vmem:[%s7410_s1] ss:$0 sm:$0xff] }
  0x80   : > { %v5218_v5 = vadd.f32 1.0, %v3924_v52  ;;  %v1002_v8 = vmul.f32 %v5227_v3, %v966_v58  ;;  %v949_v34 = vmul.f32 %v510_v10, %v4729_v41  ;;  %3929 = vpow2.f32 %v5083_v2  ;;  %v5246_v41 = vld [vmem:[%s7411_s2] ss:$0 sm:$0xff]  ;;  %vm5255_vm13 = vmor %vm877_vm11, %vm878_vm12 }
  0x81   : > { %7611 = vst [vmem:[#allocation16_spill] sm:$0xff] %v5208_v18  ;;  %3676 = vmatmul.msk.f32.gmra.mxu3 %vm4401_vm1, %v5208_v18  ;;  %v7427_v32 = vrot.slane %v5211_v35, 7  ;;  %v5232_v27 = vpop.eup %3927  ;;  %v875_v26 = vmul.f32 %v3926_v9, %v874_v0  ;;  %v656_v52 = vand.u32 2147483647, %v5153_v16  ;;  %v658_v20 = vand.u32 2147483648, %v5153_v16  ;;  %v5284_v40 = vld [vmem:[%s4181_s16 + $0x20] sm:$0xff] }
  0x82   : > { %3931 = vrcp.f32 %v5218_v5  ;;  %v5249_v2 = vadd.f32 %v5246_v41, %v1002_v8  ;;  %v985_v51 = vmul.f32 %v5227_v3, %v949_v34  ;;  %v648_v57 = vmul.f32 %v5232_v27, %v5153_v16  ;;  %v1544_v34 = vld [vmem:[%s7412_s3 + $0x198] sm:$0xff] }
  0x83   : > { %v5241_v36 = vsel %vm1084_vm2, %v5036_v50, %v7427_v32  ;;  %v876_v53 = vadd.f32 %v3926_v9, %v875_v26  ;;  %vm5265_vm14 = vcmp.eq.f32.partialorder %v881_v23, 8.507059e+37  ;;  %vm652_vm15 = vweird.f32 %v5153_v16  ;;  %v1562_v26 = vld [vmem:[%s7412_s3 + $0x228] sm:$0xff]  ;;  %1988 = vmatpush.msrb.mxu3 %v1544_v34 }
  0x84   : > { %7612 = vst [vmem:[#allocation17_spill] sm:$0xff] %v5241_v36  ;;  %1692 = vmatmul.f32.gmra.mxu1 %v5241_v36  ;;  %vm653_vm0 = vweird.f32 %v5232_v27  ;;  %v7426_v22 = vrot.slane %v5249_v2, 7  ;;  %v1021_v33 = vadd.f32 %v5246_v41, %v985_v51  ;;  %v649_v49 = vsub.f32 1.0, %v648_v57  ;;  %v1527_v57 = vld [vmem:[%s7412_s3 + $0x110] sm:$0xff]  ;;  %2099 = vmatpush.msrb.mxu0 %v1562_v26  ;;  %v5351_v32 = vld [vmem:[%s4181_s16 + $0xe8] sm:$0xff] }
  0x85   : > { %3933 = vpow2.f32 %v3643_v42  ;;  %v880_v43 = vsel %vm5255_vm13, %v3926_v9, %v876_v53  ;;  %vm5278_vm7 = vcmp.eq.f32.partialorder %v656_v52, 8.507059e+37  ;;  %v659_v23 = vor.u32 1.1754944e-38, %v658_v20  ;;  %v1512_v52 = vld [vmem:[%s7412_s3 + $0x98] sm:$0xff]  ;;  %vm5312_vm9 = vmor %vm652_vm15, %vm653_vm0  ;;  %v1543_v53 = vld [vmem:[%s7412_s3 + $0x190] sm:$0xff]  ;;  %1876 = vmatpush.msrb.mxu2 %v1527_v57 }
  0x86   : > { %v3628_v58 = vmul.f32 -1.442695, %v5262_v11  ;;  %v3930_v10 = vpop.eup %3929  ;;  %v5290_v42 = vsel %vm1084_vm2, %v5054_v4, %v7426_v22  ;;  %v5292_v0 = vrot.slane %v1021_v33, 7  ;;  %v885_v9 = vsel %vm5265_vm14, %v884_v44, %v880_v43  ;;  %1762 = vmatpush.msrb.mxu1 %v1512_v52  ;;  %v1561_v33 = vld [vmem:[%s7412_s3 + $0x220] sm:$0xff]  ;;  %1989 = vmatpush.msrb.mxu3 %v1543_v53 }
  0x87   : > { %v650_v8 = vmul.f32 %v5232_v27, %v649_v49  ;;  %1716 = vmatmul.f32.gmra.mxu2 %v5290_v42  ;;  %v974_v51 = vmul.f32 %v885_v9, %v4944_v14  ;;  %v5316_v62 = vadd.f32 1.0, %v3930_v10  ;;  %v3636_v14 = vmul.f32 -1.442695, %v5274_v45  ;;  %2100 = vmatpush.msrb.mxu0 %v1561_v33  ;;  %v1511_v33 = vld [vmem:[%s7412_s3 + $0x90] sm:$0xff] }
  0x88   : > { %v3932_v20 = vpop.eup %3931  ;;  %3935 = vpow2.f32 %v3628_v58  ;;  %3652 = vmatmul.msk.f32.gmra.mxu0 %vm4401_vm1, %v5292_v0  ;;  %vm772_vm3 = vweird.f32 %v5218_v5  ;;  %v3619_v49 = vmul.f32 -1.442695, %v5284_v40  ;;  %v776_v58 = vand.u32 2147483647, %v5218_v5  ;;  %1763 = vmatpush.msrb.mxu1 %v1511_v33 }
  0x89   : > { %v651_v16 = vadd.f32 %v5232_v27, %v650_v8  ;;  %v768_v19 = vmul.f32 %v3932_v20, %v5218_v5  ;;  %v1010_v43 = vmul.f32 %v5227_v3, %v974_v51  ;;  %v778_v10 = vand.u32 2147483648, %v5218_v5 }
  0x8a   : > { %3937 = vrcp.f32 %v5316_v62  ;;  %vm773_vm5 = vweird.f32 %v3932_v20  ;;  %vm777_vm6 = vcmp.eq.f32.partialorder %v776_v58, 8.507059e+37  ;;  %vm517_vm8 = vweird.f32 %v5316_v62 }
  0x8b   : > { %v3934_v9 = vpop.eup %3933  ;;  %v655_v8 = vsel %vm5312_vm9, %v5232_v27, %v651_v16  ;;  %v769_v34 = vsub.f32 1.0, %v768_v19  ;;  %3939 = vpow2.f32 %v3636_v14  ;;  %v5343_v52 = vadd.f32 %v5246_v41, %v1010_v43  ;;  %vm5356_vm4 = vmor %vm772_vm3, %vm773_vm5 }
  0x8c   : > { %v660_v51 = vsel %vm5278_vm7, %v659_v23, %v655_v8  ;;  %v5347_v22 = vadd.f32 1.0, %v3934_v9  ;;  %3941 = vpow2.f32 %v3619_v49  ;;  %v779_v63 = vor.u32 1.1754944e-38, %v778_v10  ;;  %v1526_v49 = vld [vmem:[%s7412_s3 + $0x108] sm:$0xff] }
  0x8d   : > { %7621 = vst [vmem:[#allocation18_spill] sm:$0xff] %v5343_v52  ;;  %v959_v26 = vmul.f32 %v660_v51, %v5029_v39  ;;  %v770_v57 = vmul.f32 %v3932_v20, %v769_v34  ;;  %v7428_v44 = vrot.slane %v5343_v52, 7  ;;  %v521_v23 = vand.u32 2147483647, %v5316_v62  ;;  %1877 = vmatpush.msrb.mxu2 %v1526_v49  ;;  %v1525_v52 = vld [vmem:[%s7412_s3 + $0x100] sm:$0xff] }
  0x8e   : > { %v3936_v27 = vpop.eup %3935  ;;  %3943 = vrcp.f32 %v5347_v22  ;;  %v3644_v43 = vmul.f32 -1.442695, %v5351_v32  ;;  %v523_v34 = vand.u32 2147483648, %v5316_v62  ;;  %vm892_vm13 = vweird.f32 %v5347_v22 }
  0x8f   : > { %v995_v39 = vmul.f32 %v5227_v3, %v959_v26  ;;  %v771_v14 = vadd.f32 %v3932_v20, %v770_v57  ;;  %v5363_v16 = vadd.f32 1.0, %v3936_v27  ;;  %v5369_v5 = vsel %vm1084_vm2, %v5208_v18, %v7428_v44  ;;  %v1542_v44 = vld [vmem:[%s7412_s3 + $0x188] sm:$0xff]  ;;  %1878 = vmatpush.msrb.mxu2 %v1525_v52  ;;  %v1509_v26 = vld [vmem:[%s7412_s3 + $0x80] sm:$0xff] }
  0x90   : > { %v3938_v19 = vpop.eup %3937  ;;  %7624 = vst [vmem:[#allocation19_spill] sm:$0xff] %v5369_v5  ;;  %1740 = vmatmul.f32.gmra.mxu3 %v5369_v5  ;;  %vm5385_vm10 = vcmp.eq.f32.partialorder %v521_v23, 8.507059e+37  ;;  %v896_v57 = vand.u32 2147483647, %v5347_v22  ;;  %v1541_v5 = vld [vmem:[%s7412_s3 + $0x180] sm:$0xff] }
  0x91   : > { %v3940_v58 = vpop.eup %3939  ;;  %v1031_v10 = vadd.f32 %v5246_v41, %v995_v39  ;;  %v775_v9 = vsel %vm5356_vm4, %v3932_v20, %v771_v14  ;;  %v513_v8 = vmul.f32 %v3938_v19, %v5316_v62  ;;  %3945 = vrcp.f32 %v5363_v16  ;;  %1990 = vmatpush.msrb.mxu3 %v1542_v44 }
  0x92   : > { %v780_v51 = vsel %vm777_vm6, %v779_v63, %v775_v9  ;;  %v3942_v27 = vpop.eup %3941  ;;  %vm518_vm11 = vweird.f32 %v3938_v19  ;;  %v898_v63 = vand.u32 2147483648, %v5347_v22  ;;  %v5397_v23 = vadd.f32 1.0, %v3940_v58 }
  0x93   : > { %v5391_v39 = vrot.slane %v1031_v10, 7  ;;  %v967_v20 = vmul.f32 %v780_v51, %v5034_v60  ;;  %v514_v53 = vsub.f32 1.0, %v513_v8  ;;  %v5399_v33 = vadd.f32 1.0, %v3942_v27  ;;  %vm5409_vm12 = vmor %vm517_vm8, %vm518_vm11  ;;  %v1559_v8 = vld [vmem:[%s7412_s3 + $0x210] sm:$0xff]  ;;  %1991 = vmatpush.msrb.mxu3 %v1541_v5 }
  0x94   : > { %v5394_v14 = vpop.eup %3943  ;;  %3947 = vpow2.f32 %v3644_v43  ;;  %v524_v9 = vor.u32 1.1754944e-38, %v523_v34  ;;  %v671_v43 = vand.u32 2147483647, %v5363_v16  ;;  %v673_v58 = vand.u32 2147483648, %v5363_v16 }
  0x95   : > { %7627 = vst [vmem:[#allocation20_spill] sm:$0xff] %v5391_v39  ;;  %3662 = vmatmul.msk.f32.gmra.mxu1 %vm4401_vm1, %v5391_v39  ;;  %v1003_v49 = vmul.f32 %v5227_v3, %v967_v20  ;;  %v515_v10 = vmul.f32 %v3938_v19, %v514_v53  ;;  %v888_v60 = vmul.f32 %v5394_v14, %v5347_v22  ;;  %3949 = vrcp.f32 %v5397_v23  ;;  %v1604_v22 = vld [vmem:[%s7412_s3 + $0x378] sm:$0xff] }
  0x96   : > { %vm893_vm14 = vweird.f32 %v5394_v14  ;;  %vm5421_vm15 = vcmp.eq.f32.partialorder %v896_v57, 8.507059e+37  ;;  %v899_v53 = vor.u32 1.1754944e-38, %v898_v63  ;;  %3951 = vrcp.f32 %v5399_v33  ;;  %2315 = vmatpush.msra.mxu2 %v1604_v22 }
  0x97   : > { %v1039_v51 = vadd.f32 %v5246_v41, %v1003_v49  ;;  %v516_v34 = vadd.f32 %v3938_v19, %v515_v10  ;;  %v889_v27 = vsub.f32 1.0, %v888_v60  ;;  %v5419_v20 = vpop.eup %3945  ;;  %v1560_v49 = vld [vmem:[%s7412_s3 + $0x218] sm:$0xff]  ;;  %v1510_v10 = vld [vmem:[%s7412_s3 + $0x88] sm:$0xff]  ;;  %vm5457_vm0 = vmor %vm892_vm13, %vm893_vm14  ;;  %vm667_vm7 = vweird.f32 %v5363_v16 }
  0x98   : > { %v663_v54 = vmul.f32 %v5419_v20, %v5363_v16  ;;  %2101 = vmatpush.msrb.mxu0 %v1560_v49  ;;  %vm5462_vm9 = vcmp.eq.f32.partialorder %v671_v43, 8.507059e+37  ;;  %1764 = vmatpush.msrb.mxu1 %v1510_v10  ;;  %vm668_vm3 = vweird.f32 %v5419_v20  ;;  %vm787_vm5 = vweird.f32 %v5397_v23 }
  0x99   : > { %v5435_v60 = vrot.slane %v1039_v51, 7  ;;  %v520_v57 = vsel %vm5409_vm12, %v3938_v19, %v516_v34  ;;  %v890_v63 = vmul.f32 %v5394_v14, %v889_v27  ;;  %v674_v27 = vor.u32 1.1754944e-38, %v673_v58  ;;  %vm5495_vm4 = vmor %vm667_vm7, %vm668_vm3 }
  0x9a   : > { %v3948_v19 = vpop.eup %3947  ;;  %v525_v51 = vsel %vm5385_vm10, %v524_v9, %v520_v57  ;;  %v664_v49 = vsub.f32 1.0, %v663_v54  ;;  %v791_v58 = vand.u32 2147483647, %v5397_v23  ;;  %v793_v10 = vand.u32 2147483648, %v5397_v23  ;;  %2102 = vmatpush.msrb.mxu0 %v1559_v8  ;;  %1765 = vmatpush.msrb.mxu1 %v1509_v26 }
  0x9b   : > { %7632 = vst [vmem:[#allocation21_spill] sm:$0xff] %v5435_v60  ;;  %3670 = vmatmul.msk.f32.gmra.mxu2 %vm4401_vm1, %v5435_v60  ;;  %v950_v9 = vmul.f32 %v525_v51, %v5052_v7  ;;  %v891_v43 = vadd.f32 %v5394_v14, %v890_v63  ;;  %v3950_v52 = vpop.eup %3949  ;;  %v5481_v57 = vadd.f32 1.0, %v3948_v19  ;;  %vm532_vm8 = vweird.f32 %v5399_v33 }
  0x9c   : > { %v665_v54 = vmul.f32 %v5419_v20, %v664_v49  ;;  %v783_v5 = vmul.f32 %v3950_v52, %v5397_v23  ;;  %v3952_v63 = vpop.eup %3951  ;;  %vm788_vm6 = vweird.f32 %v3950_v52  ;;  %vm5506_vm10 = vcmp.eq.f32.partialorder %v791_v58, 8.507059e+37 }
  0x9d   : > { %v986_v18 = vmul.f32 %v5227_v3, %v950_v9  ;;  %v895_v7 = vsel %vm5457_vm0, %v5394_v14, %v891_v43  ;;  %3953 = vrcp.f32 %v5481_v57  ;;  %v528_v16 = vmul.f32 %v3952_v63, %v5399_v33  ;;  %vm5523_vm11 = vmor %vm787_vm5, %vm788_vm6 }
  0x9e   : > { %v900_v51 = vsel %vm5421_vm15, %v899_v53, %v895_v7  ;;  %v666_v62 = vadd.f32 %v5419_v20, %v665_v54  ;;  %v784_v53 = vsub.f32 1.0, %v783_v5  ;;  %v536_v26 = vand.u32 2147483647, %v5399_v33 }
  0x9f   : > { %v5502_v14 = vadd.f32 %v5246_v41, %v986_v18  ;;  %v975_v19 = vmul.f32 %v900_v51, %v5159_v48  ;;  %v538_v22 = vand.u32 2147483648, %v5399_v33  ;;  %v794_v7 = vor.u32 1.1754944e-38, %v793_v10 }
  0xa0   : > { %v670_v48 = vsel %vm5495_vm4, %v5419_v20, %v666_v62  ;;  %v785_v43 = vmul.f32 %v3950_v52, %v784_v53  ;;  %v529_v54 = vsub.f32 1.0, %v528_v16  ;;  %vm533_vm12 = vweird.f32 %v3952_v63 }
  0xa1   : > { %v1091_v9 = vrot.slane %v5502_v14, 7  ;;  %v1011_v18 = vmul.f32 %v5227_v3, %v975_v19  ;;  %v675_v49 = vsel %vm5462_vm9, %v674_v27, %v670_v48  ;;  %vm5536_vm13 = vcmp.eq.f32.partialorder %v536_v26, 8.507059e+37  ;;  %vm5548_vm15 = vmor %vm532_vm8, %vm533_vm12  ;;  %v5554_v26 = vld [vmem:[%s4181_s16 + $0x28] sm:$0xff] }
  0xa2   : > { %v960_v27 = vmul.f32 %v675_v49, %v5262_v11  ;;  %v786_v5 = vadd.f32 %v3950_v52, %v785_v43  ;;  %v530_v51 = vmul.f32 %v3952_v63, %v529_v54  ;;  %v539_v8 = vor.u32 1.1754944e-38, %v538_v22 }
  0xa3   : > { %v5531_v20 = vsel %vm1084_vm2, %v5292_v0, %v1091_v9  ;;  %v1047_v34 = vadd.f32 %v5246_v41, %v1011_v18  ;;  %v3954_v23 = vpop.eup %3953  ;;  %vm907_vm14 = vweird.f32 %v5481_v57  ;;  %v911_v48 = vand.u32 2147483647, %v5481_v57 }
  0xa4   : > { %1668 = vmatmul.f32.gmra.mxu0 %v5531_v20  ;;  %v996_v62 = vmul.f32 %v5227_v3, %v960_v27  ;;  %v790_v53 = vsel %vm5523_vm11, %v3950_v52, %v786_v5  ;;  %v903_v16 = vmul.f32 %v3954_v23, %v5481_v57  ;;  %v531_v18 = vadd.f32 %v3952_v63, %v530_v51 }
  0xa5   : > { %v5541_v19 = vrot.slane %v1047_v34, 7  ;;  %v795_v22 = vsel %vm5506_vm10, %v794_v7, %v790_v53  ;;  %v913_v43 = vand.u32 2147483648, %v5481_v57  ;;  %vm908_vm0 = vweird.f32 %v3954_v23 }
  0xa6   : > { %v5564_v33 = vadd.f32 %v5246_v41, %v996_v62  ;;  %v968_v52 = vmul.f32 %v795_v22, %v5274_v45  ;;  %v904_v49 = vsub.f32 1.0, %v903_v16  ;;  %v535_v44 = vsel %vm5548_vm15, %v3952_v63, %v531_v18  ;;  %vm5579_vm7 = vmor %vm907_vm14, %vm908_vm0  ;;  %v1558_v22 = vld [vmem:[%s7412_s3 + $0x208] sm:$0xff]  ;;  %v1620_v18 = vld [vmem:[%s7412_s3 + $0x3f8] sm:$0xff] }
  0xa7   : > { %3678 = vmatmul.msk.f32.gmra.mxu3 %vm4401_vm1, %v5541_v19  ;;  %v1185_v58 = vsel %vm1084_vm2, 0.0, %v4317_v12  ;;  %v3620_v7 = vmul.f32 -1.442695, %v5554_v26  ;;  %v540_v27 = vsel %vm5536_vm13, %v539_v8, %v535_v44  ;;  %v914_v63 = vor.u32 1.1754944e-38, %v913_v43  ;;  %2103 = vmatpush.msrb.mxu0 %v1558_v22  ;;  %v1603_v22 = vld [vmem:[%s7412_s3 + $0x370] sm:$0xff] }
  0xa8   : > { %v7437_v54 = vrot.slane %v5564_v33, 7  ;;  %v1004_v34 = vmul.f32 %v5227_v3, %v968_v52  ;;  %v905_v5 = vmul.f32 %v3954_v23, %v904_v49  ;;  %v951_v45 = vmul.f32 %v540_v27, %v5284_v40  ;;  %2428 = vmatpush.msra.mxu3 %v1620_v18  ;;  %2316 = vmatpush.msra.mxu2 %v1603_v22 }
  0xa9   : > { %3955 = vpow2.f32 %v3620_v7  ;;  %vm912_vm9 = vcmp.eq.f32.partialorder %v911_v48, 8.507059e+37  ;;  %v1252_v57 = vrot.slane %v1185_v58, 1  ;;  %v1253_v53 = vrot.slane %v4317_v12, 1  ;;  %v1588_v48 = vld [vmem:[%s7412_s3 + $0x2f8] sm:$0xff] }
  0xaa   : > { %v5587_v62 = vsel %vm1084_vm2, %v5391_v39, %v7437_v54  ;;  %v5590_v10 = vadd.f32 %v5246_v41, %v1004_v34  ;;  %v906_v8 = vadd.f32 %v3954_v23, %v905_v5  ;;  %v987_v40 = vmul.f32 %v5227_v3, %v951_v45  ;;  %2202 = vmatpush.msra.mxu1 %v1588_v48 }
  0xab   : > { %7649 = vst [vmem:[#allocation22_spill] sm:$0xff] %v5587_v62  ;;  %1698 = vmatmul.f32.gmra.mxu1 %v5587_v62  ;;  %vm1251_vm3 = vcmask 1046528   ;;  %v1365_v45 = vrot.slane %v1185_v58, 2  ;;  %v1366_v51 = vrot.slane %v4317_v12, 2  ;;  %vm1364_vm5 = vcmask 1045504  }
  0xac   : > { %v7436_v11 = vrot.slane %v5590_v10, 7  ;;  %v910_v16 = vsel %vm5579_vm7, %v3954_v23, %v906_v8  ;;  %v1023_v43 = vadd.f32 %v5246_v41, %v987_v40  ;;  %v1557_v23 = vld [vmem:[%s7412_s3 + $0x200] sm:$0xff]  ;;  %v5622_v27 = vsel %vm1251_vm3, %v1252_v57, %v1253_v53 }
  0xad   : > { %v915_v52 = vsel %vm912_vm9, %v914_v63, %v910_v16  ;;  %7651 = vst [vmem:[#allocation24_spill] sm:$0xff] %v5622_v27  ;;  %2104 = vmatpush.msrb.mxu0 %v1557_v23  ;;  %v5637_v58 = vsel %vm1364_vm5, %v1365_v45, %v1366_v51  ;;  %v1636_v16 = vld [vmem:[%s7412_s3 + $0x478] sm:$0xff] }
  0xae   : > { %v5615_v49 = vsel %vm1084_vm2, %v5435_v60, %v7436_v11  ;;  %v976_v44 = vmul.f32 %v915_v52, %v5351_v32  ;;  %v5619_v34 = vrot.slane %v1023_v43, 7  ;;  %v1202_v32 = vsel %vm1084_vm2, %v4317_v12, 0.0  ;;  %7652 = vst [vmem:[#allocation25_spill] sm:$0xff] %v5637_v58 }
  0xaf   : > { %7650 = vst [vmem:[#allocation23_spill] sm:$0xff] %v5615_v49  ;;  %v3956_v7 = vpop.eup %3955  ;;  %1722 = vmatmul.f32.gmra.mxu2 %v5615_v49  ;;  %v1255_v57 = vrot.slane %v1202_v32, 1  ;;  %2541 = vmatpush.msra.mxu0 %v1636_v16  ;;  %v1368_v52 = vrot.slane %v1202_v32, 2  ;;  %v1587_v32 = vld [vmem:[%s7412_s3 + $0x2f0] sm:$0xff] }
  0xb0   : > { %v1012_v5 = vmul.f32 %v5227_v3, %v976_v44  ;;  %v440_v63 = vadd.f32 1.0, %v3956_v7  ;;  %3654 = vmatmul.msk.f32.gmra.mxu0 %vm4401_vm1, %v5619_v34  ;;  %v1186_v7 = vsel %vm1084_vm2, 0.0, %v4958_v6  ;;  %2203 = vmatpush.msra.mxu1 %v1587_v32  ;;  %v7655_v32 = vrot.slane %v5135_v38, 7 }
  0xb1   : > { %v5654_v43 = vsel %vm1251_vm3, %v1253_v53, %v1255_v57  ;;  %v5660_v16 = vsel %vm1364_vm5, %v1366_v51, %v1368_v52  ;;  %v1619_v53 = vld [vmem:[%s7412_s3 + $0x3f0] sm:$0xff]  ;;  %v1370_v51 = vrot.slane %v1186_v7, 2  ;;  %v1371_v52 = vrot.slane %v5165_v15, 2 }
  0xb2   : > { %v5632_v8 = vadd.f32 %v5246_v41, %v1012_v5  ;;  %3957 = vrcp.f32 %v440_v63  ;;  %7653 = vst [vmem:[#allocation26_spill] sm:$0xff] %v5654_v43  ;;  %v553_v44 = vand.u32 2147483648, %v440_v63  ;;  %vm547_vm4 = vweird.f32 %v440_v63  ;;  %2429 = vmatpush.msra.mxu3 %v1619_v53 }
  0xb3   : > { %1766 = vmatmul.f32.vlgmr.msrb.gmra.mxu1 %v5622_v27  ;;  %v551_v45 = vand.u32 2147483647, %v440_v63  ;;  %7654 = vst [vmem:[#allocation27_spill] sm:$0xff] %v5660_v16 }
  0xb4   : > { %v7435_v40 = vrot.slane %v5632_v8, 7  ;;  %v554_v22 = vor.u32 1.1754944e-38, %v553_v44 }
  0xb5   : > { %vm552_vm10 = vcmp.eq.f32.partialorder %v551_v45, 8.507059e+37  ;;  %v1203_v45 = vsel %vm1084_vm2, %v7655_v32, 0.0 }
  0xb6   : > { %v5649_v18 = vsel %vm1084_vm2, %v5541_v19, %v7435_v40 }
  0xb7   : > { %1746 = vmatmul.f32.gmra.mxu3 %v5649_v18  ;;  %1879 = vmatmul.f32.vlgmr.msrb.gmra.mxu2 %v5637_v58 }
  0xb8   : > { %v3958_v48 = vpop.eup %3957 }
  0xb9   : > { %v543_v23 = vmul.f32 %v3958_v48, %v440_v63  ;;  %vm548_vm6 = vweird.f32 %v3958_v48  ;;  %v1258_v63 = vrot.slane %v5165_v15, 1 }
  0xba   : > { %vm549_vm8 = vmor %vm547_vm4, %vm548_vm6 }
  0xbb   : > { %v544_v5 = vsub.f32 1.0, %v543_v23  ;;  %1769 = vmatmul.f32.gmra.mxu1 %v5654_v43  ;;  %v1257_v23 = vrot.slane %v1186_v7, 1  ;;  %v1190_v43 = vsel %vm1084_vm2, 0.0, %v4695_v30 }
  0xbc   : > { %v5810_v54 = vpop.f32.mrf.mxu3 }
  0xbd   : > { %v545_v57 = vmul.f32 %v3958_v48, %v544_v5  ;;  %v1259_v53 = vsel %vm1251_vm3, %v1257_v23, %v1258_v63  ;;  %7661 = vst [vmem:[#allocation32_spill] sm:$0xff] %v5810_v54 }
  0xbf   : > { %v546_v40 = vadd.f32 %v3958_v48, %v545_v57  ;;  %3680 = vmatmul.msk.f32.vlgmr.msrb.gmra.mxu3 %vm4401_vm1, %v4958_v6  ;;  %1882 = vmatmul.f32.gmra.mxu2 %v5660_v16  ;;  %v5680_v57 = vsel %vm1364_vm5, %v1370_v51, %v1371_v52  ;;  %v1635_v6 = vld [vmem:[%s7412_s3 + $0x470] sm:$0xff] }
  0xc0   : > { %2542 = vmatpush.msra.mxu0 %v1635_v6 }
  0xc1   : > { %v550_v11 = vsel %vm549_vm8, %v3958_v48, %v546_v40  ;;  %v1373_v48 = vrot.slane %v1203_v45, 2 }
  0xc2   : > { %v555_v5 = vsel %vm552_vm10, %v554_v22, %v550_v11  ;;  %v1602_v11 = vld [vmem:[%s7412_s3 + $0x368] sm:$0xff] }
  0xc3   : > { %v952_v44 = vmul.f32 %v555_v5, %v5554_v26  ;;  %1772 = vmatmul.f32.gmra.mxu1 %v1259_v53  ;;  %2317 = vmatpush.msra.mxu2 %v1602_v11  ;;  %v1260_v26 = vrot.slane %v1203_v45, 1  ;;  %v1263_v5 = vrot.slane %v5531_v20, 1  ;;  %v1204_v45 = vsel %vm1084_vm2, %v1091_v9, 0.0  ;;  %v1634_v11 = vld [vmem:[%s7412_s3 + $0x468] sm:$0xff] }
  0xc4   : > { %2543 = vmatpush.msra.mxu0 %v1634_v11  ;;  %v1378_v14 = vrot.slane %v1204_v45, 2  ;;  %v5766_v11 = vpop.f32.mrf.mxu1  ;;  %v5841_v27 = vpop.f32.mrf.mxu3 }
  0xc5   : > { %v988_v40 = vmul.f32 %v5227_v3, %v952_v44  ;;  %v1261_v22 = vsel %vm1251_vm3, %v1258_v63, %v1260_v26  ;;  %v1187_v3 = vsel %vm1084_vm2, 0.0, %v5292_v0  ;;  %v1586_v63 = vld [vmem:[%s7412_s3 + $0x2e8] sm:$0xff]  ;;  %v1376_v44 = vrot.slane %v5531_v20, 2  ;;  %7664 = vst [vmem:[#allocation35_spill] sm:$0xff] %v5841_v27 }
  0xc6   : > { %2204 = vmatpush.msra.mxu1 %v1586_v63  ;;  %v1262_v51 = vrot.slane %v1187_v3, 1  ;;  %v1265_v26 = vrot.slane %v1204_v45, 1  ;;  %v1633_v45 = vld [vmem:[%s7412_s3 + $0x460] sm:$0xff]  ;;  %v7666_v27 = vrot.slane %v4888_v24, 7 }
  0xc7   : > { %v1024_v38 = vadd.f32 %v5246_v41, %v988_v40  ;;  %1995 = vmatmul.f32.gmra.mxu3 %v5165_v15  ;;  %1885 = vmatmul.f32.gmra.mxu2 %v5680_v57  ;;  %v5701_v41 = vsel %vm1364_vm5, %v1371_v52, %v1373_v48  ;;  %v1618_v15 = vld [vmem:[%s7412_s3 + $0x3e8] sm:$0xff]  ;;  %v1375_v52 = vrot.slane %v1187_v3, 2  ;;  %v1601_v40 = vld [vmem:[%s7412_s3 + $0x360] sm:$0xff] }
  0xc8   : > { %2430 = vmatpush.msra.mxu3 %v1618_v15  ;;  %v5716_v32 = vsel %vm1251_vm3, %v1262_v51, %v1263_v5  ;;  %2318 = vmatpush.msra.mxu2 %v1601_v40  ;;  %v5734_v9 = vsel %vm1251_vm3, %v1263_v5, %v1265_v26  ;;  %v1617_v48 = vld [vmem:[%s7412_s3 + $0x3e0] sm:$0xff]  ;;  %v1600_v40 = vld [vmem:[%s7412_s3 + $0x358] sm:$0xff] }
  0xc9   : > { %v1094_v7 = vrot.slane %v1024_v38, 7  ;;  %v5723_v6 = vsel %vm1364_vm5, %v1375_v52, %v1376_v44  ;;  %v5740_v38 = vsel %vm1364_vm5, %v1376_v44, %v1378_v14  ;;  %v1585_v3 = vld [vmem:[%s7412_s3 + $0x2e0] sm:$0xff]  ;;  %2544 = vmatpush.msra.mxu0 %v1633_v45  ;;  %v1273_v45 = vrot.slane %v4607_v37, 1 }
  0xca   : > { %2431 = vmatpush.msra.mxu3 %v1617_v48  ;;  %2205 = vmatpush.msra.mxu1 %v1585_v3  ;;  %v1616_v3 = vld [vmem:[%s7412_s3 + $0x3d8] sm:$0xff] }
  0xcb   : > { %v5695_v23 = vsel %vm1084_vm2, %v5619_v34, %v1094_v7  ;;  %1775 = vmatmul.f32.gmra.mxu1 %v1261_v22  ;;  %v1205_v52 = vsel %vm1084_vm2, %v1094_v7, 0.0  ;;  %2319 = vmatpush.msra.mxu2 %v1600_v40  ;;  %v1386_v40 = vrot.slane %v4607_v37, 2 }
  0xcc   : > { %1674 = vmatmul.f32.gmra.mxu0 %v5695_v23  ;;  %v1268_v63 = vrot.slane %v5695_v23, 1  ;;  %v1381_v51 = vrot.slane %v5695_v23, 2  ;;  %v1270_v26 = vrot.slane %v1205_v52, 1  ;;  %v1383_v7 = vrot.slane %v1205_v52, 2  ;;  %2432 = vmatpush.msra.mxu3 %v1616_v3 }
  0xce   : > { %v5774_v14 = vsel %vm1251_vm3, %v1268_v63, %v1270_v26  ;;  %v5781_v48 = vsel %vm1364_vm5, %v1381_v51, %v1383_v7  ;;  %v7659_v7 = vrot.slane %v4550_v56, 7 }
  0xcf   : > { %3682 = vmatmul.msk.f32.gmra.mxu3 %vm4401_vm1, %v5292_v0  ;;  %1888 = vmatmul.f32.gmra.mxu2 %v5701_v41  ;;  %7656 = vst [vmem:[#allocation28_spill] sm:$0xff] %v5774_v14 }
  0xd0   : > { %7657 = vst [vmem:[#allocation29_spill] sm:$0xff] %v5781_v48  ;;  %v1206_v3 = vsel %vm1084_vm2, %v7659_v7, 0.0 }
  0xd1   : > { %v1275_v56 = vrot.slane %v1206_v3, 1 }
  0xd3   : > { %1778 = vmatmul.f32.gmra.mxu1 %v5716_v32  ;;  %v5825_v58 = vsel %vm1251_vm3, %v1273_v45, %v1275_v56  ;;  %v1278_v56 = vrot.slane %v4914_v46, 1 }
  0xd4   : > { %2105 = vmatmul.f32.vlgmr.msrb.gmra.mxu0 %v1259_v53  ;;  %v1188_v53 = vsel %vm1084_vm2, 0.0, %v5619_v34  ;;  %7662 = vst [vmem:[#allocation33_spill] sm:$0xff] %v5825_v58 }
  0xd5   : > { %v1267_v15 = vrot.slane %v1188_v53, 1 }
  0xd7   : > { %2001 = vmatmul.f32.gmra.mxu3 %v5531_v20  ;;  %1891 = vmatmul.f32.gmra.mxu2 %v5723_v6  ;;  %v5755_v5 = vsel %vm1251_vm3, %v1267_v15, %v1268_v63  ;;  %v5786_v15 = vpop.f32.mrf.mxu2  ;;  %v1584_v63 = vld [vmem:[%s7412_s3 + $0x2d8] sm:$0xff] }
  0xd8   : > { %2206 = vmatpush.msra.mxu1 %v1584_v63  ;;  %v5873_v24 = vpop.f32.mrf.mxu3 }
  0xd9   : > { %7668 = vst [vmem:[#allocation38_spill] sm:$0xff] %v5873_v24 }
  0xdb   : > { %1781 = vmatmul.f32.gmra.mxu1 %v5734_v9 }
  0xdc   : > { %2108 = vmatmul.f32.gmra.mxu0 %v1261_v22  ;;  %v1380_v22 = vrot.slane %v1188_v53, 2  ;;  %v1189_v53 = vsel %vm1084_vm2, 0.0, %v4521_v21 }
  0xdd   : > { %v1272_v52 = vrot.slane %v1189_v53, 1 }
  0xde   : > { %v5761_v44 = vsel %vm1364_vm5, %v1380_v22, %v1381_v51  ;;  %v5791_v22 = vpop.f32.mrf.mxu1  ;;  %v1385_v51 = vrot.slane %v1189_v53, 2  ;;  %v1632_v53 = vld [vmem:[%s7412_s3 + $0x458] sm:$0xff] }
  0xdf   : > { %3684 = vmatmul.msk.f32.gmra.mxu3 %vm4401_vm1, %v5619_v34  ;;  %1894 = vmatmul.f32.gmra.mxu2 %v5740_v38  ;;  %v5800_v26 = vsel %vm1251_vm3, %v1272_v52, %v1273_v45  ;;  %v1599_v52 = vld [vmem:[%s7412_s3 + $0x350] sm:$0xff]  ;;  %v5818_v16 = vpop.f32.mrf.mxu2  ;;  %v1277_v45 = vrot.slane %v1190_v43, 1 }
  0xe0   : > { %7658 = vst [vmem:[#allocation30_spill] sm:$0xff] %v5800_v26  ;;  %v5808_v63 = vsel %vm1364_vm5, %v1385_v51, %v1386_v40  ;;  %2545 = vmatpush.msra.mxu0 %v1632_v53  ;;  %2320 = vmatpush.msra.mxu2 %v1599_v52  ;;  %v1388_v51 = vrot.slane %v1206_v3, 2  ;;  %v1615_v52 = vld [vmem:[%s7412_s3 + $0x3d0] sm:$0xff] }
  0xe1   : > { %7660 = vst [vmem:[#allocation31_spill] sm:$0xff] %v5808_v63  ;;  %v1583_v3 = vld [vmem:[%s7412_s3 + $0x2d0] sm:$0xff]  ;;  %2433 = vmatpush.msra.mxu3 %v1615_v52  ;;  %v5853_v52 = vsel %vm1251_vm3, %v1277_v45, %v1278_v56  ;;  %v1598_v45 = vld [vmem:[%s7412_s3 + $0x348] sm:$0xff] }
  0xe2   : > { %v5832_v53 = vsel %vm1364_vm5, %v1386_v40, %v1388_v51  ;;  %2207 = vmatpush.msra.mxu1 %v1583_v3  ;;  %v1390_v40 = vrot.slane %v1190_v43, 2  ;;  %v1391_v51 = vrot.slane %v4914_v46, 2  ;;  %7665 = vst [vmem:[#allocation36_spill] sm:$0xff] %v5853_v52  ;;  %v5855_v3 = vpop.f32.mrf.mxu0  ;;  %2321 = vmatpush.msra.mxu2 %v1598_v45 }
  0xe3   : > { %1784 = vmatmul.f32.gmra.mxu1 %v5755_v5  ;;  %7663 = vst [vmem:[#allocation34_spill] sm:$0xff] %v5832_v53 }
  0xe4   : > { %2111 = vmatmul.f32.gmra.mxu0 %v5716_v32  ;;  %v5863_v43 = vsel %vm1364_vm5, %v1390_v40, %v1391_v51 }
  0xe5   : > { %7667 = vst [vmem:[#allocation37_spill] sm:$0xff] %v5863_v43 }
  0xe6   : > { %v5820_v7 = vpop.f32.mrf.mxu1 }
  0xe7   : > { %2007 = vmatmul.f32.gmra.mxu3 %v5695_v23  ;;  %1897 = vmatmul.f32.gmra.mxu2 %v5761_v44  ;;  %v5848_v12 = vpop.f32.mrf.mxu2 }
  0xeb   : > { %1787 = vmatmul.f32.gmra.mxu1 %v5774_v14 }
  0xec   : > { %2114 = vmatmul.f32.gmra.mxu0 %v5734_v9 }
  0xee   : > { %v5850_v54 = vpop.f32.mrf.mxu1 }
  0xef   : > { %3686 = vmatmul.msk.f32.gmra.mxu3 %vm4401_vm1, %v4521_v21  ;;  %1900 = vmatmul.f32.gmra.mxu2 %v5781_v48 }
  0xf3   : > { %1790 = vmatmul.f32.gmra.mxu1 %v5800_v26 }
  0xf4   : > { %2117 = vmatmul.f32.gmra.mxu0 %v5755_v5 }
  0xf7   : > { %2013 = vmatmul.f32.gmra.mxu3 %v4607_v37  ;;  %1903 = vmatmul.f32.gmra.mxu2 %v5808_v63  ;;  %v5878_v37 = vpop.f32.mrf.mxu2 }
  0xf8   : > { %7670 = vst [vmem:[#allocation40_spill] sm:$0xff] %v5878_v37 }
  0xfb   : > { %1793 = vmatmul.f32.gmra.mxu1 %v5825_v58 }
  0xfc   : > { %2120 = vmatmul.f32.gmra.mxu0 %v5774_v14  ;;  %v1411_v14 = vrot.slane %v4939_v13, 2 }
  0xff   : > { %3688 = vmatmul.msk.f32.gmra.mxu3 %vm4401_vm1, %v4695_v30  ;;  %1906 = vmatmul.f32.gmra.mxu2 %v5832_v53  ;;  %v1207_v30 = vsel %vm1084_vm2, %v7666_v27, 0.0  ;;  %v1631_v53 = vld [vmem:[%s7412_s3 + $0x450] sm:$0xff] }
 0x100   : > { %2546 = vmatpush.msra.mxu0 %v1631_v53  ;;  %v1280_v63 = vrot.slane %v1207_v30, 1  ;;  %v1393_v27 = vrot.slane %v1207_v30, 2  ;;  %v1191_v53 = vsel %vm1084_vm2, 0.0, %v5036_v50  ;;  %v1614_v30 = vld [vmem:[%s7412_s3 + $0x3c8] sm:$0xff] }
 0x101   : > { %2434 = vmatpush.msra.mxu3 %v1614_v30  ;;  %v1282_v24 = vrot.slane %v1191_v53, 1  ;;  %v7674_v30 = vrot.slane %v5211_v35, 7 }
 0x102   : > { %v5876_v40 = vsel %vm1251_vm3, %v1278_v56, %v1280_v63  ;;  %v5887_v45 = vsel %vm1364_vm5, %v1391_v51, %v1393_v27  ;;  %v1582_v63 = vld [vmem:[%s7412_s3 + $0x2c8] sm:$0xff]  ;;  %v5895_v56 = vpop.f32.mrf.mxu0  ;;  %v1395_v51 = vrot.slane %v1191_v53, 2  ;;  %v1396_v27 = vrot.slane %v5241_v36, 2 }
 0x103   : > { %1796 = vmatmul.f32.gmra.mxu1 %v5853_v52  ;;  %7669 = vst [vmem:[#allocation39_spill] sm:$0xff] %v5876_v40 }
 0x104   : > { %2123 = vmatmul.f32.gmra.mxu0 %v5800_v26  ;;  %v5880_v26 = vpop.f32.mrf.mxu1  ;;  %7671 = vst [vmem:[#allocation41_spill] sm:$0xff] %v5887_v45  ;;  %2208 = vmatpush.msra.mxu1 %v1582_v63  ;;  %v1208_v63 = vsel %vm1084_vm2, %v7674_v30, 0.0 }
 0x105   : > { %v1285_v35 = vrot.slane %v1208_v63, 1 }
 0x107   : > { %2019 = vmatmul.f32.gmra.mxu3 %v4914_v46  ;;  %1909 = vmatmul.f32.gmra.mxu2 %v5863_v43  ;;  %v1283_v43 = vrot.slane %v5241_v36, 1 }
 0x109   : > { %v5904_v46 = vsel %vm1251_vm3, %v1282_v24, %v1283_v43  ;;  %v1630_v24 = vld [vmem:[%s7412_s3 + $0x448] sm:$0xff] }
 0x10a   : > { %7672 = vst [vmem:[#allocation42_spill] sm:$0xff] %v5904_v46  ;;  %2547 = vmatpush.msra.mxu0 %v1630_v24  ;;  %v5926_v30 = vpop.f32.mrf.mxu0 }
 0x10b   : > { %1799 = vmatmul.f32.gmra.mxu1 %v5876_v40 }
 0x10c   : > { %2126 = vmatmul.f32.gmra.mxu0 %v5825_v58  ;;  %v5906_v58 = vpop.f32.mrf.mxu3  ;;  %v5918_v53 = vpop.f32.mrf.mxu1 }
 0x10d   : > { %7673 = vst [vmem:[#allocation43_spill] sm:$0xff] %v5906_v58  ;;  %v1597_v58 = vld [vmem:[%s7412_s3 + $0x340] sm:$0xff] }
 0x10e   : > { %2322 = vmatpush.msra.mxu2 %v1597_v58 }
 0x10f   : > { %3690 = vmatmul.msk.f32.gmra.mxu3 %vm4401_vm1, %v5036_v50  ;;  %1912 = vmatmul.f32.gmra.mxu2 %v5887_v45  ;;  %v5914_v50 = vsel %vm1364_vm5, %v1395_v51, %v1396_v27  ;;  %v5916_v45 = vpop.f32.mrf.mxu2  ;;  %v1398_v51 = vrot.slane %v1208_v63, 2 }
 0x110   : > { %7675 = vst [vmem:[#allocation44_spill] sm:$0xff] %v5914_v50 }
 0x111   : > { %7676 = vst [vmem:[#allocation45_spill] sm:$0xff] %v5916_v45  ;;  %v1192_v45 = vsel %vm1084_vm2, 0.0, %v5391_v39  ;;  %v5940_v58 = vsel %vm1364_vm5, %v1396_v27, %v1398_v51  ;;  %v1401_v51 = vrot.slane %v5587_v62, 2 }
 0x112   : > { %7679 = vst [vmem:[#allocation48_spill] sm:$0xff] %v5940_v58  ;;  %v1287_v63 = vrot.slane %v1192_v45, 1  ;;  %v1400_v27 = vrot.slane %v1192_v45, 2  ;;  %v1629_v45 = vld [vmem:[%s7412_s3 + $0x440] sm:$0xff] }
 0x113   : > { %1802 = vmatmul.f32.gmra.mxu1 %v5904_v46  ;;  %2548 = vmatpush.msra.mxu0 %v1629_v45 }
 0x114   : > { %2129 = vmatmul.f32.gmra.mxu0 %v5853_v52  ;;  %v5931_v52 = vsel %vm1251_vm3, %v1283_v43, %v1285_v35  ;;  %v5937_v24 = vpop.f32.mrf.mxu3  ;;  %v1581_v43 = vld [vmem:[%s7412_s3 + $0x2c0] sm:$0xff]  ;;  %v1288_v35 = vrot.slane %v5587_v62, 1 }
 0x115   : > { %7677 = vst [vmem:[#allocation46_spill] sm:$0xff] %v5931_v52  ;;  %2209 = vmatpush.msra.mxu1 %v1581_v43  ;;  %v7682_v43 = vrot.slane %v5564_v33, 7 }
 0x116   : > { %7678 = vst [vmem:[#allocation47_spill] sm:$0xff] %v5937_v24  ;;  %v5958_v24 = vpop.f32.mrf.mxu0 }
 0x117   : > { %2025 = vmatmul.f32.gmra.mxu3 %v5241_v36  ;;  %1915 = vmatmul.f32.gmra.mxu2 %v5914_v50  ;;  %v1613_v50 = vld [vmem:[%s7412_s3 + $0x3c0] sm:$0xff]  ;;  %v5949_v36 = vpop.f32.mrf.mxu2 }
 0x118   : > { %2435 = vmatpush.msra.mxu3 %v1613_v50  ;;  %7680 = vst [vmem:[#allocation49_spill] sm:$0xff] %v5949_v36  ;;  %v5961_v50 = vsel %vm1251_vm3, %v1287_v63, %v1288_v35  ;;  %v1209_v36 = vsel %vm1084_vm2, %v7682_v43, 0.0 }
 0x119   : > { %7681 = vst [vmem:[#allocation50_spill] sm:$0xff] %v5961_v50  ;;  %v1290_v63 = vrot.slane %v1209_v36, 1 }
 0x11b   : > { %1805 = vmatmul.f32.gmra.mxu1 %v5931_v52  ;;  %v5986_v48 = vsel %vm1251_vm3, %v1288_v35, %v1290_v63  ;;  %v1580_v35 = vld [vmem:[%s7412_s3 + $0x2b8] sm:$0xff] }
 0x11c   : > { %2132 = vmatmul.f32.gmra.mxu0 %v5876_v40  ;;  %v5951_v40 = vpop.f32.mrf.mxu1  ;;  %7686 = vst [vmem:[#allocation54_spill] sm:$0xff] %v5986_v48  ;;  %2210 = vmatpush.msra.mxu1 %v1580_v35  ;;  %v7690_v35 = vrot.slane %v4569_v17, 7 }
 0x11e   : > { %v5988_v45 = vpop.f32.mrf.mxu0  ;;  %v1210_v21 = vsel %vm1084_vm2, %v7690_v35, 0.0 }
 0x11f   : > { %3692 = vmatmul.msk.f32.gmra.mxu3 %vm4401_vm1, %v5391_v39  ;;  %1918 = vmatmul.f32.gmra.mxu2 %v5940_v58  ;;  %v5969_v39 = vsel %vm1364_vm5, %v1400_v27, %v1401_v51  ;;  %v5974_v58 = vpop.f32.mrf.mxu3  ;;  %v5978_v33 = vpop.f32.mrf.mxu2  ;;  %v1596_v27 = vld [vmem:[%s7412_s3 + $0x338] sm:$0xff] }
 0x120   : > { %7683 = vst [vmem:[#allocation51_spill] sm:$0xff] %v5969_v39  ;;  %2323 = vmatpush.msra.mxu2 %v1596_v27  ;;  %v1293_v27 = vrot.slane %v4616_v29, 1 }
 0x121   : > { %7684 = vst [vmem:[#allocation52_spill] sm:$0xff] %v5974_v58  ;;  %v1193_v58 = vsel %vm1084_vm2, 0.0, %v4535_v61 }
 0x122   : > { %7685 = vst [vmem:[#allocation53_spill] sm:$0xff] %v5978_v33  ;;  %v1292_v63 = vrot.slane %v1193_v58, 1 }
 0x123   : > { %1808 = vmatmul.f32.gmra.mxu1 %v5961_v50 }
 0x124   : > { %2135 = vmatmul.f32.gmra.mxu0 %v5904_v46  ;;  %v1403_v46 = vrot.slane %v1209_v36, 2  ;;  %v1612_v36 = vld [vmem:[%s7412_s3 + $0x3b8] sm:$0xff]  ;;  %v6012_v33 = vsel %vm1251_vm3, %v1292_v63, %v1293_v27  ;;  %v1295_v63 = vrot.slane %v1210_v21, 1 }
 0x125   : > { %2436 = vmatpush.msra.mxu3 %v1612_v36 }
 0x127   : > { %2031 = vmatmul.f32.gmra.mxu3 %v5587_v62  ;;  %1921 = vmatmul.f32.gmra.mxu2 %v5969_v39  ;;  %v5995_v39 = vsel %vm1364_vm5, %v1401_v51, %v1403_v46  ;;  %v1405_v62 = vrot.slane %v1193_v58, 2  ;;  %v1628_v58 = vld [vmem:[%s7412_s3 + $0x438] sm:$0xff] }
 0x128   : > { %v5980_v43 = vpop.f32.mrf.mxu1  ;;  %7687 = vst [vmem:[#allocation55_spill] sm:$0xff] %v5995_v39  ;;  %2549 = vmatpush.msra.mxu0 %v1628_v58  ;;  %v1194_v58 = vsel %vm1084_vm2, 0.0, %v4818_v25 }
 0x12a   : > { %v6008_v46 = vpop.f32.mrf.mxu3 }
 0x12b   : > { %1811 = vmatmul.f32.gmra.mxu1 %v5986_v48  ;;  %7688 = vst [vmem:[#allocation56_spill] sm:$0xff] %v6008_v46  ;;  %v6027_v46 = vpop.f32.mrf.mxu0 }
 0x12c   : > { %2138 = vmatmul.f32.gmra.mxu0 %v5931_v52  ;;  %v1406_v52 = vrot.slane %v4616_v29, 2 }
 0x12f   : > { %3694 = vmatmul.msk.f32.gmra.mxu3 %vm4401_vm1, %v4535_v61  ;;  %1924 = vmatmul.f32.gmra.mxu2 %v5995_v39  ;;  %v6022_v39 = vsel %vm1364_vm5, %v1405_v62, %v1406_v52  ;;  %v1408_v61 = vrot.slane %v1210_v21, 2 }
 0x130   : > { %v1767_v51 = vpop.f32.mrf.mxu1  ;;  %7691 = vst [vmem:[#allocation58_spill] sm:$0xff] %v6022_v39 }
 0x131   : > { %v6044_v21 = vsel %vm1364_vm5, %v1406_v52, %v1408_v61 }
 0x132   : > { %v6014_v36 = vpop.f32.mrf.mxu2  ;;  %7693 = vst [vmem:[#allocation60_spill] sm:$0xff] %v6044_v21 }
 0x133   : > { %7689 = vst [vmem:[#allocation57_spill] sm:$0xff] %v6014_v36  ;;  %1814 = vmatmul.f32.gmra.mxu1 %v6012_v33  ;;  %v1595_v36 = vld [vmem:[%s7412_s3 + $0x330] sm:$0xff] }
 0x134   : > { %2141 = vmatmul.f32.gmra.mxu0 %v5961_v50  ;;  %v6034_v50 = vsel %vm1251_vm3, %v1293_v27, %v1295_v63  ;;  %2324 = vmatpush.msra.mxu2 %v1595_v36  ;;  %v1611_v27 = vld [vmem:[%s7412_s3 + $0x3b0] sm:$0xff]  ;;  %v1298_v36 = vrot.slane %v4939_v13, 1 }
 0x135   : > { %v1579_v63 = vld [vmem:[%s7412_s3 + $0x2b0] sm:$0xff]  ;;  %2437 = vmatpush.msra.mxu3 %v1611_v27 }
 0x136   : > { %2211 = vmatpush.msra.mxu1 %v1579_v63  ;;  %v7695_v63 = vrot.slane %v4907_v31, 7 }
 0x137   : > { %2037 = vmatmul.f32.gmra.mxu3 %v4616_v29  ;;  %1927 = vmatmul.f32.gmra.mxu2 %v6022_v39  ;;  %v1297_v39 = vrot.slane %v1194_v58, 1  ;;  %v6054_v29 = vpop.f32.mrf.mxu0 }
 0x138   : > { %v1770_v17 = vpop.f32.mrf.mxu1 }
 0x13a   : > { %v6031_v35 = vpop.f32.mrf.mxu3  ;;  %v1880_v62 = vpop.f32.mrf.mxu2 }
 0x13b   : > { %7692 = vst [vmem:[#allocation59_spill] sm:$0xff] %v6031_v35  ;;  %1817 = vmatmul.f32.gmra.mxu1 %v6034_v50  ;;  %v1768_v35 = vadd.f32 %v1767_v51, %v5855_v3  ;;  %v6062_v3 = vsel %vm1251_vm3, %v1297_v39, %v1298_v36  ;;  %v1771_v39 = vadd.f32 %v1770_v17, %v5895_v56  ;;  %v1594_v56 = vld [vmem:[%s7412_s3 + $0x328] sm:$0xff] }
 0x13c   : > { %2144 = vmatmul.f32.gmra.mxu0 %v5986_v48  ;;  %v1410_v48 = vrot.slane %v1194_v58, 2  ;;  %2325 = vmatpush.msra.mxu2 %v1594_v56  ;;  %v1416_v56 = vrot.slane %v5290_v42, 2 }
 0x13d   : > { %v1881_v61 = vadd.f32 %v1880_v62, %v1768_v35  ;;  %v1627_v62 = vld [vmem:[%s7412_s3 + $0x430] sm:$0xff] }
 0x13e   : > { %v6072_v35 = vsel %vm1364_vm5, %v1410_v48, %v1411_v14  ;;  %2550 = vmatpush.msra.mxu0 %v1627_v62 }
 0x13f   : > { %3696 = vmatmul.msk.f32.gmra.mxu3 %vm4401_vm1, %v4818_v25  ;;  %1930 = vmatmul.f32.gmra.mxu2 %v6044_v21  ;;  %v1211_v25 = vsel %vm1084_vm2, %v7695_v63, 0.0  ;;  %7696 = vst [vmem:[#allocation62_spill] sm:$0xff] %v6072_v35 }
 0x140   : > { %v1773_v52 = vpop.f32.mrf.mxu1 }
 0x141   : > { %v1774_v62 = vadd.f32 %v1773_v52, %v5926_v30 }
 0x142   : > { %v1993_v37 = vpop.f32.mrf.mxu3  ;;  %v1883_v51 = vpop.f32.mrf.mxu2 }
 0x143   : > { %v6064_v27 = vadd.f32 %v1993_v37, %v1881_v61  ;;  %1820 = vmatmul.f32.gmra.mxu1 %v6062_v3  ;;  %v1300_v37 = vrot.slane %v1211_v25, 1  ;;  %v1884_v58 = vadd.f32 %v1883_v51, %v1771_v39  ;;  %v1413_v61 = vrot.slane %v1211_v25, 2 }
 0x144   : > { %2147 = vmatmul.f32.gmra.mxu0 %v6012_v33  ;;  %v1195_v51 = vsel %vm1084_vm2, 0.0, %v5054_v4 }
 0x145   : > { %7694 = vst [vmem:[#allocation61_spill] sm:$0xff] %v6064_v27  ;;  %v6083_v48 = vsel %vm1251_vm3, %v1298_v36, %v1300_v37  ;;  %v6095_v25 = vsel %vm1364_vm5, %v1411_v14, %v1413_v61  ;;  %v1610_v36 = vld [vmem:[%s7412_s3 + $0x3a8] sm:$0xff]  ;;  %v1302_v39 = vrot.slane %v1195_v51, 1  ;;  %v1303_v37 = vrot.slane %v5290_v42, 1 }
 0x146   : > { %7698 = vst [vmem:[#allocation64_spill] sm:$0xff] %v6095_v25  ;;  %2438 = vmatpush.msra.mxu3 %v1610_v36  ;;  %v1415_v61 = vrot.slane %v1195_v51, 2 }
 0x147   : > { %2043 = vmatmul.f32.gmra.mxu3 %v4939_v13  ;;  %1933 = vmatmul.f32.gmra.mxu2 %v6072_v35  ;;  %v6113_v30 = vsel %vm1251_vm3, %v1302_v39, %v1303_v37 }
 0x148   : > { %v1776_v31 = vpop.f32.mrf.mxu1  ;;  %v6123_v51 = vsel %vm1364_vm5, %v1415_v61, %v1416_v56 }
 0x149   : > { %v6080_v63 = vpop.f32.mrf.mxu0  ;;  %v1777_v39 = vadd.f32 %v1776_v31, %v5958_v24  ;;  %v1593_v24 = vld [vmem:[%s7412_s3 + $0x320] sm:$0xff] }
 0x14a   : > { %v1996_v27 = vpop.f32.mrf.mxu3  ;;  %v1886_v21 = vpop.f32.mrf.mxu2  ;;  %2326 = vmatpush.msra.mxu2 %v1593_v24  ;;  %v1421_v24 = vrot.slane %v5615_v49, 2 }
 0x14b   : > { %v6088_v17 = vadd.f32 %v1996_v27, %v1884_v58  ;;  %1823 = vmatmul.f32.gmra.mxu1 %v6083_v48  ;;  %v1578_v27 = vld [vmem:[%s7412_s3 + $0x2a8] sm:$0xff]  ;;  %v1887_v14 = vadd.f32 %v1886_v21, %v1774_v62 }
 0x14c   : > { %2150 = vmatmul.f32.gmra.mxu0 %v6034_v50  ;;  %2212 = vmatpush.msra.mxu1 %v1578_v27  ;;  %v7701_v27 = vrot.slane %v5249_v2, 7  ;;  %v1626_v62 = vld [vmem:[%s7412_s3 + $0x428] sm:$0xff] }
 0x14d   : > { %7697 = vst [vmem:[#allocation63_spill] sm:$0xff] %v6088_v17  ;;  %2551 = vmatpush.msra.mxu0 %v1626_v62 }
 0x14e   : > { %v1212_v21 = vsel %vm1084_vm2, %v7701_v27, 0.0 }
 0x14f   : > { %3698 = vmatmul.msk.f32.gmra.mxu3 %vm4401_vm1, %v5054_v4  ;;  %1936 = vmatmul.f32.gmra.mxu2 %v6095_v25  ;;  %v1418_v27 = vrot.slane %v1212_v21, 2 }
 0x150   : > { %v1779_v58 = vpop.f32.mrf.mxu1 }
 0x151   : > { %v6110_v17 = vpop.f32.mrf.mxu0  ;;  %v1780_v62 = vadd.f32 %v1779_v58, %v5988_v45 }
 0x152   : > { %7699 = vst [vmem:[#allocation65_spill] sm:$0xff] %v6110_v17  ;;  %v1999_v35 = vpop.f32.mrf.mxu3  ;;  %v1889_v52 = vpop.f32.mrf.mxu2 }
 0x153   : > { %v6115_v36 = vadd.f32 %v1999_v35, %v1887_v14  ;;  %1826 = vmatmul.f32.gmra.mxu1 %v6113_v30  ;;  %v1305_v35 = vrot.slane %v1212_v21, 1  ;;  %v1890_v14 = vadd.f32 %v1889_v52, %v1777_v39  ;;  %v1196_v52 = vsel %vm1084_vm2, 0.0, %v5435_v60 }
 0x154   : > { %2153 = vmatmul.f32.gmra.mxu0 %v6062_v3  ;;  %v6146_v21 = vsel %vm1364_vm5, %v1416_v56, %v1418_v27  ;;  %v1307_v39 = vrot.slane %v1196_v52, 1  ;;  %v1420_v27 = vrot.slane %v1196_v52, 2 }
 0x155   : > { %7700 = vst [vmem:[#allocation66_spill] sm:$0xff] %v6115_v36  ;;  %v6134_v61 = vsel %vm1251_vm3, %v1303_v37, %v1305_v35  ;;  %v1609_v37 = vld [vmem:[%s7412_s3 + $0x3a0] sm:$0xff]  ;;  %v1308_v35 = vrot.slane %v5615_v49, 1 }
 0x156   : > { %7704 = vst [vmem:[#allocation69_spill] sm:$0xff] %v6146_v21  ;;  %2439 = vmatpush.msra.mxu3 %v1609_v37  ;;  %v6174_v52 = vsel %vm1364_vm5, %v1420_v27, %v1421_v24 }
 0x157   : > { %2049 = vmatmul.f32.gmra.mxu3 %v5290_v42  ;;  %1939 = vmatmul.f32.gmra.mxu2 %v6123_v51  ;;  %v6164_v45 = vsel %vm1251_vm3, %v1307_v39, %v1308_v35  ;;  %7708 = vst [vmem:[#allocation72_spill] sm:$0xff] %v6174_v52 }
 0x158   : > { %v1782_v2 = vpop.f32.mrf.mxu1 }
 0x159   : > { %v6131_v36 = vpop.f32.mrf.mxu0  ;;  %v1783_v39 = vadd.f32 %v1782_v2, %v6027_v46  ;;  %v1592_v46 = vld [vmem:[%s7412_s3 + $0x318] sm:$0xff] }
 0x15a   : > { %7702 = vst [vmem:[#allocation67_spill] sm:$0xff] %v6131_v36  ;;  %v2002_v17 = vpop.f32.mrf.mxu3  ;;  %v1892_v25 = vpop.f32.mrf.mxu2  ;;  %2327 = vmatpush.msra.mxu2 %v1592_v46 }
 0x15b   : > { %v6139_v31 = vadd.f32 %v2002_v17, %v1890_v14  ;;  %1829 = vmatmul.f32.gmra.mxu1 %v6134_v61  ;;  %v1577_v17 = vld [vmem:[%s7412_s3 + $0x2a0] sm:$0xff]  ;;  %v1893_v56 = vadd.f32 %v1892_v25, %v1780_v62 }
 0x15c   : > { %2156 = vmatmul.f32.gmra.mxu0 %v6083_v48  ;;  %2213 = vmatpush.msra.mxu1 %v1577_v17  ;;  %v7707_v17 = vrot.slane %v5590_v10, 7  ;;  %v1625_v62 = vld [vmem:[%s7412_s3 + $0x420] sm:$0xff] }
 0x15d   : > { %7703 = vst [vmem:[#allocation68_spill] sm:$0xff] %v6139_v31  ;;  %2552 = vmatpush.msra.mxu0 %v1625_v62 }
 0x15e   : > { %v1213_v25 = vsel %vm1084_vm2, %v7707_v17, 0.0 }
 0x15f   : > { %3700 = vmatmul.msk.f32.gmra.mxu3 %vm4401_vm1, %v5435_v60  ;;  %1942 = vmatmul.f32.gmra.mxu2 %v6146_v21  ;;  %v1423_v17 = vrot.slane %v1213_v25, 2 }
 0x160   : > { %v1785_v14 = vpop.f32.mrf.mxu1 }
 0x161   : > { %v6161_v31 = vpop.f32.mrf.mxu0  ;;  %v1786_v27 = vadd.f32 %v1785_v14, %v6054_v29  ;;  %v6198_v29 = vsel %vm1364_vm5, %v1421_v24, %v1423_v17  ;;  %v1313_v14 = vrot.slane %v4662_v1, 1 }
 0x162   : > { %7705 = vst [vmem:[#allocation70_spill] sm:$0xff] %v6161_v31  ;;  %v2005_v36 = vpop.f32.mrf.mxu3  ;;  %v1895_v58 = vpop.f32.mrf.mxu2 }
 0x163   : > { %v6166_v37 = vadd.f32 %v2005_v36, %v1893_v56  ;;  %1832 = vmatmul.f32.gmra.mxu1 %v6164_v45  ;;  %v1310_v36 = vrot.slane %v1213_v25, 1  ;;  %v1896_v56 = vadd.f32 %v1895_v58, %v1783_v39  ;;  %v1197_v25 = vsel %vm1084_vm2, 0.0, %v4566_v28  ;;  %7712 = vst [vmem:[#allocation76_spill] sm:$0xff] %v6198_v29 }
 0x164   : > { %2159 = vmatmul.f32.gmra.mxu0 %v6113_v30  ;;  %v1425_v62 = vrot.slane %v1197_v25, 2  ;;  %v1426_v39 = vrot.slane %v4662_v1, 2 }
 0x165   : > { %7706 = vst [vmem:[#allocation71_spill] sm:$0xff] %v6166_v37  ;;  %v6186_v21 = vsel %vm1251_vm3, %v1308_v35, %v1310_v36  ;;  %v1608_v35 = vld [vmem:[%s7412_s3 + $0x398] sm:$0xff] }
 0x166   : > { %7710 = vst [vmem:[#allocation74_spill] sm:$0xff] %v6186_v21  ;;  %2440 = vmatpush.msra.mxu3 %v1608_v35 }
 0x167   : > { %2055 = vmatmul.f32.gmra.mxu3 %v5615_v49  ;;  %1945 = vmatmul.f32.gmra.mxu2 %v6174_v52 }
 0x168   : > { %v1788_v10 = vpop.f32.mrf.mxu1 }
 0x169   : > { %v6182_v37 = vpop.f32.mrf.mxu0 }
 0x16a   : > { %7709 = vst [vmem:[#allocation73_spill] sm:$0xff] %v6182_v37  ;;  %v2008_v31 = vpop.f32.mrf.mxu3  ;;  %v1898_v60 = vpop.f32.mrf.mxu2 }
 0x16b   : > { %v6191_v2 = vadd.f32 %v2008_v31, %v1896_v56  ;;  %v1899_v58 = vadd.f32 %v1898_v60, %v1786_v27  ;;  %1835 = vmatmul.f32.gmra.mxu1 %v6186_v21  ;;  %v1576_v31 = vld [vmem:[%s7412_s3 + $0x298] sm:$0xff]  ;;  %v1312_v60 = vrot.slane %v1197_v25, 1  ;;  %v1789_v56 = vadd.f32 %v1788_v10, %v6080_v63 }
 0x16c   : > { %2162 = vmatmul.f32.gmra.mxu0 %v6134_v61  ;;  %2214 = vmatpush.msra.mxu1 %v1576_v31  ;;  %v1624_v63 = vld [vmem:[%s7412_s3 + $0x418] sm:$0xff] }
 0x16d   : > { %7711 = vst [vmem:[#allocation75_spill] sm:$0xff] %v6191_v2  ;;  %v6216_v27 = vsel %vm1251_vm3, %v1312_v60, %v1313_v14  ;;  %v7716_v2 = vrot.slane %v4629_v47, 7  ;;  %2553 = vmatpush.msra.mxu0 %v1624_v63  ;;  %v1591_v63 = vld [vmem:[%s7412_s3 + $0x310] sm:$0xff] }
 0x16e   : > { %7714 = vst [vmem:[#allocation78_spill] sm:$0xff] %v6216_v27  ;;  %2328 = vmatpush.msra.mxu2 %v1591_v63 }
 0x16f   : > { %3702 = vmatmul.msk.f32.gmra.mxu3 %vm4401_vm1, %v4566_v28  ;;  %1948 = vmatmul.f32.gmra.mxu2 %v6198_v29  ;;  %v1214_v25 = vsel %vm1084_vm2, %v7716_v2, 0.0 }
 0x170   : > { %v1791_v24 = vpop.f32.mrf.mxu1  ;;  %v1315_v10 = vrot.slane %v1214_v25, 1  ;;  %v1428_v2 = vrot.slane %v1214_v25, 2  ;;  %v1198_v25 = vsel %vm1084_vm2, 0.0, %v4856_v55 }
 0x171   : > { %v6212_v36 = vpop.f32.mrf.mxu0  ;;  %v1317_v63 = vrot.slane %v1198_v25, 1  ;;  %v1430_v37 = vrot.slane %v1198_v25, 2 }
 0x172   : > { %7713 = vst [vmem:[#allocation77_spill] sm:$0xff] %v6212_v36  ;;  %v2011_v17 = vpop.f32.mrf.mxu3  ;;  %v1901_v46 = vpop.f32.mrf.mxu2  ;;  %v6226_v36 = vsel %vm1364_vm5, %v1425_v62, %v1426_v39 }
 0x173   : > { %v6218_v35 = vadd.f32 %v2011_v17, %v1899_v58  ;;  %v1902_v31 = vadd.f32 %v1901_v46, %v1789_v56  ;;  %1838 = vmatmul.f32.gmra.mxu1 %v6216_v27  ;;  %7717 = vst [vmem:[#allocation80_spill] sm:$0xff] %v6226_v36  ;;  %v6234_v58 = vld [vmem:[%s4181_s16 + $0xf0] sm:$0xff]  ;;  %v6240_v17 = vsel %vm1251_vm3, %v1313_v14, %v1315_v10 }
 0x174   : > { %2165 = vmatmul.f32.gmra.mxu0 %v6164_v45  ;;  %v3645_v60 = vmul.f32 -1.442695, %v6234_v58  ;;  %7719 = vst [vmem:[#allocation82_spill] sm:$0xff] %v6240_v17  ;;  %v6255_v14 = vsel %vm1364_vm5, %v1426_v39, %v1428_v2  ;;  %v1607_v10 = vld [vmem:[%s7412_s3 + $0x390] sm:$0xff] }
 0x175   : > { %7715 = vst [vmem:[#allocation79_spill] sm:$0xff] %v6218_v35  ;;  %2441 = vmatpush.msra.mxu3 %v1607_v10 }
 0x176   : > { %3959 = vpow2.f32 %v3645_v60  ;;  %7721 = vst [vmem:[#allocation84_spill] sm:$0xff] %v6255_v14 }
 0x177   : > { %2061 = vmatmul.f32.gmra.mxu3 %v4662_v1  ;;  %1951 = vmatmul.f32.gmra.mxu2 %v6226_v36  ;;  %v6251_v36 = vld [vmem:[%s4181_s16 + $0xf8] sm:$0xff] }
 0x178   : > { %v1794_v47 = vpop.f32.mrf.mxu1  ;;  %v3646_v60 = vmul.f32 -1.442695, %v6251_v36 }
 0x179   : > { %v6237_v56 = vpop.f32.mrf.mxu0 }
 0x17a   : > { %7718 = vst [vmem:[#allocation81_spill] sm:$0xff] %v6237_v56  ;;  %v2014_v62 = vpop.f32.mrf.mxu3  ;;  %v1904_v46 = vpop.f32.mrf.mxu2  ;;  %3961 = vpow2.f32 %v3646_v60 }
 0x17b   : > { %v6245_v35 = vadd.f32 %v2014_v62, %v1902_v31  ;;  %1841 = vmatmul.f32.gmra.mxu1 %v6240_v17  ;;  %v1575_v31 = vld [vmem:[%s7412_s3 + $0x290] sm:$0xff]  ;;  %v1792_v62 = vadd.f32 %v1791_v24, %v5766_v11 }
 0x17c   : > { %2168 = vmatmul.f32.gmra.mxu0 %v6186_v21  ;;  %2215 = vmatpush.msra.mxu1 %v1575_v31  ;;  %v3960_v2 = vpop.eup %3959 }
 0x17d   : > { %7720 = vst [vmem:[#allocation83_spill] sm:$0xff] %v6245_v35  ;;  %v7722_v35 = vld [vmem:[#allocation14_spill] sm:$0xff]  ;;  %v1905_v39 = vadd.f32 %v1904_v46, %v1792_v62  ;;  %v6276_v31 = vadd.f32 1.0, %v3960_v2  ;;  %v7726_v46 = vld [vmem:[#allocation13_spill] sm:$0xff] }
 0x17e   : > { %v1318_v56 = vrot.slane %v7722_v35, 1  ;;  %v1431_v29 = vrot.slane %v7722_v35, 2  ;;  %v7727_v62 = vrot.slane %v7726_v46, 7 }
 0x17f   : > { %3704 = vmatmul.msk.f32.gmra.mxu3 %vm4401_vm1, %v4856_v55  ;;  %1954 = vmatmul.f32.gmra.mxu2 %v6255_v14  ;;  %3963 = vrcp.f32 %v6276_v31  ;;  %vm922_vm11 = vweird.f32 %v6276_v31 }
 0x180   : > { %v1797_v1 = vpop.f32.mrf.mxu1  ;;  %v6274_v24 = vsel %vm1251_vm3, %v1317_v63, %v1318_v56  ;;  %v1215_v14 = vsel %vm1084_vm2, %v7727_v62, 0.0  ;;  %v3962_v25 = vpop.eup %3961  ;;  %v1623_v63 = vld [vmem:[%s7412_s3 + $0x410] sm:$0xff] }
 0x181   : > { %v6271_v28 = vpop.f32.mrf.mxu0  ;;  %7724 = vst [vmem:[#allocation86_spill] sm:$0xff] %v6274_v24  ;;  %2554 = vmatpush.msra.mxu0 %v1623_v63  ;;  %v6293_v2 = vadd.f32 1.0, %v3962_v25  ;;  %v1433_v62 = vrot.slane %v1215_v14, 2  ;;  %v1590_v25 = vld [vmem:[%s7412_s3 + $0x308] sm:$0xff]  ;;  %v7731_v63 = vld [vmem:[#allocation16_spill] sm:$0xff] }
 0x182   : > { %7723 = vst [vmem:[#allocation85_spill] sm:$0xff] %v6271_v28  ;;  %v2017_v11 = vpop.f32.mrf.mxu3  ;;  %v1907_v10 = vpop.f32.mrf.mxu2  ;;  %v6286_v28 = vsel %vm1364_vm5, %v1430_v37, %v1431_v29  ;;  %2329 = vmatpush.msra.mxu2 %v1590_v25  ;;  %v1798_v25 = vadd.f32 %v1797_v1, %v5820_v7 }
 0x183   : > { %v6278_v60 = vadd.f32 %v2017_v11, %v1905_v39  ;;  %1844 = vmatmul.f32.gmra.mxu1 %v6274_v24  ;;  %7728 = vst [vmem:[#allocation13_spill] sm:$0xff] %v6286_v28  ;;  %v1795_v39 = vadd.f32 %v1794_v47, %v5791_v22  ;;  %v1320_v11 = vrot.slane %v1215_v14, 1  ;;  %3965 = vrcp.f32 %v6293_v2 }
 0x184   : > { %2171 = vmatmul.f32.gmra.mxu0 %v6216_v27  ;;  %v1199_v14 = vsel %vm1084_vm2, 0.0, %v7731_v63  ;;  %vm937_vm15 = vweird.f32 %v6293_v2 }
 0x185   : > { %7725 = vst [vmem:[#allocation87_spill] sm:$0xff] %v6278_v60  ;;  %v1908_v46 = vadd.f32 %v1907_v10, %v1795_v39  ;;  %v6300_v55 = vpop.eup %3963  ;;  %v6303_v22 = vsel %vm1251_vm3, %v1318_v56, %v1320_v11  ;;  %v6315_v39 = vsel %vm1364_vm5, %v1431_v29, %v1433_v62  ;;  %v1606_v56 = vld [vmem:[%s7412_s3 + $0x388] sm:$0xff] }
 0x186   : > { %7732 = vst [vmem:[#allocation90_spill] sm:$0xff] %v6315_v39  ;;  %v918_v11 = vmul.f32 %v6300_v55, %v6276_v31  ;;  %2442 = vmatpush.msra.mxu3 %v1606_v56  ;;  %v7733_v29 = vld [vmem:[#allocation19_spill] sm:$0xff]  ;;  %vm923_vm12 = vweird.f32 %v6300_v55 }
 0x187   : > { %2067 = vmatmul.f32.gmra.mxu3 %v7722_v35  ;;  %1957 = vmatmul.f32.gmra.mxu2 %v6286_v28  ;;  %v1323_v62 = vrot.slane %v7733_v29, 1  ;;  %v1436_v21 = vrot.slane %v7733_v29, 2  ;;  %vm6361_vm13 = vmor %vm922_vm11, %vm923_vm12 }
 0x188   : > { %v1800_v37 = vpop.f32.mrf.mxu1 }
 0x189   : > { %v6298_v60 = vpop.f32.mrf.mxu0 }
 0x18a   : > { %7729 = vst [vmem:[#allocation88_spill] sm:$0xff] %v6298_v60  ;;  %v2020_v27 = vpop.f32.mrf.mxu3  ;;  %v1910_v47 = vpop.f32.mrf.mxu2  ;;  %v919_v60 = vsub.f32 1.0, %v918_v11 }
 0x18b   : > { %v6308_v10 = vadd.f32 %v2020_v27, %v1908_v46  ;;  %1847 = vmatmul.f32.gmra.mxu1 %v6303_v22  ;;  %v1574_v27 = vld [vmem:[%s7412_s3 + $0x288] sm:$0xff]  ;;  %v6325_v46 = vpop.eup %3965  ;;  %v1911_v28 = vadd.f32 %v1910_v47, %v1798_v25  ;;  %v7736_v47 = vld [vmem:[#allocation18_spill] sm:$0xff] }
 0x18c   : > { %2174 = vmatmul.f32.gmra.mxu0 %v6240_v17  ;;  %2216 = vmatpush.msra.mxu1 %v1574_v27  ;;  %v1435_v17 = vrot.slane %v1199_v14, 2  ;;  %v933_v1 = vmul.f32 %v6325_v46, %v6293_v2  ;;  %v920_v56 = vmul.f32 %v6300_v55, %v919_v60  ;;  %vm938_vm0 = vweird.f32 %v6325_v46 }
 0x18d   : > { %7730 = vst [vmem:[#allocation89_spill] sm:$0xff] %v6308_v10  ;;  %v1322_v10 = vrot.slane %v1199_v14, 1  ;;  %v7737_v14 = vrot.slane %v7736_v47, 7  ;;  %v1801_v47 = vadd.f32 %v1800_v37, %v5850_v54  ;;  %vm6404_vm7 = vmor %vm937_vm15, %vm938_vm0 }
 0x18e   : > { %v6352_v60 = vsel %vm1364_vm5, %v1435_v17, %v1436_v21 }
 0x18f   : > { %3706 = vmatmul.msk.f32.gmra.mxu3 %vm4401_vm1, %v7731_v63  ;;  %1960 = vmatmul.f32.gmra.mxu2 %v6315_v39  ;;  %v6340_v11 = vsel %vm1251_vm3, %v1322_v10, %v1323_v62  ;;  %v1216_v25 = vsel %vm1084_vm2, %v7737_v14, 0.0  ;;  %v928_v10 = vand.u32 2147483648, %v6276_v31  ;;  %v921_v14 = vadd.f32 %v6300_v55, %v920_v56 }
 0x190   : > { %v1803_v35 = vpop.f32.mrf.mxu1  ;;  %v1438_v49 = vrot.slane %v1216_v25, 2 }
 0x191   : > { %v6336_v7 = vpop.f32.mrf.mxu0 }
 0x192   : > { %7734 = vst [vmem:[#allocation91_spill] sm:$0xff] %v6336_v7  ;;  %v2023_v27 = vpop.f32.mrf.mxu3  ;;  %v1913_v52 = vpop.f32.mrf.mxu2  ;;  %v1325_v7 = vrot.slane %v1216_v25, 1  ;;  %v6389_v39 = vsel %vm1364_vm5, %v1436_v21, %v1438_v49 }
 0x193   : > { %v6342_v63 = vadd.f32 %v2023_v27, %v1911_v28  ;;  %1850 = vmatmul.f32.gmra.mxu1 %v6340_v11  ;;  %v1622_v28 = vld [vmem:[%s7412_s3 + $0x408] sm:$0xff]  ;;  %v934_v27 = vsub.f32 1.0, %v933_v1  ;;  %v1914_v17 = vadd.f32 %v1913_v52, %v1801_v47  ;;  %v929_v1 = vor.u32 1.1754944e-38, %v928_v10  ;;  %v1589_v52 = vld [vmem:[%s7412_s3 + $0x300] sm:$0xff] }
 0x194   : > { %2177 = vmatmul.f32.gmra.mxu0 %v6274_v24  ;;  %2330 = vmatpush.msra.mxu2 %v1589_v52  ;;  %v1573_v10 = vld [vmem:[%s7412_s3 + $0x280] sm:$0xff]  ;;  %v941_v47 = vand.u32 2147483647, %v6293_v2 }
 0x195   : > { %7735 = vst [vmem:[#allocation92_spill] sm:$0xff] %v6342_v63  ;;  %2555 = vmatpush.msra.mxu0 %v1622_v28  ;;  %v926_v63 = vand.u32 2147483647, %v6276_v31  ;;  %v935_v54 = vmul.f32 %v6325_v46, %v934_v27  ;;  %v925_v31 = vsel %vm6361_vm13, %v6300_v55, %v921_v14  ;;  %v6374_v28 = vsel %vm1251_vm3, %v1323_v62, %v1325_v7  ;;  %v1605_v7 = vld [vmem:[%s7412_s3 + $0x380] sm:$0xff] }
 0x196   : > { %v1200_v55 = vsel %vm1084_vm2, 0.0, %v5541_v19  ;;  %v1804_v14 = vadd.f32 %v1803_v35, %v5880_v26  ;;  %2443 = vmatpush.msra.mxu3 %v1605_v7  ;;  %2217 = vmatpush.msra.mxu1 %v1573_v10  ;;  %vm942_vm9 = vcmp.eq.f32.partialorder %v941_v47, 8.507059e+37  ;;  %v1621_v47 = vld [vmem:[%s7412_s3 + $0x400] sm:$0xff] }
 0x197   : > { %2073 = vmatmul.f32.gmra.mxu3 %v7733_v29  ;;  %1963 = vmatmul.f32.gmra.mxu2 %v6352_v60  ;;  %vm927_vm14 = vcmp.eq.f32.partialorder %v926_v63, 8.507059e+37  ;;  %v943_v63 = vand.u32 2147483648, %v6293_v2  ;;  %v936_v27 = vadd.f32 %v6325_v46, %v935_v54  ;;  %v1327_v21 = vrot.slane %v1200_v55, 1 }
 0x198   : > { %v1806_v24 = vpop.f32.mrf.mxu1  ;;  %v930_v62 = vsel %vm927_vm14, %v929_v1, %v925_v31  ;;  %v1440_v31 = vrot.slane %v1200_v55, 2  ;;  %v1441_v2 = vrot.slane %v5649_v18, 2  ;;  %2556 = vmatpush.msra.mxu0 %v1621_v47 }
 0x199   : > { %v6368_v37 = vpop.f32.mrf.mxu0  ;;  %v977_v26 = vmul.f32 %v930_v62, %v6234_v58  ;;  %v944_v35 = vor.u32 1.1754944e-38, %v943_v63  ;;  %v4097_v58 = vld [vmem:[%s7410_s1] ss:$0 sm:$0xff]  ;;  %v7742_v63 = vrot.slane %v5632_v8, 7  ;;  %v1807_v49 = vadd.f32 %v1806_v24, %v5918_v53 }
 0x19a   : > { %v2026_v56 = vpop.f32.mrf.mxu3  ;;  %v1916_v29 = vpop.f32.mrf.mxu2 }
 0x19b   : > { %v6381_v25 = vadd.f32 %v2026_v56, %v1914_v17  ;;  %1853 = vmatmul.f32.gmra.mxu1 %v6374_v28  ;;  %v1328_v17 = vrot.slane %v5649_v18, 1  ;;  %v1917_v1 = vadd.f32 %v1916_v29, %v1804_v14  ;;  %v940_v56 = vsel %vm6404_vm7, %v6325_v46, %v936_v27 }
 0x19c   : > { %2180 = vmatmul.f32.gmra.mxu0 %v6303_v22  ;;  %v1013_v55 = vmul.f32 %v4097_v58, %v977_v26  ;;  %v1217_v46 = vsel %vm1084_vm2, %v7742_v63, 0.0  ;;  %v945_v62 = vsel %vm942_vm9, %v944_v35, %v940_v56  ;;  %v6434_v27 = vsel %vm1364_vm5, %v1440_v31, %v1441_v2  ;;  %v4098_v26 = vld [vmem:[%s7411_s2] ss:$0 sm:$0xff] }
 0x19d   : > { %v6421_v10 = vsel %vm1251_vm3, %v1327_v21, %v1328_v17  ;;  %v1330_v21 = vrot.slane %v1217_v46, 1  ;;  %v1443_v56 = vrot.slane %v1217_v46, 2 }
 0x19e   : > { %v1049_v35 = vadd.f32 %v4098_v26, %v1013_v55 }
 0x19f   : > { %3708 = vmatmul.msk.f32.gmra.mxu3 %vm4401_vm1, %v5541_v19  ;;  %1966 = vmatmul.f32.gmra.mxu2 %v6389_v39  ;;  %v6449_v53 = vsel %vm1251_vm3, %v1328_v17, %v1330_v21  ;;  %v6458_v55 = vsel %vm1364_vm5, %v1441_v2, %v1443_v56 }
 0x1a0   : > { %v1809_v54 = vpop.f32.mrf.mxu1 }
 0x1a1   : > { %v6418_v52 = vpop.f32.mrf.mxu0  ;;  %v1810_v46 = vadd.f32 %v1809_v54, %v5951_v40 }
 0x1a2   : > { %v2029_v7 = vpop.f32.mrf.mxu3  ;;  %v1919_v29 = vpop.f32.mrf.mxu2 }
 0x1a3   : > { %v6423_v14 = vadd.f32 %v2029_v7, %v1917_v1  ;;  %1856 = vmatmul.f32.gmra.mxu1 %v6421_v10  ;;  %v978_v1 = vmul.f32 %v945_v62, %v6251_v36  ;;  %v1920_v8 = vadd.f32 %v1919_v29, %v1807_v49  ;;  %v6453_v29 = vrot.slane %v1049_v35, 7 }
 0x1a4   : > { %2183 = vmatmul.f32.gmra.mxu0 %v6340_v11 }
 0x1a5   : > { %v1014_v36 = vmul.f32 %v4097_v58, %v978_v1 }
 0x1a7   : > { %2079 = vmatmul.f32.gmra.mxu3 %v5649_v18  ;;  %1969 = vmatmul.f32.gmra.mxu2 %v6434_v27  ;;  %v1050_v47 = vadd.f32 %v4098_v26, %v1014_v36 }
 0x1a8   : > { %v1812_v31 = vpop.f32.mrf.mxu1 }
 0x1a9   : > { %v6446_v7 = vpop.f32.mrf.mxu0  ;;  %v1133_v1 = vrot.slane %v1050_v47, 7  ;;  %v1813_v40 = vadd.f32 %v1812_v31, %v5980_v43 }
 0x1aa   : > { %v2032_v63 = vpop.f32.mrf.mxu3  ;;  %v1922_v24 = vpop.f32.mrf.mxu2 }
 0x1ab   : > { %v6451_v62 = vadd.f32 %v2032_v63, %v1920_v8  ;;  %1859 = vmatmul.f32.gmra.mxu1 %v6449_v53  ;;  %v1923_v17 = vadd.f32 %v1922_v24, %v1810_v46  ;;  %v6474_v54 = vsel %vm1084_vm2, %v6453_v29, %v1133_v1 }
 0x1ac   : > { %2186 = vmatmul.f32.gmra.mxu0 %v6374_v28  ;;  %v1480_v36 = vrot.slane %v6474_v54, 1 }
 0x1af   : > { %3710 = vmatmul.msk.f32.gmra.mxu3 %vm4401_vm1, %v6453_v29  ;;  %1972 = vmatmul.f32.gmra.mxu2 %v6458_v55 }
 0x1b0   : > { %v1815_v58 = vpop.f32.mrf.mxu1 }
 0x1b1   : > { %v6465_v49 = vpop.f32.mrf.mxu0 }
 0x1b2   : > { %v2035_v21 = vpop.f32.mrf.mxu3  ;;  %v1925_v8 = vpop.f32.mrf.mxu2 }
 0x1b3   : > { %v6467_v35 = vadd.f32 %v2035_v21, %v1923_v17  ;;  %2218 = vmatmul.f32.vlgmr.msra.gmra.mxu1 %v5680_v57  ;;  %v1926_v2 = vadd.f32 %v1925_v8, %v1813_v40  ;;  %v6484_v57 = vsel %vm1084_vm2, 0.0, %v6453_v29 }
 0x1b4   : > { %2189 = vmatmul.f32.gmra.mxu0 %v6421_v10  ;;  %v1479_v24 = vrot.slane %v6484_v57, 1 }
 0x1b6   : > { %v6498_v21 = vsel %vm1251_vm3, %v1479_v24, %v1480_v36 }
 0x1b7   : > { %2085 = vmatmul.f32.gmra.mxu3 %v6474_v54  ;;  %3712 = vmatmul.msk.f32.vlgmr.msra.gmra.mxu2 %vm4401_vm1, %v5292_v0  ;;  %v1816_v0 = vadd.f32 %v1815_v58, %v5786_v15 }
 0x1b8   : > { %v1818_v26 = vpop.f32.mrf.mxu1 }
 0x1b9   : > { %v6480_v56 = vpop.f32.mrf.mxu0 }
 0x1ba   : > { %v2038_v63 = vpop.f32.mrf.mxu3  ;;  %v1928_v43 = vpop.f32.mrf.mxu2 }
 0x1bb   : > { %v6486_v31 = vadd.f32 %v2038_v63, %v1926_v2  ;;  %2221 = vmatmul.f32.gmra.mxu1 %v5701_v41  ;;  %v1929_v46 = vadd.f32 %v1928_v43, %v1816_v0  ;;  %v6501_v41 = vsel %vm1084_vm2, %v1133_v1, 0.0 }
 0x1bc   : > { %2192 = vmatmul.f32.gmra.mxu0 %v6449_v53 }
 0x1bd   : > { %7743 = vst [vmem:[#allocation18_spill] sm:$0xff] %v6486_v31 }
 0x1bf   : > { %2444 = vmatmul.f32.vlgmr.msra.gmra.mxu3 %v5716_v32  ;;  %2334 = vmatmul.f32.gmra.mxu2 %v5531_v20  ;;  %v1482_v32 = vrot.slane %v6501_v41, 1  ;;  %v1819_v20 = vadd.f32 %v1818_v26, %v5818_v16 }
 0x1c0   : > { %v1821_v47 = vpop.f32.mrf.mxu1 }
 0x1c1   : > { %v6495_v17 = vpop.f32.mrf.mxu0  ;;  %v6516_v63 = vsel %vm1251_vm3, %v1480_v36, %v1482_v32  ;;  %v1822_v16 = vadd.f32 %v1821_v47, %v5848_v12 }
 0x1c2   : > { %7744 = vst [vmem:[#allocation93_spill] sm:$0xff] %v6495_v17  ;;  %v2041_v8 = vpop.f32.mrf.mxu3  ;;  %v1931_v40 = vpop.f32.mrf.mxu2 }
 0x1c3   : > { %v6503_v2 = vadd.f32 %v2041_v8, %v1929_v46  ;;  %2224 = vmatmul.f32.gmra.mxu1 %v5723_v6  ;;  %v1932_v15 = vadd.f32 %v1931_v40, %v1819_v20  ;;  %v7750_v40 = vld [vmem:[#allocation40_spill] sm:$0xff] }
 0x1c4   : > { %2195 = vmatmul.f32.gmra.mxu0 %v6498_v21  ;;  %v7751_v20 = vld [vmem:[#allocation28_spill] sm:$0xff] }
 0x1c5   : > { %7745 = vst [vmem:[#allocation94_spill] sm:$0xff] %v6503_v2 }
 0x1c7   : > { %2447 = vmatmul.f32.gmra.mxu3 %v5734_v9  ;;  %3714 = vmatmul.msk.f32.gmra.mxu2 %vm4401_vm1, %v5619_v34 }
 0x1c8   : > { %v1824_v58 = vpop.f32.mrf.mxu1 }
 0x1c9   : > { %v6513_v1 = vpop.f32.mrf.mxu0  ;;  %v1825_v32 = vadd.f32 %v1824_v58, %v7750_v40 }
 0x1ca   : > { %7746 = vst [vmem:[#allocation95_spill] sm:$0xff] %v6513_v1  ;;  %v2044_v43 = vpop.f32.mrf.mxu3  ;;  %v1934_v24 = vpop.f32.mrf.mxu2 }
 0x1cb   : > { %v6518_v0 = vadd.f32 %v2044_v43, %v1932_v15  ;;  %2227 = vmatmul.f32.gmra.mxu1 %v5740_v38  ;;  %v1935_v9 = vadd.f32 %v1934_v24, %v1822_v16  ;;  %v7755_v16 = vld [vmem:[#allocation29_spill] sm:$0xff] }
 0x1cc   : > { %2198 = vmatmul.f32.gmra.mxu0 %v6516_v63 }
 0x1cd   : > { %7747 = vst [vmem:[#allocation96_spill] sm:$0xff] %v6518_v0 }
 0x1cf   : > { %2450 = vmatmul.f32.gmra.mxu3 %v5755_v5  ;;  %2340 = vmatmul.f32.gmra.mxu2 %v5695_v23  ;;  %v7752_v5 = vld [vmem:[#allocation3_spill] sm:$0xff] }
 0x1d0   : > { %v1827_v34 = vpop.f32.mrf.mxu1 }
 0x1d1   : > { %v6525_v26 = vpop.f32.mrf.mxu0 }
 0x1d2   : > { %7748 = vst [vmem:[#allocation97_spill] sm:$0xff] %v6525_v26  ;;  %v2047_v36 = vpop.f32.mrf.mxu3  ;;  %v1937_v46 = vpop.f32.mrf.mxu2 }
 0x1d3   : > { %v6527_v8 = vadd.f32 %v2047_v36, %v1935_v9  ;;  %2230 = vmatmul.f32.gmra.mxu1 %v5761_v44  ;;  %v1938_v12 = vadd.f32 %v1937_v46, %v1825_v32  ;;  %v7757_v9 = vld [vmem:[#allocation30_spill] sm:$0xff] }
 0x1d4   : > { %2557 = vmatmul.f32.vlgmr.msra.gmra.mxu0 %v5723_v6  ;;  %v7756_v6 = vld [vmem:[#allocation45_spill] sm:$0xff]  ;;  %v7758_v46 = vld [vmem:[#allocation6_spill] sm:$0xff] }
 0x1d5   : > { %7749 = vst [vmem:[#allocation98_spill] sm:$0xff] %v6527_v8  ;;  %v1828_v58 = vadd.f32 %v1827_v34, %v7756_v6  ;;  %v7764_v6 = vld [vmem:[#allocation9_spill] sm:$0xff] }
 0x1d7   : > { %2453 = vmatmul.f32.gmra.mxu3 %v7751_v20  ;;  %3716 = vmatmul.msk.f32.gmra.mxu2 %vm4401_vm1, %v7752_v5 }
 0x1d8   : > { %v1830_v23 = vpop.f32.mrf.mxu1 }
 0x1d9   : > { %v6536_v47 = vpop.f32.mrf.mxu0 }
 0x1da   : > { %7753 = vst [vmem:[#allocation40_spill] sm:$0xff] %v6536_v47  ;;  %v2050_v15 = vpop.f32.mrf.mxu3  ;;  %v1940_v43 = vpop.f32.mrf.mxu2 }
 0x1db   : > { %v6538_v24 = vadd.f32 %v2050_v15, %v1938_v12  ;;  %2233 = vmatmul.f32.gmra.mxu1 %v7755_v16  ;;  %v1941_v36 = vadd.f32 %v1940_v43, %v1828_v58  ;;  %v7761_v12 = vld [vmem:[#allocation31_spill] sm:$0xff]  ;;  %v7762_v15 = vld [vmem:[#allocation49_spill] sm:$0xff] }
 0x1dc   : > { %2560 = vmatmul.f32.gmra.mxu0 %v5740_v38  ;;  %v1831_v38 = vadd.f32 %v1830_v23, %v7762_v15  ;;  %v7769_v15 = vld [vmem:[#allocation36_spill] sm:$0xff] }
 0x1dd   : > { %7754 = vst [vmem:[#allocation28_spill] sm:$0xff] %v6538_v24  ;;  %v7763_v24 = vld [vmem:[#allocation33_spill] sm:$0xff] }
 0x1df   : > { %2456 = vmatmul.f32.gmra.mxu3 %v7757_v9  ;;  %2346 = vmatmul.f32.gmra.mxu2 %v7758_v46 }
 0x1e0   : > { %v1833_v40 = vpop.f32.mrf.mxu1 }
 0x1e1   : > { %v6545_v32 = vpop.f32.mrf.mxu0 }
 0x1e2   : > { %7759 = vst [vmem:[#allocation3_spill] sm:$0xff] %v6545_v32  ;;  %v2053_v20 = vpop.f32.mrf.mxu3  ;;  %v1943_v5 = vpop.f32.mrf.mxu2 }
 0x1e3   : > { %v6547_v8 = vadd.f32 %v2053_v20, %v1941_v36  ;;  %2236 = vmatmul.f32.gmra.mxu1 %v7761_v12  ;;  %v1944_v34 = vadd.f32 %v1943_v5, %v1831_v38  ;;  %v7767_v20 = vld [vmem:[#allocation34_spill] sm:$0xff]  ;;  %v7770_v5 = vld [vmem:[#allocation12_spill] sm:$0xff] }
 0x1e4   : > { %2563 = vmatmul.f32.gmra.mxu0 %v5761_v44  ;;  %v7768_v44 = vld [vmem:[#allocation53_spill] sm:$0xff] }
 0x1e5   : > { %7760 = vst [vmem:[#allocation29_spill] sm:$0xff] %v6547_v8  ;;  %v1834_v23 = vadd.f32 %v1833_v40, %v7768_v44  ;;  %v7776_v44 = vld [vmem:[#allocation15_spill] sm:$0xff] }
 0x1e7   : > { %2459 = vmatmul.f32.gmra.mxu3 %v7763_v24  ;;  %3718 = vmatmul.msk.f32.gmra.mxu2 %vm4401_vm1, %v7764_v6 }
 0x1e8   : > { %v1836_v43 = vpop.f32.mrf.mxu1 }
 0x1e9   : > { %v6556_v58 = vpop.f32.mrf.mxu0 }
 0x1ea   : > { %7765 = vst [vmem:[#allocation45_spill] sm:$0xff] %v6556_v58  ;;  %v2056_v9 = vpop.f32.mrf.mxu3  ;;  %v1946_v46 = vpop.f32.mrf.mxu2 }
 0x1eb   : > { %v6558_v36 = vadd.f32 %v2056_v9, %v1944_v34  ;;  %2239 = vmatmul.f32.gmra.mxu1 %v7767_v20  ;;  %v1947_v24 = vadd.f32 %v1946_v46, %v1834_v23  ;;  %v7773_v34 = vld [vmem:[#allocation37_spill] sm:$0xff] }
 0x1ec   : > { %2566 = vmatmul.f32.gmra.mxu0 %v7755_v16  ;;  %v7774_v9 = vld [vmem:[#allocation57_spill] sm:$0xff] }
 0x1ed   : > { %7766 = vst [vmem:[#allocation30_spill] sm:$0xff] %v6558_v36  ;;  %v1837_v16 = vadd.f32 %v1836_v43, %v7774_v9  ;;  %v7775_v36 = vld [vmem:[#allocation39_spill] sm:$0xff]  ;;  %v7781_v9 = vld [vmem:[#allocation42_spill] sm:$0xff] }
 0x1ef   : > { %2462 = vmatmul.f32.gmra.mxu3 %v7769_v15  ;;  %2352 = vmatmul.f32.gmra.mxu2 %v7770_v5 }
 0x1f0   : > { %v1839_v38 = vpop.f32.mrf.mxu1 }
 0x1f1   : > { %v6565_v6 = vpop.f32.mrf.mxu0 }
 0x1f2   : > { %7771 = vst [vmem:[#allocation6_spill] sm:$0xff] %v6565_v6  ;;  %v2059_v8 = vpop.f32.mrf.mxu3  ;;  %v1949_v58 = vpop.f32.mrf.mxu2 }
 0x1f3   : > { %v6567_v32 = vadd.f32 %v2059_v8, %v1947_v24  ;;  %2242 = vmatmul.f32.gmra.mxu1 %v7773_v34  ;;  %v1950_v40 = vadd.f32 %v1949_v58, %v1837_v16  ;;  %v7779_v24 = vld [vmem:[#allocation41_spill] sm:$0xff] }
 0x1f4   : > { %2569 = vmatmul.f32.gmra.mxu0 %v7761_v12  ;;  %v7780_v12 = vld [vmem:[#allocation32_spill] sm:$0xff] }
 0x1f5   : > { %7772 = vst [vmem:[#allocation31_spill] sm:$0xff] %v6567_v32  ;;  %v1840_v43 = vadd.f32 %v1839_v38, %v7780_v12  ;;  %v7788_v12 = vld [vmem:[#allocation20_spill] sm:$0xff] }
 0x1f7   : > { %2465 = vmatmul.f32.gmra.mxu3 %v7775_v36  ;;  %3720 = vmatmul.msk.f32.gmra.mxu2 %vm4401_vm1, %v7776_v44  ;;  %v7782_v36 = vld [vmem:[#allocation17_spill] sm:$0xff] }
 0x1f8   : > { %v1842_v46 = vpop.f32.mrf.mxu1 }
 0x1f9   : > { %v6576_v23 = vpop.f32.mrf.mxu0 }
 0x1fa   : > { %7777 = vst [vmem:[#allocation49_spill] sm:$0xff] %v6576_v23  ;;  %v2062_v15 = vpop.f32.mrf.mxu3  ;;  %v1952_v5 = vpop.f32.mrf.mxu2 }
 0x1fb   : > { %v6578_v8 = vadd.f32 %v2062_v15, %v1950_v40  ;;  %2245 = vmatmul.f32.gmra.mxu1 %v7779_v24  ;;  %v1953_v58 = vadd.f32 %v1952_v5, %v1840_v43  ;;  %v7785_v40 = vld [vmem:[#allocation44_spill] sm:$0xff]  ;;  %v7786_v15 = vld [vmem:[#allocation35_spill] sm:$0xff] }
 0x1fc   : > { %2572 = vmatmul.f32.gmra.mxu0 %v7767_v20  ;;  %v1843_v20 = vadd.f32 %v1842_v46, %v7786_v15  ;;  %v7793_v15 = vld [vmem:[#allocation50_spill] sm:$0xff] }
 0x1fd   : > { %7778 = vst [vmem:[#allocation33_spill] sm:$0xff] %v6578_v8  ;;  %v7787_v8 = vld [vmem:[#allocation46_spill] sm:$0xff] }
 0x1ff   : > { %2468 = vmatmul.f32.gmra.mxu3 %v7781_v9  ;;  %2358 = vmatmul.f32.gmra.mxu2 %v7782_v36 }
 0x200   : > { %v1845_v16 = vpop.f32.mrf.mxu1 }
 0x201   : > { %v6585_v44 = vpop.f32.mrf.mxu0 }
 0x202   : > { %7783 = vst [vmem:[#allocation9_spill] sm:$0xff] %v6585_v44  ;;  %v2065_v32 = vpop.f32.mrf.mxu3  ;;  %v1955_v23 = vpop.f32.mrf.mxu2 }
 0x203   : > { %v6587_v6 = vadd.f32 %v2065_v32, %v1953_v58  ;;  %2248 = vmatmul.f32.gmra.mxu1 %v7785_v40  ;;  %v1956_v38 = vadd.f32 %v1955_v23, %v1843_v20  ;;  %v7791_v58 = vld [vmem:[#allocation48_spill] sm:$0xff] }
 0x204   : > { %2575 = vmatmul.f32.gmra.mxu0 %v7773_v34  ;;  %v7792_v34 = vld [vmem:[#allocation38_spill] sm:$0xff] }
 0x205   : > { %7784 = vst [vmem:[#allocation34_spill] sm:$0xff] %v6587_v6  ;;  %v1846_v46 = vadd.f32 %v1845_v16, %v7792_v34  ;;  %v7800_v34 = vld [vmem:[#allocation4_spill] sm:$0xff] }
 0x207   : > { %2471 = vmatmul.f32.gmra.mxu3 %v7787_v8  ;;  %3722 = vmatmul.msk.f32.gmra.mxu2 %vm4401_vm1, %v7788_v12  ;;  %v7794_v8 = vld [vmem:[#allocation22_spill] sm:$0xff] }
 0x208   : > { %v1848_v5 = vpop.f32.mrf.mxu1 }
 0x209   : > { %v6596_v43 = vpop.f32.mrf.mxu0 }
 0x20a   : > { %7789 = vst [vmem:[#allocation53_spill] sm:$0xff] %v6596_v43  ;;  %v2068_v9 = vpop.f32.mrf.mxu3  ;;  %v1958_v36 = vpop.f32.mrf.mxu2 }
 0x20b   : > { %v6598_v32 = vadd.f32 %v2068_v9, %v1956_v38  ;;  %2251 = vmatmul.f32.gmra.mxu1 %v7791_v58  ;;  %v1959_v23 = vadd.f32 %v1958_v36, %v1846_v46  ;;  %v7797_v38 = vld [vmem:[#allocation51_spill] sm:$0xff] }
 0x20c   : > { %2578 = vmatmul.f32.gmra.mxu0 %v7779_v24  ;;  %v7798_v9 = vld [vmem:[#allocation43_spill] sm:$0xff] }
 0x20d   : > { %7790 = vst [vmem:[#allocation36_spill] sm:$0xff] %v6598_v32  ;;  %v1849_v24 = vadd.f32 %v1848_v5, %v7798_v9  ;;  %v7799_v32 = vld [vmem:[#allocation54_spill] sm:$0xff] }
 0x20f   : > { %2474 = vmatmul.f32.gmra.mxu3 %v7793_v15  ;;  %2364 = vmatmul.f32.gmra.mxu2 %v7794_v8 }
 0x210   : > { %v1851_v20 = vpop.f32.mrf.mxu1 }
 0x211   : > { %v6605_v12 = vpop.f32.mrf.mxu0 }
 0x212   : > { %7795 = vst [vmem:[#allocation12_spill] sm:$0xff] %v6605_v12  ;;  %v2071_v6 = vpop.f32.mrf.mxu3  ;;  %v1961_v43 = vpop.f32.mrf.mxu2 }
 0x213   : > { %v6607_v44 = vadd.f32 %v2071_v6, %v1959_v23  ;;  %2254 = vmatmul.f32.gmra.mxu1 %v7797_v38  ;;  %v1962_v16 = vadd.f32 %v1961_v43, %v1849_v24  ;;  %v7803_v23 = vld [vmem:[#allocation55_spill] sm:$0xff] }
 0x214   : > { %2581 = vmatmul.f32.gmra.mxu0 %v7785_v40  ;;  %v7804_v40 = vld [vmem:[#allocation47_spill] sm:$0xff] }
 0x215   : > { %7796 = vst [vmem:[#allocation37_spill] sm:$0xff] %v6607_v44  ;;  %v1852_v5 = vadd.f32 %v1851_v20, %v7804_v40 }
 0x217   : > { %2477 = vmatmul.f32.gmra.mxu3 %v7799_v32  ;;  %3724 = vmatmul.msk.f32.gmra.mxu2 %vm4401_vm1, %v7800_v34  ;;  %v7805_v32 = vld [vmem:[#allocation7_spill] sm:$0xff] }
 0x218   : > { %v1854_v36 = vpop.f32.mrf.mxu1 }
 0x219   : > { %v6616_v46 = vpop.f32.mrf.mxu0 }
 0x21a   : > { %7801 = vst [vmem:[#allocation57_spill] sm:$0xff] %v6616_v46  ;;  %v2074_v15 = vpop.f32.mrf.mxu3  ;;  %v1964_v8 = vpop.f32.mrf.mxu2 }
 0x21b   : > { %v6618_v6 = vadd.f32 %v2074_v15, %v1962_v16  ;;  %2257 = vmatmul.f32.gmra.mxu1 %v7803_v23  ;;  %v1965_v43 = vadd.f32 %v1964_v8, %v1852_v5  ;;  %v7808_v16 = vld [vmem:[#allocation58_spill] sm:$0xff]  ;;  %v7809_v15 = vld [vmem:[#allocation52_spill] sm:$0xff] }
 0x21c   : > { %2584 = vmatmul.f32.gmra.mxu0 %v7791_v58  ;;  %v1855_v58 = vadd.f32 %v1854_v36, %v7809_v15 }
 0x21d   : > { %7802 = vst [vmem:[#allocation39_spill] sm:$0xff] %v6618_v6 }
 0x21f   : > { %2480 = vmatmul.f32.gmra.mxu3 %v6012_v33  ;;  %2370 = vmatmul.f32.gmra.mxu2 %v7805_v32  ;;  %v7810_v33 = vld [vmem:[#allocation10_spill] sm:$0xff] }
 0x220   : > { %v1857_v9 = vpop.f32.mrf.mxu1 }
 0x221   : > { %v6625_v24 = vpop.f32.mrf.mxu0 }
 0x222   : > { %7806 = vst [vmem:[#allocation15_spill] sm:$0xff] %v6625_v24  ;;  %v2077_v34 = vpop.f32.mrf.mxu3  ;;  %v1967_v44 = vpop.f32.mrf.mxu2 }
 0x223   : > { %v6627_v46 = vadd.f32 %v2077_v34, %v1965_v43  ;;  %2260 = vmatmul.f32.gmra.mxu1 %v7808_v16  ;;  %v1968_v20 = vadd.f32 %v1967_v44, %v1855_v58  ;;  %v7813_v34 = vld [vmem:[#allocation60_spill] sm:$0xff] }
 0x224   : > { %2587 = vmatmul.f32.gmra.mxu0 %v7797_v38  ;;  %v7814_v38 = vld [vmem:[#allocation56_spill] sm:$0xff] }
 0x225   : > { %7807 = vst [vmem:[#allocation41_spill] sm:$0xff] %v6627_v46  ;;  %v1858_v36 = vadd.f32 %v1857_v9, %v7814_v38 }
 0x227   : > { %2483 = vmatmul.f32.gmra.mxu3 %v6034_v50  ;;  %3726 = vmatmul.msk.f32.gmra.mxu2 %vm4401_vm1, %v7810_v33 }
 0x228   : > { %v1860_v8 = vpop.f32.mrf.mxu1 }
 0x229   : > { %v6636_v40 = vpop.f32.mrf.mxu0 }
 0x22a   : > { %7811 = vst [vmem:[#allocation32_spill] sm:$0xff] %v6636_v40  ;;  %v2080_v5 = vpop.f32.mrf.mxu3  ;;  %v1970_v32 = vpop.f32.mrf.mxu2 }
 0x22b   : > { %v6638_v43 = vadd.f32 %v2080_v5, %v1968_v20  ;;  %2263 = vmatmul.f32.gmra.mxu1 %v7813_v34  ;;  %v1971_v50 = vadd.f32 %v1970_v32, %v1858_v36  ;;  %v7817_v20 = vld [vmem:[#allocation62_spill] sm:$0xff]  ;;  %v7818_v5 = vld [vmem:[#allocation59_spill] sm:$0xff] }
 0x22c   : > { %2590 = vmatmul.f32.gmra.mxu0 %v7803_v23  ;;  %v1861_v23 = vadd.f32 %v1860_v8, %v7818_v5 }
 0x22d   : > { %7812 = vst [vmem:[#allocation42_spill] sm:$0xff] %v6638_v43 }
 0x22f   : > { %2486 = vmatmul.f32.gmra.mxu3 %v6062_v3  ;;  %2376 = vmatmul.f32.gmra.mxu2 %v4939_v13 }
 0x230   : > { %v2219_v44 = vpop.f32.mrf.mxu1 }
 0x231   : > { %v6645_v15 = vpop.f32.mrf.mxu0 }
 0x232   : > { %7815 = vst [vmem:[#allocation17_spill] sm:$0xff] %v6645_v15  ;;  %v2083_v58 = vpop.f32.mrf.mxu3  ;;  %v1973_v33 = vpop.f32.mrf.mxu2  ;;  %v7834_v15 = vld [vmem:[#allocation74_spill] sm:$0xff] }
 0x233   : > { %v6647_v46 = vadd.f32 %v2083_v58, %v1971_v50  ;;  %2266 = vmatmul.f32.gmra.mxu1 %v7817_v20  ;;  %v1974_v9 = vadd.f32 %v1973_v33, %v1861_v23  ;;  %v7821_v50 = vld [vmem:[#allocation64_spill] sm:$0xff]  ;;  %v7823_v58 = vld [vmem:[#allocation61_spill] sm:$0xff] }
 0x234   : > { %2593 = vmatmul.f32.gmra.mxu0 %v7808_v16  ;;  %v7824_v33 = vld [vmem:[#allocation65_spill] sm:$0xff] }
 0x235   : > { %7816 = vst [vmem:[#allocation44_spill] sm:$0xff] %v6647_v46  ;;  %v2107_v5 = vadd.f32 %v7824_v33, %v7823_v58  ;;  %v2690_v33 = vld [vmem:[%s297_s23] sm:$0xff] }
 0x236   : > { %v6693_v46 = vperm.slane %v2690_v33, 0 }
 0x237   : > { %2489 = vmatmul.f32.gmra.mxu3 %v6083_v48  ;;  %3728 = vmatmul.msk.f32.gmra.mxu2 %vm4401_vm1, %v5054_v4 }
 0x238   : > { %v2222_v13 = vpop.f32.mrf.mxu1 }
 0x239   : > { %v6656_v3 = vpop.f32.mrf.mxu0 }
 0x23a   : > { %7819 = vst [vmem:[#allocation35_spill] sm:$0xff] %v6656_v3  ;;  %v2086_v32 = vpop.f32.mrf.mxu3  ;;  %v2332_v38 = vpop.f32.mrf.mxu2 }
 0x23b   : > { %v6658_v36 = vadd.f32 %v2086_v32, %v1974_v9  ;;  %2269 = vmatmul.f32.gmra.mxu1 %v7821_v50 }
 0x23c   : > { %2596 = vmatmul.f32.gmra.mxu0 %v7813_v34  ;;  %v7825_v34 = vld [vmem:[#allocation21_spill] sm:$0xff] }
 0x23d   : > { %7820 = vst [vmem:[#allocation46_spill] sm:$0xff] %v6658_v36 }
 0x23f   : > { %2492 = vmatmul.f32.gmra.mxu3 %v6113_v30  ;;  %2382 = vmatmul.f32.gmra.mxu2 %v5290_v42  ;;  %v2220_v42 = vadd.f32 %v2219_v44, %v2107_v5  ;;  %v7830_v5 = vld [vmem:[#allocation23_spill] sm:$0xff] }
 0x240   : > { %v2225_v48 = vpop.f32.mrf.mxu1 }
 0x241   : > { %v6664_v16 = vpop.f32.mrf.mxu0  ;;  %v2333_v9 = vadd.f32 %v2332_v38, %v2220_v42 }
 0x242   : > { %7822 = vst [vmem:[#allocation20_spill] sm:$0xff] %v6664_v16  ;;  %v2445_v4 = vpop.f32.mrf.mxu3  ;;  %v2335_v8 = vpop.f32.mrf.mxu2  ;;  %v7827_v16 = vld [vmem:[#allocation69_spill] sm:$0xff] }
 0x243   : > { %2272 = vmatmul.f32.gmra.mxu1 %v6123_v51  ;;  %v2446_v44 = vadd.f32 %v2445_v4, %v2333_v9  ;;  %v7831_v4 = vld [vmem:[#allocation72_spill] sm:$0xff]  ;;  %v7833_v9 = vld [vmem:[#allocation70_spill] sm:$0xff] }
 0x244   : > { %2599 = vmatmul.f32.gmra.mxu0 %v7817_v20  ;;  %v7829_v20 = vld [vmem:[#allocation67_spill] sm:$0xff] }
 0x247   : > { %2495 = vmatmul.f32.gmra.mxu3 %v6134_v61  ;;  %3730 = vmatmul.msk.f32.gmra.mxu2 %vm4401_vm1, %v7825_v34  ;;  %v7828_v61 = vld [vmem:[#allocation63_spill] sm:$0xff]  ;;  %v6691_v34 = vld [vmem:[%s7413_s4] ss:$0 sm:$0xff] }
 0x248   : > { %v2228_v30 = vpop.f32.mrf.mxu1  ;;  %v2110_v58 = vadd.f32 %v7829_v20, %v7828_v61 }
 0x249   : > { %v6674_v23 = vpop.f32.mrf.mxu0 }
 0x24a   : > { %7826 = vst [vmem:[#allocation48_spill] sm:$0xff] %v6674_v23  ;;  %v2448_v32 = vpop.f32.mrf.mxu3  ;;  %v2338_v36 = vpop.f32.mrf.mxu2  ;;  %v2223_v38 = vadd.f32 %v2222_v13, %v2110_v58  ;;  %v7832_v13 = vld [vmem:[#allocation66_spill] sm:$0xff] }
 0x24b   : > { %2275 = vmatmul.f32.gmra.mxu1 %v7827_v16  ;;  %v2113_v20 = vadd.f32 %v7833_v9, %v7832_v13 }
 0x24c   : > { %2602 = vmatmul.f32.gmra.mxu0 %v7821_v50  ;;  %v2336_v3 = vadd.f32 %v2335_v8, %v2223_v38 }
 0x24d   : > { %v2226_v33 = vadd.f32 %v2225_v48, %v2113_v20  ;;  %v7839_v20 = vld [vmem:[#allocation78_spill] sm:$0xff] }
 0x24f   : > { %2498 = vmatmul.f32.gmra.mxu3 %v6164_v45  ;;  %2388 = vmatmul.f32.gmra.mxu2 %v7830_v5  ;;  %v2449_v5 = vadd.f32 %v2448_v32, %v2336_v3  ;;  %v7838_v32 = vld [vmem:[#allocation73_spill] sm:$0xff] }
 0x250   : > { %v2231_v50 = vpop.f32.mrf.mxu1 }
 0x251   : > { %v2558_v42 = vpop.f32.mrf.mxu0 }
 0x252   : > { %v2559_v23 = vadd.f32 %v2558_v42, %v2446_v44  ;;  %v2451_v43 = vpop.f32.mrf.mxu3  ;;  %v2341_v61 = vpop.f32.mrf.mxu2  ;;  %v7835_v44 = vld [vmem:[#allocation5_spill] sm:$0xff]  ;;  %v2339_v42 = vadd.f32 %v2338_v36, %v2226_v33 }
 0x253   : > { %2278 = vmatmul.f32.gmra.mxu1 %v7831_v4 }
 0x254   : > { %v2658_v45 = vadd.f32 %v6691_v34, %v2559_v23  ;;  %2605 = vmatmul.f32.gmra.mxu0 %v6123_v51  ;;  %v2452_v48 = vadd.f32 %v2451_v43, %v2339_v42  ;;  %v7841_v43 = vld [vmem:[#allocation80_spill] sm:$0xff] }
 0x256   : > { %v6701_v58 = vadd.f32 %v6693_v46, %v2658_v45  ;;  %v7836_v45 = vld [vmem:[#allocation76_spill] sm:$0xff] }
 0x257   : > { %2501 = vmatmul.f32.gmra.mxu3 %v7834_v15  ;;  %3732 = vmatmul.msk.f32.gmra.mxu2 %vm4401_vm1, %v7835_v44  ;;  %v7837_v15 = vld [vmem:[#allocation68_spill] sm:$0xff] }
 0x258   : > { %v3743_v8 = vmul.f32 -1.442695, %v6701_v58  ;;  %v6708_v38 = vpop.f32.mrf.mxu1  ;;  %v2116_v44 = vadd.f32 %v7838_v32, %v7837_v15 }
 0x259   : > { %v2561_v23 = vpop.f32.mrf.mxu0 }
 0x25a   : > { %3967 = vpow2.f32 %v3743_v8  ;;  %v2562_v51 = vadd.f32 %v2561_v23, %v2449_v5  ;;  %v2454_v13 = vpop.f32.mrf.mxu3  ;;  %v2344_v9 = vpop.f32.mrf.mxu2  ;;  %v7840_v8 = vld [vmem:[#allocation8_spill] sm:$0xff]  ;;  %v2229_v33 = vadd.f32 %v2228_v30, %v2116_v44  ;;  %v7842_v44 = vld [vmem:[#allocation82_spill] sm:$0xff] }
 0x25b   : > { %2281 = vmatmul.f32.gmra.mxu1 %v7836_v45 }
 0x25c   : > { %v2659_v3 = vadd.f32 %v6691_v34, %v2562_v51  ;;  %2608 = vmatmul.f32.gmra.mxu0 %v7827_v16  ;;  %v2342_v24 = vadd.f32 %v2341_v61, %v2229_v33  ;;  %v7844_v61 = vld [vmem:[#allocation71_spill] sm:$0xff] }
 0x25e   : > { %v6716_v40 = vadd.f32 %v6693_v46, %v2659_v3  ;;  %v2455_v30 = vadd.f32 %v2454_v13, %v2342_v24 }
 0x25f   : > { %2504 = vmatmul.f32.gmra.mxu3 %v7839_v20  ;;  %2394 = vmatmul.f32.gmra.mxu2 %v7840_v8  ;;  %v7843_v20 = vld [vmem:[#allocation11_spill] sm:$0xff] }
 0x260   : > { %v3968_v36 = vpop.eup %3967  ;;  %v3744_v5 = vmul.f32 -1.442695, %v6716_v40  ;;  %v6721_v23 = vpop.f32.mrf.mxu1 }
 0x261   : > { %v2820_v51 = vadd.f32 1.0, %v3968_v36  ;;  %v2564_v6 = vpop.f32.mrf.mxu0 }
 0x262   : > { %3969 = vpow2.f32 %v3744_v5  ;;  %v2565_v16 = vadd.f32 %v2564_v6, %v2452_v48  ;;  %v2457_v15 = vpop.f32.mrf.mxu3  ;;  %v6723_v32 = vpop.f32.mrf.mxu2  ;;  %v7845_v48 = vld [vmem:[#allocation77_spill] sm:$0xff] }
 0x263   : > { %3971 = vrcp.f32 %v2820_v51  ;;  %2284 = vmatmul.f32.gmra.mxu1 %v7841_v43  ;;  %v2119_v8 = vadd.f32 %v7845_v48, %v7844_v61  ;;  %v2861_v26 = vand.u32 2147483647, %v2820_v51  ;;  %vm2857_vm4 = vweird.f32 %v2820_v51 }
 0x264   : > { %v2660_v42 = vadd.f32 %v6691_v34, %v2565_v16  ;;  %2611 = vmatmul.f32.gmra.mxu0 %v7831_v4 }
 0x265   : > { %v2232_v24 = vadd.f32 %v2231_v50, %v2119_v8  ;;  %v7848_v8 = vld [vmem:[#allocation14_spill] sm:$0xff]  ;;  %vm2862_vm8 = vcmp.eq.f32.partialorder %v2861_v26, 8.507059e+37 }
 0x266   : > { %v6729_v3 = vadd.f32 %v6693_v46, %v2660_v42 }
 0x267   : > { %2507 = vmatmul.f32.gmra.mxu3 %v7842_v44  ;;  %3734 = vmatmul.msk.f32.gmra.mxu2 %vm4401_vm1, %v7843_v20  ;;  %v7846_v20 = vld [vmem:[#allocation84_spill] sm:$0xff]  ;;  %v2345_v47 = vadd.f32 %v2344_v9, %v2232_v24  ;;  %v7849_v24 = vld [vmem:[#allocation75_spill] sm:$0xff] }
 0x268   : > { %v3970_v6 = vpop.eup %3969  ;;  %v3745_v36 = vmul.f32 -1.442695, %v6729_v3  ;;  %v6738_v5 = vpop.f32.mrf.mxu1 }
 0x269   : > { %v3972_v33 = vpop.eup %3971  ;;  %v6740_v4 = vadd.f32 1.0, %v3970_v6  ;;  %v2567_v16 = vpop.f32.mrf.mxu0  ;;  %v2863_v6 = vand.u32 2147483648, %v2820_v51 }
 0x26a   : > { %v2853_v42 = vmul.f32 %v3972_v33, %v2820_v51  ;;  %3973 = vpow2.f32 %v3745_v36  ;;  %v2568_v13 = vadd.f32 %v2567_v16, %v2455_v30  ;;  %v2460_v44 = vpop.f32.mrf.mxu3  ;;  %v6742_v12 = vpop.f32.mrf.mxu2  ;;  %vm2858_vm3 = vweird.f32 %v3972_v33  ;;  %v7847_v30 = vld [vmem:[#allocation86_spill] sm:$0xff] }
 0x26b   : > { %3975 = vrcp.f32 %v6740_v4  ;;  %2287 = vmatmul.f32.gmra.mxu1 %v7846_v20  ;;  %vm2859_vm6 = vmor %vm2857_vm4, %vm2858_vm3  ;;  %vm2872_vm11 = vweird.f32 %v6740_v4 }
 0x26c   : > { %v2854_v61 = vsub.f32 1.0, %v2853_v42  ;;  %v2661_v48 = vadd.f32 %v6691_v34, %v2568_v13  ;;  %2614 = vmatmul.f32.gmra.mxu0 %v7836_v45  ;;  %v2458_v13 = vadd.f32 %v2457_v15, %v2345_v47 }
 0x26e   : > { %v2855_v0 = vmul.f32 %v3972_v33, %v2854_v61  ;;  %v6749_v50 = vadd.f32 %v6693_v46, %v2661_v48  ;;  %v7850_v61 = vld [vmem:[#allocation81_spill] sm:$0xff]  ;;  %v2864_v48 = vor.u32 1.1754944e-38, %v2863_v6 }
 0x26f   : > { %2510 = vmatmul.f32.gmra.mxu3 %v7847_v30  ;;  %2400 = vmatmul.f32.gmra.mxu2 %v7848_v8  ;;  %v2122_v2 = vadd.f32 %v7850_v61, %v7849_v24  ;;  %v2878_v61 = vand.u32 2147483648, %v6740_v4 }
 0x270   : > { %v3974_v36 = vpop.eup %3973  ;;  %v2856_v16 = vadd.f32 %v3972_v33, %v2855_v0  ;;  %v3746_v42 = vmul.f32 -1.442695, %v6749_v50  ;;  %v6754_v45 = vpop.f32.mrf.mxu1 }
 0x271   : > { %v3976_v9 = vpop.eup %3975  ;;  %v6758_v1 = vadd.f32 1.0, %v3974_v36  ;;  %v2570_v30 = vpop.f32.mrf.mxu0  ;;  %v2235_v15 = vadd.f32 %v6708_v38, %v2122_v2  ;;  %v2876_v2 = vand.u32 2147483647, %v6740_v4 }
 0x272   : > { %v2860_v31 = vsel %vm2859_vm6, %v3972_v33, %v2856_v16  ;;  %v2868_v0 = vmul.f32 %v3976_v9, %v6740_v4  ;;  %3977 = vpow2.f32 %v3746_v42  ;;  %v2463_v51 = vpop.f32.mrf.mxu3  ;;  %v6761_v8 = vpop.f32.mrf.mxu2  ;;  %v7851_v33 = vld [vmem:[#allocation13_spill] sm:$0xff]  ;;  %v2571_v36 = vadd.f32 %v2570_v30, %v2458_v13  ;;  %v7852_v16 = vld [vmem:[#allocation79_spill] sm:$0xff]  ;;  %v7854_v13 = vld [vmem:[#allocation16_spill] sm:$0xff] }
 0x273   : > { %v2865_v47 = vsel %vm2862_vm8, %v2864_v48, %v2860_v31  ;;  %3979 = vrcp.f32 %v6758_v1  ;;  %2290 = vmatmul.f32.gmra.mxu1 %v7851_v33  ;;  %v7853_v42 = vld [vmem:[#allocation85_spill] sm:$0xff]  ;;  %v2348_v17 = vadd.f32 %v6723_v32, %v2235_v15  ;;  %vm2873_vm10 = vweird.f32 %v3976_v9 }
 0x274   : > { %v3332_v26 = vmul.f32 %v2865_v47, %v6701_v58  ;;  %v2869_v6 = vsub.f32 1.0, %v2868_v0  ;;  %2617 = vmatmul.f32.gmra.mxu0 %v7841_v43  ;;  %v2125_v24 = vadd.f32 %v7853_v42, %v7852_v16  ;;  %v2662_v38 = vadd.f32 %v6691_v34, %v2571_v36  ;;  %vm2874_vm12 = vmor %vm2872_vm11, %vm2873_vm10 }
 0x275   : > { %v2879_v47 = vor.u32 1.1754944e-38, %v2878_v61  ;;  %vm2877_vm13 = vcmp.eq.f32.partialorder %v2876_v2, 8.507059e+37  ;;  %vm2887_vm15 = vweird.f32 %v6758_v1 }
 0x276   : > { %3364 = vst [vmem:[%s6768_s30] sm:$0xff] %v3332_v26  ;;  %v2870_v31 = vmul.f32 %v3976_v9, %v2869_v6  ;;  %v2238_v58 = vadd.f32 %v6721_v23, %v2125_v24  ;;  %v6789_v32 = vadd.f32 %v6693_v46, %v2662_v38  ;;  %v2461_v23 = vadd.f32 %v2460_v44, %v2348_v17  ;;  %v7856_v38 = vld [vmem:[#allocation88_spill] sm:$0xff]  ;;  %v7857_v17 = vld [vmem:[#allocation90_spill] sm:$0xff] }
 0x277   : > { %2513 = vmatmul.f32.gmra.mxu3 %v6303_v22  ;;  %3736 = vmatmul.msk.f32.gmra.mxu2 %vm4401_vm1, %v7854_v13  ;;  %v3433_v2 = vmul.f32 %v3332_v26, %v3332_v26 }
 0x278   : > { %v3978_v43 = vpop.eup %3977  ;;  %v2871_v48 = vadd.f32 %v3976_v9, %v2870_v31  ;;  %v6791_v30 = vpop.f32.mrf.mxu1  ;;  %v2351_v6 = vadd.f32 %v6742_v12, %v2238_v58  ;;  %v3747_v4 = vmul.f32 -1.442695, %v6789_v32  ;;  %v7855_v31 = vld [vmem:[#allocation83_spill] sm:$0xff]  ;;  %v2893_v58 = vand.u32 2147483648, %v6758_v1 }
 0x279   : > { %v3980_v0 = vpop.eup %3979  ;;  %v6793_v15 = vadd.f32 1.0, %v3978_v43  ;;  %v2573_v22 = vpop.f32.mrf.mxu0  ;;  %v2128_v13 = vadd.f32 %v7856_v38, %v7855_v31 }
 0x27a   : > { %v2875_v36 = vsel %vm2874_vm12, %v3976_v9, %v2871_v48  ;;  %v2883_v16 = vmul.f32 %v3980_v0, %v6758_v1  ;;  %v2466_v42 = vpop.f32.mrf.mxu3  ;;  %v6798_v24 = vpop.f32.mrf.mxu2  ;;  %v2891_v9 = vand.u32 2147483647, %v6758_v1  ;;  %v2574_v43 = vadd.f32 %v2573_v22, %v2461_v23 }
 0x27b   : > { %v2880_v61 = vsel %vm2877_vm13, %v2879_v47, %v2875_v36  ;;  %3981 = vrcp.f32 %v6793_v15  ;;  %2293 = vmatmul.f32.gmra.mxu1 %v7857_v17  ;;  %v2464_v48 = vadd.f32 %v2463_v51, %v2351_v6  ;;  %vm2888_vm14 = vweird.f32 %v3980_v0 }
 0x27c   : > { %v3333_v12 = vmul.f32 %v2880_v61, %v6716_v40  ;;  %v2884_v44 = vsub.f32 1.0, %v2883_v16  ;;  %3983 = vpow2.f32 %v3747_v4  ;;  %2620 = vmatmul.f32.gmra.mxu0 %v7846_v20  ;;  %v2663_v38 = vadd.f32 %v6691_v34, %v2574_v43  ;;  %v7858_v16 = vld [vmem:[#allocation19_spill] sm:$0xff]  ;;  %vm2889_vm0 = vmor %vm2887_vm15, %vm2888_vm14 }
 0x27d   : > { %v2241_v40 = vadd.f32 %v6738_v5, %v2128_v13  ;;  %vm2892_vm7 = vcmp.eq.f32.partialorder %v2891_v9, 8.507059e+37  ;;  %v7860_v43 = vld [vmem:[#allocation91_spill] sm:$0xff]  ;;  %v2906_v9 = vand.u32 2147483647, %v6793_v15  ;;  %vm2902_vm3 = vweird.f32 %v6793_v15 }
 0x27e   : > { %3365 = vst [vmem:[%s6768_s30 + $0x8] sm:$0xff] %v3333_v12  ;;  %v3396_v31 = vadd.f32 %v3333_v12, %v3332_v26  ;;  %v3434_v47 = vmul.f32 %v3333_v12, %v3333_v12  ;;  %v2885_v36 = vmul.f32 %v3980_v0, %v2884_v44  ;;  %v2894_v26 = vor.u32 1.1754944e-38, %v2893_v58 }
 0x27f   : > { %2516 = vmatmul.f32.gmra.mxu3 %v6340_v11  ;;  %2406 = vmatmul.f32.gmra.mxu2 %v7858_v16  ;;  %v6817_v23 = vadd.f32 %v6693_v46, %v2663_v38  ;;  %v2354_v6 = vadd.f32 %v6761_v8, %v2241_v40  ;;  %v2908_v40 = vand.u32 2147483648, %v6793_v15  ;;  %vm2907_vm6 = vcmp.eq.f32.partialorder %v2906_v9, 8.507059e+37 }
 0x280   : > { %v3465_v4 = vadd.f32 %v3434_v47, %v3433_v2  ;;  %v2886_v20 = vadd.f32 %v3980_v0, %v2885_v36  ;;  %v6814_v61 = vpop.f32.mrf.mxu1  ;;  %v7859_v2 = vld [vmem:[#allocation87_spill] sm:$0xff] }
 0x281   : > { %v3982_v51 = vpop.eup %3981  ;;  %v2576_v22 = vpop.f32.mrf.mxu0  ;;  %v2131_v47 = vadd.f32 %v7860_v43, %v7859_v2  ;;  %v3748_v38 = vmul.f32 -1.442695, %v6817_v23  ;;  %v2467_v16 = vadd.f32 %v2466_v42, %v2354_v6 }
 0x282   : > { %v3984_v5 = vpop.eup %3983  ;;  %v2890_v13 = vsel %vm2889_vm0, %v3980_v0, %v2886_v20  ;;  %v2898_v11 = vmul.f32 %v3982_v51, %v6793_v15  ;;  %v2577_v12 = vadd.f32 %v2576_v22, %v2464_v48  ;;  %v2469_v44 = vpop.f32.mrf.mxu3  ;;  %vm2903_vm9 = vweird.f32 %v3982_v51 }
 0x283   : > { %v6821_v1 = vpop.f32.mrf.mxu2  ;;  %v2895_v58 = vsel %vm2892_vm7, %v2894_v26, %v2890_v13  ;;  %v6825_v36 = vadd.f32 1.0, %v3984_v5  ;;  %2296 = vmatmul.f32.gmra.mxu1 %v6352_v60  ;;  %v2244_v5 = vadd.f32 %v6754_v45, %v2131_v47  ;;  %vm2904_vm4 = vmor %vm2902_vm3, %vm2903_vm9 }
 0x284   : > { %v3334_v8 = vmul.f32 %v2895_v58, %v6729_v3  ;;  %v2899_v0 = vsub.f32 1.0, %v2898_v11  ;;  %v2664_v48 = vadd.f32 %v6691_v34, %v2577_v12  ;;  %2623 = vmatmul.f32.gmra.mxu0 %v7851_v33 }
 0x285   : > { %3985 = vrcp.f32 %v6825_v36  ;;  %v2357_v45 = vadd.f32 %v6798_v24, %v2244_v5  ;;  %v7861_v24 = vld [vmem:[#allocation89_spill] sm:$0xff]  ;;  %vm2917_vm10 = vweird.f32 %v6825_v36 }
 0x286   : > { %3366 = vst [vmem:[%s6768_s30 + $0x10] sm:$0xff] %v3334_v8  ;;  %v3397_v20 = vadd.f32 %v3396_v31, %v3334_v8  ;;  %v3435_v26 = vmul.f32 %v3334_v8, %v3334_v8  ;;  %v2900_v22 = vmul.f32 %v3982_v51, %v2899_v0  ;;  %3987 = vpow2.f32 %v3748_v38 }
 0x287   : > { %v6837_v3 = vadd.f32 %v6693_v46, %v2664_v48  ;;  %2519 = vmatmul.f32.gmra.mxu3 %v6374_v28  ;;  %3738 = vmatmul.msk.f32.gmra.mxu2 %vm4401_vm1, %v5541_v19  ;;  %v2909_v31 = vor.u32 1.1754944e-38, %v2908_v40  ;;  %v2470_v0 = vadd.f32 %v2469_v44, %v2357_v45 }
 0x288   : > { %v3466_v33 = vadd.f32 %v3465_v4, %v3435_v26  ;;  %v2901_v13 = vadd.f32 %v3982_v51, %v2900_v22  ;;  %v6845_v42 = vpop.f32.mrf.mxu1  ;;  %v2923_v26 = vand.u32 2147483648, %v6825_v36 }
 0x289   : > { %v3749_v6 = vmul.f32 -1.442695, %v6837_v3  ;;  %v2579_v11 = vpop.f32.mrf.mxu0 }
 0x28a   : > { %v2905_v12 = vsel %vm2904_vm4, %v3982_v51, %v2901_v13  ;;  %v2580_v28 = vadd.f32 %v2579_v11, %v2467_v16  ;;  %v2472_v2 = vpop.f32.mrf.mxu3  ;;  %v2134_v51 = vadd.f32 %v6368_v37, %v7861_v24 }
 0x28b   : > { %v6850_v19 = vpop.f32.mrf.mxu2  ;;  %v3986_v4 = vpop.eup %3985  ;;  %v2910_v43 = vsel %vm2907_vm6, %v2909_v31, %v2905_v12  ;;  %3989 = vpow2.f32 %v3749_v6  ;;  %2299 = vmatmul.f32.gmra.mxu1 %v6389_v39 }
 0x28c   : > { %v3988_v15 = vpop.eup %3987  ;;  %v3335_v47 = vmul.f32 %v2910_v43, %v6749_v50  ;;  %v2913_v58 = vmul.f32 %v3986_v4, %v6825_v36  ;;  %v2665_v38 = vadd.f32 %v6691_v34, %v2580_v28  ;;  %2626 = vmatmul.f32.gmra.mxu0 %v7857_v17  ;;  %v2921_v50 = vand.u32 2147483647, %v6825_v36  ;;  %v7862_v36 = vld [vmem:[#allocation92_spill] sm:$0xff] }
 0x28d   : > { %v6859_v8 = vadd.f32 1.0, %v3988_v15  ;;  %v2247_v17 = vadd.f32 %v6791_v30, %v2134_v51  ;;  %vm2918_vm8 = vweird.f32 %v3986_v4  ;;  %v2137_v12 = vadd.f32 %v6418_v52, %v7862_v36 }
 0x28e   : > { %3367 = vst [vmem:[%s6768_s30 + $0x18] sm:$0xff] %v3335_v47  ;;  %v3398_v9 = vadd.f32 %v3397_v20, %v3335_v47  ;;  %v3436_v48 = vmul.f32 %v3335_v47, %v3335_v47  ;;  %v2914_v40 = vsub.f32 1.0, %v2913_v58  ;;  %v6863_v16 = vadd.f32 %v6693_v46, %v2665_v38  ;;  %vm2919_vm11 = vmor %vm2917_vm10, %vm2918_vm8 }
 0x28f   : > { %3991 = vrcp.f32 %v6859_v8  ;;  %2522 = vmatmul.f32.gmra.mxu3 %v6421_v10  ;;  %2412 = vmatmul.f32.gmra.mxu2 %v5649_v18  ;;  %v2360_v31 = vadd.f32 %v6821_v1, %v2247_v17  ;;  %vm2922_vm12 = vcmp.eq.f32.partialorder %v2921_v50, 8.507059e+37  ;;  %v2936_v38 = vand.u32 2147483647, %v6859_v8 }
 0x290   : > { %v3467_v37 = vadd.f32 %v3466_v33, %v3436_v48  ;;  %v2915_v44 = vmul.f32 %v3986_v4, %v2914_v40  ;;  %v3750_v20 = vmul.f32 -1.442695, %v6863_v16  ;;  %v6872_v22 = vpop.f32.mrf.mxu1  ;;  %v2924_v33 = vor.u32 1.1754944e-38, %v2923_v26 }
 0x291   : > { %v3990_v5 = vpop.eup %3989  ;;  %v2582_v13 = vpop.f32.mrf.mxu0  ;;  %v2473_v58 = vadd.f32 %v2472_v2, %v2360_v31  ;;  %vm2932_vm14 = vweird.f32 %v6859_v8  ;;  %vm2937_vm15 = vcmp.eq.f32.partialorder %v2936_v38, 8.507059e+37 }
 0x292   : > { %v2916_v6 = vadd.f32 %v3986_v4, %v2915_v44  ;;  %v6876_v11 = vadd.f32 1.0, %v3990_v5  ;;  %3993 = vpow2.f32 %v3750_v20  ;;  %v2583_v10 = vadd.f32 %v2582_v13, %v2470_v0  ;;  %v2475_v30 = vpop.f32.mrf.mxu3 }
 0x293   : > { %v6878_v18 = vpop.f32.mrf.mxu2  ;;  %2302 = vmatmul.f32.gmra.mxu1 %v6434_v27  ;;  %v2143_v0 = vadd.f32 %v6465_v49, %v6423_v14 }
 0x294   : > { %v2920_v45 = vsel %vm2919_vm11, %v3986_v4, %v2916_v6  ;;  %3995 = vrcp.f32 %v6876_v11  ;;  %2629 = vmatmul.f32.gmra.mxu0 %v6352_v60  ;;  %v2666_v43 = vadd.f32 %v6691_v34, %v2583_v10  ;;  %v2140_v4 = vadd.f32 %v6446_v7, %v6381_v25 }
 0x295   : > { %v3992_v1 = vpop.eup %3991  ;;  %v2925_v28 = vsel %vm2922_vm12, %v2924_v33, %v2920_v45  ;;  %v2250_v60 = vadd.f32 %v6814_v61, %v2137_v12  ;;  %v2938_v25 = vand.u32 2147483648, %v6859_v8  ;;  %v2951_v5 = vand.u32 2147483647, %v6876_v11 }
 0x296   : > { %v3336_v15 = vmul.f32 %v2925_v28, %v6789_v32  ;;  %v2928_v47 = vmul.f32 %v3992_v1, %v6859_v8  ;;  %v6892_v24 = vadd.f32 %v6693_v46, %v2666_v43  ;;  %vm2933_vm13 = vweird.f32 %v3992_v1 }
 0x297   : > { %2525 = vmatmul.f32.gmra.mxu3 %v6449_v53  ;;  %3740 = vmatmul.msk.f32.gmra.mxu2 %vm4401_vm1, %v6453_v29  ;;  %v2363_v40 = vadd.f32 %v6850_v19, %v2250_v60  ;;  %v2253_v49 = vadd.f32 %v6845_v42, %v2140_v4  ;;  %vm2934_vm0 = vmor %vm2932_vm14, %vm2933_vm13  ;;  %v2953_v8 = vand.u32 2147483648, %v6876_v11  ;;  %v1486_v42 = vrot.slane %v6484_v57, 2 }
 0x298   : > { %v3994_v52 = vpop.eup %3993  ;;  %3368 = vst [vmem:[%s6768_s30 + $0x20] sm:$0xff] %v3336_v15  ;;  %v3399_v32 = vadd.f32 %v3398_v9, %v3336_v15  ;;  %v3437_v2 = vmul.f32 %v3336_v15, %v3336_v15  ;;  %v2929_v51 = vsub.f32 1.0, %v2928_v47  ;;  %v6901_v7 = vpop.f32.mrf.mxu1  ;;  %v3751_v53 = vmul.f32 -1.442695, %v6892_v24 }
 0x299   : > { %v6905_v48 = vadd.f32 1.0, %v3994_v52  ;;  %v2585_v61 = vpop.f32.mrf.mxu0  ;;  %v2476_v6 = vadd.f32 %v2475_v30, %v2363_v40  ;;  %v1487_v10 = vrot.slane %v6474_v54, 2  ;;  %vm2947_vm9 = vweird.f32 %v6876_v11 }
 0x29a   : > { %v3996_v29 = vpop.eup %3995  ;;  %v3468_v50 = vadd.f32 %v3467_v37, %v3437_v2  ;;  %v2930_v26 = vmul.f32 %v3992_v1, %v2929_v51  ;;  %v2586_v9 = vadd.f32 %v2585_v61, %v2473_v58  ;;  %v6909_v17 = vpop.f32.mrf.mxu3  ;;  %v2939_v37 = vor.u32 1.1754944e-38, %v2938_v25 }
 0x29b   : > { %v6911_v44 = vpop.f32.mrf.mxu2  ;;  %v2943_v14 = vmul.f32 %v3996_v29, %v6876_v11  ;;  %3997 = vrcp.f32 %v6905_v48  ;;  %2305 = vmatmul.f32.gmra.mxu1 %v6458_v55  ;;  %vm2948_vm7 = vweird.f32 %v3996_v29  ;;  %v2366_v30 = vadd.f32 %v6878_v18, %v2253_v49 }
 0x29c   : > { %v2931_v19 = vadd.f32 %v3992_v1, %v2930_v26  ;;  %3999 = vpow2.f32 %v3751_v53  ;;  %2632 = vmatmul.f32.gmra.mxu0 %v6389_v39  ;;  %v2667_v13 = vadd.f32 %v6691_v34, %v2586_v9  ;;  %v2256_v57 = vadd.f32 %v6872_v22, %v2143_v0  ;;  %vm2949_vm4 = vmor %vm2947_vm9, %vm2948_vm7 }
 0x29d   : > { %v2944_v20 = vsub.f32 1.0, %v2943_v14  ;;  %vm6935_vm3 = vcmp.eq.f32.partialorder %v2951_v5, 8.507059e+37  ;;  %v2954_v15 = vor.u32 1.1754944e-38, %v2953_v8  ;;  %v6944_v58 = vsel %vm1364_vm5, %v1486_v42, %v1487_v10 }
 0x29e   : > { %v2935_v31 = vsel %vm2934_vm0, %v3992_v1, %v2931_v19  ;;  %v6925_v39 = vadd.f32 %v6693_v46, %v2667_v13  ;;  %v2966_v25 = vand.u32 2147483647, %v6905_v48  ;;  %v2968_v53 = vand.u32 2147483648, %v6905_v48 }
 0x29f   : > { %v2940_v33 = vsel %vm2937_vm15, %v2939_v37, %v2935_v31  ;;  %v2945_v45 = vmul.f32 %v3996_v29, %v2944_v20  ;;  %2528 = vmatmul.f32.gmra.mxu3 %v6498_v21  ;;  %2418 = vmatmul.f32.gmra.mxu2 %v6474_v54  ;;  %v1489_v61 = vrot.slane %v6501_v41, 2  ;;  %vm2962_vm8 = vweird.f32 %v6905_v48 }
 0x2a0   : > { %v3337_v36 = vmul.f32 %v2940_v33, %v6817_v23  ;;  %v6933_v1 = vpop.f32.mrf.mxu1  ;;  %v3752_v21 = vmul.f32 -1.442695, %v6925_v39  ;;  %v2369_v14 = vadd.f32 %v6911_v44, %v2256_v57  ;;  %vm2967_vm11 = vcmp.eq.f32.partialorder %v2966_v25, 8.507059e+37 }
 0x2a1   : > { %v3998_v12 = vpop.eup %3997  ;;  %v2946_v28 = vadd.f32 %v3996_v29, %v2945_v45  ;;  %v2588_v54 = vpop.f32.mrf.mxu0  ;;  %v6975_v59 = vsel %vm1364_vm5, %v1487_v10, %v1489_v61  ;;  %v2146_v10 = vadd.f32 %v6480_v56, %v6451_v62 }
 0x2a2   : > { %v4000_v47 = vpop.eup %3999  ;;  %3369 = vst [vmem:[%s6768_s30 + $0x28] sm:$0xff] %v3337_v36  ;;  %v3400_v23 = vadd.f32 %v3399_v32, %v3337_v36  ;;  %v3438_v11 = vmul.f32 %v3337_v36, %v3337_v36  ;;  %v2958_v22 = vmul.f32 %v3998_v12, %v6905_v48  ;;  %v2481_v18 = vpop.f32.mrf.mxu3  ;;  %4001 = vpow2.f32 %v3752_v21 }
 0x2a3   : > { %v6946_v4 = vpop.f32.mrf.mxu2  ;;  %v2950_v38 = vsel %vm2949_vm4, %v3996_v29, %v2946_v28  ;;  %v6948_v60 = vadd.f32 1.0, %v4000_v47  ;;  %v2589_v52 = vadd.f32 %v2588_v54, %v2476_v6  ;;  %2308 = vmatmul.f32.gmra.mxu1 %v6944_v58  ;;  %vm2963_vm6 = vweird.f32 %v3998_v12 }
 0x2a4   : > { %v3469_v32 = vadd.f32 %v3468_v50, %v3438_v11  ;;  %v2955_v2 = vsel %vm6935_vm3, %v2954_v15, %v2950_v38  ;;  %v2959_v51 = vsub.f32 1.0, %v2958_v22  ;;  %2635 = vmatmul.f32.gmra.mxu0 %v6434_v27  ;;  %v2479_v50 = vadd.f32 %v6909_v17, %v2366_v30  ;;  %v7865_v27 = vld [vmem:[#allocation2_spill] sm:$0xff]  ;;  %vm2964_vm10 = vmor %vm2962_vm8, %vm2963_vm6  ;;  %v7866_v15 = vld [vmem:[#allocation24_spill] sm:$0xff] }
 0x2a5   : > { %v3338_v0 = vmul.f32 %v2955_v2, %v6837_v3  ;;  %4003 = vrcp.f32 %v6948_v60  ;;  %v2668_v29 = vadd.f32 %v6691_v34, %v2589_v52  ;;  %v2482_v45 = vadd.f32 %v2481_v18, %v2369_v14 }
 0x2a6   : > { %v2960_v40 = vmul.f32 %v3998_v12, %v2959_v51  ;;  %v2981_v28 = vand.u32 2147483647, %v6948_v60  ;;  %v2259_v43 = vadd.f32 %v6901_v7, %v2146_v10  ;;  %vm2977_vm5 = vweird.f32 %v6948_v60 }
 0x2a7   : > { %3370 = vst [vmem:[%s6768_s30 + $0x30] sm:$0xff] %v3338_v0  ;;  %v3401_v26 = vadd.f32 %v3400_v23, %v3338_v0  ;;  %v3439_v9 = vmul.f32 %v3338_v0, %v3338_v0  ;;  %2531 = vmatmul.f32.gmra.mxu3 %v6516_v63  ;;  %3742 = vmatmul.msk.f32.gmra.mxu2 %vm4401_vm1, %v7865_v27  ;;  %v2969_v63 = vor.u32 1.1754944e-38, %v2968_v53 }
 0x2a8   : > { %v2961_v3 = vadd.f32 %v3998_v12, %v2960_v40  ;;  %v6968_v41 = vadd.f32 %v6693_v46, %v2668_v29  ;;  %v6971_v49 = vpop.f32.mrf.mxu1  ;;  %v4002_v17 = vpop.eup %4001  ;;  %v2372_v22 = vadd.f32 %v6946_v4, %v2259_v43  ;;  %vm2982_vm13 = vcmp.eq.f32.partialorder %v2981_v28, 8.507059e+37  ;;  %v7867_v4 = vld [vmem:[#allocation93_spill] sm:$0xff] }
 0x2a9   : > { %v3470_v19 = vadd.f32 %v3469_v32, %v3439_v9  ;;  %v2591_v37 = vpop.f32.mrf.mxu0  ;;  %v6977_v48 = vadd.f32 1.0, %v4002_v17  ;;  %v2149_v0 = vadd.f32 %v7867_v4, %v6467_v35 }
 0x2aa   : > { %v2965_v20 = vsel %vm2964_vm10, %v3998_v12, %v2961_v3  ;;  %v3753_v5 = vmul.f32 -1.442695, %v6968_v41  ;;  %v2592_v8 = vadd.f32 %v2591_v37, %v2479_v50  ;;  %v2484_v44 = vpop.f32.mrf.mxu3 }
 0x2ab   : > { %v6980_v13 = vpop.f32.mrf.mxu2  ;;  %v4004_v31 = vpop.eup %4003  ;;  %v2970_v6 = vsel %vm2967_vm11, %v2969_v63, %v2965_v20  ;;  %2311 = vmatmul.f32.gmra.mxu1 %v6975_v59  ;;  %4005 = vrcp.f32 %v6977_v48  ;;  %v2998_v29 = vand.u32 2147483648, %v6977_v48  ;;  %v2485_v50 = vadd.f32 %v2484_v44, %v2372_v22 }
 0x2ac   : > { %v3339_v42 = vmul.f32 %v2970_v6, %v6863_v16  ;;  %v2973_v33 = vmul.f32 %v4004_v31, %v6948_v60  ;;  %2638 = vmatmul.f32.gmra.mxu0 %v6458_v55  ;;  %4007 = vpow2.f32 %v3753_v5  ;;  %v2669_v12 = vadd.f32 %v6691_v34, %v2592_v8 }
 0x2ad   : > { %v2983_v16 = vand.u32 2147483648, %v6948_v60  ;;  %vm2978_vm1 = vweird.f32 %v4004_v31  ;;  %v2996_v9 = vand.u32 2147483647, %v6977_v48  ;;  %v2262_v14 = vadd.f32 %v6933_v1, %v2149_v0  ;;  %v7871_v0 = vld [vmem:[#allocation25_spill] sm:$0xff] }
 0x2ae   : > { %3371 = vst [vmem:[%s6768_s30 + $0x38] sm:$0xff] %v3339_v42  ;;  %v3402_v36 = vadd.f32 %v3401_v26, %v3339_v42  ;;  %v3440_v30 = vmul.f32 %v3339_v42, %v3339_v42  ;;  %v2974_v57 = vsub.f32 1.0, %v2973_v33  ;;  %v6997_v56 = vadd.f32 %v6693_v46, %v2669_v12  ;;  %vm2979_vm12 = vmor %vm2977_vm5, %vm2978_vm1 }
 0x2af   : > { %2534 = vmatmul.f32.gmra.mxu3 %v7866_v15  ;;  %2424 = vmatmul.f32.gmra.mxu2 %v7865_v27  ;;  %v2984_v32 = vor.u32 1.1754944e-38, %v2983_v16  ;;  %vm2992_vm15 = vweird.f32 %v6977_v48  ;;  %v2999_v5 = vor.u32 1.1754944e-38, %v2998_v29  ;;  %v2375_v44 = vadd.f32 %v6980_v13, %v2262_v14  ;;  %v7869_v13 = vld [vmem:[#allocation18_spill] sm:$0xff] }
 0x2b0   : > { %v3471_v55 = vadd.f32 %v3470_v19, %v3440_v30  ;;  %v2975_v62 = vmul.f32 %v4004_v31, %v2974_v57  ;;  %v6999_v21 = vpop.f32.mrf.mxu1  ;;  %v3754_v11 = vmul.f32 -1.442695, %v6997_v56  ;;  %vm2997_vm7 = vcmp.eq.f32.partialorder %v2996_v9, 8.507059e+37  ;;  %v7870_v30 = vld [vmem:[#allocation95_spill] sm:$0xff] }
 0x2b1   : > { %v2594_v54 = vpop.f32.mrf.mxu0  ;;  %v4006_v47 = vpop.eup %4005  ;;  %v2152_v57 = vadd.f32 %v7870_v30, %v7869_v13  ;;  %v7875_v13 = vld [vmem:[#allocation40_spill] sm:$0xff] }
 0x2b2   : > { %v2976_v23 = vadd.f32 %v4004_v31, %v2975_v62  ;;  %v2595_v7 = vadd.f32 %v2594_v54, %v2482_v45  ;;  %v2487_v18 = vpop.f32.mrf.mxu3  ;;  %v4008_v52 = vpop.eup %4007  ;;  %v2988_v2 = vmul.f32 %v4006_v47, %v6977_v48  ;;  %4009 = vpow2.f32 %v3754_v11 }
 0x2b3   : > { %v7004_v38 = vpop.f32.mrf.mxu2  ;;  %v7007_v25 = vadd.f32 1.0, %v4008_v52  ;;  %vm2993_vm14 = vweird.f32 %v4006_v47  ;;  %v2488_v28 = vadd.f32 %v2487_v18, %v2375_v44 }
 0x2b4   : > { %v2980_v51 = vsel %vm2979_vm12, %v4004_v31, %v2976_v23  ;;  %v2670_v60 = vadd.f32 %v6691_v34, %v2595_v7  ;;  %2641 = vmatmul.f32.gmra.mxu0 %v6944_v58  ;;  %v2989_v61 = vsub.f32 1.0, %v2988_v2  ;;  %v7868_v58 = vld [vmem:[#allocation26_spill] sm:$0xff]  ;;  %vm2994_vm0 = vmor %vm2992_vm15, %vm2993_vm14 }
 0x2b5   : > { %v2985_v53 = vsel %vm2982_vm13, %v2984_v32, %v2980_v51  ;;  %4011 = vrcp.f32 %v7007_v25  ;;  %v3011_v11 = vand.u32 2147483647, %v7007_v25  ;;  %vm3007_vm3 = vweird.f32 %v7007_v25 }
 0x2b6   : > { %v3340_v40 = vmul.f32 %v2985_v53, %v6892_v24  ;;  %v2990_v26 = vmul.f32 %v4006_v47, %v2989_v61  ;;  %v7018_v27 = vadd.f32 %v6693_v46, %v2670_v60  ;;  %v7872_v61 = vld [vmem:[#allocation94_spill] sm:$0xff] }
 0x2b7   : > { %2537 = vmatmul.f32.gmra.mxu3 %v7868_v58  ;;  %vm3012_vm6 = vcmp.eq.f32.partialorder %v3011_v11, 8.507059e+37 }
 0x2b8   : > { %3372 = vst [vmem:[%s6768_s30 + $0x40] sm:$0xff] %v3340_v40  ;;  %v3403_v35 = vadd.f32 %v3402_v36, %v3340_v40  ;;  %v3441_v3 = vmul.f32 %v3340_v40, %v3340_v40  ;;  %v7023_v24 = vpop.f32.mrf.mxu1  ;;  %v2991_v17 = vadd.f32 %v4006_v47, %v2990_v26  ;;  %v3755_v19 = vmul.f32 -1.442695, %v7018_v27  ;;  %v4010_v37 = vpop.eup %4009  ;;  %v7873_v40 = vld [vmem:[#allocation97_spill] sm:$0xff] }
 0x2b9   : > { %v2597_v63 = vpop.f32.mrf.mxu0  ;;  %v7031_v42 = vadd.f32 1.0, %v4010_v37  ;;  %v2155_v29 = vadd.f32 %v7873_v40, %v7872_v61 }
 0x2ba   : > { %v3472_v20 = vadd.f32 %v3471_v55, %v3441_v3  ;;  %v2598_v8 = vadd.f32 %v2597_v63, %v2485_v50  ;;  %v2490_v31 = vpop.f32.mrf.mxu3  ;;  %v2995_v1 = vsel %vm2994_vm0, %v4006_v47, %v2991_v17  ;;  %4013 = vpow2.f32 %v3755_v19 }
 0x2bb   : > { %v7029_v6 = vpop.f32.mrf.mxu2  ;;  %v4012_v48 = vpop.eup %4011  ;;  %v3000_v33 = vsel %vm2997_vm7, %v2999_v5, %v2995_v1  ;;  %4015 = vrcp.f32 %v7031_v42  ;;  %v3013_v55 = vand.u32 2147483648, %v7007_v25  ;;  %v3028_v58 = vand.u32 2147483648, %v7031_v42 }
 0x2bc   : > { %v2671_v10 = vadd.f32 %v6691_v34, %v2598_v8  ;;  %2644 = vmatmul.f32.gmra.mxu0 %v6975_v59  ;;  %v3341_v45 = vmul.f32 %v3000_v33, %v6925_v39  ;;  %v3003_v36 = vmul.f32 %v4012_v48, %v7007_v25  ;;  %v2265_v39 = vadd.f32 %v6971_v49, %v2152_v57 }
 0x2bd   : > { %vm3008_vm9 = vweird.f32 %v4012_v48  ;;  %v3014_v60 = vor.u32 1.1754944e-38, %v3013_v55  ;;  %v3026_v17 = vand.u32 2147483647, %v7031_v42  ;;  %vm3022_vm10 = vweird.f32 %v7031_v42 }
 0x2be   : > { %v7041_v12 = vadd.f32 %v6693_v46, %v2671_v10  ;;  %3373 = vst [vmem:[%s6768_s30 + $0x48] sm:$0xff] %v3341_v45  ;;  %v3404_v16 = vadd.f32 %v3403_v35, %v3341_v45  ;;  %v3442_v43 = vmul.f32 %v3341_v45, %v3341_v45  ;;  %v3004_v15 = vsub.f32 1.0, %v3003_v36  ;;  %vm3009_vm4 = vmor %vm3007_vm3, %vm3008_vm9  ;;  %v7874_v36 = vld [vmem:[#allocation96_spill] sm:$0xff] }
 0x2bf   : > { %v2378_v52 = vadd.f32 %v7004_v38, %v2265_v39  ;;  %v3029_v10 = vor.u32 1.1754944e-38, %v3028_v58  ;;  %v2158_v30 = vadd.f32 %v7875_v13, %v7874_v36  ;;  %vm3027_vm1 = vcmp.eq.f32.partialorder %v3026_v17, 8.507059e+37 }
 0x2c0   : > { %v3756_v59 = vmul.f32 -1.442695, %v7041_v12  ;;  %v7047_v62 = vpop.f32.mrf.mxu1  ;;  %v4014_v54 = vpop.eup %4013  ;;  %v3473_v47 = vadd.f32 %v3472_v20, %v3442_v43  ;;  %v3005_v23 = vmul.f32 %v4012_v48, %v3004_v15 }
 0x2c1   : > { %v2600_v7 = vpop.f32.mrf.mxu0  ;;  %v7050_v22 = vadd.f32 1.0, %v4014_v54  ;;  %v4016_v51 = vpop.eup %4015  ;;  %v2491_v9 = vadd.f32 %v2490_v31, %v2378_v52 }
 0x2c2   : > { %4017 = vpow2.f32 %v3756_v59  ;;  %v2601_v18 = vadd.f32 %v2600_v7, %v2488_v28  ;;  %v2493_v32 = vpop.f32.mrf.mxu3  ;;  %v3006_v49 = vadd.f32 %v4012_v48, %v3005_v23  ;;  %v3018_v4 = vmul.f32 %v4016_v51, %v7031_v42  ;;  %v7876_v42 = vld [vmem:[#allocation27_spill] sm:$0xff] }
 0x2c3   : > { %v7053_v2 = vpop.f32.mrf.mxu2  ;;  %4019 = vrcp.f32 %v7050_v22  ;;  %vm3023_vm8 = vweird.f32 %v4016_v51  ;;  %v3043_v55 = vand.u32 2147483648, %v7050_v22  ;;  %v2271_v59 = vadd.f32 %v7023_v24, %v2158_v30 }
 0x2c4   : > { %2647 = vmatmul.f32.gmra.mxu0 %v7871_v0  ;;  %v3010_v53 = vsel %vm3009_vm4, %v4012_v48, %v3006_v49  ;;  %v2672_v38 = vadd.f32 %v6691_v34, %v2601_v18  ;;  %v3019_v26 = vsub.f32 1.0, %v3018_v4  ;;  %v2268_v34 = vadd.f32 %v6999_v21, %v2155_v29  ;;  %vm3024_vm11 = vmor %vm3022_vm10, %vm3023_vm8 }
 0x2c5   : > { %v3015_v50 = vsel %vm3012_vm6, %v3014_v60, %v3010_v53  ;;  %vm3037_vm12 = vweird.f32 %v7050_v22  ;;  %v3044_v60 = vor.u32 1.1754944e-38, %v3043_v55 }
 0x2c6   : > { %v3342_v25 = vmul.f32 %v3015_v50, %v6968_v41  ;;  %v7065_v35 = vadd.f32 %v6693_v46, %v2672_v38  ;;  %v3020_v14 = vmul.f32 %v4016_v51, %v3019_v26  ;;  %v2381_v1 = vadd.f32 %v7029_v6, %v2268_v34  ;;  %v7877_v26 = vld [vmem:[#allocation98_spill] sm:$0xff] }
 0x2c8   : > { %v4018_v3 = vpop.eup %4017  ;;  %v7069_v19 = vpop.f32.mrf.mxu1  ;;  %3374 = vst [vmem:[%s6768_s30 + $0x50] sm:$0xff] %v3342_v25  ;;  %v3405_v63 = vadd.f32 %v3404_v16, %v3342_v25  ;;  %v3443_v37 = vmul.f32 %v3342_v25, %v3342_v25  ;;  %v3757_v41 = vmul.f32 -1.442695, %v7065_v35  ;;  %v3021_v44 = vadd.f32 %v4016_v51, %v3020_v14  ;;  %v7088_v16 = vld [vmem:[%s7413_s4] ss:$0 sm:$0xff] }
 0x2c9   : > { %v7072_v20 = vadd.f32 1.0, %v4018_v3  ;;  %v2603_v5 = vpop.f32.mrf.mxu0  ;;  %v4020_v8 = vpop.eup %4019  ;;  %v2494_v39 = vadd.f32 %v2493_v32, %v2381_v1  ;;  %v2384_v32 = vadd.f32 %v7053_v2, %v2271_v59 }
 0x2ca   : > { %v2604_v31 = vadd.f32 %v2603_v5, %v2491_v9  ;;  %v2496_v48 = vpop.f32.mrf.mxu3  ;;  %v3474_v21 = vadd.f32 %v3473_v47, %v3443_v37  ;;  %v3033_v45 = vmul.f32 %v4020_v8, %v7050_v22  ;;  %v3025_v57 = vsel %vm3024_vm11, %v4016_v51, %v3021_v44  ;;  %v7878_v9 = vld [vmem:[#allocation3_spill] sm:$0xff] }
 0x2cb   : > { %v7077_v33 = vpop.f32.mrf.mxu2  ;;  %4021 = vrcp.f32 %v7072_v20  ;;  %v3030_v6 = vsel %vm3027_vm1, %v3029_v10, %v3025_v57  ;;  %vm3038_vm5 = vweird.f32 %v4020_v8  ;;  %v3041_v47 = vand.u32 2147483647, %v7050_v22 }
 0x2cc   : > { %2650 = vmatmul.f32.gmra.mxu0 %v7876_v42  ;;  %v3034_v28 = vsub.f32 1.0, %v3033_v45  ;;  %4023 = vpow2.f32 %v3757_v41  ;;  %v2673_v43 = vadd.f32 %v7088_v16, %v2604_v31  ;;  %v3343_v15 = vmul.f32 %v3030_v6, %v6997_v56  ;;  %vm3039_vm13 = vmor %vm3037_vm12, %vm3038_vm5 }
 0x2cd   : > { %vm3042_vm14 = vcmp.eq.f32.partialorder %v3041_v47, 8.507059e+37  ;;  %v2161_v25 = vadd.f32 %v7878_v9, %v7877_v26  ;;  %v3056_v3 = vand.u32 2147483647, %v7072_v20  ;;  %v3058_v14 = vand.u32 2147483648, %v7072_v20 }
 0x2ce   : > { %v3035_v54 = vmul.f32 %v4020_v8, %v3034_v28  ;;  %v7096_v23 = vadd.f32 %v6693_v46, %v2673_v43  ;;  %3375 = vst [vmem:[%s6768_s30 + $0x58] sm:$0xff] %v3343_v15  ;;  %v3406_v11 = vadd.f32 %v3405_v63, %v3343_v15  ;;  %v3444_v7 = vmul.f32 %v3343_v15, %v3343_v15  ;;  %v7879_v43 = vld [vmem:[#allocation28_spill] sm:$0xff]  ;;  %v7880_v15 = vld [vmem:[#allocation45_spill] sm:$0xff] }
 0x2cf   : > { %v2497_v34 = vadd.f32 %v2496_v48, %v2384_v32  ;;  %vm3052_vm0 = vweird.f32 %v7072_v20  ;;  %vm3057_vm9 = vcmp.eq.f32.partialorder %v3056_v3, 8.507059e+37  ;;  %v3059_v31 = vor.u32 1.1754944e-38, %v3058_v14 }
 0x2d0   : > { %v7099_v18 = vpop.f32.mrf.mxu1  ;;  %v3036_v51 = vadd.f32 %v4020_v8, %v3035_v54  ;;  %v3758_v56 = vmul.f32 -1.442695, %v7096_v23  ;;  %v3475_v49 = vadd.f32 %v3474_v21, %v3444_v7  ;;  %v2164_v55 = vadd.f32 %v7880_v15, %v7879_v43  ;;  %v7884_v43 = vld [vmem:[#allocation49_spill] sm:$0xff] }
 0x2d1   : > { %v4022_v52 = vpop.eup %4021  ;;  %v2606_v24 = vpop.f32.mrf.mxu0 }
 0x2d2   : > { %v3048_v4 = vmul.f32 %v4022_v52, %v7072_v20  ;;  %v2607_v0 = vadd.f32 %v2606_v24, %v2494_v39  ;;  %v2499_v53 = vpop.f32.mrf.mxu3  ;;  %v4024_v61 = vpop.eup %4023  ;;  %v3040_v40 = vsel %vm3039_vm13, %v4020_v8, %v3036_v51  ;;  %4025 = vpow2.f32 %v3758_v56 }
 0x2d3   : > { %v7105_v38 = vpop.f32.mrf.mxu2  ;;  %v3045_v22 = vsel %vm3042_vm14, %v3044_v60, %v3040_v40  ;;  %v7107_v50 = vadd.f32 1.0, %v4024_v61  ;;  %vm3053_vm15 = vweird.f32 %v4022_v52  ;;  %v2277_v7 = vadd.f32 %v7069_v19, %v2164_v55 }
 0x2d4   : > { %v3049_v29 = vsub.f32 1.0, %v3048_v4  ;;  %v2674_v2 = vadd.f32 %v7088_v16, %v2607_v0  ;;  %v3344_v58 = vmul.f32 %v3045_v22, %v7018_v27  ;;  %v2274_v27 = vadd.f32 %v7047_v62, %v2161_v25  ;;  %vm3054_vm7 = vmor %vm3052_vm0, %vm3053_vm15 }
 0x2d5   : > { %4027 = vrcp.f32 %v7107_v50  ;;  %v3071_v56 = vand.u32 2147483647, %v7107_v50  ;;  %v2390_v0 = vadd.f32 %v7105_v38, %v2277_v7  ;;  %vm3067_vm4 = vweird.f32 %v7107_v50 }
 0x2d6   : > { %v3050_v17 = vmul.f32 %v4022_v52, %v3049_v29  ;;  %3376 = vst [vmem:[%s6768_s30 + $0x60] sm:$0xff] %v3344_v58  ;;  %v3407_v63 = vadd.f32 %v3406_v11, %v3344_v58  ;;  %v3445_v37 = vmul.f32 %v3344_v58, %v3344_v58  ;;  %v7118_v41 = vadd.f32 %v6693_v46, %v2674_v2  ;;  %v7881_v29 = vld [vmem:[#allocation29_spill] sm:$0xff]  ;;  %v7882_v2 = vld [vmem:[#allocation6_spill] sm:$0xff] }
 0x2d7   : > { %v2387_v13 = vadd.f32 %v7077_v33, %v2274_v27  ;;  %v2167_v26 = vadd.f32 %v7882_v2, %v7881_v29  ;;  %vm3072_vm8 = vcmp.eq.f32.partialorder %v3071_v56, 8.507059e+37 }
 0x2d8   : > { %v3051_v5 = vadd.f32 %v4022_v52, %v3050_v17  ;;  %v4026_v8 = vpop.eup %4025  ;;  %v3476_v44 = vadd.f32 %v3475_v49, %v3445_v37  ;;  %v3759_v1 = vmul.f32 -1.442695, %v7118_v41  ;;  %v7123_v48 = vpop.f32.mrf.mxu1 }
 0x2d9   : > { %v2609_v21 = vpop.f32.mrf.mxu0  ;;  %v7125_v45 = vadd.f32 1.0, %v4026_v8  ;;  %v2500_v39 = vadd.f32 %v2499_v53, %v2387_v13 }
 0x2da   : > { %v3055_v10 = vsel %vm3054_vm7, %v4022_v52, %v3051_v5  ;;  %v2610_v36 = vadd.f32 %v2609_v21, %v2497_v34  ;;  %v2502_v20 = vpop.f32.mrf.mxu3  ;;  %4029 = vpow2.f32 %v3759_v1  ;;  %v2280_v5 = vadd.f32 %v7099_v18, %v2167_v26 }
 0x2db   : > { %v7128_v30 = vpop.f32.mrf.mxu2  ;;  %v3060_v62 = vsel %vm3057_vm9, %v3059_v31, %v3055_v10  ;;  %v4028_v57 = vpop.eup %4027  ;;  %4031 = vrcp.f32 %v7125_v45  ;;  %v3086_v3 = vand.u32 2147483647, %v7125_v45  ;;  %v3088_v14 = vand.u32 2147483648, %v7125_v45 }
 0x2dc   : > { %v3345_v42 = vmul.f32 %v3060_v62, %v7041_v12  ;;  %v3063_v6 = vmul.f32 %v4028_v57, %v7107_v50  ;;  %v2675_v28 = vadd.f32 %v7088_v16, %v2610_v36  ;;  %v3073_v12 = vand.u32 2147483648, %v7107_v50 }
 0x2dd   : > { %vm3068_vm3 = vweird.f32 %v4028_v57  ;;  %v2503_v17 = vadd.f32 %v2502_v20, %v2390_v0  ;;  %vm3082_vm11 = vweird.f32 %v7125_v45  ;;  %v2393_v20 = vadd.f32 %v7128_v30, %v2280_v5 }
 0x2de   : > { %3377 = vst [vmem:[%s6768_s30 + $0x68] sm:$0xff] %v3345_v42  ;;  %v3408_v59 = vadd.f32 %v3407_v63, %v3345_v42  ;;  %v3446_v33 = vmul.f32 %v3345_v42, %v3345_v42  ;;  %v3064_v54 = vsub.f32 1.0, %v3063_v6  ;;  %v7138_v47 = vadd.f32 %v6693_v46, %v2675_v28  ;;  %vm3069_vm6 = vmor %vm3067_vm4, %vm3068_vm3  ;;  %v7883_v28 = vld [vmem:[#allocation30_spill] sm:$0xff] }
 0x2df   : > { %v3074_v9 = vor.u32 1.1754944e-38, %v3073_v12  ;;  %vm3087_vm5 = vcmp.eq.f32.partialorder %v3086_v3, 8.507059e+37  ;;  %v2170_v15 = vadd.f32 %v7884_v43, %v7883_v28 }
 0x2e0   : > { %v3477_v11 = vadd.f32 %v3476_v44, %v3446_v33  ;;  %v4030_v52 = vpop.eup %4029  ;;  %v3065_v51 = vmul.f32 %v4028_v57, %v3064_v54  ;;  %v3760_v24 = vmul.f32 -1.442695, %v7138_v47  ;;  %v7151_v22 = vpop.f32.mrf.mxu1 }
 0x2e1   : > { %v2612_v32 = vpop.f32.mrf.mxu0  ;;  %v4032_v49 = vpop.eup %4031  ;;  %v7144_v60 = vadd.f32 1.0, %v4030_v52 }
 0x2e2   : > { %v2613_v4 = vadd.f32 %v2612_v32, %v2500_v39  ;;  %v2505_v53 = vpop.f32.mrf.mxu3  ;;  %v3066_v40 = vadd.f32 %v4028_v57, %v3065_v51  ;;  %v3078_v19 = vmul.f32 %v4032_v49, %v7125_v45  ;;  %4033 = vpow2.f32 %v3760_v24 }
 0x2e3   : > { %v7147_v61 = vpop.f32.mrf.mxu2  ;;  %4035 = vrcp.f32 %v7144_v60  ;;  %vm3083_vm10 = vweird.f32 %v4032_v49  ;;  %v3101_v33 = vand.u32 2147483647, %v7144_v60  ;;  %v3103_v39 = vand.u32 2147483648, %v7144_v60 }
 0x2e4   : > { %v3070_v38 = vsel %vm3069_vm6, %v4028_v57, %v3066_v40  ;;  %v3079_v25 = vsub.f32 1.0, %v3078_v19  ;;  %v2676_v58 = vadd.f32 %v7088_v16, %v2613_v4  ;;  %vm3084_vm1 = vmor %vm3082_vm11, %vm3083_vm10  ;;  %vm3097_vm13 = vweird.f32 %v7144_v60 }
 0x2e5   : > { %v3075_v50 = vsel %vm3072_vm8, %v3074_v9, %v3070_v38  ;;  %v3104_v4 = vor.u32 1.1754944e-38, %v3103_v39  ;;  %vm3102_vm15 = vcmp.eq.f32.partialorder %v3101_v33, 8.507059e+37 }
 0x2e6   : > { %v3346_v34 = vmul.f32 %v3075_v50, %v7065_v35  ;;  %v3080_v63 = vmul.f32 %v4032_v49, %v3079_v25  ;;  %v7162_v37 = vadd.f32 %v6693_v46, %v2676_v58  ;;  %v3089_v35 = vor.u32 1.1754944e-38, %v3088_v14  ;;  %v7885_v25 = vld [vmem:[#allocation31_spill] sm:$0xff]  ;;  %v7886_v58 = vld [vmem:[#allocation9_spill] sm:$0xff] }
 0x2e7   : > { %v2173_v50 = vadd.f32 %v7886_v58, %v7885_v25  ;;  %v7889_v58 = vld [vmem:[#allocation34_spill] sm:$0xff] }
 0x2e8   : > { %v4034_v27 = vpop.eup %4033  ;;  %3378 = vst [vmem:[%s6768_s30 + $0x70] sm:$0xff] %v3346_v34  ;;  %v3409_v8 = vadd.f32 %v3408_v59, %v3346_v34  ;;  %v3447_v44 = vmul.f32 %v3346_v34, %v3346_v34  ;;  %v3081_v31 = vadd.f32 %v4032_v49, %v3080_v63  ;;  %v3761_v1 = vmul.f32 -1.442695, %v7162_v37  ;;  %v7178_v30 = vpop.f32.mrf.mxu1 }
 0x2e9   : > { %v2615_v21 = vpop.f32.mrf.mxu0  ;;  %v4036_v10 = vpop.eup %4035  ;;  %v7168_v36 = vadd.f32 1.0, %v4034_v27 }
 0x2ea   : > { %v2616_v13 = vadd.f32 %v2615_v21, %v2503_v17  ;;  %v2508_v62 = vpop.f32.mrf.mxu3  ;;  %v3478_v18 = vadd.f32 %v3477_v11, %v3447_v44  ;;  %v3085_v57 = vsel %vm3084_vm1, %v4032_v49, %v3081_v31  ;;  %v3093_v42 = vmul.f32 %v4036_v10, %v7144_v60 }
 0x2eb   : > { %v7171_v45 = vpop.f32.mrf.mxu2  ;;  %v3090_v6 = vsel %vm3087_vm5, %v3089_v35, %v3085_v57  ;;  %4037 = vrcp.f32 %v7168_v36  ;;  %v2506_v11 = vadd.f32 %v2505_v53, %v2393_v20  ;;  %vm3098_vm12 = vweird.f32 %v4036_v10 }
 0x2ec   : > { %v3347_v55 = vmul.f32 %v3090_v6, %v7096_v23  ;;  %v3094_v59 = vsub.f32 1.0, %v3093_v42  ;;  %4039 = vpow2.f32 %v3761_v1  ;;  %v2677_v54 = vadd.f32 %v7088_v16, %v2616_v13  ;;  %vm3099_vm14 = vmor %vm3097_vm13, %vm3098_vm12 }
 0x2ed   : > { %v2283_v23 = vadd.f32 %v7123_v48, %v2170_v15  ;;  %v3116_v14 = vand.u32 2147483647, %v7168_v36  ;;  %v3118_v17 = vand.u32 2147483648, %v7168_v36  ;;  %vm3112_vm7 = vweird.f32 %v7168_v36 }
 0x2ee   : > { %3379 = vst [vmem:[%s6768_s30 + $0x78] sm:$0xff] %v3347_v55  ;;  %v3410_v12 = vadd.f32 %v3409_v8, %v3347_v55  ;;  %v3448_v7 = vmul.f32 %v3347_v55, %v3347_v55  ;;  %v3095_v52 = vmul.f32 %v4036_v10, %v3094_v59  ;;  %v7185_v51 = vadd.f32 %v6693_v46, %v2677_v54  ;;  %v7888_v55 = vld [vmem:[#allocation53_spill] sm:$0xff] }
 0x2ef   : > { %v2396_v40 = vadd.f32 %v7147_v61, %v2283_v23  ;;  %v3119_v13 = vor.u32 1.1754944e-38, %v3118_v17  ;;  %vm3117_vm3 = vcmp.eq.f32.partialorder %v3116_v14, 8.507059e+37 }
 0x2f0   : > { %v3479_v56 = vadd.f32 %v3478_v18, %v3448_v7  ;;  %v3096_v24 = vadd.f32 %v4036_v10, %v3095_v52  ;;  %v3762_v0 = vmul.f32 -1.442695, %v7185_v51  ;;  %v7207_v44 = vpop.f32.mrf.mxu1 }
 0x2f1   : > { %v2618_v32 = vpop.f32.mrf.mxu0  ;;  %v4038_v49 = vpop.eup %4037  ;;  %v2509_v34 = vadd.f32 %v2508_v62, %v2396_v40 }
 0x2f2   : > { %v2619_v53 = vadd.f32 %v2618_v32, %v2506_v11  ;;  %v2511_v19 = vpop.f32.mrf.mxu3  ;;  %v4040_v2 = vpop.eup %4039  ;;  %v3100_v26 = vsel %vm3099_vm14, %v4036_v10, %v3096_v24  ;;  %v3108_v48 = vmul.f32 %v4038_v49, %v7168_v36  ;;  %4041 = vpow2.f32 %v3762_v0 }
 0x2f3   : > { %v7191_v29 = vpop.f32.mrf.mxu2  ;;  %v3105_v9 = vsel %vm3102_vm15, %v3104_v4, %v3100_v26  ;;  %v7194_v60 = vadd.f32 1.0, %v4040_v2  ;;  %vm3113_vm0 = vweird.f32 %v4038_v49 }
 0x2f4   : > { %v2678_v38 = vadd.f32 %v7088_v16, %v2619_v53  ;;  %v3348_v61 = vmul.f32 %v3105_v9, %v7118_v41  ;;  %v3109_v3 = vsub.f32 1.0, %v3108_v48  ;;  %v2286_v41 = vadd.f32 %v7151_v22, %v2173_v50  ;;  %vm3114_vm9 = vmor %vm3112_vm7, %vm3113_vm0  ;;  %v7890_v50 = vld [vmem:[#allocation12_spill] sm:$0xff] }
 0x2f5   : > { %4043 = vrcp.f32 %v7194_v60  ;;  %v3133_v7 = vand.u32 2147483648, %v7194_v60  ;;  %v3131_v32 = vand.u32 2147483647, %v7194_v60  ;;  %vm3127_vm6 = vweird.f32 %v7194_v60 }
 0x2f6   : > { %3380 = vst [vmem:[%s6768_s30 + $0x80] sm:$0xff] %v3348_v61  ;;  %v3411_v63 = vadd.f32 %v3410_v12, %v3348_v61  ;;  %v3449_v5 = vmul.f32 %v3348_v61, %v3348_v61  ;;  %v3110_v27 = vmul.f32 %v4038_v49, %v3109_v3  ;;  %v7205_v8 = vadd.f32 %v6693_v46, %v2678_v38 }
 0x2f7   : > { %v2399_v62 = vadd.f32 %v7171_v45, %v2286_v41  ;;  %v7887_v45 = vld [vmem:[#allocation33_spill] sm:$0xff]  ;;  %v3134_v48 = vor.u32 1.1754944e-38, %v3133_v7  ;;  %vm3132_vm10 = vcmp.eq.f32.partialorder %v3131_v32, 8.507059e+37 }
 0x2f8   : > { %v3480_v31 = vadd.f32 %v3479_v56, %v3449_v5  ;;  %v3111_v1 = vadd.f32 %v4038_v49, %v3110_v27  ;;  %v3763_v21 = vmul.f32 -1.442695, %v7205_v8  ;;  %v4042_v35 = vpop.eup %4041  ;;  %v2176_v59 = vadd.f32 %v7888_v55, %v7887_v45  ;;  %v2294_v4 = vpop.f32.mrf.mxu1 }
 0x2f9   : > { %v2621_v10 = vpop.f32.mrf.mxu0  ;;  %v7216_v22 = vadd.f32 1.0, %v4042_v35  ;;  %v2512_v39 = vadd.f32 %v2511_v19, %v2399_v62 }
 0x2fa   : > { %v2622_v20 = vadd.f32 %v2621_v10, %v2509_v34  ;;  %v2514_v18 = vpop.f32.mrf.mxu3  ;;  %v3115_v42 = vsel %vm3114_vm9, %v4038_v49, %v3111_v1  ;;  %4045 = vpow2.f32 %v3763_v21 }
 0x2fb   : > { %v7214_v57 = vpop.f32.mrf.mxu2  ;;  %v4044_v36 = vpop.eup %4043  ;;  %v3120_v6 = vsel %vm3117_vm3, %v3119_v13, %v3115_v42  ;;  %4047 = vrcp.f32 %v7216_v22  ;;  %v3148_v17 = vand.u32 2147483648, %v7216_v22  ;;  %v3146_v27 = vand.u32 2147483647, %v7216_v22 }
 0x2fc   : > { %v2679_v28 = vadd.f32 %v7088_v16, %v2622_v20  ;;  %v3349_v43 = vmul.f32 %v3120_v6, %v7138_v47  ;;  %v3123_v15 = vmul.f32 %v4044_v36, %v7194_v60  ;;  %v2289_v47 = vadd.f32 %v7178_v30, %v2176_v59 }
 0x2fd   : > { %vm3128_vm4 = vweird.f32 %v4044_v36  ;;  %vm3142_vm1 = vweird.f32 %v7216_v22  ;;  %vm3147_vm12 = vcmp.eq.f32.partialorder %v3146_v27, 8.507059e+37 }
 0x2fe   : > { %v7225_v33 = vadd.f32 %v6693_v46, %v2679_v28  ;;  %3381 = vst [vmem:[%s6768_s30 + $0x88] sm:$0xff] %v3349_v43  ;;  %v3412_v54 = vadd.f32 %v3411_v63, %v3349_v43  ;;  %v3450_v11 = vmul.f32 %v3349_v43, %v3349_v43  ;;  %v3124_v12 = vsub.f32 1.0, %v3123_v15  ;;  %vm3129_vm8 = vmor %vm3127_vm6, %vm3128_vm4  ;;  %v7891_v28 = vld [vmem:[#allocation36_spill] sm:$0xff]  ;;  %v7892_v43 = vld [vmem:[#allocation57_spill] sm:$0xff] }
 0x2ff   : > { %v2402_v40 = vadd.f32 %v7191_v29, %v2289_v47  ;;  %v2179_v29 = vadd.f32 %v7890_v50, %v7889_v58  ;;  %v2182_v15 = vadd.f32 %v7892_v43, %v7891_v28  ;;  %v7893_v50 = vld [vmem:[#allocation37_spill] sm:$0xff] }
 0x300   : > { %v3764_v52 = vmul.f32 -1.442695, %v7225_v33  ;;  %v4046_v23 = vpop.eup %4045  ;;  %v3481_v56 = vadd.f32 %v3480_v31, %v3450_v11  ;;  %v3125_v24 = vmul.f32 %v4044_v36, %v3124_v12  ;;  %v2297_v6 = vpop.f32.mrf.mxu1 }
 0x301   : > { %v2624_v49 = vpop.f32.mrf.mxu0  ;;  %v7232_v0 = vadd.f32 1.0, %v4046_v23  ;;  %v4048_v2 = vpop.eup %4047  ;;  %v2515_v14 = vadd.f32 %v2514_v18, %v2402_v40  ;;  %v2292_v41 = vadd.f32 %v7207_v44, %v2179_v29  ;;  %v3149_v44 = vor.u32 1.1754944e-38, %v3148_v17 }
 0x302   : > { %4049 = vpow2.f32 %v3764_v52  ;;  %v2625_v53 = vadd.f32 %v2624_v49, %v2512_v39  ;;  %v2517_v19 = vpop.f32.mrf.mxu3  ;;  %v3126_v26 = vadd.f32 %v4044_v36, %v3125_v24  ;;  %v3138_v9 = vmul.f32 %v4048_v2, %v7216_v22 }
 0x303   : > { %v2407_v30 = vpop.f32.mrf.mxu2  ;;  %4051 = vrcp.f32 %v7232_v0  ;;  %vm3143_vm11 = vweird.f32 %v4048_v2  ;;  %v2405_v62 = vadd.f32 %v7214_v57, %v2292_v41  ;;  %v2295_v11 = vadd.f32 %v2294_v4, %v2182_v15 }
 0x304   : > { %v3130_v38 = vsel %vm3129_vm8, %v4044_v36, %v3126_v26  ;;  %v2680_v25 = vadd.f32 %v7088_v16, %v2625_v53  ;;  %v3139_v3 = vsub.f32 1.0, %v3138_v9  ;;  %vm3144_vm5 = vmor %vm3142_vm1, %vm3143_vm11  ;;  %v3161_v52 = vand.u32 2147483647, %v7232_v0 }
 0x305   : > { %v3135_v61 = vsel %vm3132_vm10, %v3134_v48, %v3130_v38  ;;  %v2518_v12 = vadd.f32 %v2517_v19, %v2405_v62  ;;  %vm3157_vm14 = vweird.f32 %v7232_v0  ;;  %v2408_v53 = vadd.f32 %v2407_v30, %v2295_v11  ;;  %v7894_v30 = vld [vmem:[#allocation15_spill] sm:$0xff] }
 0x306   : > { %v3350_v60 = vmul.f32 %v3135_v61, %v7162_v37  ;;  %v7244_v34 = vadd.f32 %v6693_v46, %v2680_v25  ;;  %v3140_v5 = vmul.f32 %v4048_v2, %v3139_v3  ;;  %vm3162_vm0 = vcmp.eq.f32.partialorder %v3161_v52, 8.507059e+37 }
 0x307   : > { %v2185_v29 = vadd.f32 %v7894_v30, %v7893_v50 }
 0x308   : > { %v4050_v63 = vpop.eup %4049  ;;  %3382 = vst [vmem:[%s6768_s30 + $0x90] sm:$0xff] %v3350_v60  ;;  %v3413_v31 = vadd.f32 %v3412_v54, %v3350_v60  ;;  %v3451_v1 = vmul.f32 %v3350_v60, %v3350_v60  ;;  %v3765_v10 = vmul.f32 -1.442695, %v7244_v34  ;;  %v3141_v13 = vadd.f32 %v4048_v2, %v3140_v5  ;;  %v2300_v60 = vpop.f32.mrf.mxu1 }
 0x309   : > { %v7249_v21 = vadd.f32 1.0, %v4050_v63  ;;  %v2627_v37 = vpop.f32.mrf.mxu0  ;;  %v4052_v35 = vpop.eup %4051  ;;  %v3163_v54 = vand.u32 2147483648, %v7232_v0 }
 0x30a   : > { %v2628_v20 = vadd.f32 %v2627_v37, %v2515_v14  ;;  %v2520_v18 = vpop.f32.mrf.mxu3  ;;  %v3482_v42 = vadd.f32 %v3481_v56, %v3451_v1  ;;  %v3153_v36 = vmul.f32 %v4052_v35, %v7232_v0  ;;  %v3145_v45 = vsel %vm3144_vm5, %v4048_v2, %v3141_v13 }
 0x30b   : > { %4053 = vrcp.f32 %v7249_v21  ;;  %v3150_v22 = vsel %vm3147_vm12, %v3149_v44, %v3145_v45  ;;  %v2410_v59 = vpop.f32.mrf.mxu2  ;;  %vm3158_vm13 = vweird.f32 %v4052_v35  ;;  %v3164_v40 = vor.u32 1.1754944e-38, %v3163_v54  ;;  %v7895_v45 = vld [vmem:[#allocation39_spill] sm:$0xff] }
 0x30c   : > { %v3154_v55 = vsub.f32 1.0, %v3153_v36  ;;  %4055 = vpow2.f32 %v3765_v10  ;;  %v2681_v57 = vadd.f32 %v7088_v16, %v2628_v20  ;;  %v3351_v39 = vmul.f32 %v3150_v22, %v7185_v51  ;;  %vm3159_vm15 = vmor %vm3157_vm14, %vm3158_vm13  ;;  %v7896_v22 = vld [vmem:[#allocation32_spill] sm:$0xff] }
 0x30d   : > { %v3176_v3 = vand.u32 2147483647, %v7249_v21  ;;  %v3178_v14 = vand.u32 2147483648, %v7249_v21  ;;  %v2521_v63 = vadd.f32 %v2520_v18, %v2408_v53  ;;  %vm3172_vm9 = vweird.f32 %v7249_v21 }
 0x30e   : > { %v3155_v7 = vmul.f32 %v4052_v35, %v3154_v55  ;;  %v7264_v47 = vadd.f32 %v6693_v46, %v2681_v57  ;;  %3383 = vst [vmem:[%s6768_s30 + $0x98] sm:$0xff] %v3351_v39  ;;  %v3414_v23 = vadd.f32 %v3413_v31, %v3351_v39  ;;  %v3452_v56 = vmul.f32 %v3351_v39, %v3351_v39 }
 0x30f   : > { %vm3177_vm4 = vcmp.eq.f32.partialorder %v3176_v3, 8.507059e+37  ;;  %v2188_v55 = vadd.f32 %v7896_v22, %v7895_v45 }
 0x310   : > { %v3156_v32 = vadd.f32 %v4052_v35, %v3155_v7  ;;  %v3766_v51 = vmul.f32 -1.442695, %v7264_v47  ;;  %v3483_v4 = vadd.f32 %v3482_v42, %v3452_v56 }
 0x311   : > { %v4054_v24 = vpop.eup %4053  ;;  %v2630_v49 = vpop.f32.mrf.mxu0  ;;  %v2301_v52 = vadd.f32 %v2300_v60, %v2188_v55 }
 0x312   : > { %v3168_v19 = vmul.f32 %v4054_v24, %v7249_v21  ;;  %v2631_v2 = vadd.f32 %v2630_v49, %v2518_v12  ;;  %v2523_v26 = vpop.f32.mrf.mxu3  ;;  %v4056_v48 = vpop.eup %4055  ;;  %v3160_v9 = vsel %vm3159_vm15, %v4052_v35, %v3156_v32  ;;  %4057 = vpow2.f32 %v3766_v51 }
 0x313   : > { %v3165_v38 = vsel %vm3162_vm0, %v3164_v40, %v3160_v9  ;;  %v7270_v58 = vadd.f32 1.0, %v4056_v48  ;;  %vm3173_vm7 = vweird.f32 %v4054_v24  ;;  %v2413_v31 = vpop.f32.mrf.mxu2  ;;  %v3179_v35 = vor.u32 1.1754944e-38, %v3178_v14  ;;  %v2303_v12 = vpop.f32.mrf.mxu1  ;;  %v7897_v48 = vld [vmem:[#allocation41_spill] sm:$0xff] }
 0x314   : > { %v3169_v25 = vsub.f32 1.0, %v3168_v19  ;;  %v2682_v0 = vadd.f32 %v7088_v16, %v2631_v2  ;;  %v3352_v61 = vmul.f32 %v3165_v38, %v7205_v8  ;;  %v2298_v8 = vadd.f32 %v2297_v6, %v2185_v29  ;;  %vm3174_vm3 = vmor %vm3172_vm9, %vm3173_vm7  ;;  %v7898_v9 = vld [vmem:[#allocation17_spill] sm:$0xff] }
 0x315   : > { %4059 = vrcp.f32 %v7270_v58  ;;  %v2414_v19 = vadd.f32 %v2413_v31, %v2301_v52  ;;  %vm3187_vm8 = vweird.f32 %v7270_v58  ;;  %v2191_v38 = vadd.f32 %v7898_v9, %v7897_v48 }
 0x316   : > { %v3170_v17 = vmul.f32 %v4054_v24, %v3169_v25  ;;  %3384 = vst [vmem:[%s6768_s30 + $0xa0] sm:$0xff] %v3352_v61  ;;  %v3415_v5 = vadd.f32 %v3414_v23, %v3352_v61  ;;  %v3453_v27 = vmul.f32 %v3352_v61, %v3352_v61  ;;  %v7281_v41 = vadd.f32 %v6693_v46, %v2682_v0 }
 0x317   : > { %v2411_v44 = vadd.f32 %v2410_v59, %v2298_v8 }
 0x318   : > { %v3171_v1 = vadd.f32 %v4054_v24, %v3170_v17  ;;  %v4058_v10 = vpop.eup %4057  ;;  %v3484_v37 = vadd.f32 %v3483_v4, %v3453_v27  ;;  %v3767_v13 = vmul.f32 -1.442695, %v7281_v41 }
 0x319   : > { %v2633_v20 = vpop.f32.mrf.mxu0  ;;  %v7285_v18 = vadd.f32 1.0, %v4058_v10  ;;  %v2524_v54 = vadd.f32 %v2523_v26, %v2411_v44 }
 0x31a   : > { %v3175_v62 = vsel %vm3174_vm3, %v4054_v24, %v3171_v1  ;;  %v2634_v42 = vadd.f32 %v2633_v20, %v2521_v63  ;;  %4061 = vpow2.f32 %v3767_v13  ;;  %v2526_v28 = vpop.f32.mrf.mxu3  ;;  %v3191_v24 = vand.u32 2147483647, %v7270_v58 }
 0x31b   : > { %v3180_v36 = vsel %vm3177_vm4, %v3179_v35, %v3175_v62  ;;  %v4060_v43 = vpop.eup %4059  ;;  %4063 = vrcp.f32 %v7285_v18  ;;  %v2416_v49 = vpop.f32.mrf.mxu2  ;;  %v3208_v3 = vand.u32 2147483648, %v7285_v18  ;;  %v2527_v14 = vadd.f32 %v2526_v28, %v2414_v19 }
 0x31c   : > { %v3353_v21 = vmul.f32 %v3180_v36, %v7225_v33  ;;  %v3183_v6 = vmul.f32 %v4060_v43, %v7270_v58  ;;  %v2683_v15 = vadd.f32 %v7088_v16, %v2634_v42  ;;  %v3193_v33 = vand.u32 2147483648, %v7270_v58  ;;  %v2306_v35 = vpop.f32.mrf.mxu1 }
 0x31d   : > { %vm3188_vm6 = vweird.f32 %v4060_v43  ;;  %vm3192_vm11 = vcmp.eq.f32.partialorder %v3191_v24, 8.507059e+37  ;;  %v3206_v58 = vand.u32 2147483647, %v7285_v18  ;;  %vm3202_vm5 = vweird.f32 %v7285_v18 }
 0x31e   : > { %3385 = vst [vmem:[%s6768_s30 + $0xa8] sm:$0xff] %v3353_v21  ;;  %v3416_v57 = vadd.f32 %v3415_v5, %v3353_v21  ;;  %v3454_v39 = vmul.f32 %v3353_v21, %v3353_v21  ;;  %v3184_v59 = vsub.f32 1.0, %v3183_v6  ;;  %v7295_v11 = vadd.f32 %v6693_v46, %v2683_v15  ;;  %vm3189_vm10 = vmor %vm3187_vm8, %vm3188_vm6  ;;  %v7899_v21 = vld [vmem:[#allocation42_spill] sm:$0xff]  ;;  %v7900_v6 = vld [vmem:[#allocation35_spill] sm:$0xff] }
 0x31f   : > { %v3194_v25 = vor.u32 1.1754944e-38, %v3193_v33  ;;  %v2304_v5 = vadd.f32 %v2303_v12, %v2191_v38  ;;  %vm3207_vm13 = vcmp.eq.f32.partialorder %v3206_v58, 8.507059e+37  ;;  %v2194_v15 = vadd.f32 %v7900_v6, %v7899_v21  ;;  %v7903_v6 = vld [vmem:[#allocation46_spill] sm:$0xff] }
 0x320   : > { %v3485_v7 = vadd.f32 %v3484_v37, %v3454_v39  ;;  %v4062_v23 = vpop.eup %4061  ;;  %v3185_v56 = vmul.f32 %v4060_v43, %v3184_v59  ;;  %v3768_v32 = vmul.f32 -1.442695, %v7295_v11 }
 0x321   : > { %v2636_v51 = vpop.f32.mrf.mxu0  ;;  %v4064_v53 = vpop.eup %4063  ;;  %v7300_v4 = vadd.f32 1.0, %v4062_v23  ;;  %v2417_v42 = vadd.f32 %v2416_v49, %v2304_v5  ;;  %v2307_v23 = vadd.f32 %v2306_v35, %v2194_v15  ;;  %v7904_v15 = vld [vmem:[#allocation48_spill] sm:$0xff] }
 0x322   : > { %v2637_v40 = vadd.f32 %v2636_v51, %v2524_v54  ;;  %v3186_v2 = vadd.f32 %v4060_v43, %v3185_v56  ;;  %v3198_v26 = vmul.f32 %v4064_v53, %v7285_v18  ;;  %4065 = vpow2.f32 %v3768_v32  ;;  %v2529_v29 = vpop.f32.mrf.mxu3 }
 0x323   : > { %4067 = vrcp.f32 %v7300_v4  ;;  %vm3203_vm1 = vweird.f32 %v4064_v53  ;;  %v2419_v28 = vpop.f32.mrf.mxu2  ;;  %v3221_v55 = vand.u32 2147483647, %v7300_v4  ;;  %v2530_v54 = vadd.f32 %v2529_v29, %v2417_v42 }
 0x324   : > { %v3190_v0 = vsel %vm3189_vm10, %v4060_v43, %v3186_v2  ;;  %v3199_v50 = vsub.f32 1.0, %v3198_v26  ;;  %v2684_v30 = vadd.f32 %v7088_v16, %v2637_v40  ;;  %vm3204_vm12 = vmor %vm3202_vm5, %vm3203_vm1  ;;  %vm3217_vm15 = vweird.f32 %v7300_v4  ;;  %v2309_v48 = vpop.f32.mrf.mxu1 }
 0x325   : > { %v3195_v61 = vsel %vm3192_vm11, %v3194_v25, %v3190_v0  ;;  %v2420_v40 = vadd.f32 %v2419_v28, %v2307_v23  ;;  %vm3222_vm7 = vcmp.eq.f32.partialorder %v3221_v55, 8.507059e+37  ;;  %v7901_v25 = vld [vmem:[#allocation44_spill] sm:$0xff] }
 0x326   : > { %v3354_v60 = vmul.f32 %v3195_v61, %v7244_v34  ;;  %v3200_v17 = vmul.f32 %v4064_v53, %v3199_v50  ;;  %v7312_v63 = vadd.f32 %v6693_v46, %v2684_v30  ;;  %v3209_v34 = vor.u32 1.1754944e-38, %v3208_v3  ;;  %v7902_v0 = vld [vmem:[#allocation20_spill] sm:$0xff] }
 0x327   : > { %v2197_v50 = vadd.f32 %v7902_v0, %v7901_v25 }
 0x328   : > { %v4066_v27 = vpop.eup %4065  ;;  %3386 = vst [vmem:[%s6768_s30 + $0xb0] sm:$0xff] %v3354_v60  ;;  %v3417_v31 = vadd.f32 %v3416_v57, %v3354_v60  ;;  %v3455_v1 = vmul.f32 %v3354_v60, %v3354_v60  ;;  %v3201_v8 = vadd.f32 %v4064_v53, %v3200_v17  ;;  %v3769_v10 = vmul.f32 -1.442695, %v7312_v63 }
 0x329   : > { %v2639_v37 = vpop.f32.mrf.mxu0  ;;  %v4068_v13 = vpop.eup %4067  ;;  %v7317_v20 = vadd.f32 1.0, %v4066_v27  ;;  %v3223_v57 = vand.u32 2147483648, %v7300_v4 }
 0x32a   : > { %v2640_v62 = vadd.f32 %v2639_v37, %v2527_v14  ;;  %v3486_v44 = vadd.f32 %v3485_v7, %v3455_v1  ;;  %v3205_v18 = vsel %vm3204_vm12, %v4064_v53, %v3201_v8  ;;  %v3213_v36 = vmul.f32 %v4068_v13, %v7300_v4  ;;  %v2532_v33 = vpop.f32.mrf.mxu3 }
 0x32b   : > { %v3210_v43 = vsel %vm3207_vm13, %v3209_v34, %v3205_v18  ;;  %4069 = vrcp.f32 %v7317_v20  ;;  %vm3218_vm14 = vweird.f32 %v4068_v13  ;;  %v3224_v51 = vor.u32 1.1754944e-38, %v3223_v57  ;;  %v2422_v58 = vpop.f32.mrf.mxu2 }
 0x32c   : > { %v3355_v45 = vmul.f32 %v3210_v43, %v7264_v47  ;;  %v3214_v22 = vsub.f32 1.0, %v3213_v36  ;;  %4071 = vpow2.f32 %v3769_v10  ;;  %v2685_v39 = vadd.f32 %v7088_v16, %v2640_v62  ;;  %vm3219_vm0 = vmor %vm3217_vm15, %vm3218_vm14  ;;  %v2312_v21 = vpop.f32.mrf.mxu1 }
 0x32d   : > { %v3236_v61 = vand.u32 2147483647, %v7317_v20  ;;  %v3238_v3 = vand.u32 2147483648, %v7317_v20  ;;  %v2533_v14 = vadd.f32 %v2532_v33, %v2420_v40  ;;  %vm3232_vm3 = vweird.f32 %v7317_v20 }
 0x32e   : > { %3387 = vst [vmem:[%s6768_s30 + $0xb8] sm:$0xff] %v3355_v45  ;;  %v3418_v59 = vadd.f32 %v3417_v31, %v3355_v45  ;;  %v3456_v12 = vmul.f32 %v3355_v45, %v3355_v45  ;;  %v3215_v7 = vmul.f32 %v4068_v13, %v3214_v22  ;;  %v7329_v52 = vadd.f32 %v6693_v46, %v2685_v39 }
 0x32f   : > { %v2310_v31 = vadd.f32 %v2309_v48, %v2197_v50  ;;  %vm3237_vm6 = vcmp.eq.f32.partialorder %v3236_v61, 8.507059e+37  ;;  %v2200_v45 = vadd.f32 %v7904_v15, %v7903_v6  ;;  %v4100_v48 = vld [vmem:[%s7413_s4] ss:$0 sm:$0xff] }
 0x330   : > { %v3487_v47 = vadd.f32 %v3486_v44, %v3456_v12  ;;  %v3216_v56 = vadd.f32 %v4068_v13, %v3215_v7  ;;  %v3770_v49 = vmul.f32 -1.442695, %v7329_v52 }
 0x331   : > { %v2642_v24 = vpop.f32.mrf.mxu0  ;;  %v4070_v32 = vpop.eup %4069  ;;  %v2423_v62 = vadd.f32 %v2422_v58, %v2310_v31  ;;  %v2313_v12 = vadd.f32 %v2312_v21, %v2200_v45 }
 0x332   : > { %v2643_v53 = vadd.f32 %v2642_v24, %v2530_v54  ;;  %v4072_v19 = vpop.eup %4071  ;;  %v3220_v2 = vsel %vm3219_vm0, %v4068_v13, %v3216_v56  ;;  %v3228_v26 = vmul.f32 %v4070_v32, %v7317_v20  ;;  %4073 = vpow2.f32 %v3770_v49  ;;  %v2535_v37 = vpop.f32.mrf.mxu3 }
 0x333   : > { %v3225_v9 = vsel %vm3222_vm7, %v3224_v51, %v3220_v2  ;;  %v7334_v38 = vadd.f32 1.0, %v4072_v19  ;;  %vm3233_vm9 = vweird.f32 %v4070_v32  ;;  %v3239_v13 = vor.u32 1.1754944e-38, %v3238_v3 }
 0x334   : > { %v2686_v4 = vadd.f32 %v7088_v16, %v2643_v53  ;;  %v3356_v30 = vmul.f32 %v3225_v9, %v7281_v41  ;;  %v3229_v29 = vsub.f32 1.0, %v3228_v26  ;;  %vm3234_vm4 = vmor %vm3232_vm3, %vm3233_vm9  ;;  %v2536_v55 = vadd.f32 %v2535_v37, %v2423_v62 }
 0x335   : > { %4075 = vrcp.f32 %v7334_v38  ;;  %vm3247_vm10 = vweird.f32 %v7334_v38 }
 0x336   : > { %3388 = vst [vmem:[%s6768_s30 + $0xc0] sm:$0xff] %v3356_v30  ;;  %v3419_v60 = vadd.f32 %v3418_v59, %v3356_v30  ;;  %v3457_v17 = vmul.f32 %v3356_v30, %v3356_v30  ;;  %v3230_v5 = vmul.f32 %v4070_v32, %v3229_v29  ;;  %v7345_v27 = vadd.f32 %v6693_v46, %v2686_v4  ;;  %v2425_v59 = vpop.f32.mrf.mxu2 }
 0x337   : > { %v2426_v51 = vadd.f32 %v2425_v59, %v2313_v12 }
 0x338   : > { %v3488_v1 = vadd.f32 %v3487_v47, %v3457_v17  ;;  %v3231_v41 = vadd.f32 %v4070_v32, %v3230_v5  ;;  %v3771_v8 = vmul.f32 -1.442695, %v7345_v27  ;;  %v4074_v35 = vpop.eup %4073  ;;  %v3251_v47 = vand.u32 2147483647, %v7334_v38 }
 0x339   : > { %v2645_v10 = vpop.f32.mrf.mxu0  ;;  %v7350_v44 = vadd.f32 1.0, %v4074_v35 }
 0x33a   : > { %v2646_v34 = vadd.f32 %v2645_v10, %v2533_v14  ;;  %v3235_v42 = vsel %vm3234_vm4, %v4070_v32, %v3231_v41  ;;  %4077 = vpow2.f32 %v3771_v8  ;;  %v2538_v40 = vpop.f32.mrf.mxu3  ;;  %vm3252_vm1 = vcmp.eq.f32.partialorder %v3251_v47, 8.507059e+37 }
 0x33b   : > { %v4076_v18 = vpop.eup %4075  ;;  %v3240_v36 = vsel %vm3237_vm6, %v3239_v13, %v3235_v42  ;;  %4079 = vrcp.f32 %v7350_v44  ;;  %v2539_v0 = vadd.f32 %v2538_v40, %v2426_v51  ;;  %v3268_v50 = vand.u32 2147483648, %v7350_v44 }
 0x33c   : > { %v2687_v20 = vadd.f32 %v7088_v16, %v2646_v34  ;;  %v3357_v28 = vmul.f32 %v3240_v36, %v7295_v11  ;;  %v3243_v43 = vmul.f32 %v4076_v18, %v7334_v38  ;;  %v3253_v16 = vand.u32 2147483648, %v7334_v38 }
 0x33d   : > { %vm3248_vm8 = vweird.f32 %v4076_v18  ;;  %v3266_v58 = vand.u32 2147483647, %v7350_v44  ;;  %vm3262_vm12 = vweird.f32 %v7350_v44  ;;  %v3269_v8 = vor.u32 1.1754944e-38, %v3268_v50 }
 0x33e   : > { %v7359_v22 = vadd.f32 %v6693_v46, %v2687_v20  ;;  %3389 = vst [vmem:[%s6768_s30 + $0xc8] sm:$0xff] %v3357_v28  ;;  %v3420_v57 = vadd.f32 %v3419_v60, %v3357_v28  ;;  %v3458_v39 = vmul.f32 %v3357_v28, %v3357_v28  ;;  %v3244_v54 = vsub.f32 1.0, %v3243_v43  ;;  %vm3249_vm11 = vmor %vm3247_vm10, %vm3248_vm8 }
 0x33f   : > { %v3254_v19 = vor.u32 1.1754944e-38, %v3253_v16  ;;  %vm3267_vm14 = vcmp.eq.f32.partialorder %v3266_v58, 8.507059e+37 }
 0x340   : > { %v3772_v11 = vmul.f32 -1.442695, %v7359_v22  ;;  %v4078_v7 = vpop.eup %4077  ;;  %v3489_v33 = vadd.f32 %v3488_v1, %v3458_v39  ;;  %v3245_v23 = vmul.f32 %v4076_v18, %v3244_v54 }
 0x341   : > { %v2648_v56 = vpop.f32.mrf.mxu0  ;;  %v7365_v24 = vadd.f32 1.0, %v4078_v7  ;;  %v4080_v49 = vpop.eup %4079 }
 0x342   : > { %4081 = vpow2.f32 %v3772_v11  ;;  %v2649_v32 = vadd.f32 %v2648_v56, %v2536_v55  ;;  %v3246_v53 = vadd.f32 %v4076_v18, %v3245_v23  ;;  %v3258_v2 = vmul.f32 %v4080_v49, %v7350_v44 }
 0x343   : > { %4083 = vrcp.f32 %v7365_v24  ;;  %vm3263_vm5 = vweird.f32 %v4080_v49  ;;  %v3283_v42 = vand.u32 2147483648, %v7365_v24  ;;  %v3281_v44 = vand.u32 2147483647, %v7365_v24 }
 0x344   : > { %v3250_v26 = vsel %vm3249_vm11, %v4076_v18, %v3246_v53  ;;  %v2688_v9 = vadd.f32 %v4100_v48, %v2649_v32  ;;  %v3259_v25 = vsub.f32 1.0, %v3258_v2  ;;  %vm3264_vm13 = vmor %vm3262_vm12, %vm3263_vm5  ;;  %vm3277_vm0 = vweird.f32 %v7365_v24 }
 0x345   : > { %v3255_v4 = vsel %vm3252_vm1, %v3254_v19, %v3250_v26  ;;  %vm3282_vm9 = vcmp.eq.f32.partialorder %v3281_v44, 8.507059e+37 }
 0x346   : > { %v3358_v38 = vmul.f32 %v3255_v4, %v7312_v63  ;;  %v7376_v30 = vadd.f32 %v6693_v46, %v2688_v9  ;;  %v3260_v61 = vmul.f32 %v4080_v49, %v3259_v25 }
 0x348   : > { %v4082_v29 = vpop.eup %4081  ;;  %3390 = vst [vmem:[%s6768_s30 + $0xd0] sm:$0xff] %v3358_v38  ;;  %v3421_v3 = vadd.f32 %v3420_v57, %v3358_v38  ;;  %v3459_v14 = vmul.f32 %v3358_v38, %v3358_v38  ;;  %v3773_v17 = vmul.f32 -1.442695, %v7376_v30  ;;  %v3261_v1 = vadd.f32 %v4080_v49, %v3260_v61 }
 0x349   : > { %v2849_v60 = vadd.f32 1.0, %v4082_v29  ;;  %v2651_v5 = vpop.f32.mrf.mxu0  ;;  %v4084_v31 = vpop.eup %4083 }
 0x34a   : > { %v2652_v63 = vadd.f32 %v2651_v5, %v2539_v0  ;;  %v3490_v41 = vadd.f32 %v3489_v33, %v3459_v14  ;;  %v3273_v10 = vmul.f32 %v4084_v31, %v7365_v24  ;;  %v3265_v37 = vsel %vm3264_vm13, %v4080_v49, %v3261_v1 }
 0x34b   : > { %4085 = vrcp.f32 %v2849_v60  ;;  %v3270_v35 = vsel %vm3267_vm14, %v3269_v8, %v3265_v37  ;;  %vm3278_vm15 = vweird.f32 %v4084_v31  ;;  %v3298_v16 = vand.u32 2147483648, %v2849_v60 }
 0x34c   : > { %v3274_v13 = vsub.f32 1.0, %v3273_v10  ;;  %4087 = vpow2.f32 %v3773_v17  ;;  %v2689_v34 = vadd.f32 %v4100_v48, %v2652_v63  ;;  %v3359_v62 = vmul.f32 %v3270_v35, %v7329_v52  ;;  %vm3279_vm7 = vmor %vm3277_vm0, %vm3278_vm15 }
 0x34d   : > { %v3284_v52 = vor.u32 1.1754944e-38, %v3283_v42  ;;  %v3296_v12 = vand.u32 2147483647, %v2849_v60  ;;  %vm3292_vm4 = vweird.f32 %v2849_v60  ;;  %v3299_v24 = vor.u32 1.1754944e-38, %v3298_v16 }
 0x34e   : > { %v3275_v18 = vmul.f32 %v4084_v31, %v3274_v13  ;;  %v7387_v36 = vadd.f32 %v6693_v46, %v2689_v34  ;;  %3391 = vst [vmem:[%s6768_s30 + $0xd8] sm:$0xff] %v3359_v62  ;;  %v3422_v20 = vadd.f32 %v3421_v3, %v3359_v62  ;;  %v3460_v28 = vmul.f32 %v3359_v62, %v3359_v62 }
 0x34f   : > { %vm3297_vm8 = vcmp.eq.f32.partialorder %v3296_v12, 8.507059e+37  ;;  %vm3503_vm0 = vcmask 1041408  }
 0x350   : > { %v3276_v21 = vadd.f32 %v4084_v31, %v3275_v18  ;;  %v3774_v6 = vmul.f32 -1.442695, %v7387_v36  ;;  %v3491_v15 = vadd.f32 %v3490_v41, %v3460_v28 }
 0x351   : > { %v4086_v43 = vpop.eup %4085 }
 0x352   : > { %v3288_v45 = vmul.f32 %v4086_v43, %v2849_v60  ;;  %v4088_v55 = vpop.eup %4087  ;;  %v3280_v57 = vsel %vm3279_vm7, %v4084_v31, %v3276_v21  ;;  %4089 = vpow2.f32 %v3774_v6  ;;  %vm3293_vm3 = vweird.f32 %v4086_v43 }
 0x353   : > { %v3285_v46 = vsel %vm3282_vm9, %v3284_v52, %v3280_v57  ;;  %v2850_v54 = vadd.f32 1.0, %v4088_v55  ;;  %vm3294_vm6 = vmor %vm3292_vm4, %vm3293_vm3 }
 0x354   : > { %v3289_v39 = vsub.f32 1.0, %v3288_v45  ;;  %v3360_v59 = vmul.f32 %v3285_v46, %v7345_v27 }
 0x355   : > { %4091 = vrcp.f32 %v2850_v54  ;;  %v3313_v9 = vand.u32 2147483648, %v2850_v54  ;;  %v3311_v25 = vand.u32 2147483647, %v2850_v54  ;;  %vm3307_vm11 = vweird.f32 %v2850_v54 }
 0x356   : > { %v3290_v11 = vmul.f32 %v4086_v43, %v3289_v39  ;;  %3392 = vst [vmem:[%s6768_s30 + $0xe0] sm:$0xff] %v3360_v59  ;;  %v3423_v7 = vadd.f32 %v3422_v20, %v3360_v59  ;;  %v3461_v33 = vmul.f32 %v3360_v59, %v3360_v59 }
 0x357   : > { %v3314_v29 = vor.u32 1.1754944e-38, %v3313_v9  ;;  %vm3312_vm5 = vcmp.eq.f32.partialorder %v3311_v25, 8.507059e+37 }
 0x358   : > { %v3291_v23 = vadd.f32 %v4086_v43, %v3290_v11  ;;  %v4090_v47 = vpop.eup %4089  ;;  %v3492_v56 = vadd.f32 %v3491_v15, %v3461_v33 }
 0x359   : > { %v2851_v51 = vadd.f32 1.0, %v4090_v47 }
 0x35a   : > { %v3295_v32 = vsel %vm3294_vm6, %v4086_v43, %v3291_v23 }
 0x35b   : > { %v3300_v49 = vsel %vm3297_vm8, %v3299_v24, %v3295_v32  ;;  %v4092_v27 = vpop.eup %4091  ;;  %4093 = vrcp.f32 %v2851_v51  ;;  %v3328_v3 = vand.u32 2147483648, %v2851_v51  ;;  %v3326_v17 = vand.u32 2147483647, %v2851_v51 }
 0x35c   : > { %v3361_v53 = vmul.f32 %v3300_v49, %v7359_v22  ;;  %v3303_v40 = vmul.f32 %v4092_v27, %v2850_v54  ;;  %vm3308_vm10 = vweird.f32 %v4092_v27  ;;  %vm3322_vm13 = vweird.f32 %v2851_v51 }
 0x35d   : > { %vm3309_vm1 = vmor %vm3307_vm11, %vm3308_vm10  ;;  %v3329_v63 = vor.u32 1.1754944e-38, %v3328_v3  ;;  %vm3327_vm15 = vcmp.eq.f32.partialorder %v3326_v17, 8.507059e+37 }
 0x35e   : > { %3393 = vst [vmem:[%s6768_s30 + $0xe8] sm:$0xff] %v3361_v53  ;;  %v3424_v19 = vadd.f32 %v3423_v7, %v3361_v53  ;;  %v3462_v2 = vmul.f32 %v3361_v53, %v3361_v53  ;;  %v3304_v26 = vsub.f32 1.0, %v3303_v40 }
 0x360   : > { %v3493_v48 = vadd.f32 %v3492_v56, %v3462_v2  ;;  %v3305_v4 = vmul.f32 %v4092_v27, %v3304_v26 }
 0x361   : > { %v4094_v0 = vpop.eup %4093 }
 0x362   : > { %v3306_v38 = vadd.f32 %v4092_v27, %v3305_v4  ;;  %v3318_v50 = vmul.f32 %v4094_v0, %v2851_v51  ;;  %vm3323_vm12 = vweird.f32 %v4094_v0 }
 0x363   : > { %vm3324_vm14 = vmor %vm3322_vm13, %vm3323_vm12 }
 0x364   : > { %v3310_v61 = vsel %vm3309_vm1, %v4092_v27, %v3306_v38  ;;  %v3319_v22 = vsub.f32 1.0, %v3318_v50 }
 0x365   : > { %v3315_v58 = vsel %vm3312_vm5, %v3314_v29, %v3310_v61 }
 0x366   : > { %v3362_v14 = vmul.f32 %v3315_v58, %v7376_v30  ;;  %v3320_v60 = vmul.f32 %v4094_v0, %v3319_v22 }
 0x368   : > { %3394 = vst [vmem:[%s6768_s30 + $0xf0] sm:$0xff] %v3362_v14  ;;  %v3425_v5 = vadd.f32 %v3424_v19, %v3362_v14  ;;  %v3463_v31 = vmul.f32 %v3362_v14, %v3362_v14  ;;  %v3321_v1 = vadd.f32 %v4094_v0, %v3320_v60 }
 0x36a   : > { %v3494_v41 = vadd.f32 %v3493_v48, %v3463_v31  ;;  %v3325_v8 = vsel %vm3324_vm14, %v4094_v0, %v3321_v1 }
 0x36b   : > { %v3330_v10 = vsel %vm3327_vm15, %v3329_v63, %v3325_v8 }
 0x36c   : > { %v3363_v37 = vmul.f32 %v3330_v10, %v7387_v36 }
 0x36e   : > { %3395 = vst [vmem:[%s6768_s30 + $0xf8] sm:$0xff] %v3363_v37  ;;  %v3426_v35 = vadd.f32 %v3425_v5, %v3363_v37  ;;  %v3464_v30 = vmul.f32 %v3363_v37, %v3363_v37 }
 0x370   : > { %v3427_v13 = vrot.slane %v3426_v35, 4  ;;  %v3495_v34 = vadd.f32 %v3494_v41, %v3464_v30 }
 0x372   : > { %v3428_v62 = vadd.f32 %v3427_v13, %v3426_v35  ;;  %v3496_v42 = vrot.slane %v3495_v34, 4 }
 0x374   : > { %v3429_v18 = vrot.slane %v3428_v62, 2  ;;  %v3497_v44 = vadd.f32 %v3496_v42, %v3495_v34 }
 0x376   : > { %v3430_v20 = vadd.f32 %v3429_v18, %v3428_v62  ;;  %v3498_v28 = vrot.slane %v3497_v44, 2 }
 0x378   : > { %v3431_v43 = vrot.slane %v3430_v20, 1  ;;  %v3499_v21 = vadd.f32 %v3498_v28, %v3497_v44 }
 0x37a   : > { %v3500_v6 = vrot.slane %v3499_v21, 1  ;;  %v3432_v15 = vadd.f32 %v3431_v43, %v3430_v20 }
 0x37c   : > { %v3501_v52 = vadd.f32 %v3500_v6, %v3499_v21 }
 0x37e   : > { %v3502_v36 = vsel %vm1084_vm2, %v3432_v15, %v3501_v52 }
 0x37f   : > { %v3504_v45 = vsel %vm3503_vm0, %v3502_v36, 0.0 }
 0x380   : > { %3505 = vst [vmem:[%s306_s14] sm:$0xff] %v3504_v45 }
 0x381 PF: > { %s18_s24 = sadd.s32 1, %s4107_s24  }
 0x382   : > { %p15_p4 = scmp.ge.s32.totalorder %s18_s24, 4  }
 0x384   :  { %17 = sbr.rel (!%p15_p4) target bundleno = 1 (0x1), region = 89 }

// kernel: residual_layer.5
= control target key start
LH: loop header
LB: loop body
LE: loop exit
PB: predicated region body
PF: predicated region fallthrough
CT: control target
= control target key end

     0   :  { %s2396_s21 = smov 0   ;;  %s4134_s0 = inlined_call_operand.vmem [shape: f32[2,16,16,128], index: 0, kind: input, shape index: {}]   ;;  %s4135_s1 = inlined_call_operand.vmem [shape: f32[1,128], index: 1, kind: input, shape index: {}]   ;;  %s4136_s2 = inlined_call_operand.vmem [shape: f32[1,128], index: 2, kind: input, shape index: {}]   ;;  %s4137_s3 = inlined_call_operand.vmem [shape: f32[1152,128], index: 3, kind: input, shape index: {}]   ;;  %s4138_s4 = inlined_call_operand.vmem [shape: f32[1,128], index: 4, kind: input, shape index: {}]   ;;  %s4139_s5 = inlined_call_operand.vmem [shape: f32[2,16,16,128], index: 5, kind: input, shape index: {}]   ;;  %s4140_s6 = inlined_call_operand.vmem [shape: f32[2,16,16,128], index: 6, kind: output, shape index: {}]  }
   0x1 LB: > { %s2178_s22 = sadd.s32 4294967295, %s2358_s21   ;;  %p2182_p0 = scmp.ge.s32.totalorder %s2358_s21, 1  ;;  %s2358_s21 = sphi %s2396_s21, %s16_s21  }
   0x2   : > { %p222_p1 = scmp.lt.s32.totalorder %s2358_s21, 3 }
   0x4   : > { %p223_p2 = pnand %p2182_p0, %p222_p1 }
   0x6   : > { %226 = sbr.rel (%p223_p2) target bundleno = 754 (0x2f2), region = 44 }
   0xb   : > { %v833_v0 = vld [vmem:[%s4137_s3 + $0x78] sm:$0xff]  ;;  %v832_v1 = vld [vmem:[%s4137_s3 + $0x70] sm:$0xff]  ;;  %v831_v2 = vld [vmem:[%s4137_s3 + $0x68] sm:$0xff]  ;;  %p257_p3 = scmp.lt.s32.totalorder %s2178_s22, 1  ;;  %vm409_vm0 = vcmask 1040384   ;;  %v2360_v51 = vmov 0.0  }
   0xc   : > { %2290 = vmatpush.msra.mxu1 %v833_v0  ;;  %2291 = vmatpush.msra.mxu2 %v833_v0  ;;  %v830_v3 = vld [vmem:[%s4137_s3 + $0x60] sm:$0xff]  ;;  %v829_v4 = vld [vmem:[%s4137_s3 + $0x58] sm:$0xff]  ;;  %v828_v5 = vld [vmem:[%s4137_s3 + $0x50] sm:$0xff]  ;;  %v2539_v52 = vrot.slane %v2360_v51, 7  ;;  %vm576_vm2 = vcmask 1046528   ;;  %vm689_vm3 = vcmask 1045504  }
   0xd   : > { %2292 = vmatpush.msra.mxu3 %v833_v0  ;;  %962 = vmatpush.msra.mxu0 %v833_v0  ;;  %s4408_s22 = smov (!%p257_p3, %s2178_s22), 1  ;;  %v827_v6 = vld [vmem:[%s4137_s3 + $0x48] sm:$0xff]  ;;  %v826_v7 = vld [vmem:[%s4137_s3 + $0x40] sm:$0xff]  ;;  %v825_v8 = vld [vmem:[%s4137_s3 + $0x38] sm:$0xff] }
   0xe   : > { %2293 = vmatpush.msra.mxu1 %v832_v1  ;;  %2294 = vmatpush.msra.mxu2 %v832_v1  ;;  %s2425_s13 = sshll.u32 %s4408_s22, 8  ;;  %v824_v9 = vld [vmem:[%s4137_s3 + $0x30] sm:$0xff]  ;;  %v2445_v10 = vld [vmem:[%s4135_s1] ss:$0 sm:$0xff]  ;;  %v823_v13 = vld [vmem:[%s4137_s3 + $0x28] sm:$0xff]  ;;  %4223 = vst [vmem:[#allocation4_spill] sm:$0xff] %v2539_v52 }
   0xf   : > { %2295 = vmatpush.msra.mxu3 %v832_v1  ;;  %963 = vmatpush.msra.mxu0 %v832_v1  ;;  %s2437_s20 = scalar_lea.vmem %s4134_s0, %s2425_s13  ;;  %v822_v15 = vld [vmem:[%s4137_s3 + $0x20] sm:$0xff]  ;;  %v821_v19 = vld [vmem:[%s4137_s3 + $0x18] sm:$0xff]  ;;  %v820_v23 = vld [vmem:[%s4137_s3 + $0x10] sm:$0xff]  ;;  %s3915_s28 = scalar_lea.vmem %s4139_s5, %s2425_s13 }
  0x10   : > { %2296 = vmatpush.msra.mxu1 %v831_v2  ;;  %2297 = vmatpush.msra.mxu2 %v831_v2  ;;  %v278_v11 = vld [vmem:[%s2437_s20 + $0x30] sm:$0xff]  ;;  %v2460_v17 = vld [vmem:[%s4136_s2] ss:$0 sm:$0xff]  ;;  %v279_v21 = vld [vmem:[%s2437_s20 + $0x38] sm:$0xff]  ;;  %s3933_s9 = scalar_lea.vmem %s4140_s6, %s2425_s13 }
  0x11   : > { %2298 = vmatpush.msra.mxu3 %v831_v2  ;;  %964 = vmatpush.msra.mxu0 %v831_v2  ;;  %v286_v12 = vld [vmem:[%s2437_s20 + $0x70] sm:$0xff]  ;;  %v314_v16 = vmul.f32 %v2445_v10, %v278_v11  ;;  %v287_v22 = vld [vmem:[%s2437_s20 + $0x78] sm:$0xff]  ;;  %v315_v27 = vmul.f32 %v2445_v10, %v279_v21  ;;  %v819_v29 = vld [vmem:[%s4137_s3 + $0x8] sm:$0xff] }
  0x12   : > { %2299 = vmatpush.msra.mxu1 %v830_v3  ;;  %2300 = vmatpush.msra.mxu2 %v830_v3  ;;  %v294_v14 = vld [vmem:[%s2437_s20 + $0xb0] sm:$0xff]  ;;  %v322_v18 = vmul.f32 %v2445_v10, %v286_v12  ;;  %v295_v26 = vld [vmem:[%s2437_s20 + $0xb8] sm:$0xff]  ;;  %v323_v28 = vmul.f32 %v2445_v10, %v287_v22  ;;  %v818_v32 = vld [vmem:[%s4137_s3] sm:$0xff] }
  0x13   : > { %2301 = vmatpush.msra.mxu3 %v830_v3  ;;  %965 = vmatpush.msra.mxu0 %v830_v3  ;;  %v330_v20 = vmul.f32 %v2445_v10, %v294_v14  ;;  %v350_v24 = vadd.f32 %v2460_v17, %v314_v16  ;;  %v331_v31 = vmul.f32 %v2445_v10, %v295_v26  ;;  %vm2490_vm1 = vmneg %vm409_vm0  ;;  %v865_v38 = vld [vmem:[%s4137_s3 + $0x178] sm:$0xff]  ;;  %v864_v43 = vld [vmem:[%s4137_s3 + $0x170] sm:$0xff] }
  0x14   : > { %2302 = vmatpush.msra.mxu1 %v829_v4  ;;  %2303 = vmatpush.msra.mxu2 %v829_v4  ;;  %v358_v25 = vadd.f32 %v2460_v17, %v322_v18  ;;  %v2495_v36 = vadd.f32 %v2460_v17, %v315_v27  ;;  %v2498_v37 = vadd.f32 %v2460_v17, %v323_v28  ;;  %v849_v40 = vld [vmem:[%s4137_s3 + $0xf8] sm:$0xff]  ;;  %v848_v46 = vld [vmem:[%s4137_s3 + $0xf0] sm:$0xff]  ;;  %v280_v47 = vld [vmem:[%s2437_s20 + $0x40] sm:$0xff] }
  0x15   : > { %2304 = vmatpush.msra.mxu3 %v829_v4  ;;  %966 = vmatpush.msra.mxu0 %v829_v4  ;;  %v366_v30 = vadd.f32 %v2460_v17, %v330_v20  ;;  %v2485_v33 = vrot.slane %v350_v24, 7  ;;  %v2509_v41 = vadd.f32 %v2460_v17, %v331_v31  ;;  %v881_v42 = vld [vmem:[%s4137_s3 + $0x1f8] sm:$0xff]  ;;  %v288_v48 = vld [vmem:[%s2437_s20 + $0x80] sm:$0xff]  ;;  %v880_v49 = vld [vmem:[%s4137_s3 + $0x1f0] sm:$0xff]  ;;  %v316_v58 = vmul.f32 %v2445_v10, %v280_v47 }
  0x16   : > { %2305 = vmatpush.msra.mxu1 %v828_v5  ;;  %2306 = vmatpush.msra.mxu2 %v828_v5  ;;  %v2487_v34 = vrot.slane %v358_v25, 7  ;;  %v4152_v44 = vrot.slane %v2495_v36, 7  ;;  %v4148_v45 = vrot.slane %v2498_v37, 7  ;;  %v863_v50 = vld [vmem:[%s4137_s3 + $0x168] sm:$0xff]  ;;  %v296_v55 = vld [vmem:[%s2437_s20 + $0xc0] sm:$0xff]  ;;  %v897_v57 = vld [vmem:[%s4137_s3 + $0x278] sm:$0xff]  ;;  %v324_v59 = vmul.f32 %v2445_v10, %v288_v48 }
  0x17   : > { %2307 = vmatpush.msra.mxu3 %v828_v5  ;;  %967 = vmatpush.msra.mxu0 %v828_v5  ;;  %4219 = vst [vmem:[#allocation2_spill] sm:$0xff] %v2485_v33  ;;  %v2503_v39 = vrot.slane %v366_v30, 7  ;;  %v4143_v53 = vrot.slane %v2509_v41, 7  ;;  %v847_v54 = vld [vmem:[%s4137_s3 + $0xe8] sm:$0xff]  ;;  %v862_v62 = vld [vmem:[%s4137_s3 + $0x160] sm:$0xff]  ;;  %v332_v0 = vmul.f32 %v2445_v10, %v296_v55  ;;  %v896_v4 = vld [vmem:[%s4137_s3 + $0x270] sm:$0xff] }
  0x18   : > { %2308 = vmatpush.msra.mxu1 %v827_v6  ;;  %2309 = vmatpush.msra.mxu2 %v827_v6  ;;  %4220 = vst [vmem:[#allocation3_spill] sm:$0xff] %v2487_v34  ;;  %v879_v56 = vld [vmem:[%s4137_s3 + $0x1e8] sm:$0xff]  ;;  %v2558_v60 = vsel %vm409_vm0, %v2485_v33, %v4152_v44  ;;  %v2564_v61 = vsel %vm409_vm0, %v2487_v34, %v4148_v45  ;;  %v878_v63 = vld [vmem:[%s4137_s3 + $0x1e0] sm:$0xff]  ;;  %v877_v12 = vld [vmem:[%s4137_s3 + $0x1d8] sm:$0xff] }
  0x19   : > { %2310 = vmatpush.msra.mxu3 %v827_v6  ;;  %968 = vmatpush.msra.mxu0 %v827_v6  ;;  %4224 = vst [vmem:[#allocation5_spill] sm:$0xff] %v2558_v60  ;;  %v281_v1 = vld [vmem:[%s2437_s20 + $0x48] sm:$0xff]  ;;  %v2582_v3 = vsel %vm409_vm0, %v2503_v39, %v4143_v53  ;;  %v272_v5 = vld [vmem:[%s2437_s20] sm:$0xff]  ;;  %v352_v6 = vadd.f32 %v2460_v17, %v316_v58  ;;  %v845_v18 = vld [vmem:[%s4137_s3 + $0xd8] sm:$0xff] }
  0x1a   : > { %2311 = vmatpush.msra.mxu1 %v826_v7  ;;  %2312 = vmatpush.msra.mxu2 %v826_v7  ;;  %4225 = vst [vmem:[#allocation6_spill] sm:$0xff] %v2564_v61  ;;  %v289_v2 = vld [vmem:[%s2437_s20 + $0x88] sm:$0xff]  ;;  %v317_v14 = vmul.f32 %v2445_v10, %v281_v1  ;;  %v368_v16 = vadd.f32 %v2460_v17, %v332_v0  ;;  %v876_v21 = vld [vmem:[%s4137_s3 + $0x1d0] sm:$0xff]  ;;  %v894_v25 = vld [vmem:[%s4137_s3 + $0x260] sm:$0xff] }
  0x1b   : > { %2313 = vmatpush.msra.mxu3 %v826_v7  ;;  %969 = vmatpush.msra.mxu0 %v826_v7  ;;  %4226 = vst [vmem:[#allocation7_spill] sm:$0xff] %v2582_v3  ;;  %v360_v7 = vadd.f32 %v2460_v17, %v324_v59  ;;  %v297_v11 = vld [vmem:[%s2437_s20 + $0xc8] sm:$0xff]  ;;  %v308_v20 = vmul.f32 %v2445_v10, %v272_v5  ;;  %v844_v26 = vld [vmem:[%s4137_s3 + $0xd0] sm:$0xff]  ;;  %v858_v47 = vld [vmem:[%s4137_s3 + $0x140] sm:$0xff] }
  0x1c   : > { %2314 = vmatpush.msra.mxu1 %v825_v8  ;;  %2315 = vmatpush.msra.mxu2 %v825_v8  ;;  %v333_v22 = vmul.f32 %v2445_v10, %v297_v11  ;;  %v273_v27 = vld [vmem:[%s2437_s20 + $0x8] sm:$0xff]  ;;  %v2632_v28 = vadd.f32 %v2460_v17, %v317_v14  ;;  %v2638_v30 = vrot.slane %v368_v16, 7  ;;  %v282_v48 = vld [vmem:[%s2437_s20 + $0x50] sm:$0xff]  ;;  %v874_v51 = vld [vmem:[%s4137_s3 + $0x1c0] sm:$0xff] }
  0x1d   : > { %2316 = vmatpush.msra.mxu3 %v825_v8  ;;  %970 = vmatpush.msra.mxu0 %v825_v8  ;;  %v846_v8 = vld [vmem:[%s4137_s3 + $0xe0] sm:$0xff]  ;;  %v2622_v24 = vrot.slane %v360_v7, 7  ;;  %v859_v31 = vld [vmem:[%s4137_s3 + $0x148] sm:$0xff]  ;;  %v290_v55 = vld [vmem:[%s2437_s20 + $0x90] sm:$0xff]  ;;  %v318_v1 = vmul.f32 %v2445_v10, %v282_v48 }
  0x1e   : > { %2317 = vmatpush.msra.mxu1 %v824_v9  ;;  %2318 = vmatpush.msra.mxu2 %v824_v9  ;;  %v857_v58 = vld [vmem:[%s4137_s3 + $0x138] sm:$0xff]  ;;  %v856_v11 = vld [vmem:[%s4137_s3 + $0x130] sm:$0xff]  ;;  %v890_v16 = vld [vmem:[%s4137_s3 + $0x240] sm:$0xff] }
  0x1f   : > { %2319 = vmatpush.msra.mxu3 %v824_v9  ;;  %971 = vmatpush.msra.mxu0 %v824_v9  ;;  %v861_v9 = vld [vmem:[%s4137_s3 + $0x158] sm:$0xff]  ;;  %4228 = vst [vmem:[#allocation9_spill] sm:$0xff] %v2622_v24 }
  0x20   : > { %2320 = vmatpush.msra.mxu1 %v823_v13  ;;  %2321 = vmatpush.msra.mxu2 %v823_v13  ;;  %v873_v0 = vld [vmem:[%s4137_s3 + $0x1b8] sm:$0xff] }
  0x21   : > { %2322 = vmatpush.msra.mxu3 %v823_v13  ;;  %972 = vmatpush.msra.mxu0 %v823_v13  ;;  %v895_v13 = vld [vmem:[%s4137_s3 + $0x268] sm:$0xff]  ;;  %v841_v5 = vld [vmem:[%s4137_s3 + $0xb8] sm:$0xff] }
  0x22   : > { %2323 = vmatpush.msra.mxu1 %v822_v15  ;;  %2324 = vmatpush.msra.mxu2 %v822_v15 }
  0x23   : > { %2325 = vmatpush.msra.mxu3 %v822_v15  ;;  %973 = vmatpush.msra.mxu0 %v822_v15  ;;  %v325_v15 = vmul.f32 %v2445_v10, %v289_v2  ;;  %v326_v2 = vmul.f32 %v2445_v10, %v290_v55 }
  0x24   : > { %2326 = vmatpush.msra.mxu1 %v821_v19  ;;  %2327 = vmatpush.msra.mxu2 %v821_v19 }
  0x25   : > { %2328 = vmatpush.msra.mxu3 %v821_v19  ;;  %974 = vmatpush.msra.mxu0 %v821_v19  ;;  %v860_v19 = vld [vmem:[%s4137_s3 + $0x150] sm:$0xff] }
  0x26   : > { %2329 = vmatpush.msra.mxu1 %v820_v23  ;;  %2330 = vmatpush.msra.mxu2 %v820_v23 }
  0x27   : > { %2331 = vmatpush.msra.mxu3 %v820_v23  ;;  %975 = vmatpush.msra.mxu0 %v820_v23  ;;  %v2620_v23 = vrot.slane %v352_v6, 7 }
  0x28   : > { %2332 = vmatpush.msra.mxu1 %v819_v29  ;;  %2333 = vmatpush.msra.mxu2 %v819_v29 }
  0x29   : > { %2334 = vmatpush.msra.mxu3 %v819_v29  ;;  %976 = vmatpush.msra.mxu0 %v819_v29  ;;  %4227 = vst [vmem:[#allocation8_spill] sm:$0xff] %v2620_v23  ;;  %v2635_v29 = vadd.f32 %v2460_v17, %v325_v15 }
  0x2a   : > { %2335 = vmatpush.msra.mxu1 %v818_v32  ;;  %2336 = vmatpush.msra.mxu2 %v818_v32 }
  0x2b   : > { %2198 = vmatmul.msk.f32.vlgmr.msra.gmra.mxu1 %vm2490_vm1, %v2485_v33  ;;  %2206 = vmatmul.msk.f32.vlgmr.msra.gmra.mxu2 %vm2490_vm1, %v2487_v34 }
  0x2c   : > { %1188 = vmatpush.msrb.mxu2 %v865_v38  ;;  %2337 = vmatpush.msra.mxu3 %v818_v32  ;;  %v875_v38 = vld [vmem:[%s4137_s3 + $0x1c8] sm:$0xff] }
  0x2d   : > { %2214 = vmatmul.msk.f32.vlgmr.msra.gmra.mxu3 %vm2490_vm1, %v2503_v39  ;;  %1075 = vmatpush.msrb.mxu1 %v849_v40  ;;  %v2648_v40 = vadd.f32 %v2460_v17, %v333_v22  ;;  %v855_v22 = vld [vmem:[%s4137_s3 + $0x128] sm:$0xff] }
  0x2e   : > { %1301 = vmatpush.msrb.mxu3 %v881_v42  ;;  %1189 = vmatpush.msrb.mxu2 %v864_v43  ;;  %v893_v42 = vld [vmem:[%s4137_s3 + $0x258] sm:$0xff]  ;;  %v309_v43 = vmul.f32 %v2445_v10, %v273_v27 }
  0x2f   : > { %1076 = vmatpush.msrb.mxu1 %v848_v46  ;;  %977 = vmatpush.msra.mxu0 %v818_v32  ;;  %v344_v32 = vadd.f32 %v2460_v17, %v308_v20  ;;  %v843_v46 = vld [vmem:[%s4137_s3 + $0xc8] sm:$0xff]  ;;  %v4142_v59 = vrot.slane %v2648_v40, 7  ;;  %v362_v20 = vadd.f32 %v2460_v17, %v326_v2 }
  0x30   : > { %1302 = vmatpush.msrb.mxu3 %v880_v49  ;;  %1190 = vmatpush.msrb.mxu2 %v863_v50  ;;  %v4151_v49 = vrot.slane %v2632_v28, 7  ;;  %v4147_v50 = vrot.slane %v2635_v29, 7 }
  0x31   : > { %2190 = vmatmul.msk.f32.vlgmr.msra.gmra.mxu0 %vm2490_vm1, %v2539_v52  ;;  %1077 = vmatpush.msrb.mxu1 %v847_v54  ;;  %v892_v54 = vld [vmem:[%s4137_s3 + $0x250] sm:$0xff]  ;;  %v2731_v14 = vsel %vm409_vm0, %v2638_v30, %v4142_v59  ;;  %v2778_v55 = vrot.slane %v362_v20, 7 }
  0x32   : > { %1303 = vmatpush.msrb.mxu3 %v879_v56  ;;  %1414 = vmatpush.msrb.mxu0 %v897_v57  ;;  %v2679_v56 = vrot.slane %v344_v32, 7  ;;  %v842_v57 = vld [vmem:[%s4137_s3 + $0xc0] sm:$0xff]  ;;  %v2707_v6 = vsel %vm409_vm0, %v2620_v23, %v4151_v49  ;;  %v2713_v7 = vsel %vm409_vm0, %v2622_v24, %v4147_v50  ;;  %4231 = vst [vmem:[#allocation12_spill] sm:$0xff] %v2731_v14  ;;  %v889_v32 = vld [vmem:[%s4137_s3 + $0x238] sm:$0xff]  ;;  %v527_v50 = vsel %vm409_vm0, %v2539_v52, 0.0  ;;  %v911_v49 = vld [vmem:[%s4137_s3 + $0x2e8] sm:$0xff] }
  0x33   : > { %1005 = vmatmul.f32.gmra.mxu1 %v2558_v60  ;;  %1029 = vmatmul.f32.gmra.mxu2 %v2564_v61  ;;  %4229 = vst [vmem:[#allocation10_spill] sm:$0xff] %v2707_v6 }
  0x34   : > { %1191 = vmatpush.msrb.mxu2 %v862_v62  ;;  %1304 = vmatpush.msrb.mxu3 %v878_v63  ;;  %v2689_v62 = vadd.f32 %v2460_v17, %v309_v43  ;;  %v298_v63 = vld [vmem:[%s2437_s20 + $0xd0] sm:$0xff]  ;;  %4230 = vst [vmem:[#allocation11_spill] sm:$0xff] %v2713_v7  ;;  %v839_v43 = vld [vmem:[%s4137_s3 + $0xa8] sm:$0xff] }
  0x35   : > { %1053 = vmatmul.f32.gmra.mxu3 %v2582_v3  ;;  %1415 = vmatpush.msrb.mxu0 %v896_v4  ;;  %v891_v4 = vld [vmem:[%s4137_s3 + $0x248] sm:$0xff] }
  0x36   : > { %1078 = vmatpush.msrb.mxu1 %v846_v8  ;;  %1192 = vmatpush.msrb.mxu2 %v861_v9  ;;  %v283_v8 = vld [vmem:[%s2437_s20 + $0x58] sm:$0xff]  ;;  %v334_v9 = vmul.f32 %v2445_v10, %v298_v63  ;;  %v413_v15 = vrot.slane %v2689_v62, 7 }
  0x37   : > { %1305 = vmatpush.msrb.mxu3 %v877_v12  ;;  %1416 = vmatpush.msrb.mxu0 %v895_v13  ;;  %v872_v12 = vld [vmem:[%s4137_s3 + $0x1b0] sm:$0xff]  ;;  %v291_v13 = vld [vmem:[%s2437_s20 + $0x98] sm:$0xff] }
  0x38   : > { %1079 = vmatpush.msrb.mxu1 %v845_v18  ;;  %1193 = vmatpush.msrb.mxu2 %v860_v19  ;;  %v274_v18 = vld [vmem:[%s2437_s20 + $0x10] sm:$0xff]  ;;  %v354_v19 = vadd.f32 %v2460_v17, %v318_v1  ;;  %v327_v27 = vmul.f32 %v2445_v10, %v291_v13  ;;  %v275_v63 = vld [vmem:[%s2437_s20 + $0x18] sm:$0xff]  ;;  %v284_v13 = vld [vmem:[%s2437_s20 + $0x60] sm:$0xff] }
  0x39   : > { %981 = vmatmul.f32.gmra.mxu0 %v2539_v52  ;;  %1306 = vmatpush.msrb.mxu3 %v876_v21  ;;  %v840_v21 = vld [vmem:[%s4137_s3 + $0xb0] sm:$0xff] }
  0x3a   : > { %1417 = vmatpush.msrb.mxu0 %v894_v25  ;;  %1080 = vmatpush.msrb.mxu1 %v844_v26  ;;  %v299_v25 = vld [vmem:[%s2437_s20 + $0xd8] sm:$0xff]  ;;  %v319_v26 = vmul.f32 %v2445_v10, %v283_v8  ;;  %v2791_v1 = vadd.f32 %v2460_v17, %v327_v27  ;;  %v836_v27 = vld [vmem:[%s4137_s3 + $0x90] sm:$0xff] }
  0x3b   : > { %2200 = vmatmul.msk.f32.gmra.mxu1 %vm2490_vm1, %v2620_v23  ;;  %2208 = vmatmul.msk.f32.gmra.mxu2 %vm2490_vm1, %v2622_v24  ;;  %v335_v48 = vmul.f32 %v2445_v10, %v299_v25  ;;  %v869_v8 = vld [vmem:[%s4137_s3 + $0x198] sm:$0xff]  ;;  %v886_v25 = vld [vmem:[%s4137_s3 + $0x220] sm:$0xff] }
  0x3c   : > { %1194 = vmatpush.msrb.mxu2 %v859_v31  ;;  %1307 = vmatpush.msrb.mxu3 %v875_v38  ;;  %v871_v31 = vld [vmem:[%s4137_s3 + $0x1a8] sm:$0xff]  ;;  %v370_v38 = vadd.f32 %v2460_v17, %v334_v9  ;;  %v4146_v20 = vrot.slane %v2791_v1, 7 }
  0x3d   : > { %2216 = vmatmul.msk.f32.gmra.mxu3 %vm2490_vm1, %v2638_v30  ;;  %1418 = vmatpush.msrb.mxu0 %v893_v42  ;;  %v310_v42 = vmul.f32 %v2445_v10, %v274_v18  ;;  %v2804_v9 = vadd.f32 %v2460_v17, %v335_v48  ;;  %v852_v18 = vld [vmem:[%s4137_s3 + $0x110] sm:$0xff] }
  0x3e   : > { %1081 = vmatpush.msrb.mxu1 %v843_v46  ;;  %1195 = vmatpush.msrb.mxu2 %v858_v47  ;;  %v854_v46 = vld [vmem:[%s4137_s3 + $0x120] sm:$0xff]  ;;  %v2770_v47 = vsel %vm409_vm0, %v2679_v56, %v413_v15  ;;  %v2794_v2 = vrot.slane %v370_v38, 7 }
  0x3f   : > { %1308 = vmatpush.msrb.mxu3 %v874_v51  ;;  %1419 = vmatpush.msrb.mxu0 %v892_v54  ;;  %v870_v51 = vld [vmem:[%s4137_s3 + $0x1a0] sm:$0xff]  ;;  %v2776_v54 = vrot.slane %v354_v19, 7 }
  0x40   : > { %1082 = vmatpush.msrb.mxu1 %v842_v57  ;;  %1196 = vmatpush.msrb.mxu2 %v857_v58  ;;  %v888_v57 = vld [vmem:[%s4137_s3 + $0x230] sm:$0xff]  ;;  %v838_v58 = vld [vmem:[%s4137_s3 + $0xa0] sm:$0xff]  ;;  %4233 = vst [vmem:[#allocation14_spill] sm:$0xff] %v2794_v2 }
  0x41   : > { %2192 = vmatmul.msk.f32.gmra.mxu0 %vm2490_vm1, %v2679_v56  ;;  %1309 = vmatpush.msrb.mxu3 %v873_v0  ;;  %4232 = vst [vmem:[#allocation13_spill] sm:$0xff] %v2776_v54  ;;  %v2788_v0 = vadd.f32 %v2460_v17, %v319_v26 }
  0x42   : > { %1420 = vmatpush.msrb.mxu0 %v891_v4  ;;  %1083 = vmatpush.msrb.mxu1 %v841_v5  ;;  %v346_v4 = vadd.f32 %v2460_v17, %v310_v42  ;;  %v853_v5 = vld [vmem:[%s4137_s3 + $0x118] sm:$0xff]  ;;  %v300_v42 = vld [vmem:[%s2437_s20 + $0xe0] sm:$0xff] }
  0x43   : > { %1011 = vmatmul.f32.gmra.mxu1 %v2707_v6  ;;  %1035 = vmatmul.f32.gmra.mxu2 %v2713_v7  ;;  %v4150_v19 = vrot.slane %v2788_v0, 7 }
  0x44   : > { %1197 = vmatpush.msrb.mxu2 %v856_v11  ;;  %1310 = vmatpush.msrb.mxu3 %v872_v12  ;;  %v311_v11 = vmul.f32 %v2445_v10, %v275_v63  ;;  %v887_v12 = vld [vmem:[%s4137_s3 + $0x228] sm:$0xff]  ;;  %v2835_v26 = vrot.slane %v346_v4, 7  ;;  %v2869_v63 = vsel %vm409_vm0, %v2778_v55, %v4146_v20 }
  0x45   : > { %1059 = vmatmul.f32.gmra.mxu3 %v2731_v14  ;;  %1421 = vmatpush.msrb.mxu0 %v890_v16  ;;  %v837_v16 = vld [vmem:[%s4137_s3 + $0x98] sm:$0xff]  ;;  %4235 = vst [vmem:[#allocation16_spill] sm:$0xff] %v2869_v63  ;;  %v285_v4 = vld [vmem:[%s2437_s20 + $0x68] sm:$0xff] }
  0x46   : > { %1084 = vmatpush.msrb.mxu1 %v840_v21  ;;  %1198 = vmatpush.msrb.mxu2 %v855_v22  ;;  %v292_v21 = vld [vmem:[%s2437_s20 + $0xa0] sm:$0xff]  ;;  %v868_v22 = vld [vmem:[%s4137_s3 + $0x190] sm:$0xff]  ;;  %v2845_v38 = vadd.f32 %v2460_v17, %v311_v11 }
  0x47   : > { %1311 = vmatpush.msrb.mxu3 %v871_v31  ;;  %1422 = vmatpush.msrb.mxu0 %v889_v32  ;;  %v851_v31 = vld [vmem:[%s4137_s3 + $0x108] sm:$0xff]  ;;  %v4141_v32 = vrot.slane %v2804_v9, 7  ;;  %v328_v48 = vmul.f32 %v2445_v10, %v292_v21  ;;  %v850_v11 = vld [vmem:[%s4137_s3 + $0x100] sm:$0xff]  ;;  %v884_v21 = vld [vmem:[%s4137_s3 + $0x210] sm:$0xff] }
  0x48   : > { %1085 = vmatpush.msrb.mxu1 %v839_v43  ;;  %1199 = vmatpush.msrb.mxu2 %v854_v46  ;;  %v867_v43 = vld [vmem:[%s4137_s3 + $0x188] sm:$0xff]  ;;  %v320_v46 = vmul.f32 %v2445_v10, %v284_v13 }
  0x49   : > { %987 = vmatmul.f32.gmra.mxu0 %v2770_v47  ;;  %1312 = vmatpush.msrb.mxu3 %v870_v51  ;;  %v885_v51 = vld [vmem:[%s4137_s3 + $0x218] sm:$0xff]  ;;  %v2887_v13 = vsel %vm409_vm0, %v2794_v2, %v4141_v32 }
  0x4a   : > { %1423 = vmatpush.msrb.mxu0 %v888_v57  ;;  %1086 = vmatpush.msrb.mxu1 %v838_v58  ;;  %v835_v57 = vld [vmem:[%s4137_s3 + $0x88] sm:$0xff]  ;;  %v2863_v58 = vsel %vm409_vm0, %v2776_v54, %v4150_v19  ;;  %4236 = vst [vmem:[#allocation17_spill] sm:$0xff] %v2887_v13  ;;  %v693_v19 = vrot.slane %v527_v50, 2 }
  0x4b   : > { %2202 = vmatmul.msk.f32.gmra.mxu1 %vm2490_vm1, %v2776_v54  ;;  %2210 = vmatmul.msk.f32.gmra.mxu2 %vm2490_vm1, %v2778_v55  ;;  %4234 = vst [vmem:[#allocation15_spill] sm:$0xff] %v2863_v58 }
  0x4c   : > { %1200 = vmatpush.msrb.mxu2 %v853_v5  ;;  %1313 = vmatpush.msrb.mxu3 %v869_v8  ;;  %v336_v5 = vmul.f32 %v2445_v10, %v300_v42  ;;  %v293_v8 = vld [vmem:[%s2437_s20 + $0xa8] sm:$0xff]  ;;  %v929_v42 = vld [vmem:[%s4137_s3 + $0x378] sm:$0xff] }
  0x4d   : > { %2218 = vmatmul.msk.f32.gmra.mxu3 %vm2490_vm1, %v2794_v2  ;;  %1424 = vmatpush.msrb.mxu0 %v887_v12  ;;  %v866_v12 = vld [vmem:[%s4137_s3 + $0x180] sm:$0xff] }
  0x4e   : > { %1087 = vmatpush.msrb.mxu1 %v837_v16  ;;  %1201 = vmatpush.msrb.mxu2 %v852_v18  ;;  %v4154_v16 = vrot.slane %v2845_v38, 7  ;;  %v276_v18 = vld [vmem:[%s2437_s20 + $0x20] sm:$0xff] }
  0x4f   : > { %1314 = vmatpush.msrb.mxu3 %v868_v22  ;;  %1425 = vmatpush.msrb.mxu0 %v886_v25  ;;  %v356_v22 = vadd.f32 %v2460_v17, %v320_v46  ;;  %v364_v25 = vadd.f32 %v2460_v17, %v328_v48  ;;  %v883_v46 = vld [vmem:[%s4137_s3 + $0x208] sm:$0xff]  ;;  %v945_v48 = vld [vmem:[%s4137_s3 + $0x3f8] sm:$0xff]  ;;  %v312_v32 = vmul.f32 %v2445_v10, %v276_v18 }
  0x50   : > { %1088 = vmatpush.msrb.mxu1 %v836_v27  ;;  %1202 = vmatpush.msrb.mxu2 %v851_v31  ;;  %v301_v27 = vld [vmem:[%s2437_s20 + $0xe8] sm:$0xff]  ;;  %v834_v31 = vld [vmem:[%s4137_s3 + $0x80] sm:$0xff] }
  0x51   : > { %2194 = vmatmul.msk.f32.gmra.mxu0 %vm2490_vm1, %v2835_v26  ;;  %1315 = vmatpush.msrb.mxu3 %v867_v43  ;;  %v321_v43 = vmul.f32 %v2445_v10, %v285_v4  ;;  %v913_v4 = vld [vmem:[%s4137_s3 + $0x2f8] sm:$0xff]  ;;  %v277_v18 = vld [vmem:[%s2437_s20 + $0x28] sm:$0xff] }
  0x52   : > { %1426 = vmatpush.msrb.mxu0 %v885_v51  ;;  %1089 = vmatpush.msrb.mxu1 %v835_v57  ;;  %v329_v51 = vmul.f32 %v2445_v10, %v293_v8  ;;  %v372_v57 = vadd.f32 %v2460_v17, %v336_v5  ;;  %v2923_v8 = vsel %vm409_vm0, %v2835_v26, %v4154_v16  ;;  %v2928_v5 = vrot.slane %v364_v25, 7 }
  0x53   : > { %1017 = vmatmul.f32.gmra.mxu1 %v2863_v58  ;;  %1041 = vmatmul.f32.gmra.mxu2 %v2869_v63  ;;  %v2935_v59 = vadd.f32 %v2460_v17, %v321_v43  ;;  %v348_v25 = vadd.f32 %v2460_v17, %v312_v32  ;;  %v928_v32 = vld [vmem:[%s4137_s3 + $0x370] sm:$0xff] }
  0x54   : > { %1203 = vmatpush.msrb.mxu2 %v850_v11  ;;  %1316 = vmatpush.msrb.mxu3 %v866_v12  ;;  %v337_v11 = vmul.f32 %v2445_v10, %v301_v27  ;;  %v2926_v12 = vrot.slane %v356_v22, 7  ;;  %v2938_v53 = vadd.f32 %v2460_v17, %v329_v51  ;;  %v2941_v22 = vrot.slane %v372_v57, 7  ;;  %v961_v27 = vld [vmem:[%s4137_s3 + $0x478] sm:$0xff] }
  0x55   : > { %1065 = vmatmul.f32.gmra.mxu3 %v2887_v13  ;;  %1427 = vmatpush.msrb.mxu0 %v884_v21  ;;  %v882_v21 = vld [vmem:[%s4137_s3 + $0x200] sm:$0xff]  ;;  %v4149_v43 = vrot.slane %v2935_v59, 7 }
  0x56   : > { %1090 = vmatpush.msrb.mxu1 %v834_v31  ;;  %1640 = vmatpush.msra.mxu2 %v929_v42  ;;  %4237 = vst [vmem:[#allocation18_spill] sm:$0xff] %v2926_v12  ;;  %v2948_v31 = vadd.f32 %v2460_v17, %v337_v11  ;;  %v313_v42 = vmul.f32 %v2445_v10, %v277_v18  ;;  %v4145_v51 = vrot.slane %v2938_v53, 7  ;;  %v2965_v10 = vrot.slane %v348_v25, 7 }
  0x57   : > { %1428 = vmatpush.msrb.mxu0 %v883_v46  ;;  %1753 = vmatpush.msra.mxu3 %v945_v48  ;;  %4238 = vst [vmem:[#allocation19_spill] sm:$0xff] %v2941_v22  ;;  %v944_v46 = vld [vmem:[%s4137_s3 + $0x3f0] sm:$0xff]  ;;  %v2981_v11 = vsel %vm409_vm0, %v2926_v12, %v4149_v43  ;;  %v583_v43 = vrot.slane %v2770_v47, 1 }
  0x58   : > { %1527 = vmatpush.msra.mxu1 %v913_v4  ;;  %1641 = vmatpush.msra.mxu2 %v928_v32  ;;  %4239 = vst [vmem:[#allocation20_spill] sm:$0xff] %v2965_v10  ;;  %v912_v48 = vld [vmem:[%s4137_s3 + $0x2f0] sm:$0xff]  ;;  %v4144_v57 = vrot.slane %v2948_v31, 7  ;;  %v2975_v4 = vadd.f32 %v2460_v17, %v313_v42  ;;  %v2987_v18 = vsel %vm409_vm0, %v2928_v5, %v4145_v51  ;;  %v510_v17 = vsel %vm409_vm0, 0.0, %v2539_v52 }
  0x59   : > { %993 = vmatmul.f32.gmra.mxu0 %v2923_v8  ;;  %1754 = vmatpush.msra.mxu3 %v944_v46  ;;  %4240 = vst [vmem:[#allocation21_spill] sm:$0xff] %v2981_v11  ;;  %v578_v42 = vrot.slane %v2539_v52, 1  ;;  %v690_v32 = vrot.slane %v510_v17, 2  ;;  %v691_v46 = vrot.slane %v2539_v52, 2 }
  0x5a   : > { %1429 = vmatpush.msrb.mxu0 %v882_v21  ;;  %1528 = vmatpush.msra.mxu1 %v912_v48  ;;  %4241 = vst [vmem:[#allocation22_spill] sm:$0xff] %v2987_v18  ;;  %v2998_v21 = vsel %vm409_vm0, %v2941_v22, %v4144_v57  ;;  %v4153_v25 = vrot.slane %v2975_v4, 7  ;;  %v960_v48 = vld [vmem:[%s4137_s3 + $0x470] sm:$0xff] }
  0x5b   : > { %2204 = vmatmul.msk.f32.gmra.mxu1 %vm2490_vm1, %v2926_v12  ;;  %2212 = vmatmul.msk.f32.gmra.mxu2 %vm2490_vm1, %v2928_v5  ;;  %v3021_v20 = vsel %vm689_vm3, %v690_v32, %v691_v46  ;;  %v943_v32 = vld [vmem:[%s4137_s3 + $0x3e8] sm:$0xff] }
  0x5c   : > { %1866 = vmatpush.msra.mxu0 %v961_v27  ;;  %v577_v27 = vrot.slane %v510_v17, 1  ;;  %v3013_v57 = vsel %vm409_vm0, %v2965_v10, %v4153_v25  ;;  %v511_v17 = vsel %vm409_vm0, 0.0, %v2679_v56  ;;  %4244 = vst [vmem:[#allocation25_spill] sm:$0xff] %v3021_v20  ;;  %1755 = vmatpush.msra.mxu3 %v943_v32 }
  0x5d   : > { %2220 = vmatmul.msk.f32.gmra.mxu3 %vm2490_vm1, %v2941_v22  ;;  %4242 = vst [vmem:[#allocation23_spill] sm:$0xff] %v3013_v57  ;;  %v582_v45 = vrot.slane %v511_v17, 1  ;;  %1529 = vmatpush.msra.mxu1 %v911_v49  ;;  %v695_v16 = vrot.slane %v511_v17, 2  ;;  %v959_v49 = vld [vmem:[%s4137_s3 + $0x468] sm:$0xff] }
  0x5e   : > { %1867 = vmatpush.msra.mxu0 %v960_v48  ;;  %v3018_v51 = vsel %vm576_vm2, %v577_v27, %v578_v42  ;;  %v927_v27 = vld [vmem:[%s4137_s3 + $0x368] sm:$0xff]  ;;  %v580_v48 = vrot.slane %v527_v50, 1  ;;  %v528_v50 = vsel %vm409_vm0, %v413_v15, 0.0  ;;  %v512_v15 = vsel %vm409_vm0, 0.0, %v2835_v26 }
  0x5f   : > { %4243 = vst [vmem:[#allocation24_spill] sm:$0xff] %v3018_v51  ;;  %1642 = vmatpush.msra.mxu2 %v927_v27  ;;  %v584_v44 = vsel %vm576_vm2, %v582_v45, %v583_v43  ;;  %v585_v25 = vrot.slane %v528_v50, 1  ;;  %v696_v45 = vrot.slane %v2770_v47, 2  ;;  %v698_v17 = vrot.slane %v528_v50, 2 }
  0x60   : > { %v3046_v27 = vsel %vm576_vm2, %v578_v42, %v580_v48  ;;  %1868 = vmatpush.msra.mxu0 %v959_v49  ;;  %v587_v42 = vrot.slane %v512_v15, 1  ;;  %v700_v49 = vrot.slane %v512_v15, 2 }
  0x61   : > { %2196 = vmatmul.msk.f32.gmra.mxu0 %vm2490_vm1, %v2965_v10  ;;  %4245 = vst [vmem:[#allocation26_spill] sm:$0xff] %v3046_v27  ;;  %v586_v62 = vsel %vm576_vm2, %v583_v43, %v585_v25  ;;  %v4247_v25 = vrot.slane %v2845_v38, 7  ;;  %v3085_v32 = vsel %vm689_vm3, %v696_v45, %v698_v17  ;;  %v958_v38 = vld [vmem:[%s4137_s3 + $0x460] sm:$0xff]  ;;  %v593_v17 = vrot.slane %v3013_v57, 1 }
  0x62   : > { %1869 = vmatpush.msra.mxu0 %v958_v38 }
  0x63   : > { %1023 = vmatmul.f32.gmra.mxu1 %v2981_v11  ;;  %1047 = vmatmul.f32.gmra.mxu2 %v2987_v18  ;;  %v529_v48 = vsel %vm409_vm0, %v4247_v25, 0.0 }
  0x64   : > { %v590_v50 = vrot.slane %v529_v48, 1 }
  0x65   : > { %1071 = vmatmul.f32.gmra.mxu3 %v2998_v21 }
  0x69   : > { %999 = vmatmul.f32.gmra.mxu0 %v3013_v57 }
  0x6b   : > { %1091 = vmatmul.f32.vlgmr.msrb.gmra.mxu1 %v3018_v51  ;;  %1204 = vmatmul.f32.vlgmr.msrb.gmra.mxu2 %v3021_v20  ;;  %v603_v51 = vrot.slane %v2707_v6, 1 }
  0x6d   : > { %2222 = vmatmul.msk.f32.vlgmr.msrb.gmra.mxu3 %vm2490_vm1, %v2679_v56  ;;  %v3049_v56 = vsel %vm689_vm3, %v691_v46, %v693_v19  ;;  %v3062_v19 = vsel %vm689_vm3, %v695_v16, %v696_v45  ;;  %v588_v46 = vrot.slane %v2923_v8, 1  ;;  %v942_v16 = vld [vmem:[%s4137_s3 + $0x3e0] sm:$0xff]  ;;  %v513_v45 = vsel %vm409_vm0, 0.0, %v2965_v10 }
  0x6e   : > { %4246 = vst [vmem:[#allocation27_spill] sm:$0xff] %v3049_v56  ;;  %1756 = vmatpush.msra.mxu3 %v942_v16  ;;  %v592_v15 = vrot.slane %v513_v45, 1  ;;  %v703_v16 = vrot.slane %v529_v48, 2 }
  0x6f   : > { %v3079_v43 = vsel %vm576_vm2, %v587_v42, %v588_v46  ;;  %v3095_v42 = vsel %vm576_vm2, %v588_v46, %v590_v50  ;;  %v925_v46 = vld [vmem:[%s4137_s3 + $0x358] sm:$0xff] }
  0x70   : > { %v3116_v25 = vsel %vm576_vm2, %v592_v15, %v593_v17  ;;  %v909_v50 = vld [vmem:[%s4137_s3 + $0x2d8] sm:$0xff]  ;;  %v705_v15 = vrot.slane %v513_v45, 2 }
  0x71   : > { %1430 = vmatmul.f32.vlgmr.msrb.gmra.mxu0 %v584_v44  ;;  %4248 = vst [vmem:[#allocation28_spill] sm:$0xff] %v3116_v25 }
  0x73   : > { %1094 = vmatmul.f32.gmra.mxu1 %v3046_v27  ;;  %1207 = vmatmul.f32.gmra.mxu2 %v3049_v56  ;;  %v908_v56 = vld [vmem:[%s4137_s3 + $0x2d0] sm:$0xff]  ;;  %v4254_v27 = vrot.slane %v2495_v36, 7 }
  0x74   : > { %v956_v36 = vld [vmem:[%s4137_s3 + $0x450] sm:$0xff] }
  0x75   : > { %1320 = vmatmul.f32.gmra.mxu3 %v2770_v47  ;;  %v926_v47 = vld [vmem:[%s4137_s3 + $0x360] sm:$0xff] }
  0x76   : > { %1643 = vmatpush.msra.mxu2 %v926_v47  ;;  %v701_v47 = vrot.slane %v2923_v8, 2 }
  0x78   : > { %1644 = vmatpush.msra.mxu2 %v925_v46  ;;  %v3125_v38 = vsel %vm689_vm3, %v701_v47, %v703_v16 }
  0x79   : > { %1433 = vmatmul.f32.gmra.mxu0 %v586_v62  ;;  %4250 = vst [vmem:[#allocation29_spill] sm:$0xff] %v3125_v38 }
  0x7b   : > { %1097 = vmatmul.f32.gmra.mxu1 %v584_v44  ;;  %1210 = vmatmul.f32.gmra.mxu2 %v3062_v19  ;;  %v910_v44 = vld [vmem:[%s4137_s3 + $0x2e0] sm:$0xff] }
  0x7c   : > { %1530 = vmatpush.msra.mxu1 %v910_v44  ;;  %v941_v44 = vld [vmem:[%s4137_s3 + $0x3d8] sm:$0xff] }
  0x7d   : > { %2224 = vmatmul.msk.f32.gmra.mxu3 %vm2490_vm1, %v2835_v26 }
  0x7e   : > { %1757 = vmatpush.msra.mxu3 %v941_v44  ;;  %1531 = vmatpush.msra.mxu1 %v909_v50  ;;  %v706_v44 = vrot.slane %v3013_v57, 2 }
  0x80   : > { %v3141_v16 = vsel %vm689_vm3, %v705_v15, %v706_v44  ;;  %v940_v15 = vld [vmem:[%s4137_s3 + $0x3d0] sm:$0xff]  ;;  %1532 = vmatpush.msra.mxu1 %v908_v56  ;;  %v515_v56 = vsel %vm409_vm0, 0.0, %v2620_v23 }
  0x81   : > { %1436 = vmatmul.f32.gmra.mxu0 %v3079_v43  ;;  %4252 = vst [vmem:[#allocation31_spill] sm:$0xff] %v3141_v16  ;;  %1758 = vmatpush.msra.mxu3 %v940_v15  ;;  %v711_v15 = vrot.slane %v2558_v60, 2 }
  0x83   : > { %1100 = vmatmul.f32.gmra.mxu1 %v586_v62  ;;  %1213 = vmatmul.f32.gmra.mxu2 %v3085_v32  ;;  %v3100_v62 = vsel %vm689_vm3, %v700_v49, %v701_v47  ;;  %v4249_v49 = vrot.slane %v2975_v4, 7  ;;  %v957_v4 = vld [vmem:[%s4137_s3 + $0x458] sm:$0xff]  ;;  %v514_v47 = vsel %vm409_vm0, 0.0, %v2485_v33 }
  0x84   : > { %1870 = vmatpush.msra.mxu0 %v957_v4  ;;  %v597_v45 = vrot.slane %v514_v47, 1 }
  0x85   : > { %1326 = vmatmul.f32.gmra.mxu3 %v2923_v8  ;;  %v530_v48 = vsel %vm409_vm0, %v4249_v49, 0.0  ;;  %v598_v49 = vrot.slane %v2558_v60, 1 }
  0x86   : > { %v595_v46 = vrot.slane %v530_v48, 1  ;;  %1871 = vmatpush.msra.mxu0 %v956_v36 }
  0x87   : > { %v3157_v4 = vsel %vm576_vm2, %v597_v45, %v598_v49  ;;  %v710_v45 = vrot.slane %v514_v47, 2  ;;  %v602_v47 = vrot.slane %v515_v56, 1 }
  0x88   : > { %v3136_v50 = vsel %vm576_vm2, %v593_v17, %v595_v46  ;;  %v924_v17 = vld [vmem:[%s4137_s3 + $0x350] sm:$0xff]  ;;  %v708_v46 = vrot.slane %v530_v48, 2  ;;  %4253 = vst [vmem:[#allocation32_spill] sm:$0xff] %v3157_v4  ;;  %v531_v48 = vsel %vm409_vm0, %v4254_v27, 0.0 }
  0x89   : > { %1439 = vmatmul.f32.gmra.mxu0 %v3095_v42  ;;  %4251 = vst [vmem:[#allocation30_spill] sm:$0xff] %v3136_v50  ;;  %1645 = vmatpush.msra.mxu2 %v924_v17  ;;  %v600_v20 = vrot.slane %v531_v48, 1 }
  0x8a   : > { %v3166_v17 = vsel %vm689_vm3, %v706_v44, %v708_v46  ;;  %v3184_v46 = vsel %vm689_vm3, %v710_v45, %v711_v15  ;;  %v939_v45 = vld [vmem:[%s4137_s3 + $0x3c8] sm:$0xff] }
  0x8b   : > { %1103 = vmatmul.f32.gmra.mxu1 %v3079_v43  ;;  %1216 = vmatmul.f32.gmra.mxu2 %v3100_v62  ;;  %4255 = vst [vmem:[#allocation33_spill] sm:$0xff] %v3166_v17  ;;  %v3177_v27 = vsel %vm576_vm2, %v598_v49, %v600_v20  ;;  %v923_v20 = vld [vmem:[%s4137_s3 + $0x348] sm:$0xff]  ;;  %v713_v49 = vrot.slane %v531_v48, 2 }
  0x8c   : > { %4256 = vst [vmem:[#allocation34_spill] sm:$0xff] %v3177_v27  ;;  %1646 = vmatpush.msra.mxu2 %v923_v20  ;;  %1759 = vmatpush.msra.mxu3 %v939_v45  ;;  %v907_v48 = vld [vmem:[%s4137_s3 + $0x2c8] sm:$0xff]  ;;  %v4259_v20 = vrot.slane %v2632_v28, 7  ;;  %v715_v45 = vrot.slane %v515_v56, 2  ;;  %v716_v28 = vrot.slane %v2707_v6, 2 }
  0x8d   : > { %2226 = vmatmul.msk.f32.gmra.mxu3 %vm2490_vm1, %v2965_v10  ;;  %4257 = vst [vmem:[#allocation35_spill] sm:$0xff] %v3184_v46  ;;  %1533 = vmatpush.msra.mxu1 %v907_v48  ;;  %v955_v48 = vld [vmem:[%s4137_s3 + $0x448] sm:$0xff] }
  0x8e   : > { %1872 = vmatpush.msra.mxu0 %v955_v48 }
  0x91   : > { %1442 = vmatmul.f32.gmra.mxu0 %v3116_v25 }
  0x93   : > { %1106 = vmatmul.f32.gmra.mxu1 %v3095_v42  ;;  %1219 = vmatmul.f32.gmra.mxu2 %v3125_v38 }
  0x95   : > { %1332 = vmatmul.f32.gmra.mxu3 %v3013_v57 }
  0x99   : > { %1445 = vmatmul.f32.gmra.mxu0 %v3136_v50 }
  0x9b   : > { %1109 = vmatmul.f32.gmra.mxu1 %v3116_v25  ;;  %1222 = vmatmul.f32.gmra.mxu2 %v3141_v16 }
  0x9d   : > { %2228 = vmatmul.msk.f32.gmra.mxu3 %vm2490_vm1, %v2485_v33  ;;  %v3217_v33 = vsel %vm689_vm3, %v711_v15, %v713_v49 }
  0x9e   : > { %4261 = vst [vmem:[#allocation38_spill] sm:$0xff] %v3217_v33 }
  0xa1   : > { %1448 = vmatmul.f32.gmra.mxu0 %v3157_v4 }
  0xa3   : > { %1112 = vmatmul.f32.gmra.mxu1 %v3136_v50  ;;  %1225 = vmatmul.f32.gmra.mxu2 %v3166_v17  ;;  %v608_v17 = vrot.slane %v2863_v58, 1 }
  0xa5   : > { %1338 = vmatmul.f32.gmra.mxu3 %v2558_v60  ;;  %v3204_v60 = vsel %vm576_vm2, %v602_v47, %v603_v51 }
  0xa6   : > { %4258 = vst [vmem:[#allocation36_spill] sm:$0xff] %v3204_v60 }
  0xa8   : > { %v3181_v44 = vpop.f32.mrf.mxu1 }
  0xa9   : > { %1451 = vmatmul.f32.gmra.mxu0 %v3177_v27 }
  0xab   : > { %1115 = vmatmul.f32.gmra.mxu1 %v3157_v4  ;;  %1228 = vmatmul.f32.gmra.mxu2 %v3184_v46 }
  0xad   : > { %2230 = vmatmul.msk.f32.gmra.mxu3 %vm2490_vm1, %v2620_v23  ;;  %v532_v23 = vsel %vm409_vm0, %v4259_v20, 0.0 }
  0xae   : > { %v3199_v36 = vpop.f32.mrf.mxu2  ;;  %v3201_v52 = vpop.f32.mrf.mxu0  ;;  %v605_v47 = vrot.slane %v532_v23, 1 }
  0xb0   : > { %v3212_v46 = vpop.f32.mrf.mxu1  ;;  %v3214_v4 = vpop.f32.mrf.mxu3  ;;  %v3232_v49 = vsel %vm576_vm2, %v603_v51, %v605_v47  ;;  %v922_v51 = vld [vmem:[%s4137_s3 + $0x340] sm:$0xff]  ;;  %v718_v47 = vrot.slane %v532_v23, 2 }
  0xb1   : > { %4260 = vst [vmem:[#allocation37_spill] sm:$0xff] %v3214_v4  ;;  %1454 = vmatmul.f32.gmra.mxu0 %v3204_v60  ;;  %v516_v4 = vsel %vm409_vm0, 0.0, %v2776_v54  ;;  %1647 = vmatpush.msra.mxu2 %v922_v51  ;;  %v906_v23 = vld [vmem:[%s4137_s3 + $0x2c0] sm:$0xff]  ;;  %v4267_v51 = vrot.slane %v2788_v0, 7  ;;  %v721_v0 = vrot.slane %v2863_v58, 2 }
  0xb2   : > { %4262 = vst [vmem:[#allocation39_spill] sm:$0xff] %v3232_v49  ;;  %1534 = vmatpush.msra.mxu1 %v906_v23  ;;  %v3274_v57 = vsel %vm689_vm3, %v716_v28, %v718_v47  ;;  %v954_v23 = vld [vmem:[%s4137_s3 + $0x440] sm:$0xff] }
  0xb3   : > { %1118 = vmatmul.f32.gmra.mxu1 %v3177_v27  ;;  %1231 = vmatmul.f32.gmra.mxu2 %v3217_v33  ;;  %v607_v27 = vrot.slane %v516_v4, 1  ;;  %4269 = vst [vmem:[#allocation45_spill] sm:$0xff] %v3274_v57 }
  0xb4   : > { %1873 = vmatpush.msra.mxu0 %v954_v23 }
  0xb5   : > { %1344 = vmatmul.f32.gmra.mxu3 %v2707_v6  ;;  %v3241_v6 = vsel %vm689_vm3, %v715_v45, %v716_v28  ;;  %v938_v45 = vld [vmem:[%s4137_s3 + $0x3c0] sm:$0xff] }
  0xb6   : > { %v3227_v20 = vpop.f32.mrf.mxu2  ;;  %v3229_v15 = vpop.f32.mrf.mxu0  ;;  %4264 = vst [vmem:[#allocation41_spill] sm:$0xff] %v3241_v6  ;;  %1760 = vmatpush.msra.mxu3 %v938_v45  ;;  %v720_v45 = vrot.slane %v516_v4, 2 }
  0xb8   : > { %v3236_v56 = vpop.f32.mrf.mxu1  ;;  %v3238_v33 = vpop.f32.mrf.mxu3 }
  0xb9   : > { %4263 = vst [vmem:[#allocation40_spill] sm:$0xff] %v3238_v33  ;;  %1457 = vmatmul.f32.gmra.mxu0 %v3232_v49 }
  0xbb   : > { %1121 = vmatmul.f32.gmra.mxu1 %v3204_v60  ;;  %1234 = vmatmul.f32.gmra.mxu2 %v3241_v6  ;;  %v3261_v6 = vsel %vm576_vm2, %v607_v27, %v608_v17 }
  0xbc   : > { %4266 = vst [vmem:[#allocation43_spill] sm:$0xff] %v3261_v6 }
  0xbd   : > { %2232 = vmatmul.msk.f32.gmra.mxu3 %vm2490_vm1, %v2776_v54  ;;  %v533_v54 = vsel %vm409_vm0, %v4267_v51, 0.0 }
  0xbe   : > { %v3256_v48 = vpop.f32.mrf.mxu2  ;;  %v3258_v33 = vpop.f32.mrf.mxu0  ;;  %v610_v27 = vrot.slane %v533_v54, 1 }
  0xbf   : > { %4265 = vst [vmem:[#allocation42_spill] sm:$0xff] %v3256_v48 }
  0xc0   : > { %v3269_v60 = vpop.f32.mrf.mxu1  ;;  %v3271_v50 = vpop.f32.mrf.mxu3  ;;  %v3289_v47 = vsel %vm576_vm2, %v608_v17, %v610_v27  ;;  %v921_v17 = vld [vmem:[%s4137_s3 + $0x338] sm:$0xff]  ;;  %v723_v27 = vrot.slane %v533_v54, 2 }
  0xc1   : > { %4268 = vst [vmem:[#allocation44_spill] sm:$0xff] %v3271_v50  ;;  %1460 = vmatmul.f32.gmra.mxu0 %v3261_v6  ;;  %v517_v50 = vsel %vm409_vm0, 0.0, %v2926_v12  ;;  %1648 = vmatpush.msra.mxu2 %v921_v17  ;;  %v905_v17 = vld [vmem:[%s4137_s3 + $0x2b8] sm:$0xff] }
  0xc2   : > { %4271 = vst [vmem:[#allocation47_spill] sm:$0xff] %v3289_v47  ;;  %1535 = vmatpush.msra.mxu1 %v905_v17  ;;  %v518_v17 = vsel %vm409_vm0, 0.0, %v2487_v34 }
  0xc3   : > { %1124 = vmatmul.f32.gmra.mxu1 %v3232_v49  ;;  %1237 = vmatmul.f32.gmra.mxu2 %v3274_v57  ;;  %v612_v49 = vrot.slane %v517_v50, 1 }
  0xc5   : > { %1350 = vmatmul.f32.gmra.mxu3 %v2863_v58  ;;  %v3298_v58 = vsel %vm689_vm3, %v720_v45, %v721_v0  ;;  %v937_v45 = vld [vmem:[%s4137_s3 + $0x3b8] sm:$0xff] }
  0xc6   : > { %v3284_v51 = vpop.f32.mrf.mxu2  ;;  %v3286_v28 = vpop.f32.mrf.mxu0  ;;  %4273 = vst [vmem:[#allocation49_spill] sm:$0xff] %v3298_v58  ;;  %1761 = vmatpush.msra.mxu3 %v937_v45  ;;  %v953_v45 = vld [vmem:[%s4137_s3 + $0x438] sm:$0xff] }
  0xc7   : > { %4270 = vst [vmem:[#allocation46_spill] sm:$0xff] %v3284_v51  ;;  %v613_v51 = vrot.slane %v2981_v11, 1  ;;  %1874 = vmatpush.msra.mxu0 %v953_v45 }
  0xc8   : > { %v3293_v4 = vpop.f32.mrf.mxu1  ;;  %v3295_v57 = vpop.f32.mrf.mxu3 }
  0xc9   : > { %4272 = vst [vmem:[#allocation48_spill] sm:$0xff] %v3295_v57  ;;  %1463 = vmatmul.f32.gmra.mxu0 %v3289_v47 }
  0xcb   : > { %1127 = vmatmul.f32.gmra.mxu1 %v3261_v6  ;;  %1240 = vmatmul.f32.gmra.mxu2 %v3298_v58  ;;  %v3318_v58 = vsel %vm576_vm2, %v612_v49, %v613_v51  ;;  %v4276_v6 = vrot.slane %v2935_v59, 7  ;;  %v725_v59 = vrot.slane %v517_v50, 2 }
  0xcc   : > { %4275 = vst [vmem:[#allocation51_spill] sm:$0xff] %v3318_v58 }
  0xcd   : > { %2234 = vmatmul.msk.f32.gmra.mxu3 %vm2490_vm1, %v2926_v12  ;;  %v534_v54 = vsel %vm409_vm0, %v4276_v6, 0.0  ;;  %v726_v6 = vrot.slane %v2981_v11, 2 }
  0xce   : > { %v3313_v23 = vpop.f32.mrf.mxu2  ;;  %v3315_v57 = vpop.f32.mrf.mxu0  ;;  %v615_v49 = vrot.slane %v534_v54, 1 }
  0xcf   : > { %4274 = vst [vmem:[#allocation50_spill] sm:$0xff] %v3313_v23  ;;  %v3331_v23 = vsel %vm689_vm3, %v721_v0, %v723_v27 }
  0xd0   : > { %v3326_v12 = vpop.f32.mrf.mxu1  ;;  %v3328_v16 = vpop.f32.mrf.mxu3  ;;  %4278 = vst [vmem:[#allocation53_spill] sm:$0xff] %v3331_v23  ;;  %v3346_v27 = vsel %vm576_vm2, %v613_v51, %v615_v49  ;;  %v920_v51 = vld [vmem:[%s4137_s3 + $0x330] sm:$0xff]  ;;  %v728_v49 = vrot.slane %v534_v54, 2 }
  0xd1   : > { %4277 = vst [vmem:[#allocation52_spill] sm:$0xff] %v3328_v16  ;;  %1466 = vmatmul.f32.gmra.mxu0 %v3318_v58  ;;  %1649 = vmatpush.msra.mxu2 %v920_v51  ;;  %v904_v51 = vld [vmem:[%s4137_s3 + $0x2b0] sm:$0xff] }
  0xd2   : > { %4280 = vst [vmem:[#allocation55_spill] sm:$0xff] %v3346_v27  ;;  %1536 = vmatpush.msra.mxu1 %v904_v51  ;;  %v519_v51 = vsel %vm409_vm0, 0.0, %v2622_v24 }
  0xd3   : > { %1130 = vmatmul.f32.gmra.mxu1 %v3289_v47  ;;  %1243 = vmatmul.f32.gmra.mxu2 %v3331_v23  ;;  %v617_v47 = vrot.slane %v518_v17, 1 }
  0xd5   : > { %1356 = vmatmul.f32.gmra.mxu3 %v2981_v11  ;;  %v3355_v11 = vsel %vm689_vm3, %v725_v59, %v726_v6  ;;  %v936_v59 = vld [vmem:[%s4137_s3 + $0x3b0] sm:$0xff] }
  0xd6   : > { %v3341_v16 = vpop.f32.mrf.mxu2  ;;  %v3343_v0 = vpop.f32.mrf.mxu0  ;;  %4282 = vst [vmem:[#allocation57_spill] sm:$0xff] %v3355_v11  ;;  %1762 = vmatpush.msra.mxu3 %v936_v59  ;;  %v952_v59 = vld [vmem:[%s4137_s3 + $0x430] sm:$0xff] }
  0xd7   : > { %4279 = vst [vmem:[#allocation54_spill] sm:$0xff] %v3341_v16  ;;  %v618_v16 = vrot.slane %v2564_v61, 1  ;;  %1875 = vmatpush.msra.mxu0 %v952_v59 }
  0xd8   : > { %v3350_v50 = vpop.f32.mrf.mxu1  ;;  %v3352_v23 = vpop.f32.mrf.mxu3 }
  0xd9   : > { %4281 = vst [vmem:[#allocation56_spill] sm:$0xff] %v3352_v23  ;;  %1469 = vmatmul.f32.gmra.mxu0 %v3346_v27 }
  0xdb   : > { %1133 = vmatmul.f32.gmra.mxu1 %v3318_v58  ;;  %1246 = vmatmul.f32.gmra.mxu2 %v3355_v11  ;;  %v3375_v11 = vsel %vm576_vm2, %v617_v47, %v618_v16  ;;  %v4285_v58 = vrot.slane %v2498_v37, 7  ;;  %v730_v37 = vrot.slane %v518_v17, 2 }
  0xdc   : > { %4284 = vst [vmem:[#allocation59_spill] sm:$0xff] %v3375_v11 }
  0xdd   : > { %2236 = vmatmul.msk.f32.gmra.mxu3 %vm2490_vm1, %v2487_v34  ;;  %v535_v54 = vsel %vm409_vm0, %v4285_v58, 0.0  ;;  %v731_v58 = vrot.slane %v2564_v61, 2 }
  0xde   : > { %v3370_v45 = vpop.f32.mrf.mxu2  ;;  %v3372_v23 = vpop.f32.mrf.mxu0  ;;  %v620_v47 = vrot.slane %v535_v54, 1 }
  0xdf   : > { %4283 = vst [vmem:[#allocation58_spill] sm:$0xff] %v3370_v45  ;;  %v3388_v45 = vsel %vm689_vm3, %v726_v6, %v728_v49 }
  0xe0   : > { %v3383_v34 = vpop.f32.mrf.mxu1  ;;  %v3385_v25 = vpop.f32.mrf.mxu3  ;;  %4287 = vst [vmem:[#allocation61_spill] sm:$0xff] %v3388_v45  ;;  %v3403_v49 = vsel %vm576_vm2, %v618_v16, %v620_v47  ;;  %v919_v16 = vld [vmem:[%s4137_s3 + $0x328] sm:$0xff]  ;;  %v733_v47 = vrot.slane %v535_v54, 2  ;;  %v4291_v54 = vrot.slane %v2635_v29, 7  ;;  %v735_v29 = vrot.slane %v519_v51, 2 }
  0xe1   : > { %4286 = vst [vmem:[#allocation60_spill] sm:$0xff] %v3385_v25  ;;  %1472 = vmatmul.f32.gmra.mxu0 %v3375_v11  ;;  %1650 = vmatpush.msra.mxu2 %v919_v16 }
  0xe2   : > { %v536_v16 = vsel %vm409_vm0, %v4291_v54, 0.0  ;;  %v3436_v10 = vsel %vm689_vm3, %v731_v58, %v733_v47 }
  0xe3   : > { %1136 = vmatmul.f32.gmra.mxu1 %v3346_v27  ;;  %1249 = vmatmul.f32.gmra.mxu2 %v3388_v45  ;;  %v622_v27 = vrot.slane %v519_v51, 1  ;;  %v520_v51 = vsel %vm409_vm0, 0.0, %v2778_v55 }
  0xe5   : > { %1362 = vmatmul.f32.gmra.mxu3 %v2564_v61  ;;  %v3410_v61 = vsel %vm689_vm3, %v730_v37, %v731_v58  ;;  %v935_v37 = vld [vmem:[%s4137_s3 + $0x3a8] sm:$0xff] }
  0xe6   : > { %v3398_v25 = vpop.f32.mrf.mxu2  ;;  %v3400_v6 = vpop.f32.mrf.mxu0  ;;  %4290 = vst [vmem:[#allocation64_spill] sm:$0xff] %v3410_v61  ;;  %1763 = vmatpush.msra.mxu3 %v935_v37 }
  0xe7   : > { %4288 = vst [vmem:[#allocation62_spill] sm:$0xff] %v3398_v25  ;;  %v623_v25 = vrot.slane %v2713_v7, 1 }
  0xe8   : > { %v3407_v17 = vpop.f32.mrf.mxu3  ;;  %v1092_v45 = vpop.f32.mrf.mxu1 }
  0xe9   : > { %4289 = vst [vmem:[#allocation63_spill] sm:$0xff] %v3407_v17  ;;  %1475 = vmatmul.f32.gmra.mxu0 %v3403_v49  ;;  %v1093_v59 = vadd.f32 %v1092_v45, %v3201_v52  ;;  %v903_v52 = vld [vmem:[%s4137_s3 + $0x2a8] sm:$0xff] }
  0xea   : > { %1537 = vmatpush.msra.mxu1 %v903_v52 }
  0xeb   : > { %1139 = vmatmul.f32.gmra.mxu1 %v3375_v11  ;;  %1252 = vmatmul.f32.gmra.mxu2 %v3410_v61  ;;  %v3427_v61 = vsel %vm576_vm2, %v622_v27, %v623_v25  ;;  %v625_v27 = vrot.slane %v536_v16, 1 }
  0xed   : > { %2238 = vmatmul.msk.f32.gmra.mxu3 %vm2490_vm1, %v2622_v24 }
  0xee   : > { %v1205_v17 = vpop.f32.mrf.mxu2  ;;  %v1431_v11 = vpop.f32.mrf.mxu0 }
  0xef   : > { %v1206_v48 = vadd.f32 %v1205_v17, %v1093_v59  ;;  %v736_v17 = vrot.slane %v2713_v7, 2 }
  0xf0   : > { %v1095_v45 = vpop.f32.mrf.mxu1  ;;  %v1318_v24 = vpop.f32.mrf.mxu3 }
  0xf1   : > { %v1319_v38 = vadd.f32 %v1318_v24, %v1206_v48  ;;  %1478 = vmatmul.f32.gmra.mxu0 %v3427_v61  ;;  %v1096_v59 = vadd.f32 %v1095_v45, %v3229_v15  ;;  %v951_v24 = vld [vmem:[%s4137_s3 + $0x428] sm:$0xff]  ;;  %v3455_v15 = vsel %vm689_vm3, %v735_v29, %v736_v17  ;;  %v627_v45 = vrot.slane %v520_v51, 1 }
  0xf2   : > { %1876 = vmatpush.msra.mxu0 %v951_v24 }
  0xf3   : > { %v3439_v37 = vadd.f32 %v1431_v11, %v1319_v38  ;;  %1142 = vmatmul.f32.gmra.mxu1 %v3403_v49  ;;  %1255 = vmatmul.f32.gmra.mxu2 %v3436_v10  ;;  %v3450_v11 = vsel %vm576_vm2, %v623_v25, %v625_v27  ;;  %v918_v25 = vld [vmem:[%s4137_s3 + $0x320] sm:$0xff]  ;;  %v738_v27 = vrot.slane %v536_v16, 2  ;;  %v4294_v16 = vrot.slane %v2791_v1, 7 }
  0xf4   : > { %1651 = vmatpush.msra.mxu2 %v918_v25  ;;  %v740_v1 = vrot.slane %v520_v51, 2  ;;  %v521_v51 = vsel %vm409_vm0, 0.0, %v2928_v5 }
  0xf5   : > { %4292 = vst [vmem:[#allocation65_spill] sm:$0xff] %v3439_v37  ;;  %1368 = vmatmul.f32.gmra.mxu3 %v2713_v7  ;;  %v628_v37 = vrot.slane %v2869_v63, 1  ;;  %v3483_v25 = vsel %vm689_vm3, %v736_v17, %v738_v27  ;;  %v950_v17 = vld [vmem:[%s4137_s3 + $0x420] sm:$0xff] }
  0xf6   : > { %v1208_v48 = vpop.f32.mrf.mxu2  ;;  %v1434_v58 = vpop.f32.mrf.mxu0  ;;  %1877 = vmatpush.msra.mxu0 %v950_v17 }
  0xf7   : > { %v1209_v38 = vadd.f32 %v1208_v48, %v1096_v59  ;;  %v934_v59 = vld [vmem:[%s4137_s3 + $0x3a0] sm:$0xff] }
  0xf8   : > { %v1098_v47 = vpop.f32.mrf.mxu1  ;;  %v1321_v54 = vpop.f32.mrf.mxu3  ;;  %1764 = vmatpush.msra.mxu3 %v934_v59 }
  0xf9   : > { %v1322_v52 = vadd.f32 %v1321_v54, %v1209_v38  ;;  %1481 = vmatmul.f32.gmra.mxu0 %v3450_v11  ;;  %v1099_v29 = vadd.f32 %v1098_v47, %v3258_v33  ;;  %v537_v54 = vsel %vm409_vm0, %v4294_v16, 0.0  ;;  %v902_v33 = vld [vmem:[%s4137_s3 + $0x2a0] sm:$0xff] }
  0xfa   : > { %1538 = vmatpush.msra.mxu1 %v902_v33 }
  0xfb   : > { %v3459_v7 = vadd.f32 %v1434_v58, %v1322_v52  ;;  %1145 = vmatmul.f32.gmra.mxu1 %v3427_v61  ;;  %1258 = vmatmul.f32.gmra.mxu2 %v3455_v15  ;;  %v3474_v58 = vsel %vm576_vm2, %v627_v45, %v628_v37  ;;  %v630_v45 = vrot.slane %v537_v54, 1 }
  0xfd   : > { %4293 = vst [vmem:[#allocation66_spill] sm:$0xff] %v3459_v7  ;;  %2240 = vmatmul.msk.f32.gmra.mxu3 %vm2490_vm1, %v2778_v55 }
  0xfe   : > { %v1211_v24 = vpop.f32.mrf.mxu2  ;;  %v1437_v48 = vpop.f32.mrf.mxu0 }
  0xff   : > { %v1212_v38 = vadd.f32 %v1211_v24, %v1099_v29  ;;  %v741_v29 = vrot.slane %v2869_v63, 2 }
 0x100   : > { %v1101_v47 = vpop.f32.mrf.mxu1  ;;  %v1324_v52 = vpop.f32.mrf.mxu3 }
 0x101   : > { %v1325_v7 = vadd.f32 %v1324_v52, %v1212_v38  ;;  %1484 = vmatmul.f32.gmra.mxu0 %v3474_v58  ;;  %v1102_v24 = vadd.f32 %v1101_v47, %v3286_v28  ;;  %v3502_v28 = vsel %vm689_vm3, %v740_v1, %v741_v29  ;;  %v632_v52 = vrot.slane %v521_v51, 1 }
 0x103   : > { %v3486_v59 = vadd.f32 %v1437_v48, %v1325_v7  ;;  %1148 = vmatmul.f32.gmra.mxu1 %v3450_v11  ;;  %1261 = vmatmul.f32.gmra.mxu2 %v3483_v25  ;;  %v3497_v7 = vsel %vm576_vm2, %v628_v37, %v630_v45  ;;  %v917_v37 = vld [vmem:[%s4137_s3 + $0x318] sm:$0xff]  ;;  %v743_v45 = vrot.slane %v537_v54, 2  ;;  %v4297_v54 = vrot.slane %v2938_v53, 7 }
 0x104   : > { %1652 = vmatpush.msra.mxu2 %v917_v37  ;;  %v745_v53 = vrot.slane %v521_v51, 2  ;;  %v522_v51 = vsel %vm409_vm0, 0.0, %v2503_v39 }
 0x105   : > { %4295 = vst [vmem:[#allocation67_spill] sm:$0xff] %v3486_v59  ;;  %1374 = vmatmul.f32.gmra.mxu3 %v2869_v63  ;;  %v633_v59 = vrot.slane %v2987_v18, 1  ;;  %v3530_v37 = vsel %vm689_vm3, %v741_v29, %v743_v45  ;;  %v949_v29 = vld [vmem:[%s4137_s3 + $0x418] sm:$0xff] }
 0x106   : > { %v1214_v27 = vpop.f32.mrf.mxu2  ;;  %v1440_v38 = vpop.f32.mrf.mxu0  ;;  %1878 = vmatpush.msra.mxu0 %v949_v29 }
 0x107   : > { %v1215_v48 = vadd.f32 %v1214_v27, %v1102_v24  ;;  %v933_v24 = vld [vmem:[%s4137_s3 + $0x398] sm:$0xff] }
 0x108   : > { %v1104_v16 = vpop.f32.mrf.mxu1  ;;  %v1327_v33 = vpop.f32.mrf.mxu3  ;;  %1765 = vmatpush.msra.mxu3 %v933_v24 }
 0x109   : > { %v1328_v47 = vadd.f32 %v1327_v33, %v1215_v48  ;;  %1487 = vmatmul.f32.gmra.mxu0 %v3497_v7  ;;  %v1105_v1 = vadd.f32 %v1104_v16, %v3315_v57  ;;  %v538_v33 = vsel %vm409_vm0, %v4297_v54, 0.0  ;;  %v901_v57 = vld [vmem:[%s4137_s3 + $0x298] sm:$0xff] }
 0x10a   : > { %1539 = vmatpush.msra.mxu1 %v901_v57 }
 0x10b   : > { %v3506_v63 = vadd.f32 %v1440_v38, %v1328_v47  ;;  %1151 = vmatmul.f32.gmra.mxu1 %v3474_v58  ;;  %1264 = vmatmul.f32.gmra.mxu2 %v3502_v28  ;;  %v3521_v38 = vsel %vm576_vm2, %v632_v52, %v633_v59  ;;  %v635_v52 = vrot.slane %v538_v33, 1 }
 0x10d   : > { %4296 = vst [vmem:[#allocation68_spill] sm:$0xff] %v3506_v63  ;;  %2242 = vmatmul.msk.f32.gmra.mxu3 %vm2490_vm1, %v2928_v5 }
 0x10e   : > { %v1217_v17 = vpop.f32.mrf.mxu2  ;;  %v1443_v27 = vpop.f32.mrf.mxu0 }
 0x10f   : > { %v1218_v48 = vadd.f32 %v1217_v17, %v1105_v1  ;;  %v746_v1 = vrot.slane %v2987_v18, 2 }
 0x110   : > { %v1107_v16 = vpop.f32.mrf.mxu1  ;;  %v1330_v47 = vpop.f32.mrf.mxu3 }
 0x111   : > { %v1331_v63 = vadd.f32 %v1330_v47, %v1218_v48  ;;  %1490 = vmatmul.f32.gmra.mxu0 %v3521_v38  ;;  %v1108_v17 = vadd.f32 %v1107_v16, %v3343_v0  ;;  %v3549_v0 = vsel %vm689_vm3, %v745_v53, %v746_v1  ;;  %v637_v47 = vrot.slane %v522_v51, 1 }
 0x113   : > { %v3533_v24 = vadd.f32 %v1443_v27, %v1331_v63  ;;  %1154 = vmatmul.f32.gmra.mxu1 %v3497_v7  ;;  %1267 = vmatmul.f32.gmra.mxu2 %v3530_v37  ;;  %v3544_v63 = vsel %vm576_vm2, %v633_v59, %v635_v52  ;;  %v916_v59 = vld [vmem:[%s4137_s3 + $0x310] sm:$0xff]  ;;  %v748_v52 = vrot.slane %v538_v33, 2  ;;  %v4300_v33 = vrot.slane %v2509_v41, 7 }
 0x114   : > { %1653 = vmatpush.msra.mxu2 %v916_v59  ;;  %v750_v41 = vrot.slane %v522_v51, 2  ;;  %v523_v51 = vsel %vm409_vm0, 0.0, %v2638_v30 }
 0x115   : > { %4298 = vst [vmem:[#allocation69_spill] sm:$0xff] %v3533_v24  ;;  %1380 = vmatmul.f32.gmra.mxu3 %v2987_v18  ;;  %v638_v24 = vrot.slane %v2582_v3, 1  ;;  %v3577_v59 = vsel %vm689_vm3, %v746_v1, %v748_v52  ;;  %v948_v1 = vld [vmem:[%s4137_s3 + $0x410] sm:$0xff] }
 0x116   : > { %v1220_v45 = vpop.f32.mrf.mxu2  ;;  %v1446_v48 = vpop.f32.mrf.mxu0  ;;  %1879 = vmatpush.msra.mxu0 %v948_v1 }
 0x117   : > { %v1221_v27 = vadd.f32 %v1220_v45, %v1108_v17  ;;  %v932_v17 = vld [vmem:[%s4137_s3 + $0x390] sm:$0xff] }
 0x118   : > { %v1110_v54 = vpop.f32.mrf.mxu1  ;;  %v1333_v57 = vpop.f32.mrf.mxu3  ;;  %1766 = vmatpush.msra.mxu3 %v932_v17 }
 0x119   : > { %v1334_v16 = vadd.f32 %v1333_v57, %v1221_v27  ;;  %1493 = vmatmul.f32.gmra.mxu0 %v3544_v63  ;;  %v1111_v53 = vadd.f32 %v1110_v54, %v3372_v23  ;;  %v539_v57 = vsel %vm409_vm0, %v4300_v33, 0.0  ;;  %v900_v23 = vld [vmem:[%s4137_s3 + $0x290] sm:$0xff] }
 0x11a   : > { %1540 = vmatpush.msra.mxu1 %v900_v23 }
 0x11b   : > { %v3553_v18 = vadd.f32 %v1446_v48, %v1334_v16  ;;  %1157 = vmatmul.f32.gmra.mxu1 %v3521_v38  ;;  %1270 = vmatmul.f32.gmra.mxu2 %v3549_v0  ;;  %v3568_v48 = vsel %vm576_vm2, %v637_v47, %v638_v24  ;;  %v640_v47 = vrot.slane %v539_v57, 1 }
 0x11d   : > { %4299 = vst [vmem:[#allocation70_spill] sm:$0xff] %v3553_v18  ;;  %2244 = vmatmul.msk.f32.gmra.mxu3 %vm2490_vm1, %v2503_v39 }
 0x11e   : > { %v1223_v29 = vpop.f32.mrf.mxu2  ;;  %v1449_v45 = vpop.f32.mrf.mxu0 }
 0x11f   : > { %v1224_v27 = vadd.f32 %v1223_v29, %v1111_v53  ;;  %v751_v53 = vrot.slane %v2582_v3, 2 }
 0x120   : > { %v1113_v54 = vpop.f32.mrf.mxu1  ;;  %v1336_v16 = vpop.f32.mrf.mxu3 }
 0x121   : > { %v1337_v18 = vadd.f32 %v1336_v16, %v1224_v27  ;;  %1496 = vmatmul.f32.gmra.mxu0 %v3568_v48  ;;  %v1114_v29 = vadd.f32 %v1113_v54, %v3400_v6  ;;  %v3596_v6 = vsel %vm689_vm3, %v750_v41, %v751_v53  ;;  %v642_v16 = vrot.slane %v523_v51, 1 }
 0x123   : > { %v3580_v17 = vadd.f32 %v1449_v45, %v1337_v18  ;;  %1160 = vmatmul.f32.gmra.mxu1 %v3544_v63  ;;  %1273 = vmatmul.f32.gmra.mxu2 %v3577_v59  ;;  %v3591_v18 = vsel %vm576_vm2, %v638_v24, %v640_v47  ;;  %v915_v24 = vld [vmem:[%s4137_s3 + $0x308] sm:$0xff]  ;;  %v753_v47 = vrot.slane %v539_v57, 2  ;;  %v4303_v57 = vrot.slane %v2648_v40, 7 }
 0x124   : > { %1654 = vmatpush.msra.mxu2 %v915_v24  ;;  %v755_v40 = vrot.slane %v523_v51, 2  ;;  %v524_v51 = vsel %vm409_vm0, 0.0, %v2794_v2 }
 0x125   : > { %4301 = vst [vmem:[#allocation71_spill] sm:$0xff] %v3580_v17  ;;  %1386 = vmatmul.f32.gmra.mxu3 %v2582_v3  ;;  %v643_v17 = vrot.slane %v2731_v14, 1  ;;  %v3624_v24 = vsel %vm689_vm3, %v751_v53, %v753_v47  ;;  %v947_v53 = vld [vmem:[%s4137_s3 + $0x408] sm:$0xff] }
 0x126   : > { %v1226_v52 = vpop.f32.mrf.mxu2  ;;  %v1452_v27 = vpop.f32.mrf.mxu0  ;;  %1880 = vmatpush.msra.mxu0 %v947_v53 }
 0x127   : > { %v1227_v45 = vadd.f32 %v1226_v52, %v1114_v29  ;;  %v931_v29 = vld [vmem:[%s4137_s3 + $0x388] sm:$0xff] }
 0x128   : > { %v1116_v33 = vpop.f32.mrf.mxu1  ;;  %v1339_v23 = vpop.f32.mrf.mxu3  ;;  %1767 = vmatpush.msra.mxu3 %v931_v29 }
 0x129   : > { %v1340_v54 = vadd.f32 %v1339_v23, %v1227_v45  ;;  %1499 = vmatmul.f32.gmra.mxu0 %v3591_v18  ;;  %v1117_v41 = vadd.f32 %v1116_v33, %v3181_v44  ;;  %v540_v23 = vsel %vm409_vm0, %v4303_v57, 0.0  ;;  %v899_v44 = vld [vmem:[%s4137_s3 + $0x288] sm:$0xff] }
 0x12a   : > { %1541 = vmatpush.msra.mxu1 %v899_v44 }
 0x12b   : > { %v3600_v3 = vadd.f32 %v1452_v27, %v1340_v54  ;;  %1163 = vmatmul.f32.gmra.mxu1 %v3568_v48  ;;  %1276 = vmatmul.f32.gmra.mxu2 %v3596_v6  ;;  %v3615_v27 = vsel %vm576_vm2, %v642_v16, %v643_v17  ;;  %v645_v16 = vrot.slane %v540_v23, 1 }
 0x12d   : > { %4302 = vst [vmem:[#allocation72_spill] sm:$0xff] %v3600_v3  ;;  %2246 = vmatmul.msk.f32.gmra.mxu3 %vm2490_vm1, %v2638_v30 }
 0x12e   : > { %v1229_v1 = vpop.f32.mrf.mxu2  ;;  %v1455_v52 = vpop.f32.mrf.mxu0 }
 0x12f   : > { %v1230_v45 = vadd.f32 %v1229_v1, %v1117_v41  ;;  %v756_v41 = vrot.slane %v2731_v14, 2 }
 0x130   : > { %v1119_v33 = vpop.f32.mrf.mxu1  ;;  %v1342_v54 = vpop.f32.mrf.mxu3 }
 0x131   : > { %v1343_v3 = vadd.f32 %v1342_v54, %v1230_v45  ;;  %1502 = vmatmul.f32.gmra.mxu0 %v3615_v27  ;;  %v1120_v1 = vadd.f32 %v1119_v33, %v3212_v46  ;;  %v3643_v46 = vsel %vm689_vm3, %v755_v40, %v756_v41  ;;  %v647_v54 = vrot.slane %v524_v51, 1 }
 0x133   : > { %v3627_v29 = vadd.f32 %v1455_v52, %v1343_v3  ;;  %1166 = vmatmul.f32.gmra.mxu1 %v3591_v18  ;;  %1279 = vmatmul.f32.gmra.mxu2 %v3624_v24  ;;  %v3638_v3 = vsel %vm576_vm2, %v643_v17, %v645_v16  ;;  %v914_v17 = vld [vmem:[%s4137_s3 + $0x300] sm:$0xff]  ;;  %v758_v16 = vrot.slane %v540_v23, 2  ;;  %v4306_v23 = vrot.slane %v2804_v9, 7 }
 0x134   : > { %1655 = vmatpush.msra.mxu2 %v914_v17  ;;  %v760_v9 = vrot.slane %v524_v51, 2  ;;  %v525_v51 = vsel %vm409_vm0, 0.0, %v2941_v22 }
 0x135   : > { %4304 = vst [vmem:[#allocation73_spill] sm:$0xff] %v3627_v29  ;;  %1392 = vmatmul.f32.gmra.mxu3 %v2731_v14  ;;  %v648_v29 = vrot.slane %v2887_v13, 1  ;;  %v3671_v17 = vsel %vm689_vm3, %v756_v41, %v758_v16  ;;  %v946_v41 = vld [vmem:[%s4137_s3 + $0x400] sm:$0xff] }
 0x136   : > { %v1232_v47 = vpop.f32.mrf.mxu2  ;;  %v1458_v45 = vpop.f32.mrf.mxu0  ;;  %1881 = vmatpush.msra.mxu0 %v946_v41 }
 0x137   : > { %v1233_v52 = vadd.f32 %v1232_v47, %v1120_v1  ;;  %v930_v1 = vld [vmem:[%s4137_s3 + $0x380] sm:$0xff] }
 0x138   : > { %v1122_v57 = vpop.f32.mrf.mxu1  ;;  %v1345_v44 = vpop.f32.mrf.mxu3  ;;  %1768 = vmatpush.msra.mxu3 %v930_v1 }
 0x139   : > { %v1346_v33 = vadd.f32 %v1345_v44, %v1233_v52  ;;  %1505 = vmatmul.f32.gmra.mxu0 %v3638_v3  ;;  %v1123_v40 = vadd.f32 %v1122_v57, %v3236_v56  ;;  %v541_v44 = vsel %vm409_vm0, %v4306_v23, 0.0  ;;  %v898_v56 = vld [vmem:[%s4137_s3 + $0x280] sm:$0xff] }
 0x13a   : > { %1542 = vmatpush.msra.mxu1 %v898_v56 }
 0x13b   : > { %v3647_v14 = vadd.f32 %v1458_v45, %v1346_v33  ;;  %1169 = vmatmul.f32.gmra.mxu1 %v3615_v27  ;;  %1282 = vmatmul.f32.gmra.mxu2 %v3643_v46  ;;  %v3662_v45 = vsel %vm576_vm2, %v647_v54, %v648_v29  ;;  %v650_v54 = vrot.slane %v541_v44, 1 }
 0x13d   : > { %4305 = vst [vmem:[#allocation74_spill] sm:$0xff] %v3647_v14  ;;  %2248 = vmatmul.msk.f32.gmra.mxu3 %vm2490_vm1, %v2794_v2  ;;  %v302_v2 = vld [vmem:[%s2437_s20 + $0xf0] sm:$0xff] }
 0x13e   : > { %v1235_v53 = vpop.f32.mrf.mxu2  ;;  %v1461_v47 = vpop.f32.mrf.mxu0 }
 0x13f   : > { %v1236_v52 = vadd.f32 %v1235_v53, %v1123_v40  ;;  %v761_v40 = vrot.slane %v2887_v13, 2 }
 0x140   : > { %v1125_v57 = vpop.f32.mrf.mxu1  ;;  %v1348_v33 = vpop.f32.mrf.mxu3 }
 0x141   : > { %v1349_v14 = vadd.f32 %v1348_v33, %v1236_v52  ;;  %1508 = vmatmul.f32.gmra.mxu0 %v3662_v45  ;;  %v1126_v53 = vadd.f32 %v1125_v57, %v3269_v60  ;;  %v3690_v60 = vsel %vm689_vm3, %v760_v9, %v761_v40  ;;  %v303_v57 = vld [vmem:[%s2437_s20 + $0xf8] sm:$0xff] }
 0x142   : > { %4308 = vst [vmem:[#allocation76_spill] sm:$0xff] %v3690_v60 }
 0x143   : > { %v3674_v1 = vadd.f32 %v1461_v47, %v1349_v14  ;;  %1172 = vmatmul.f32.gmra.mxu1 %v3638_v3  ;;  %1285 = vmatmul.f32.gmra.mxu2 %v3671_v17  ;;  %v3685_v47 = vsel %vm576_vm2, %v648_v29, %v650_v54  ;;  %v2350_v54 = vld [vmem:[%s4135_s1] ss:$0 sm:$0xff] }
 0x144   : > { %v339_v9 = vmul.f32 %v2350_v54, %v303_v57 }
 0x145   : > { %4307 = vst [vmem:[#allocation75_spill] sm:$0xff] %v3674_v1  ;;  %1398 = vmatmul.f32.gmra.mxu3 %v2887_v13  ;;  %v652_v1 = vrot.slane %v525_v51, 1  ;;  %v653_v13 = vrot.slane %v2998_v21, 1 }
 0x146   : > { %v1238_v16 = vpop.f32.mrf.mxu2  ;;  %v1464_v14 = vpop.f32.mrf.mxu0 }
 0x147   : > { %v1239_v52 = vadd.f32 %v1238_v16, %v1126_v53  ;;  %v763_v53 = vrot.slane %v541_v44, 2  ;;  %v338_v16 = vmul.f32 %v2350_v54, %v302_v2  ;;  %v2351_v44 = vld [vmem:[%s4136_s2] ss:$0 sm:$0xff] }
 0x148   : > { %v1128_v23 = vpop.f32.mrf.mxu1  ;;  %v1351_v56 = vpop.f32.mrf.mxu3 }
 0x149   : > { %v1352_v33 = vadd.f32 %v1351_v56, %v1239_v52  ;;  %1511 = vmatmul.f32.gmra.mxu0 %v3685_v47  ;;  %v1129_v41 = vadd.f32 %v1128_v23, %v3293_v4  ;;  %v3708_v56 = vsel %vm576_vm2, %v652_v1, %v653_v13  ;;  %v375_v4 = vadd.f32 %v2351_v44, %v339_v9 }
 0x14a   : > { %v374_v1 = vadd.f32 %v2351_v44, %v338_v16  ;;  %v766_v9 = vrot.slane %v2998_v21, 2 }
 0x14b   : > { %v3696_v29 = vadd.f32 %v1464_v14, %v1352_v33  ;;  %1175 = vmatmul.f32.gmra.mxu1 %v3662_v45  ;;  %1288 = vmatmul.f32.gmra.mxu2 %v3690_v60 }
 0x14d   : > { %4309 = vst [vmem:[#allocation77_spill] sm:$0xff] %v3696_v29  ;;  %2250 = vmatmul.msk.f32.gmra.mxu3 %vm2490_vm1, %v2941_v22  ;;  %v4310_v29 = vrot.slane %v2948_v31, 7  ;;  %v3717_v22 = vsel %vm689_vm3, %v761_v40, %v763_v53  ;;  %v458_v31 = vrot.slane %v375_v4, 7  ;;  %v3727_v40 = vrot.slane %v374_v1, 7 }
 0x14e   : > { %v1241_v52 = vpop.f32.mrf.mxu2  ;;  %v1467_v14 = vpop.f32.mrf.mxu0 }
 0x14f   : > { %v1242_v33 = vadd.f32 %v1241_v52, %v1129_v41  ;;  %v542_v60 = vsel %vm409_vm0, %v4310_v29, 0.0  ;;  %v765_v29 = vrot.slane %v525_v51, 2  ;;  %v3734_v44 = vsel %vm409_vm0, %v3727_v40, %v458_v31 }
 0x150   : > { %v1131_v23 = vpop.f32.mrf.mxu1  ;;  %v1354_v57 = vpop.f32.mrf.mxu3  ;;  %v655_v54 = vrot.slane %v542_v60, 1  ;;  %v3738_v51 = vsel %vm409_vm0, 0.0, %v3727_v40 }
 0x151   : > { %v1355_v2 = vadd.f32 %v1354_v57, %v1242_v33  ;;  %1514 = vmatmul.f32.gmra.mxu0 %v3708_v56  ;;  %v1132_v52 = vadd.f32 %v1131_v23, %v3326_v12  ;;  %v3741_v23 = vsel %vm689_vm3, %v765_v29, %v766_v9 }
 0x152   : > { %v3730_v16 = vsel %vm576_vm2, %v653_v13, %v655_v54  ;;  %v804_v13 = vrot.slane %v3738_v51, 1  ;;  %v768_v54 = vrot.slane %v542_v60, 2 }
 0x153   : > { %v3720_v41 = vadd.f32 %v1467_v14, %v1355_v2  ;;  %1178 = vmatmul.f32.gmra.mxu1 %v3685_v47  ;;  %1291 = vmatmul.f32.gmra.mxu2 %v3717_v22  ;;  %v805_v2 = vrot.slane %v3734_v44, 1 }
 0x155   : > { %4311 = vst [vmem:[#allocation78_spill] sm:$0xff] %v3720_v41  ;;  %1404 = vmatmul.f32.gmra.mxu3 %v2998_v21  ;;  %v3761_v41 = vsel %vm689_vm3, %v766_v9, %v768_v54 }
 0x156   : > { %v1244_v53 = vpop.f32.mrf.mxu2  ;;  %v1470_v33 = vpop.f32.mrf.mxu0 }
 0x157   : > { %v1245_v14 = vadd.f32 %v1244_v53, %v1132_v52 }
 0x158   : > { %v1134_v4 = vpop.f32.mrf.mxu1  ;;  %v1357_v12 = vpop.f32.mrf.mxu3 }
 0x159   : > { %v1358_v57 = vadd.f32 %v1357_v12, %v1245_v14  ;;  %1517 = vmatmul.f32.gmra.mxu0 %v3730_v16  ;;  %v1135_v52 = vadd.f32 %v1134_v4, %v3350_v50  ;;  %v3755_v14 = vsel %vm576_vm2, %v804_v13, %v805_v2 }
 0x15b   : > { %v3746_v1 = vadd.f32 %v1470_v33, %v1358_v57  ;;  %1181 = vmatmul.f32.gmra.mxu1 %v3708_v56  ;;  %1294 = vmatmul.f32.gmra.mxu2 %v3741_v23  ;;  %v3758_v33 = vsel %vm409_vm0, %v458_v31, 0.0 }
 0x15c   : > { %v807_v50 = vrot.slane %v3758_v33, 1 }
 0x15d   : > { %4312 = vst [vmem:[#allocation79_spill] sm:$0xff] %v3746_v1  ;;  %2252 = vmatmul.msk.f32.gmra.mxu3 %vm2490_vm1, %v3727_v40 }
 0x15e   : > { %v1247_v29 = vpop.f32.mrf.mxu2  ;;  %v1473_v53 = vpop.f32.mrf.mxu0  ;;  %v3772_v9 = vsel %vm576_vm2, %v805_v2, %v807_v50 }
 0x15f   : > { %v1248_v12 = vadd.f32 %v1247_v29, %v1135_v52 }
 0x160   : > { %v1137_v57 = vpop.f32.mrf.mxu1  ;;  %v1360_v1 = vpop.f32.mrf.mxu3 }
 0x161   : > { %v1361_v60 = vadd.f32 %v1360_v1, %v1248_v12  ;;  %1520 = vmatmul.f32.gmra.mxu0 %v3755_v14  ;;  %v1138_v13 = vadd.f32 %v1137_v57, %v3383_v34 }
 0x163   : > { %v3765_v4 = vadd.f32 %v1473_v53, %v1361_v60  ;;  %1184 = vmatmul.f32.gmra.mxu1 %v3730_v16  ;;  %1297 = vmatmul.f32.gmra.mxu2 %v3761_v41 }
 0x165   : > { %1410 = vmatmul.f32.gmra.mxu3 %v3734_v44 }
 0x166   : > { %v1250_v31 = vpop.f32.mrf.mxu2  ;;  %v1476_v52 = vpop.f32.mrf.mxu0 }
 0x167   : > { %v1251_v1 = vadd.f32 %v1250_v31, %v1138_v13 }
 0x168   : > { %v1140_v54 = vpop.f32.mrf.mxu1  ;;  %v1363_v29 = vpop.f32.mrf.mxu3 }
 0x169   : > { %v1364_v12 = vadd.f32 %v1363_v29, %v1251_v1  ;;  %1523 = vmatmul.f32.gmra.mxu0 %v3772_v9  ;;  %v1141_v34 = vadd.f32 %v1140_v54, %v3199_v36 }
 0x16b   : > { %v3775_v53 = vadd.f32 %v1476_v52, %v1364_v12  ;;  %1543 = vmatmul.f32.vlgmr.msra.gmra.mxu1 %v3062_v19  ;;  %2254 = vmatmul.msk.f32.vlgmr.msra.gmra.mxu2 %vm2490_vm1, %v2835_v26  ;;  %v4313_v12 = vld [vmem:[#allocation29_spill] sm:$0xff] }
 0x16d   : > { %1769 = vmatmul.f32.vlgmr.msra.gmra.mxu3 %v3079_v43 }
 0x16e   : > { %v1253_v2 = vpop.f32.mrf.mxu2  ;;  %v1479_v57 = vpop.f32.mrf.mxu0 }
 0x16f   : > { %v1254_v60 = vadd.f32 %v1253_v2, %v1141_v34  ;;  %v4314_v2 = vld [vmem:[#allocation20_spill] sm:$0xff] }
 0x170   : > { %v1143_v50 = vpop.f32.mrf.mxu1  ;;  %v1366_v13 = vpop.f32.mrf.mxu3 }
 0x171   : > { %v1367_v31 = vadd.f32 %v1366_v13, %v1254_v60  ;;  %1882 = vmatmul.f32.vlgmr.msra.gmra.mxu0 %v3100_v62  ;;  %v1144_v26 = vadd.f32 %v1143_v50, %v3227_v20  ;;  %v4316_v20 = vld [vmem:[#allocation28_spill] sm:$0xff] }
 0x173   : > { %v3784_v52 = vadd.f32 %v1479_v57, %v1367_v31  ;;  %1546 = vmatmul.f32.gmra.mxu1 %v3085_v32  ;;  %1659 = vmatmul.f32.gmra.mxu2 %v2923_v8  ;;  %v4315_v8 = vld [vmem:[#allocation42_spill] sm:$0xff] }
 0x175   : > { %1772 = vmatmul.f32.gmra.mxu3 %v3095_v42 }
 0x176   : > { %v1256_v19 = vpop.f32.mrf.mxu2  ;;  %v1482_v43 = vpop.f32.mrf.mxu0 }
 0x177   : > { %v1257_v36 = vadd.f32 %v1256_v19, %v1144_v26  ;;  %v4317_v26 = vld [vmem:[#allocation31_spill] sm:$0xff] }
 0x178   : > { %v1146_v1 = vpop.f32.mrf.mxu1  ;;  %v1369_v54 = vpop.f32.mrf.mxu3 }
 0x179   : > { %v1370_v29 = vadd.f32 %v1369_v54, %v1257_v36  ;;  %1885 = vmatmul.f32.gmra.mxu0 %v4313_v12  ;;  %v1147_v32 = vadd.f32 %v1146_v1, %v4315_v8  ;;  %v4321_v54 = vld [vmem:[#allocation30_spill] sm:$0xff] }
 0x17b   : > { %v3791_v34 = vadd.f32 %v1482_v43, %v1370_v29  ;;  %1549 = vmatmul.f32.gmra.mxu1 %v3100_v62  ;;  %2256 = vmatmul.msk.f32.gmra.mxu2 %vm2490_vm1, %v4314_v2  ;;  %v4319_v62 = vld [vmem:[#allocation23_spill] sm:$0xff]  ;;  %v4320_v43 = vld [vmem:[#allocation46_spill] sm:$0xff] }
 0x17d   : > { %1775 = vmatmul.f32.gmra.mxu3 %v4316_v20 }
 0x17e   : > { %v1259_v42 = vpop.f32.mrf.mxu2  ;;  %v1485_v57 = vpop.f32.mrf.mxu0 }
 0x17f   : > { %v1260_v60 = vadd.f32 %v1259_v42, %v1147_v32  ;;  %v4322_v42 = vld [vmem:[#allocation33_spill] sm:$0xff] }
 0x180   : > { %v1149_v50 = vpop.f32.mrf.mxu1  ;;  %v1372_v13 = vpop.f32.mrf.mxu3 }
 0x181   : > { %v1373_v31 = vadd.f32 %v1372_v13, %v1260_v60  ;;  %1888 = vmatmul.f32.gmra.mxu0 %v4317_v26  ;;  %v1150_v36 = vadd.f32 %v1149_v50, %v4320_v43  ;;  %v4326_v13 = vld [vmem:[#allocation32_spill] sm:$0xff] }
 0x183   : > { %v3800_v19 = vadd.f32 %v1485_v57, %v1373_v31  ;;  %1552 = vmatmul.f32.gmra.mxu1 %v4313_v12  ;;  %1665 = vmatmul.f32.gmra.mxu2 %v4319_v62  ;;  %v4324_v57 = vld [vmem:[#allocation2_spill] sm:$0xff] }
 0x184   : > { %v4325_v12 = vld [vmem:[#allocation50_spill] sm:$0xff] }
 0x185   : > { %4318 = vst [vmem:[#allocation29_spill] sm:$0xff] %v3800_v19  ;;  %1778 = vmatmul.f32.gmra.mxu3 %v4321_v54  ;;  %v4332_v19 = vld [vmem:[#allocation38_spill] sm:$0xff] }
 0x186   : > { %v1262_v1 = vpop.f32.mrf.mxu2  ;;  %v1488_v29 = vpop.f32.mrf.mxu0 }
 0x187   : > { %v1263_v2 = vadd.f32 %v1262_v1, %v1150_v36 }
 0x188   : > { %v1152_v8 = vpop.f32.mrf.mxu1  ;;  %v1375_v32 = vpop.f32.mrf.mxu3 }
 0x189   : > { %v1376_v20 = vadd.f32 %v1375_v32, %v1263_v2  ;;  %1891 = vmatmul.f32.gmra.mxu0 %v4322_v42  ;;  %v1153_v50 = vadd.f32 %v1152_v8, %v4325_v12  ;;  %v4327_v2 = vld [vmem:[#allocation35_spill] sm:$0xff]  ;;  %v4330_v32 = vld [vmem:[#allocation54_spill] sm:$0xff] }
 0x18b   : > { %v3807_v60 = vadd.f32 %v1488_v29, %v1376_v20  ;;  %1555 = vmatmul.f32.gmra.mxu1 %v4317_v26  ;;  %2258 = vmatmul.msk.f32.gmra.mxu2 %vm2490_vm1, %v4324_v57  ;;  %v4329_v26 = vld [vmem:[#allocation5_spill] sm:$0xff]  ;;  %v4331_v57 = vld [vmem:[#allocation34_spill] sm:$0xff] }
 0x18d   : > { %4323 = vst [vmem:[#allocation20_spill] sm:$0xff] %v3807_v60  ;;  %1781 = vmatmul.f32.gmra.mxu3 %v4326_v13 }
 0x18e   : > { %v1265_v31 = vpop.f32.mrf.mxu2  ;;  %v1491_v62 = vpop.f32.mrf.mxu0 }
 0x18f   : > { %v1266_v43 = vadd.f32 %v1265_v31, %v1153_v50 }
 0x190   : > { %v1155_v36 = vpop.f32.mrf.mxu1  ;;  %v1378_v54 = vpop.f32.mrf.mxu3 }
 0x191   : > { %v1379_v1 = vadd.f32 %v1378_v54, %v1266_v43  ;;  %1894 = vmatmul.f32.gmra.mxu0 %v4327_v2  ;;  %v1156_v20 = vadd.f32 %v1155_v36, %v4330_v32  ;;  %v4336_v54 = vld [vmem:[#allocation36_spill] sm:$0xff] }
 0x193   : > { %v3816_v29 = vadd.f32 %v1491_v62, %v1379_v1  ;;  %1558 = vmatmul.f32.gmra.mxu1 %v4322_v42  ;;  %1671 = vmatmul.f32.gmra.mxu2 %v4329_v26  ;;  %v4334_v62 = vld [vmem:[#allocation8_spill] sm:$0xff]  ;;  %v4335_v42 = vld [vmem:[#allocation58_spill] sm:$0xff] }
 0x195   : > { %4328 = vst [vmem:[#allocation42_spill] sm:$0xff] %v3816_v29  ;;  %1784 = vmatmul.f32.gmra.mxu3 %v4331_v57  ;;  %v4342_v29 = vld [vmem:[#allocation45_spill] sm:$0xff] }
 0x196   : > { %v1268_v8 = vpop.f32.mrf.mxu2  ;;  %v1494_v12 = vpop.f32.mrf.mxu0 }
 0x197   : > { %v1269_v13 = vadd.f32 %v1268_v8, %v1156_v20 }
 0x198   : > { %v1158_v60 = vpop.f32.mrf.mxu1  ;;  %v1381_v50 = vpop.f32.mrf.mxu3 }
 0x199   : > { %v1382_v31 = vadd.f32 %v1381_v50, %v1269_v13  ;;  %1897 = vmatmul.f32.gmra.mxu0 %v4332_v19  ;;  %v1159_v36 = vadd.f32 %v1158_v60, %v4335_v42  ;;  %v4337_v13 = vld [vmem:[#allocation41_spill] sm:$0xff]  ;;  %v4340_v50 = vld [vmem:[#allocation62_spill] sm:$0xff] }
 0x19b   : > { %v3823_v43 = vadd.f32 %v1494_v12, %v1382_v31  ;;  %1561 = vmatmul.f32.gmra.mxu1 %v4327_v2  ;;  %2260 = vmatmul.msk.f32.gmra.mxu2 %vm2490_vm1, %v4334_v62  ;;  %v4339_v2 = vld [vmem:[#allocation10_spill] sm:$0xff]  ;;  %v4341_v62 = vld [vmem:[#allocation39_spill] sm:$0xff] }
 0x19d   : > { %4333 = vst [vmem:[#allocation28_spill] sm:$0xff] %v3823_v43  ;;  %1787 = vmatmul.f32.gmra.mxu3 %v4336_v54 }
 0x19e   : > { %v1271_v1 = vpop.f32.mrf.mxu2  ;;  %v1497_v26 = vpop.f32.mrf.mxu0 }
 0x19f   : > { %v1272_v32 = vadd.f32 %v1271_v1, %v1159_v36 }
 0x1a0   : > { %v1161_v20 = vpop.f32.mrf.mxu1  ;;  %v1384_v57 = vpop.f32.mrf.mxu3 }
 0x1a1   : > { %v1385_v8 = vadd.f32 %v1384_v57, %v1272_v32  ;;  %1900 = vmatmul.f32.gmra.mxu0 %v4337_v13  ;;  %v1162_v31 = vadd.f32 %v1161_v20, %v4340_v50  ;;  %v4346_v57 = vld [vmem:[#allocation43_spill] sm:$0xff] }
 0x1a3   : > { %v3832_v12 = vadd.f32 %v1497_v26, %v1385_v8  ;;  %1564 = vmatmul.f32.gmra.mxu1 %v4332_v19  ;;  %1677 = vmatmul.f32.gmra.mxu2 %v4339_v2  ;;  %v4344_v26 = vld [vmem:[#allocation13_spill] sm:$0xff] }
 0x1a4   : > { %v4345_v19 = vld [vmem:[#allocation37_spill] sm:$0xff] }
 0x1a5   : > { %4338 = vst [vmem:[#allocation31_spill] sm:$0xff] %v3832_v12  ;;  %1790 = vmatmul.f32.gmra.mxu3 %v4341_v62  ;;  %v4352_v12 = vld [vmem:[#allocation53_spill] sm:$0xff] }
 0x1a6   : > { %v1274_v60 = vpop.f32.mrf.mxu2  ;;  %v1500_v42 = vpop.f32.mrf.mxu0 }
 0x1a7   : > { %v1275_v54 = vadd.f32 %v1274_v60, %v1162_v31 }
 0x1a8   : > { %v1164_v43 = vpop.f32.mrf.mxu1  ;;  %v1387_v36 = vpop.f32.mrf.mxu3 }
 0x1a9   : > { %v1388_v1 = vadd.f32 %v1387_v36, %v1275_v54  ;;  %1903 = vmatmul.f32.gmra.mxu0 %v4342_v29  ;;  %v1165_v20 = vadd.f32 %v1164_v43, %v4345_v19  ;;  %v4347_v54 = vld [vmem:[#allocation49_spill] sm:$0xff]  ;;  %v4350_v36 = vld [vmem:[#allocation40_spill] sm:$0xff] }
 0x1ab   : > { %v3839_v32 = vadd.f32 %v1500_v42, %v1388_v1  ;;  %1567 = vmatmul.f32.gmra.mxu1 %v4337_v13  ;;  %2262 = vmatmul.msk.f32.gmra.mxu2 %vm2490_vm1, %v4344_v26  ;;  %v4349_v13 = vld [vmem:[#allocation15_spill] sm:$0xff] }
 0x1ac   : > { %v4351_v26 = vld [vmem:[#allocation47_spill] sm:$0xff] }
 0x1ad   : > { %4343 = vst [vmem:[#allocation23_spill] sm:$0xff] %v3839_v32  ;;  %1793 = vmatmul.f32.gmra.mxu3 %v4346_v57 }
 0x1ae   : > { %v1277_v8 = vpop.f32.mrf.mxu2  ;;  %v1503_v2 = vpop.f32.mrf.mxu0 }
 0x1af   : > { %v1278_v50 = vadd.f32 %v1277_v8, %v1165_v20 }
 0x1b0   : > { %v1167_v31 = vpop.f32.mrf.mxu1  ;;  %v1390_v62 = vpop.f32.mrf.mxu3 }
 0x1b1   : > { %v1391_v60 = vadd.f32 %v1390_v62, %v1278_v50  ;;  %1906 = vmatmul.f32.gmra.mxu0 %v4347_v54  ;;  %v1168_v1 = vadd.f32 %v1167_v31, %v4350_v36  ;;  %v4356_v62 = vld [vmem:[#allocation51_spill] sm:$0xff] }
 0x1b3   : > { %v3848_v42 = vadd.f32 %v1503_v2, %v1391_v60  ;;  %1570 = vmatmul.f32.gmra.mxu1 %v4342_v29  ;;  %1683 = vmatmul.f32.gmra.mxu2 %v4349_v13  ;;  %v4354_v2 = vld [vmem:[#allocation18_spill] sm:$0xff]  ;;  %v4355_v29 = vld [vmem:[#allocation44_spill] sm:$0xff] }
 0x1b5   : > { %4348 = vst [vmem:[#allocation46_spill] sm:$0xff] %v3848_v42  ;;  %1796 = vmatmul.f32.gmra.mxu3 %v4351_v26  ;;  %v4361_v42 = vld [vmem:[#allocation61_spill] sm:$0xff] }
 0x1b6   : > { %v1280_v43 = vpop.f32.mrf.mxu2  ;;  %v1506_v19 = vpop.f32.mrf.mxu0 }
 0x1b7   : > { %v1281_v57 = vadd.f32 %v1280_v43, %v1168_v1 }
 0x1b8   : > { %v1170_v32 = vpop.f32.mrf.mxu1  ;;  %v1393_v20 = vpop.f32.mrf.mxu3 }
 0x1b9   : > { %v1394_v8 = vadd.f32 %v1393_v20, %v1281_v57  ;;  %1909 = vmatmul.f32.gmra.mxu0 %v4352_v12  ;;  %v1171_v31 = vadd.f32 %v1170_v32, %v4355_v29  ;;  %v4357_v57 = vld [vmem:[#allocation57_spill] sm:$0xff]  ;;  %v4359_v20 = vld [vmem:[#allocation48_spill] sm:$0xff] }
 0x1bb   : > { %v3855_v50 = vadd.f32 %v1506_v19, %v1394_v8  ;;  %1573 = vmatmul.f32.gmra.mxu1 %v4347_v54  ;;  %2264 = vmatmul.msk.f32.gmra.mxu2 %vm2490_vm1, %v4354_v2  ;;  %v4358_v54 = vld [vmem:[#allocation21_spill] sm:$0xff]  ;;  %v4360_v2 = vld [vmem:[#allocation55_spill] sm:$0xff] }
 0x1bd   : > { %4353 = vst [vmem:[#allocation30_spill] sm:$0xff] %v3855_v50  ;;  %1799 = vmatmul.f32.gmra.mxu3 %v4356_v62 }
 0x1be   : > { %v1283_v60 = vpop.f32.mrf.mxu2  ;;  %v1509_v13 = vpop.f32.mrf.mxu0 }
 0x1bf   : > { %v1284_v36 = vadd.f32 %v1283_v60, %v1171_v31 }
 0x1c0   : > { %v1173_v1 = vpop.f32.mrf.mxu1  ;;  %v1396_v26 = vpop.f32.mrf.mxu3 }
 0x1c1   : > { %v1397_v43 = vadd.f32 %v1396_v26, %v1284_v36  ;;  %1912 = vmatmul.f32.gmra.mxu0 %v4357_v57  ;;  %v1174_v8 = vadd.f32 %v1173_v1, %v4359_v20  ;;  %v4364_v26 = vld [vmem:[#allocation59_spill] sm:$0xff] }
 0x1c3   : > { %v3864_v19 = vadd.f32 %v1509_v13, %v1397_v43  ;;  %1576 = vmatmul.f32.gmra.mxu1 %v4352_v12  ;;  %1689 = vmatmul.f32.gmra.mxu2 %v4358_v54  ;;  %v4362_v13 = vld [vmem:[#allocation3_spill] sm:$0xff]  ;;  %v4363_v12 = vld [vmem:[#allocation52_spill] sm:$0xff] }
 0x1c5   : > { %1802 = vmatmul.f32.gmra.mxu3 %v4360_v2 }
 0x1c6   : > { %v1286_v32 = vpop.f32.mrf.mxu2  ;;  %v1512_v29 = vpop.f32.mrf.mxu0 }
 0x1c7   : > { %v1287_v62 = vadd.f32 %v1286_v32, %v1174_v8 }
 0x1c8   : > { %v1176_v50 = vpop.f32.mrf.mxu1  ;;  %v1399_v31 = vpop.f32.mrf.mxu3 }
 0x1c9   : > { %v1400_v60 = vadd.f32 %v1399_v31, %v1287_v62  ;;  %1915 = vmatmul.f32.gmra.mxu0 %v4361_v42  ;;  %v1177_v1 = vadd.f32 %v1176_v50, %v4363_v12  ;;  %v4365_v62 = vld [vmem:[#allocation64_spill] sm:$0xff] }
 0x1ca   : > { %v4367_v31 = vld [vmem:[#allocation56_spill] sm:$0xff] }
 0x1cb   : > { %v3871_v36 = vadd.f32 %v1512_v29, %v1400_v60  ;;  %1579 = vmatmul.f32.gmra.mxu1 %v4357_v57  ;;  %2266 = vmatmul.msk.f32.gmra.mxu2 %vm2490_vm1, %v4362_v13  ;;  %v4366_v57 = vld [vmem:[#allocation6_spill] sm:$0xff] }
 0x1cd   : > { %1805 = vmatmul.f32.gmra.mxu3 %v4364_v26 }
 0x1ce   : > { %v1289_v43 = vpop.f32.mrf.mxu2  ;;  %v1515_v54 = vpop.f32.mrf.mxu0 }
 0x1cf   : > { %v1290_v20 = vadd.f32 %v1289_v43, %v1177_v1 }
 0x1d0   : > { %v1179_v8 = vpop.f32.mrf.mxu1  ;;  %v1402_v2 = vpop.f32.mrf.mxu3 }
 0x1d1   : > { %v1403_v32 = vadd.f32 %v1402_v2, %v1290_v20  ;;  %1918 = vmatmul.f32.gmra.mxu0 %v4365_v62  ;;  %v1180_v60 = vadd.f32 %v1179_v8, %v4367_v31 }
 0x1d3   : > { %v3880_v29 = vadd.f32 %v1515_v54, %v1403_v32  ;;  %1582 = vmatmul.f32.gmra.mxu1 %v4361_v42  ;;  %1695 = vmatmul.f32.gmra.mxu2 %v4366_v57  ;;  %v4368_v54 = vld [vmem:[#allocation9_spill] sm:$0xff]  ;;  %v4369_v42 = vld [vmem:[#allocation60_spill] sm:$0xff] }
 0x1d5   : > { %1808 = vmatmul.f32.gmra.mxu3 %v3403_v49 }
 0x1d6   : > { %v1292_v50 = vpop.f32.mrf.mxu2  ;;  %v1518_v13 = vpop.f32.mrf.mxu0 }
 0x1d7   : > { %v1293_v12 = vadd.f32 %v1292_v50, %v1180_v60 }
 0x1d8   : > { %v1182_v26 = vpop.f32.mrf.mxu1  ;;  %v1405_v1 = vpop.f32.mrf.mxu3 }
 0x1d9   : > { %v1406_v43 = vadd.f32 %v1405_v1, %v1293_v12  ;;  %1921 = vmatmul.f32.gmra.mxu0 %v3436_v10  ;;  %v1183_v8 = vadd.f32 %v1182_v26, %v4369_v42 }
 0x1db   : > { %v3887_v20 = vadd.f32 %v1518_v13, %v1406_v43  ;;  %1585 = vmatmul.f32.gmra.mxu1 %v4365_v62  ;;  %2268 = vmatmul.msk.f32.gmra.mxu2 %vm2490_vm1, %v4368_v54  ;;  %v4370_v62 = vld [vmem:[#allocation11_spill] sm:$0xff] }
 0x1dc   : > { %v4371_v13 = vld [vmem:[#allocation63_spill] sm:$0xff] }
 0x1dd   : > { %1811 = vmatmul.f32.gmra.mxu3 %v3427_v61 }
 0x1de   : > { %v1295_v49 = vpop.f32.mrf.mxu2  ;;  %v1521_v2 = vpop.f32.mrf.mxu0 }
 0x1df   : > { %v1296_v32 = vadd.f32 %v1295_v49, %v1183_v8 }
 0x1e0   : > { %v1185_v57 = vpop.f32.mrf.mxu1  ;;  %v1408_v31 = vpop.f32.mrf.mxu3 }
 0x1e1   : > { %v1409_v60 = vadd.f32 %v1408_v31, %v1296_v32  ;;  %1924 = vmatmul.f32.gmra.mxu0 %v3455_v15  ;;  %v1186_v12 = vadd.f32 %v1185_v57, %v4371_v13  ;;  %v4374_v13 = vld [vmem:[#allocation66_spill] sm:$0xff] }
 0x1e3   : > { %v3896_v50 = vadd.f32 %v1521_v2, %v1409_v60  ;;  %1588 = vmatmul.f32.gmra.mxu1 %v3436_v10  ;;  %1701 = vmatmul.f32.gmra.mxu2 %v4370_v62  ;;  %v4372_v10 = vld [vmem:[#allocation65_spill] sm:$0xff]  ;;  %v2015_v62 = vld [vmem:[%s3915_s28] sm:$0xff] }
 0x1e5   : > { %1814 = vmatmul.f32.gmra.mxu3 %v3450_v11 }
 0x1e6   : > { %v1298_v26 = vpop.f32.mrf.mxu2  ;;  %v1524_v61 = vpop.f32.mrf.mxu0 }
 0x1e7   : > { %v1299_v1 = vadd.f32 %v1298_v26, %v1186_v12 }
 0x1e8   : > { %v1411_v43 = vpop.f32.mrf.mxu3  ;;  %v1544_v54 = vpop.f32.mrf.mxu1 }
 0x1e9   : > { %v1412_v42 = vadd.f32 %v1411_v43, %v1299_v1  ;;  %1927 = vmatmul.f32.gmra.mxu0 %v3483_v25  ;;  %v1545_v49 = vadd.f32 %v1544_v54, %v4372_v10 }
 0x1eb   : > { %v3903_v8 = vadd.f32 %v1524_v61, %v1412_v42  ;;  %1591 = vmatmul.f32.gmra.mxu1 %v3455_v15  ;;  %2270 = vmatmul.msk.f32.gmra.mxu2 %vm2490_vm1, %v2778_v55  ;;  %v3920_v55 = vld [vmem:[%s4138_s4] ss:$0 sm:$0xff] }
 0x1ed   : > { %1817 = vmatmul.f32.gmra.mxu3 %v3474_v58  ;;  %v4373_v58 = vld [vmem:[#allocation16_spill] sm:$0xff] }
 0x1ee   : > { %v1657_v11 = vpop.f32.mrf.mxu2  ;;  %v1883_v2 = vpop.f32.mrf.mxu0 }
 0x1ef   : > { %v1658_v32 = vadd.f32 %v1657_v11, %v1545_v49  ;;  %v4375_v11 = vld [vmem:[#allocation67_spill] sm:$0xff] }
 0x1f0   : > { %v1547_v57 = vpop.f32.mrf.mxu1  ;;  %v1770_v31 = vpop.f32.mrf.mxu3 }
 0x1f1   : > { %v1771_v60 = vadd.f32 %v1770_v31, %v1658_v32  ;;  %1930 = vmatmul.f32.gmra.mxu0 %v3502_v28  ;;  %v1548_v12 = vadd.f32 %v1547_v57, %v4374_v13  ;;  %v4376_v13 = vld [vmem:[#allocation22_spill] sm:$0xff] }
 0x1f3   : > { %v1884_v15 = vadd.f32 %v1883_v2, %v1771_v60  ;;  %1594 = vmatmul.f32.gmra.mxu1 %v3483_v25  ;;  %1707 = vmatmul.f32.gmra.mxu2 %v4373_v58 }
 0x1f5   : > { %v1983_v26 = vadd.f32 %v3920_v55, %v1884_v15  ;;  %1820 = vmatmul.f32.gmra.mxu3 %v3497_v7  ;;  %v2016_v7 = vld [vmem:[%s3915_s28 + $0x8] sm:$0xff] }
 0x1f6   : > { %v1660_v61 = vpop.f32.mrf.mxu2  ;;  %v1886_v1 = vpop.f32.mrf.mxu0 }
 0x1f7   : > { %v2047_v43 = vadd.f32 %v2015_v62, %v1983_v26  ;;  %v1661_v25 = vadd.f32 %v1660_v61, %v1548_v12  ;;  %v2017_v12 = vld [vmem:[%s3915_s28 + $0x10] sm:$0xff] }
 0x1f8   : > { %v1550_v54 = vpop.f32.mrf.mxu1  ;;  %v1773_v42 = vpop.f32.mrf.mxu3  ;;  %v4377_v26 = vld [vmem:[#allocation68_spill] sm:$0xff] }
 0x1f9   : > { %2079 = vst [vmem:[%s3933_s9] sm:$0xff] %v2047_v43  ;;  %v1774_v10 = vadd.f32 %v1773_v42, %v1661_v25  ;;  %1933 = vmatmul.f32.gmra.mxu0 %v3530_v37  ;;  %v1551_v2 = vadd.f32 %v1550_v54, %v4375_v11 }
 0x1fb   : > { %v1887_v49 = vadd.f32 %v1886_v1, %v1774_v10  ;;  %1597 = vmatmul.f32.gmra.mxu1 %v3502_v28  ;;  %2272 = vmatmul.msk.f32.gmra.mxu2 %vm2490_vm1, %v2928_v5 }
 0x1fd   : > { %v1984_v32 = vadd.f32 %v3920_v55, %v1887_v49  ;;  %1823 = vmatmul.f32.gmra.mxu3 %v3521_v38 }
 0x1fe   : > { %v1663_v57 = vpop.f32.mrf.mxu2  ;;  %v1889_v31 = vpop.f32.mrf.mxu0 }
 0x1ff   : > { %v2048_v60 = vadd.f32 %v2016_v7, %v1984_v32  ;;  %v1664_v15 = vadd.f32 %v1663_v57, %v1551_v2  ;;  %v2018_v7 = vld [vmem:[%s3915_s28 + $0x18] sm:$0xff] }
 0x200   : > { %v1553_v58 = vpop.f32.mrf.mxu1  ;;  %v1776_v62 = vpop.f32.mrf.mxu3 }
 0x201   : > { %2080 = vst [vmem:[%s3933_s9 + $0x8] sm:$0xff] %v2048_v60  ;;  %v1777_v28 = vadd.f32 %v1776_v62, %v1664_v15  ;;  %1936 = vmatmul.f32.gmra.mxu0 %v3549_v0  ;;  %v1554_v38 = vadd.f32 %v1553_v58, %v4377_v26  ;;  %v4379_v62 = vld [vmem:[#allocation7_spill] sm:$0xff] }
 0x203   : > { %v1890_v5 = vadd.f32 %v1889_v31, %v1777_v28  ;;  %1600 = vmatmul.f32.gmra.mxu1 %v3530_v37  ;;  %1713 = vmatmul.f32.gmra.mxu2 %v4376_v13  ;;  %v2019_v28 = vld [vmem:[%s3915_s28 + $0x20] sm:$0xff] }
 0x205   : > { %v1985_v61 = vadd.f32 %v3920_v55, %v1890_v5  ;;  %1826 = vmatmul.f32.gmra.mxu3 %v3544_v63  ;;  %v4378_v63 = vld [vmem:[#allocation69_spill] sm:$0xff]  ;;  %v4380_v5 = vld [vmem:[#allocation70_spill] sm:$0xff] }
 0x206   : > { %v1666_v1 = vpop.f32.mrf.mxu2  ;;  %v1892_v43 = vpop.f32.mrf.mxu0 }
 0x207   : > { %v2049_v25 = vadd.f32 %v2017_v12, %v1985_v61  ;;  %v1667_v54 = vadd.f32 %v1666_v1, %v1554_v38 }
 0x208   : > { %v1556_v42 = vpop.f32.mrf.mxu1  ;;  %v1779_v10 = vpop.f32.mrf.mxu3 }
 0x209   : > { %2081 = vst [vmem:[%s3933_s9 + $0x10] sm:$0xff] %v2049_v25  ;;  %v1780_v49 = vadd.f32 %v1779_v10, %v1667_v54  ;;  %1939 = vmatmul.f32.gmra.mxu0 %v3577_v59  ;;  %v1557_v11 = vadd.f32 %v1556_v42, %v4378_v63  ;;  %v2020_v54 = vld [vmem:[%s3915_s28 + $0x28] sm:$0xff] }
 0x20b   : > { %v1893_v37 = vadd.f32 %v1892_v43, %v1780_v49  ;;  %1603 = vmatmul.f32.gmra.mxu1 %v3549_v0  ;;  %2274 = vmatmul.msk.f32.gmra.mxu2 %vm2490_vm1, %v2503_v39 }
 0x20d   : > { %v1986_v2 = vadd.f32 %v3920_v55, %v1893_v37  ;;  %1829 = vmatmul.f32.gmra.mxu3 %v3568_v48 }
 0x20e   : > { %v1669_v32 = vpop.f32.mrf.mxu2  ;;  %v1895_v57 = vpop.f32.mrf.mxu0 }
 0x20f   : > { %v2050_v31 = vadd.f32 %v2018_v7, %v1986_v2  ;;  %v1670_v60 = vadd.f32 %v1669_v32, %v1557_v11  ;;  %v4382_v32 = vld [vmem:[#allocation12_spill] sm:$0xff] }
 0x210   : > { %v1559_v15 = vpop.f32.mrf.mxu1  ;;  %v1782_v58 = vpop.f32.mrf.mxu3 }
 0x211   : > { %2082 = vst [vmem:[%s3933_s9 + $0x18] sm:$0xff] %v2050_v31  ;;  %v1783_v0 = vadd.f32 %v1782_v58, %v1670_v60  ;;  %1942 = vmatmul.f32.gmra.mxu0 %v3596_v6  ;;  %v1560_v48 = vadd.f32 %v1559_v15, %v4380_v5  ;;  %v4383_v31 = vld [vmem:[#allocation72_spill] sm:$0xff] }
 0x213   : > { %v1896_v39 = vadd.f32 %v1895_v57, %v1783_v0  ;;  %1606 = vmatmul.f32.gmra.mxu1 %v3577_v59  ;;  %1719 = vmatmul.f32.gmra.mxu2 %v4379_v62  ;;  %v2021_v57 = vld [vmem:[%s3915_s28 + $0x30] sm:$0xff] }
 0x215   : > { %v1987_v13 = vadd.f32 %v3920_v55, %v1896_v39  ;;  %1832 = vmatmul.f32.gmra.mxu3 %v3591_v18  ;;  %v4381_v18 = vld [vmem:[#allocation71_spill] sm:$0xff] }
 0x216   : > { %v1672_v12 = vpop.f32.mrf.mxu2  ;;  %v1898_v26 = vpop.f32.mrf.mxu0 }
 0x217   : > { %v2051_v38 = vadd.f32 %v2019_v28, %v1987_v13  ;;  %v1673_v61 = vadd.f32 %v1672_v12, %v1560_v48  ;;  %v4384_v48 = vld [vmem:[#allocation14_spill] sm:$0xff]  ;;  %v2022_v13 = vld [vmem:[%s3915_s28 + $0x38] sm:$0xff] }
 0x218   : > { %v1562_v1 = vpop.f32.mrf.mxu1  ;;  %v1785_v43 = vpop.f32.mrf.mxu3 }
 0x219   : > { %2083 = vst [vmem:[%s3933_s9 + $0x20] sm:$0xff] %v2051_v38  ;;  %v1786_v25 = vadd.f32 %v1785_v43, %v1673_v61  ;;  %1945 = vmatmul.f32.gmra.mxu0 %v3624_v24  ;;  %v1563_v42 = vadd.f32 %v1562_v1, %v4381_v18 }
 0x21b   : > { %v1899_v59 = vadd.f32 %v1898_v26, %v1786_v25  ;;  %1609 = vmatmul.f32.gmra.mxu1 %v3596_v6  ;;  %2276 = vmatmul.msk.f32.gmra.mxu2 %vm2490_vm1, %v2638_v30 }
 0x21d   : > { %v1988_v10 = vadd.f32 %v3920_v55, %v1899_v59  ;;  %1835 = vmatmul.f32.gmra.mxu3 %v3615_v27 }
 0x21e   : > { %v1675_v49 = vpop.f32.mrf.mxu2  ;;  %v1901_v37 = vpop.f32.mrf.mxu0 }
 0x21f   : > { %v2052_v7 = vadd.f32 %v2020_v54, %v1988_v10  ;;  %v1676_v63 = vadd.f32 %v1675_v49, %v1563_v42  ;;  %v4386_v54 = vld [vmem:[#allocation76_spill] sm:$0xff]  ;;  %v4387_v42 = vld [vmem:[#allocation17_spill] sm:$0xff]  ;;  %v2023_v10 = vld [vmem:[%s3915_s28 + $0x40] sm:$0xff] }
 0x220   : > { %v1565_v11 = vpop.f32.mrf.mxu1  ;;  %v1788_v2 = vpop.f32.mrf.mxu3  ;;  %v4388_v49 = vld [vmem:[#allocation74_spill] sm:$0xff] }
 0x221   : > { %2084 = vst [vmem:[%s3933_s9 + $0x28] sm:$0xff] %v2052_v7  ;;  %v1789_v6 = vadd.f32 %v1788_v2, %v1676_v63  ;;  %1948 = vmatmul.f32.gmra.mxu0 %v3643_v46  ;;  %v1566_v27 = vadd.f32 %v1565_v11, %v4383_v31  ;;  %v2024_v31 = vld [vmem:[%s3915_s28 + $0x48] sm:$0xff] }
 0x223   : > { %v1902_v30 = vadd.f32 %v1901_v37, %v1789_v6  ;;  %1612 = vmatmul.f32.gmra.mxu1 %v3624_v24  ;;  %1725 = vmatmul.f32.gmra.mxu2 %v4382_v32 }
 0x225   : > { %v1989_v60 = vadd.f32 %v3920_v55, %v1902_v30  ;;  %1838 = vmatmul.f32.gmra.mxu3 %v3638_v3  ;;  %v4385_v3 = vld [vmem:[#allocation73_spill] sm:$0xff] }
 0x226   : > { %v1678_v15 = vpop.f32.mrf.mxu2  ;;  %v1904_v58 = vpop.f32.mrf.mxu0 }
 0x227   : > { %v2053_v0 = vadd.f32 %v2021_v57, %v1989_v60  ;;  %v1679_v39 = vadd.f32 %v1678_v15, %v1566_v27  ;;  %v4389_v57 = vld [vmem:[#allocation19_spill] sm:$0xff] }
 0x228   : > { %v1568_v62 = vpop.f32.mrf.mxu1  ;;  %v1791_v28 = vpop.f32.mrf.mxu3 }
 0x229   : > { %2085 = vst [vmem:[%s3933_s9 + $0x30] sm:$0xff] %v2053_v0  ;;  %v1792_v5 = vadd.f32 %v1791_v28, %v1679_v39  ;;  %1951 = vmatmul.f32.gmra.mxu0 %v3671_v17  ;;  %v1569_v12 = vadd.f32 %v1568_v62, %v4385_v3 }
 0x22b   : > { %v1905_v24 = vadd.f32 %v1904_v58, %v1792_v5  ;;  %1615 = vmatmul.f32.gmra.mxu1 %v3643_v46  ;;  %2278 = vmatmul.msk.f32.gmra.mxu2 %vm2490_vm1, %v4384_v48  ;;  %v2025_v48 = vld [vmem:[%s3915_s28 + $0x50] sm:$0xff] }
 0x22d   : > { %v1990_v26 = vadd.f32 %v3920_v55, %v1905_v24  ;;  %1841 = vmatmul.f32.gmra.mxu3 %v3662_v45 }
 0x22e   : > { %v1681_v38 = vpop.f32.mrf.mxu2  ;;  %v1907_v61 = vpop.f32.mrf.mxu0 }
 0x22f   : > { %v2054_v1 = vadd.f32 %v2022_v13, %v1990_v26  ;;  %v1682_v43 = vadd.f32 %v1681_v38, %v1569_v12  ;;  %v4391_v13 = vld [vmem:[#allocation77_spill] sm:$0xff] }
 0x230   : > { %v1571_v25 = vpop.f32.mrf.mxu1  ;;  %v1794_v59 = vpop.f32.mrf.mxu3 }
 0x231   : > { %2086 = vst [vmem:[%s3933_s9 + $0x38] sm:$0xff] %v2054_v1  ;;  %v1795_v46 = vadd.f32 %v1794_v59, %v1682_v43  ;;  %1954 = vmatmul.f32.gmra.mxu0 %v4386_v54  ;;  %v1572_v45 = vadd.f32 %v1571_v25, %v4388_v49 }
 0x233   : > { %v1908_v18 = vadd.f32 %v1907_v61, %v1795_v46  ;;  %1618 = vmatmul.f32.gmra.mxu1 %v3671_v17  ;;  %1731 = vmatmul.f32.gmra.mxu2 %v4387_v42  ;;  %v4392_v46 = vld [vmem:[#allocation78_spill] sm:$0xff] }
 0x235   : > { %v1991_v37 = vadd.f32 %v3920_v55, %v1908_v18  ;;  %1844 = vmatmul.f32.gmra.mxu3 %v3685_v47  ;;  %v4390_v47 = vld [vmem:[#allocation75_spill] sm:$0xff] }
 0x236   : > { %v1684_v7 = vpop.f32.mrf.mxu2  ;;  %v1910_v63 = vpop.f32.mrf.mxu0 }
 0x237   : > { %v2055_v11 = vadd.f32 %v2023_v10, %v1991_v37  ;;  %v1685_v2 = vadd.f32 %v1684_v7, %v1572_v45 }
 0x238   : > { %v1574_v6 = vpop.f32.mrf.mxu1  ;;  %v1797_v30 = vpop.f32.mrf.mxu3 }
 0x239   : > { %2087 = vst [vmem:[%s3933_s9 + $0x40] sm:$0xff] %v2055_v11  ;;  %v1798_v32 = vadd.f32 %v1797_v30, %v1685_v2  ;;  %1957 = vmatmul.f32.gmra.mxu0 %v3717_v22  ;;  %v1575_v27 = vadd.f32 %v1574_v6, %v4390_v47  ;;  %v4393_v11 = vld [vmem:[#allocation79_spill] sm:$0xff] }
 0x23b   : > { %v1911_v17 = vadd.f32 %v1910_v63, %v1798_v32  ;;  %1621 = vmatmul.f32.gmra.mxu1 %v4386_v54  ;;  %2280 = vmatmul.msk.f32.gmra.mxu2 %vm2490_vm1, %v4389_v57 }
 0x23d   : > { %v1992_v60 = vadd.f32 %v3920_v55, %v1911_v17  ;;  %1847 = vmatmul.f32.gmra.mxu3 %v3708_v56 }
 0x23e   : > { %v1687_v15 = vpop.f32.mrf.mxu2  ;;  %v1913_v58 = vpop.f32.mrf.mxu0 }
 0x23f   : > { %v2056_v0 = vadd.f32 %v2024_v31, %v1992_v60  ;;  %v1688_v39 = vadd.f32 %v1687_v15, %v1575_v27  ;;  %v4394_v27 = vld [vmem:[#allocation4_spill] sm:$0xff]  ;;  %v2028_v60 = vld [vmem:[%s3915_s28 + $0x68] sm:$0xff] }
 0x240   : > { %v1577_v62 = vpop.f32.mrf.mxu1  ;;  %v1800_v28 = vpop.f32.mrf.mxu3 }
 0x241   : > { %2088 = vst [vmem:[%s3933_s9 + $0x48] sm:$0xff] %v2056_v0  ;;  %v1801_v5 = vadd.f32 %v1800_v28, %v1688_v39  ;;  %1960 = vmatmul.f32.gmra.mxu0 %v3741_v23  ;;  %v1578_v3 = vadd.f32 %v1577_v62, %v4391_v13  ;;  %v4396_v13 = vld [vmem:[#allocation25_spill] sm:$0xff] }
 0x243   : > { %v1914_v24 = vadd.f32 %v1913_v58, %v1801_v5  ;;  %1624 = vmatmul.f32.gmra.mxu1 %v3717_v22  ;;  %1737 = vmatmul.f32.gmra.mxu2 %v2998_v21  ;;  %v811_v22 = vrot.slane %v3738_v51, 2  ;;  %v812_v21 = vrot.slane %v3734_v44, 2  ;;  %v4395_v58 = vld [vmem:[#allocation24_spill] sm:$0xff] }
 0x245   : > { %v1993_v56 = vadd.f32 %v3920_v55, %v1914_v24  ;;  %1850 = vmatmul.f32.gmra.mxu3 %v3730_v16  ;;  %v2026_v16 = vld [vmem:[%s3915_s28 + $0x58] sm:$0xff]  ;;  %v813_v10 = vsel %vm689_vm3, %v811_v22, %v812_v21 }
 0x246   : > { %v1690_v12 = vpop.f32.mrf.mxu2  ;;  %v1916_v26 = vpop.f32.mrf.mxu0 }
 0x247   : > { %v2057_v38 = vadd.f32 %v2025_v48, %v1993_v56  ;;  %v1691_v61 = vadd.f32 %v1690_v12, %v1578_v3  ;;  %v4397_v12 = vld [vmem:[#allocation26_spill] sm:$0xff] }
 0x248   : > { %v1580_v1 = vpop.f32.mrf.mxu1  ;;  %v1803_v43 = vpop.f32.mrf.mxu3 }
 0x249   : > { %2089 = vst [vmem:[%s3933_s9 + $0x50] sm:$0xff] %v2057_v38  ;;  %v1804_v25 = vadd.f32 %v1803_v43, %v1691_v61  ;;  %1963 = vmatmul.f32.gmra.mxu0 %v3761_v41  ;;  %v1581_v54 = vadd.f32 %v1580_v1, %v4392_v46 }
 0x24b   : > { %v1917_v59 = vadd.f32 %v1916_v26, %v1804_v25  ;;  %1627 = vmatmul.f32.gmra.mxu1 %v3741_v23  ;;  %2282 = vmatmul.msk.f32.gmra.mxu2 %vm2490_vm1, %v3727_v40  ;;  %v814_v40 = vrot.slane %v3758_v33, 2 }
 0x24d   : > { %v1994_v18 = vadd.f32 %v3920_v55, %v1917_v59  ;;  %1853 = vmatmul.f32.gmra.mxu3 %v3755_v14  ;;  %v2027_v14 = vld [vmem:[%s3915_s28 + $0x60] sm:$0xff]  ;;  %v815_v17 = vsel %vm689_vm3, %v812_v21, %v814_v40  ;;  %v4398_v21 = vld [vmem:[#allocation27_spill] sm:$0xff] }
 0x24e   : > { %v1693_v42 = vpop.f32.mrf.mxu2  ;;  %v1919_v51 = vpop.f32.mrf.mxu0 }
 0x24f   : > { %v2058_v49 = vadd.f32 %v2026_v16, %v1994_v18  ;;  %v1694_v45 = vadd.f32 %v1693_v42, %v1581_v54  ;;  %v2030_v16 = vld [vmem:[%s3915_s28 + $0x78] sm:$0xff] }
 0x250   : > { %v1583_v37 = vpop.f32.mrf.mxu1  ;;  %v1806_v23 = vpop.f32.mrf.mxu3 }
 0x251   : > { %2090 = vst [vmem:[%s3933_s9 + $0x58] sm:$0xff] %v2058_v49  ;;  %v1807_v7 = vadd.f32 %v1806_v23, %v1694_v45  ;;  %1966 = vmatmul.f32.gmra.mxu0 %v813_v10  ;;  %v1584_v2 = vadd.f32 %v1583_v37, %v4393_v11  ;;  %v2031_v23 = vld [vmem:[%s3915_s28 + $0x80] sm:$0xff] }
 0x253   : > { %v1920_v63 = vadd.f32 %v1919_v51, %v1807_v7  ;;  %1630 = vmatmul.f32.gmra.mxu1 %v3761_v41  ;;  %1743 = vmatmul.f32.gmra.mxu2 %v3734_v44 }
 0x255   : > { %v1995_v6 = vadd.f32 %v3920_v55, %v1920_v63  ;;  %1856 = vmatmul.f32.gmra.mxu3 %v3772_v9 }
 0x256   : > { %v1696_v30 = vpop.f32.mrf.mxu2  ;;  %v1922_v32 = vpop.f32.mrf.mxu0 }
 0x257   : > { %v2059_v57 = vadd.f32 %v2027_v14, %v1995_v6  ;;  %v1697_v31 = vadd.f32 %v1696_v30, %v1584_v2 }
 0x258   : > { %v1586_v33 = vpop.f32.mrf.mxu1  ;;  %v1809_v47 = vpop.f32.mrf.mxu3 }
 0x259   : > { %2091 = vst [vmem:[%s3933_s9 + $0x60] sm:$0xff] %v2059_v57  ;;  %v1810_v41 = vadd.f32 %v1809_v47, %v1697_v31  ;;  %1969 = vmatmul.f32.gmra.mxu0 %v815_v17  ;;  %v1587_v9 = vadd.f32 %v1586_v33, %v3765_v4  ;;  %v2029_v4 = vld [vmem:[%s3915_s28 + $0x70] sm:$0xff]  ;;  %v4399_v57 = vld [vmem:[#allocation29_spill] sm:$0xff] }
 0x25b   : > { %v1923_v44 = vadd.f32 %v1922_v32, %v1810_v41  ;;  %1633 = vmatmul.f32.gmra.mxu1 %v813_v10  ;;  %2284 = vmatmul.msk.f32.gmra.mxu2 %vm2490_vm1, %v4394_v27 }
 0x25d   : > { %v1996_v15 = vadd.f32 %v3920_v55, %v1923_v44  ;;  %1859 = vmatmul.f32.gmra.mxu3 %v4395_v58  ;;  %v2033_v58 = vld [vmem:[%s3915_s28 + $0x90] sm:$0xff] }
 0x25e   : > { %v1699_v0 = vpop.f32.mrf.mxu2  ;;  %v1925_v39 = vpop.f32.mrf.mxu0 }
 0x25f   : > { %v2060_v62 = vadd.f32 %v2028_v60, %v1996_v15  ;;  %v1700_v28 = vadd.f32 %v1699_v0, %v1587_v9  ;;  %v4400_v0 = vld [vmem:[#allocation20_spill] sm:$0xff] }
 0x260   : > { %v1589_v5 = vpop.f32.mrf.mxu1  ;;  %v1812_v24 = vpop.f32.mrf.mxu3 }
 0x261   : > { %2092 = vst [vmem:[%s3933_s9 + $0x68] sm:$0xff] %v2060_v62  ;;  %v1813_v48 = vadd.f32 %v1812_v24, %v1700_v28  ;;  %1972 = vmatmul.f32.gmra.mxu0 %v4396_v13  ;;  %v1590_v3 = vadd.f32 %v1589_v5, %v3775_v53 }
 0x263   : > { %v1926_v35 = vadd.f32 %v1925_v39, %v1813_v48  ;;  %1636 = vmatmul.f32.gmra.mxu1 %v815_v17  ;;  %1749 = vmatmul.f32.gmra.mxu2 %v4394_v27  ;;  %v2032_v17 = vld [vmem:[%s3915_s28 + $0x88] sm:$0xff] }
 0x265   : > { %v1997_v56 = vadd.f32 %v3920_v55, %v1926_v35  ;;  %1862 = vmatmul.f32.gmra.mxu3 %v4397_v12  ;;  %v4401_v12 = vld [vmem:[#allocation42_spill] sm:$0xff] }
 0x266   : > { %v1702_v26 = vpop.f32.mrf.mxu2  ;;  %v1928_v38 = vpop.f32.mrf.mxu0 }
 0x267   : > { %v2061_v61 = vadd.f32 %v2029_v4, %v1997_v56  ;;  %v1703_v1 = vadd.f32 %v1702_v26, %v1590_v3  ;;  %v2034_v56 = vld [vmem:[%s3915_s28 + $0x98] sm:$0xff] }
 0x268   : > { %v1592_v43 = vpop.f32.mrf.mxu1  ;;  %v1815_v25 = vpop.f32.mrf.mxu3 }
 0x269   : > { %2093 = vst [vmem:[%s3933_s9 + $0x70] sm:$0xff] %v2061_v61  ;;  %v1816_v22 = vadd.f32 %v1815_v25, %v1703_v1  ;;  %1975 = vmatmul.f32.gmra.mxu0 %v4398_v21  ;;  %v1593_v53 = vadd.f32 %v1592_v43, %v3784_v52 }
 0x26b   : > { %v1929_v59 = vadd.f32 %v1928_v38, %v1816_v22 }
 0x26d   : > { %v1998_v46 = vadd.f32 %v3920_v55, %v1929_v59 }
 0x26e   : > { %v1705_v54 = vpop.f32.mrf.mxu2  ;;  %v1931_v18 = vpop.f32.mrf.mxu0 }
 0x26f   : > { %v2062_v42 = vadd.f32 %v2030_v16, %v1998_v46  ;;  %v1706_v51 = vadd.f32 %v1705_v54, %v1593_v53  ;;  %v2035_v53 = vld [vmem:[%s3915_s28 + $0xa0] sm:$0xff]  ;;  %v4402_v46 = vld [vmem:[#allocation28_spill] sm:$0xff] }
 0x270   : > { %v1595_v10 = vpop.f32.mrf.mxu1  ;;  %v1818_v49 = vpop.f32.mrf.mxu3 }
 0x271   : > { %2094 = vst [vmem:[%s3933_s9 + $0x78] sm:$0xff] %v2062_v42  ;;  %v1819_v45 = vadd.f32 %v1818_v49, %v1706_v51  ;;  %v1596_v7 = vadd.f32 %v1595_v10, %v3791_v34 }
 0x273   : > { %v1932_v37 = vadd.f32 %v1931_v18, %v1819_v45 }
 0x275   : > { %v1999_v40 = vadd.f32 %v3920_v55, %v1932_v37 }
 0x276   : > { %v1708_v63 = vpop.f32.mrf.mxu2  ;;  %v1934_v52 = vpop.f32.mrf.mxu0 }
 0x277   : > { %v2063_v14 = vadd.f32 %v2031_v23, %v1999_v40  ;;  %v1709_v11 = vadd.f32 %v1708_v63, %v1596_v7  ;;  %v2036_v40 = vld [vmem:[%s3915_s28 + $0xa8] sm:$0xff] }
 0x278   : > { %v1598_v2 = vpop.f32.mrf.mxu1  ;;  %v1821_v6 = vpop.f32.mrf.mxu3  ;;  %v4403_v63 = vld [vmem:[#allocation31_spill] sm:$0xff] }
 0x279   : > { %2095 = vst [vmem:[%s3933_s9 + $0x80] sm:$0xff] %v2063_v14  ;;  %v1822_v30 = vadd.f32 %v1821_v6, %v1709_v11  ;;  %v1599_v31 = vadd.f32 %v1598_v2, %v4399_v57 }
 0x27b   : > { %v1935_v32 = vadd.f32 %v1934_v52, %v1822_v30 }
 0x27d   : > { %v2000_v33 = vadd.f32 %v3920_v55, %v1935_v32 }
 0x27e   : > { %v1711_v47 = vpop.f32.mrf.mxu2  ;;  %v1937_v34 = vpop.f32.mrf.mxu0 }
 0x27f   : > { %v2064_v41 = vadd.f32 %v2032_v17, %v2000_v33  ;;  %v1712_v44 = vadd.f32 %v1711_v47, %v1599_v31  ;;  %v2037_v33 = vld [vmem:[%s3915_s28 + $0xb0] sm:$0xff]  ;;  %v4404_v47 = vld [vmem:[#allocation23_spill] sm:$0xff] }
 0x280   : > { %v1601_v27 = vpop.f32.mrf.mxu1  ;;  %v1824_v60 = vpop.f32.mrf.mxu3 }
 0x281   : > { %2096 = vst [vmem:[%s3933_s9 + $0x88] sm:$0xff] %v2064_v41  ;;  %v1825_v9 = vadd.f32 %v1824_v60, %v1712_v44  ;;  %v1602_v39 = vadd.f32 %v1601_v27, %v4400_v0 }
 0x283   : > { %v1938_v15 = vadd.f32 %v1937_v34, %v1825_v9 }
 0x285   : > { %v2001_v62 = vadd.f32 %v3920_v55, %v1938_v15 }
 0x286   : > { %v1714_v28 = vpop.f32.mrf.mxu2  ;;  %v1940_v5 = vpop.f32.mrf.mxu0 }
 0x287   : > { %v2065_v24 = vadd.f32 %v2033_v58, %v2001_v62  ;;  %v1715_v48 = vadd.f32 %v1714_v28, %v1602_v39  ;;  %v2038_v62 = vld [vmem:[%s3915_s28 + $0xb8] sm:$0xff]  ;;  %v4405_v28 = vld [vmem:[#allocation46_spill] sm:$0xff] }
 0x288   : > { %v1604_v13 = vpop.f32.mrf.mxu1  ;;  %v1827_v35 = vpop.f32.mrf.mxu3 }
 0x289   : > { %2097 = vst [vmem:[%s3933_s9 + $0x90] sm:$0xff] %v2065_v24  ;;  %v1828_v4 = vadd.f32 %v1827_v35, %v1715_v48  ;;  %v1605_v26 = vadd.f32 %v1604_v13, %v4401_v12 }
 0x28b   : > { %v1941_v3 = vadd.f32 %v1940_v5, %v1828_v4 }
 0x28d   : > { %v2002_v38 = vadd.f32 %v3920_v55, %v1941_v3 }
 0x28e   : > { %v1717_v61 = vpop.f32.mrf.mxu2  ;;  %v1943_v1 = vpop.f32.mrf.mxu0 }
 0x28f   : > { %v2066_v43 = vadd.f32 %v2034_v56, %v2002_v38  ;;  %v1718_v25 = vadd.f32 %v1717_v61, %v1605_v26  ;;  %v2039_v38 = vld [vmem:[%s3915_s28 + $0xc0] sm:$0xff] }
 0x290   : > { %v1607_v22 = vpop.f32.mrf.mxu1  ;;  %v1830_v21 = vpop.f32.mrf.mxu3  ;;  %v4406_v61 = vld [vmem:[#allocation30_spill] sm:$0xff] }
 0x291   : > { %2098 = vst [vmem:[%s3933_s9 + $0x98] sm:$0xff] %v2066_v43  ;;  %v1831_v59 = vadd.f32 %v1830_v21, %v1718_v25  ;;  %v1608_v54 = vadd.f32 %v1607_v22, %v4402_v46 }
 0x293   : > { %v1944_v16 = vadd.f32 %v1943_v1, %v1831_v59 }
 0x295   : > { %v2003_v18 = vadd.f32 %v3920_v55, %v1944_v16 }
 0x296   : > { %v1720_v42 = vpop.f32.mrf.mxu2  ;;  %v1946_v51 = vpop.f32.mrf.mxu0 }
 0x297   : > { %v2067_v10 = vadd.f32 %v2035_v53, %v2003_v18  ;;  %v1721_v49 = vadd.f32 %v1720_v42, %v1608_v54  ;;  %v2040_v18 = vld [vmem:[%s3915_s28 + $0xc8] sm:$0xff] }
 0x298   : > { %v1610_v45 = vpop.f32.mrf.mxu1  ;;  %v1833_v37 = vpop.f32.mrf.mxu3 }
 0x299   : > { %2099 = vst [vmem:[%s3933_s9 + $0xa0] sm:$0xff] %v2067_v10  ;;  %v1834_v23 = vadd.f32 %v1833_v37, %v1721_v49  ;;  %v1611_v52 = vadd.f32 %v1610_v45, %v4403_v63 }
 0x29b   : > { %v1947_v7 = vadd.f32 %v1946_v51, %v1834_v23 }
 0x29d   : > { %v2004_v14 = vadd.f32 %v3920_v55, %v1947_v7 }
 0x29e   : > { %v1723_v11 = vpop.f32.mrf.mxu2  ;;  %v1949_v2 = vpop.f32.mrf.mxu0 }
 0x29f   : > { %v2068_v6 = vadd.f32 %v2036_v40, %v2004_v14  ;;  %v1724_v30 = vadd.f32 %v1723_v11, %v1611_v52  ;;  %v2041_v52 = vld [vmem:[%s3915_s28 + $0xd0] sm:$0xff] }
 0x2a0   : > { %v1613_v32 = vpop.f32.mrf.mxu1  ;;  %v1836_v17 = vpop.f32.mrf.mxu3 }
 0x2a1   : > { %2100 = vst [vmem:[%s3933_s9 + $0xa8] sm:$0xff] %v2068_v6  ;;  %v1837_v57 = vadd.f32 %v1836_v17, %v1724_v30  ;;  %v1614_v34 = vadd.f32 %v1613_v32, %v4404_v47 }
 0x2a3   : > { %v1950_v31 = vadd.f32 %v1949_v2, %v1837_v57 }
 0x2a5   : > { %v2005_v41 = vadd.f32 %v3920_v55, %v1950_v31 }
 0x2a6   : > { %v1726_v44 = vpop.f32.mrf.mxu2  ;;  %v1952_v27 = vpop.f32.mrf.mxu0 }
 0x2a7   : > { %v2069_v60 = vadd.f32 %v2037_v33, %v2005_v41  ;;  %v1727_v9 = vadd.f32 %v1726_v44, %v1614_v34  ;;  %v2042_v33 = vld [vmem:[%s3915_s28 + $0xd8] sm:$0xff] }
 0x2a8   : > { %v1616_v15 = vpop.f32.mrf.mxu1  ;;  %v1839_v58 = vpop.f32.mrf.mxu3 }
 0x2a9   : > { %2101 = vst [vmem:[%s3933_s9 + $0xb0] sm:$0xff] %v2069_v60  ;;  %v1840_v0 = vadd.f32 %v1839_v58, %v1727_v9  ;;  %v1617_v5 = vadd.f32 %v1616_v15, %v4405_v28 }
 0x2ab   : > { %v1953_v39 = vadd.f32 %v1952_v27, %v1840_v0  ;;  %v2043_v0 = vld [vmem:[%s3915_s28 + $0xe0] sm:$0xff] }
 0x2ad   : > { %v2006_v24 = vadd.f32 %v3920_v55, %v1953_v39 }
 0x2ae   : > { %v1729_v48 = vpop.f32.mrf.mxu2  ;;  %v1955_v13 = vpop.f32.mrf.mxu0 }
 0x2af   : > { %v2070_v35 = vadd.f32 %v2038_v62, %v2006_v24  ;;  %v1730_v4 = vadd.f32 %v1729_v48, %v1617_v5 }
 0x2b0   : > { %v1619_v3 = vpop.f32.mrf.mxu1  ;;  %v1842_v56 = vpop.f32.mrf.mxu3 }
 0x2b1   : > { %2102 = vst [vmem:[%s3933_s9 + $0xb8] sm:$0xff] %v2070_v35  ;;  %v1843_v12 = vadd.f32 %v1842_v56, %v1730_v4  ;;  %v1620_v1 = vadd.f32 %v1619_v3, %v4406_v61  ;;  %v2044_v3 = vld [vmem:[%s3915_s28 + $0xe8] sm:$0xff] }
 0x2b3   : > { %v1956_v26 = vadd.f32 %v1955_v13, %v1843_v12 }
 0x2b5   : > { %v2007_v43 = vadd.f32 %v3920_v55, %v1956_v26 }
 0x2b6   : > { %v1732_v25 = vpop.f32.mrf.mxu2  ;;  %v1958_v22 = vpop.f32.mrf.mxu0 }
 0x2b7   : > { %v2071_v21 = vadd.f32 %v2039_v38, %v2007_v43  ;;  %v1733_v59 = vadd.f32 %v1732_v25, %v1620_v1 }
 0x2b8   : > { %v1622_v16 = vpop.f32.mrf.mxu1  ;;  %v1845_v53 = vpop.f32.mrf.mxu3 }
 0x2b9   : > { %2103 = vst [vmem:[%s3933_s9 + $0xc0] sm:$0xff] %v2071_v21  ;;  %v1846_v46 = vadd.f32 %v1845_v53, %v1733_v59  ;;  %v1623_v42 = vadd.f32 %v1622_v16, %v3864_v19  ;;  %v2045_v21 = vld [vmem:[%s3915_s28 + $0xf0] sm:$0xff] }
 0x2bb   : > { %v1959_v54 = vadd.f32 %v1958_v22, %v1846_v46 }
 0x2bd   : > { %v2008_v51 = vadd.f32 %v3920_v55, %v1959_v54 }
 0x2be   : > { %v1735_v10 = vpop.f32.mrf.mxu2  ;;  %v1961_v49 = vpop.f32.mrf.mxu0 }
 0x2bf   : > { %v2072_v45 = vadd.f32 %v2040_v18, %v2008_v51  ;;  %v1736_v37 = vadd.f32 %v1735_v10, %v1623_v42  ;;  %v2046_v10 = vld [vmem:[%s3915_s28 + $0xf8] sm:$0xff] }
 0x2c0   : > { %v1625_v23 = vpop.f32.mrf.mxu1  ;;  %v1848_v7 = vpop.f32.mrf.mxu3 }
 0x2c1   : > { %2104 = vst [vmem:[%s3933_s9 + $0xc8] sm:$0xff] %v2072_v45  ;;  %v1849_v40 = vadd.f32 %v1848_v7, %v1736_v37  ;;  %v1626_v14 = vadd.f32 %v1625_v23, %v3871_v36 }
 0x2c3   : > { %v1962_v63 = vadd.f32 %v1961_v49, %v1849_v40 }
 0x2c5   : > { %v2009_v11 = vadd.f32 %v3920_v55, %v1962_v63 }
 0x2c6   : > { %v1738_v2 = vpop.f32.mrf.mxu2  ;;  %v1964_v19 = vpop.f32.mrf.mxu0 }
 0x2c7   : > { %v2073_v6 = vadd.f32 %v2041_v52, %v2009_v11  ;;  %v1739_v30 = vadd.f32 %v1738_v2, %v1626_v14 }
 0x2c8   : > { %v1628_v32 = vpop.f32.mrf.mxu1  ;;  %v1851_v17 = vpop.f32.mrf.mxu3 }
 0x2c9   : > { %2105 = vst [vmem:[%s3933_s9 + $0xd0] sm:$0xff] %v2073_v6  ;;  %v1852_v57 = vadd.f32 %v1851_v17, %v1739_v30  ;;  %v1629_v47 = vadd.f32 %v1628_v32, %v3880_v29 }
 0x2cb   : > { %v1965_v31 = vadd.f32 %v1964_v19, %v1852_v57 }
 0x2cd   : > { %v2010_v34 = vadd.f32 %v3920_v55, %v1965_v31 }
 0x2ce   : > { %v1741_v41 = vpop.f32.mrf.mxu2  ;;  %v1967_v36 = vpop.f32.mrf.mxu0 }
 0x2cf   : > { %v2074_v44 = vadd.f32 %v2042_v33, %v2010_v34  ;;  %v1742_v27 = vadd.f32 %v1741_v41, %v1629_v47 }
 0x2d0   : > { %v1631_v60 = vpop.f32.mrf.mxu1  ;;  %v1854_v9 = vpop.f32.mrf.mxu3 }
 0x2d1   : > { %2106 = vst [vmem:[%s3933_s9 + $0xd8] sm:$0xff] %v2074_v44  ;;  %v1855_v15 = vadd.f32 %v1854_v9, %v1742_v27  ;;  %v1632_v39 = vadd.f32 %v1631_v60, %v3887_v20 }
 0x2d3   : > { %v1968_v58 = vadd.f32 %v1967_v36, %v1855_v15 }
 0x2d5   : > { %v2011_v62 = vadd.f32 %v3920_v55, %v1968_v58 }
 0x2d6   : > { %v1744_v28 = vpop.f32.mrf.mxu2  ;;  %v1970_v29 = vpop.f32.mrf.mxu0 }
 0x2d7   : > { %v2075_v5 = vadd.f32 %v2043_v0, %v2011_v62  ;;  %v1745_v24 = vadd.f32 %v1744_v28, %v1632_v39 }
 0x2d8   : > { %v1634_v48 = vpop.f32.mrf.mxu1  ;;  %v1857_v13 = vpop.f32.mrf.mxu3 }
 0x2d9   : > { %2107 = vst [vmem:[%s3933_s9 + $0xe0] sm:$0xff] %v2075_v5  ;;  %v1858_v35 = vadd.f32 %v1857_v13, %v1745_v24  ;;  %v1635_v56 = vadd.f32 %v1634_v48, %v3896_v50 }
 0x2db   : > { %v1971_v4 = vadd.f32 %v1970_v29, %v1858_v35 }
 0x2dd   : > { %v2012_v12 = vadd.f32 %v3920_v55, %v1971_v4 }
 0x2de   : > { %v1747_v26 = vpop.f32.mrf.mxu2  ;;  %v1973_v20 = vpop.f32.mrf.mxu0 }
 0x2df   : > { %v2076_v38 = vadd.f32 %v2044_v3, %v2012_v12  ;;  %v1748_v61 = vadd.f32 %v1747_v26, %v1635_v56 }
 0x2e0   : > { %v1860_v1 = vpop.f32.mrf.mxu3  ;;  %v1637_v25 = vpop.f32.mrf.mxu1 }
 0x2e1   : > { %2108 = vst [vmem:[%s3933_s9 + $0xe8] sm:$0xff] %v2076_v38  ;;  %v1861_v43 = vadd.f32 %v1860_v1, %v1748_v61  ;;  %v1638_v59 = vadd.f32 %v1637_v25, %v3903_v8 }
 0x2e3   : > { %v1974_v22 = vadd.f32 %v1973_v20, %v1861_v43 }
 0x2e5   : > { %v2013_v16 = vadd.f32 %v3920_v55, %v1974_v22 }
 0x2e6   : > { %v1750_v50 = vpop.f32.mrf.mxu2  ;;  %v1976_v18 = vpop.f32.mrf.mxu0 }
 0x2e7   : > { %v2077_v53 = vadd.f32 %v2045_v21, %v2013_v16  ;;  %v1751_v46 = vadd.f32 %v1750_v50, %v1638_v59 }
 0x2e8   : > { %v1863_v54 = vpop.f32.mrf.mxu3 }
 0x2e9   : > { %2109 = vst [vmem:[%s3933_s9 + $0xf0] sm:$0xff] %v2077_v53  ;;  %v1864_v42 = vadd.f32 %v1863_v54, %v1751_v46 }
 0x2eb   : > { %v1977_v51 = vadd.f32 %v1976_v18, %v1864_v42 }
 0x2ed   : > { %v2014_v49 = vadd.f32 %v3920_v55, %v1977_v51 }
 0x2ef   : > { %v2078_v45 = vadd.f32 %v2046_v10, %v2014_v49 }
 0x2f1   : > { %2110 = vst [vmem:[%s3933_s9 + $0xf8] sm:$0xff] %v2078_v45 }
 0x2f2 PF: > { %s16_s21 = sadd.s32 1, %s2358_s21  }
 0x2f3   : > { %p13_p4 = scmp.ge.s32.totalorder %s16_s21, 4  }
 0x2f5   :  { %15 = sbr.rel (!%p13_p4) target bundleno = 1 (0x1), region = 77 }

</bundles_post_ra>
